<compile_context>
chip_gen: v7x
topology: tpu7x:2x2x1
jax: 0.10.0
libtpu: 0.0.40
codegen_flags: <defaults>
</compile_context>

<pallas_src>
import math

import jax
import jax.numpy as jnp
import numpy as np
from jax.experimental import pallas as pl
from jax.experimental.pallas import tpu as pltpu


# ---------------------------------------------------------------------------
# host-side constant builders (numpy / host jnp, static shapes)
# ---------------------------------------------------------------------------
def _pad128(n):
    return ((n + 127) // 128) * 128


def _tap_masks_packed(H, W, P, NB):
    """(16, NB*P) f32.  Row t = kh*3+kw is 1 at packed position b*P + (ph*W+pw)
    iff the source pixel (ph+kh-1, pw+kw-1) is inside the HxW image.  Because a
    source pixel is in-bounds only when its flat offset stays inside the same
    image window, every lane-roll that wraps across a batch window or into the
    lane padding is masked to zero here.  Rows 9..15 are padding (8-sublane
    aligned per-stage blocks)."""
    m = np.zeros((16, P), np.float32)
    for kh in range(3):
        for kw in range(3):
            t = kh * 3 + kw
            for ph in range(H):
                if not 0 <= ph + kh - 1 < H:
                    continue
                for pw in range(W):
                    if 0 <= pw + kw - 1 < W:
                        m[t, ph * W + pw] = 1.0
    return np.tile(m, (1, NB))


def _upsample_matrix_packed(hin, win, pin, hout, wout, pout, NB):
    """(NB*Pin, NB*Pout) bf16 block-diagonal one-hot gather matrix implementing
    F.interpolate(mode='nearest') per packed batch element (0/1 exact in bf16).
    TODO(synk): replace with a gather-free roll/repeat upsample at large
    resolutions (this matrix is quadratic in spatial size -> VMEM on v7x)."""
    u = np.zeros((pin, pout), np.float32)
    for oh in range(hout):
        ih = (oh * hin) // hout
        for ow in range(wout):
            iw = (ow * win) // wout
            u[ih * win + iw, oh * wout + ow] = 1.0
    U = np.zeros((NB * pin, NB * pout), np.float32)
    for b in range(NB):
        U[b * pin:(b + 1) * pin, b * pout:(b + 1) * pout] = u
    return jnp.asarray(U, dtype=jnp.bfloat16)


def _w_taps(w_hwio, scale):
    """(3,3,Cin,Cout) HWIO -> (9, Cout, Cin) bf16 with the folded BN scale
    applied to the Cout rows (so the kernel epilogue is only +bias, ReLU)."""
    cin, cout = int(w_hwio.shape[2]), int(w_hwio.shape[3])
    w = jnp.transpose(w_hwio, (0, 1, 3, 2)).reshape(9, cout, cin)
    w = w * scale.reshape(1, -1, 1)
    return w.astype(jnp.bfloat16)


def _pack_lanes(a_nchw, P, NB):
    """(N,C,H,W) -> (N/NB, C, NB*P): NB batch elements packed side-by-side on
    the lane axis, each zero-padded to P (multiple of 128) spatial lanes."""
    n, c, h, w = a_nchw.shape
    g = n // NB
    a = a_nchw.reshape(g, NB, c, h * w)
    if P > h * w:
        a = jnp.pad(a, ((0, 0), (0, 0), (0, 0), (0, P - h * w)))
    return jnp.transpose(a, (0, 2, 1, 3)).reshape(g, c, NB * P)


# ---------------------------------------------------------------------------
# fused decoder kernel
# ---------------------------------------------------------------------------
def _make_decoder_kernel(geoms, ptots, c0, block_channels,
                         bias_offs, wout_off, bout_off):
    n_blocks = len(block_channels)

    def kernel(*refs):
        it = iter(refs)
        x_ref = next(it)
        feat_refs = [next(it) for _ in range(n_blocks)]
        masks_ref = next(it)
        wb_ref = next(it)
        blk = [(next(it), next(it), next(it), next(it))    # U, w1f, w1x, w2
               for _ in range(n_blocks)]
        smalls_ref = next(it)
        out_ref = next(it)

        def bias(off, c):
            return smalls_ref[pl.ds(off, c), :]            # (c, 1) f32

        def conv3x3(pairs, masks, H, W, Ptot, bcol, relu):
            """3x3 conv as 9 small bf16 MXU matmuls accumulated in f32.
            pairs: [(act (Cin, Ptot) f32, w_ref (9, Cout, Cin) bf16), ...] --
            multiple pairs realise conv over a channel-concat without ever
            materialising the concat or an im2col patch."""
            acc = None
            for kh in range(3):
                for kw in range(3):
                    t = kh * 3 + kw
                    off = (kh - 1) * W + (kw - 1)          # flat source offset
                    m = None if off == 0 else masks[t:t + 1, :]
                    for a, w_ref in pairs:
                        if m is None:
                            tap = a                        # centre tap: identity
                        else:
                            # XLU lane rotate over the packed axis; mask zeroes
                            # every out-of-image (incl. cross-batch) source.
                            tap = pltpu.roll(a, (-off) % Ptot, axis=1) * m
                        y = jnp.dot(w_ref[t], tap.astype(jnp.bfloat16),
                                    preferred_element_type=jnp.float32)
                        acc = y if acc is None else acc + y
            acc = acc + bcol
            return jnp.maximum(acc, 0.0) if relu else acc

        # ---- conv_bottom ----
        H, W = geoms[0]
        Ptot = ptots[0]
        masks0 = masks_ref[pl.ds(0, 9), pl.ds(0, Ptot)]
        x = conv3x3([(x_ref[0], wb_ref)], masks0, H, W, Ptot,
                    bias(bias_offs[0], c0), relu=True)

        # ---- decoder blocks ----
        for i in range(n_blocks):
            U_ref, w1f_ref, w1x_ref, w2_ref = blk[i]
            cf, cx, cout = block_channels[i]
            H, W = geoms[i + 1]
            Ptot = ptots[i + 1]
            masks = masks_ref[pl.ds((i + 1) * 16, 9), pl.ds(0, Ptot)]

            # nearest-neighbour upsample: one bf16 MXU matmul against the
            # block-diagonal one-hot gather matrix.
            x_up = jnp.dot(x.astype(jnp.bfloat16), U_ref[...],
                           preferred_element_type=jnp.float32)
            f = feat_refs[i][0]

            # conv1 over cat([feat, x_up], channel): same accumulator, weight
            # split host-side -> no channel concat in-kernel.
            h = conv3x3([(f, w1f_ref), (x_up, w1x_ref)], masks, H, W, Ptot,
                        bias(bias_offs[1 + 2 * i], cout), relu=True)
            # conv2 (+folded BN), residual add + ReLU, all resident in vregs.
            y2 = conv3x3([(h, w2_ref)], masks, H, W, Ptot,
                         bias(bias_offs[2 + 2 * i], cout), relu=False)
            x = jnp.maximum(h + y2, 0.0)

        # ---- conv_out (1x1) -> 1 channel, lane-dense output row ----
        w_out = smalls_ref[pl.ds(wout_off, x.shape[0]), :]  # (C_last, 1)
        b_out = smalls_ref[pl.ds(bout_off, 1), :]           # (1, 1)
        y = jnp.sum(x * w_out, axis=0, keepdims=True) + b_out
        out_ref[...] = y.reshape(out_ref.shape).astype(out_ref.dtype)

    return kernel


# ---------------------------------------------------------------------------
# wrapper: layout plumbing + pallas_call
# ---------------------------------------------------------------------------
def simple_decoder_pallas(params, x_nchw, feats_nchw, batch_per_step=2):
    """Fused SimpleDecoder forward.  Inputs in PyTorch NCHW, output NCHW."""
    N, c0, hb, wb = x_nchw.shape
    NB = max(1, min(batch_per_step, N))
    while N % NB:                                   # fall back to a divisor
        NB -= 1
    G = N // NB

    feats_r = feats_nchw[::-1]                      # decoder processing order
    geoms = [(hb, wb)] + [(int(f.shape[2]), int(f.shape[3])) for f in feats_r]
    pimgs = [_pad128(h * w) for h, w in geoms]
    ptots = [NB * p for p in pimgs]
    n_blocks = len(feats_r)
    n_stages = n_blocks + 1
    ptot_max = max(ptots)

    args, in_specs = [], []

    def add_data(a):
        args.append(a)
        in_specs.append(pl.BlockSpec((1,) + a.shape[1:], lambda g: (g, 0, 0)))

    def add_const(a):
        args.append(a)
        zero = (0,) * a.ndim
        in_specs.append(pl.BlockSpec(a.shape, lambda g, z=zero: z))

    # batch-indexed data, packed (G, C, NB*P) with zero lane padding
    add_data(_pack_lanes(x_nchw, pimgs[0], NB))
    for i, f in enumerate(feats_r):
        add_data(_pack_lanes(f, pimgs[i + 1], NB))

    # all tap masks in ONE canvas (16 rows per stage)
    mask_canvas = np.zeros((16 * n_stages, ptot_max), np.float32)
    for s, ((h, w), p) in enumerate(zip(geoms, pimgs)):
        mask_canvas[16 * s:16 * s + 16, :NB * p] = _tap_masks_packed(h, w, p, NB)
    add_const(jnp.asarray(mask_canvas))

    # conv_bottom weight (BN scale folded, bf16, per-tap layout)
    w_b, s_b, b_b = params["conv_bottom"]
    add_const(_w_taps(w_b, s_b))

    # DecBlocks
    block_channels = []
    for i, (f, blkp) in enumerate(zip(feats_r, params["blocks"])):
        cf = int(f.shape[1])
        (hin, win), (hout, wout) = geoms[i], geoms[i + 1]
        add_const(_upsample_matrix_packed(hin, win, pimgs[i],
                                          hout, wout, pimgs[i + 1], NB))
        w1, s1, b1 = blkp["conv1"]
        cx = int(w1.shape[2]) - cf
        add_const(_w_taps(w1[:, :, :cf, :], s1))    # encoder-feature part
        add_const(_w_taps(w1[:, :, cf:, :], s1))    # upsampled-x part
        w2, s2, b2 = blkp["conv2"]
        cout = int(w2.shape[3])
        add_const(_w_taps(w2, s2))
        block_channels.append((cf, cx, cout))

    # all tiny constants (biases, conv_out weight + bias) in ONE (rows,1) array
    w_out, b_out = params["conv_out"]
    small_vals = [b_b]
    for blkp in params["blocks"]:
        small_vals += [blkp["conv1"][2], blkp["conv2"][2]]
    small_vals += [w_out.reshape(-1), b_out.reshape(-1)]
    offs, cur = [], 0
    for v in small_vals:
        offs.append(cur)
        cur += ((int(v.shape[0]) + 7) // 8) * 8
    smalls = np.zeros((max(cur, 8), 1), np.float32)
    for v, o in zip(small_vals, offs):
        smalls[o:o + int(v.shape[0]), 0] = np.asarray(v, np.float32)
    add_const(jnp.asarray(smalls))
    bias_offs = offs[:1 + 2 * n_blocks]
    wout_off, bout_off = offs[-2], offs[-1]

    # advisory cost estimate for XLA scheduling
    flops = 2 * c0 * 9 * c0 * ptots[0]
    for i, (cf, cx, cout) in enumerate(block_channels):
        flops += 2 * cx * ptots[i] * ptots[i + 1]            # upsample
        flops += 2 * cout * 9 * (cf + cx) * ptots[i + 1]     # conv1
        flops += 2 * cout * 9 * cout * ptots[i + 1]          # conv2
    flops += 2 * block_channels[-1][2] * ptots[-1]           # 1x1 conv_out
    flops *= G
    bytes_accessed = sum(int(np.prod(a.shape)) * a.dtype.itemsize for a in args)
    bytes_accessed += G * ptots[-1] * 4

    kernel = _make_decoder_kernel(geoms, ptots, c0, block_channels,
                                  bias_offs, wout_off, bout_off)
    out = pl.pallas_call(
        kernel,
        out_shape=jax.ShapeDtypeStruct((G, 1, ptots[-1]), x_nchw.dtype),
        grid=(G,),
        in_specs=in_specs,
        out_specs=pl.BlockSpec((1, 1, ptots[-1]), lambda g: (g, 0, 0)),
        compiler_params=pltpu.CompilerParams(
            dimension_semantics=("parallel",)),
        cost_estimate=pl.CostEstimate(flops=int(flops), transcendentals=0,
                                      bytes_accessed=int(bytes_accessed)),
    )(*args)

    # unpack lanes -> NCHW
    (h_last, w_last), p_last = geoms[-1], pimgs[-1]
    out = out.reshape(G, 1, NB, p_last).transpose(0, 2, 1, 3).reshape(N, 1, p_last)
    return out[:, :, :h_last * w_last].reshape(N, 1, h_last, w_last)


# ---------------------------------------------------------------------------
# pure-JAX reference (correctness check for the Pallas path)
# ---------------------------------------------------------------------------
def _conv3x3_ref(x, w, scale, bias, act):
    y = jax.lax.conv_general_dilated(
        x, w, (1, 1), "SAME",
        dimension_numbers=("NCHW", "HWIO", "NCHW"),
        precision=jax.lax.Precision.HIGHEST)
    y = y * scale.reshape(1, -1, 1, 1) + bias.reshape(1, -1, 1, 1)
    return jnp.maximum(y, 0.0) if act else y


def _interp_nearest_ref(x, oh, ow):
    _, _, H, W = x.shape
    rows = (jnp.arange(oh) * H) // oh
    cols = (jnp.arange(ow) * W) // ow
    return x[:, :, rows][:, :, :, cols]


def simple_decoder_ref(params, x, feats):
    feats = feats[::-1]
    w, s, b = params["conv_bottom"]
    x = _conv3x3_ref(x, w, s, b, act=True)
    for f, blk in zip(feats, params["blocks"]):
        x2 = _interp_nearest_ref(x, f.shape[2], f.shape[3])
        xc = jnp.concatenate([f, x2], axis=1)
        w1, s1, b1 = blk["conv1"]
        h = _conv3x3_ref(xc, w1, s1, b1, act=True)
        w2, s2, b2 = blk["conv2"]
        x = jnp.maximum(h + _conv3x3_ref(h, w2, s2, b2, act=False), 0.0)
    w_out, b_out = params["conv_out"]
    y = jnp.einsum("nchw,cd->ndhw", x, w_out,
                   precision=jax.lax.Precision.HIGHEST)
    return y + b_out.reshape(1, -1, 1, 1)


# ---------------------------------------------------------------------------
# parameters (deterministic synthetic init; BatchNorm folded, eval mode)
# ---------------------------------------------------------------------------
def _bn_fold(key, cout, eps=1e-5):
    k1, k2, k3, k4 = jax.random.split(key, 4)
    gamma = 1.0 + 0.1 * jax.random.normal(k1, (cout,), jnp.float32)
    beta = 0.1 * jax.random.normal(k2, (cout,), jnp.float32)
    mean = 0.1 * jax.random.normal(k3, (cout,), jnp.float32)
    var = jnp.abs(jax.random.normal(k4, (cout,), jnp.float32)) + 0.5
    scale = gamma / jnp.sqrt(var + eps)
    bias = beta - mean * scale
    return scale, bias


def init_params(key, itm_ch, enc_chs, dec_chs):
    enc_r = enc_chs[::-1]
    it = iter(jax.random.split(key, 64))

    def conv3x3_params(cin, cout):
        kw_, kb_ = next(it), next(it)
        w = jax.random.normal(kw_, (3, 3, cin, cout), jnp.float32) / math.sqrt(9 * cin)
        scale, bias = _bn_fold(kb_, cout)
        return (w, scale, bias)

    params = {"conv_bottom": conv3x3_params(itm_ch, itm_ch), "blocks": []}
    in2s = (itm_ch,) + tuple(dec_chs[:-1])
    for in1, in2, out in zip(enc_r, in2s, dec_chs):
        params["blocks"].append({
            "conv1": conv3x3_params(in1 + in2, out),    # SimpleResBlock.conv1
            "conv2": conv3x3_params(out, out),           # SimpleResBlock.conv2
        })
    kw_, kb_ = next(it), next(it)
    params["conv_out"] = (
        jax.random.normal(kw_, (dec_chs[-1], 1), jnp.float32) / math.sqrt(dec_chs[-1]),
        0.01 * jax.random.normal(kb_, (1,), jnp.float32),
    )
    return params


# ---------------------------------------------------------------------------
if __name__ == "__main__":
    key = jax.random.PRNGKey(0)
    k_p, k_x, k_f1, k_f2 = jax.random.split(key, 4)

    itm_ch, enc_chs, dec_chs = 32, (8, 16), (16, 8)
    params = init_params(k_p, itm_ch, enc_chs, dec_chs)

    # N=4 with 2 batch elements packed per grid step -> grid=(2,) "parallel":
    # lanes are filled AND both v7x TensorCores get a step each.
    N = 4
    x = jax.random.normal(k_x, (N, itm_ch, 4, 4), jnp.float32)           # bottom
    feats = [
        jax.random.normal(k_f1, (N, enc_chs[0], 16, 16), jnp.float32),   # enc 0
        jax.random.normal(k_f2, (N, enc_chs[1], 8, 8), jnp.float32),     # enc 1
    ]

    y = simple_decoder_pallas(params, x, feats, batch_per_step=2)
    y = jax.block_until_ready(y)
    assert y.shape == (N, 1, 16, 16), y.shape

    y_ref = simple_decoder_ref(params, x, feats)
    # Tolerance slack is purely for bf16 MXU operand rounding across the chain
    # of 5 convs + 2 upsample matmuls (f32 accumulation); the f32 reference is
    # exact.  An all-f32 kernel path matches to ~1e-5.
    np.testing.assert_allclose(np.asarray(y), np.asarray(y_ref),
                               rtol=3e-2, atol=5e-2)
    print("KERNEL_OK")
</pallas_src>

<mosaic_0001>
module attributes {stable_mosaic.version = 11 : i64} {
  func.func @kernel(%arg0: i32, %arg1: memref<1x32x256xf32, #tpu.memory_space<vmem>>, %arg2: memref<1x16x256xf32, #tpu.memory_space<vmem>>, %arg3: memref<1x8x512xf32, #tpu.memory_space<vmem>>, %arg4: memref<48x512xf32, #tpu.memory_space<vmem>>, %arg5: memref<9x32x32xbf16, #tpu.memory_space<vmem>>, %arg6: memref<256x256xbf16, #tpu.memory_space<vmem>>, %arg7: memref<9x16x16xbf16, #tpu.memory_space<vmem>>, %arg8: memref<9x16x32xbf16, #tpu.memory_space<vmem>>, %arg9: memref<9x16x16xbf16, #tpu.memory_space<vmem>>, %arg10: memref<256x512xbf16, #tpu.memory_space<vmem>>, %arg11: memref<9x8x8xbf16, #tpu.memory_space<vmem>>, %arg12: memref<9x8x16xbf16, #tpu.memory_space<vmem>>, %arg13: memref<9x8x8xbf16, #tpu.memory_space<vmem>>, %arg14: memref<96x1xf32, #tpu.memory_space<vmem>>, %arg15: memref<1x1x512xf32, #tpu.memory_space<vmem>>) attributes {dimension_semantics = [#tpu.dimension_semantics<parallel>], iteration_bounds = array<i64: 2>, scalar_prefetch = 0 : i64, scratch_operands = 0 : i64, tpu.core_type = #tpu.core_type<tc>, window_params = [{transform_indices = @transform_0, window_bounds = array<i64: 1, 32, 256>}, {transform_indices = @transform_1, window_bounds = array<i64: 1, 16, 256>}, {transform_indices = @transform_2, window_bounds = array<i64: 1, 8, 512>}, {pipeline_mode = #tpu.pipeline_mode<synchronous>, transform_indices = @transform_3, window_bounds = array<i64: 48, 512>}, {pipeline_mode = #tpu.pipeline_mode<synchronous>, transform_indices = @transform_4, window_bounds = array<i64: 9, 32, 32>}, {pipeline_mode = #tpu.pipeline_mode<synchronous>, transform_indices = @transform_5, window_bounds = array<i64: 256, 256>}, {pipeline_mode = #tpu.pipeline_mode<synchronous>, transform_indices = @transform_6, window_bounds = array<i64: 9, 16, 16>}, {pipeline_mode = #tpu.pipeline_mode<synchronous>, transform_indices = @transform_7, window_bounds = array<i64: 9, 16, 32>}, {pipeline_mode = #tpu.pipeline_mode<synchronous>, transform_indices = @transform_8, window_bounds = array<i64: 9, 16, 16>}, {pipeline_mode = #tpu.pipeline_mode<synchronous>, transform_indices = @transform_9, window_bounds = array<i64: 256, 512>}, {pipeline_mode = #tpu.pipeline_mode<synchronous>, transform_indices = @transform_10, window_bounds = array<i64: 9, 8, 8>}, {pipeline_mode = #tpu.pipeline_mode<synchronous>, transform_indices = @transform_11, window_bounds = array<i64: 9, 8, 16>}, {pipeline_mode = #tpu.pipeline_mode<synchronous>, transform_indices = @transform_12, window_bounds = array<i64: 9, 8, 8>}, {pipeline_mode = #tpu.pipeline_mode<synchronous>, transform_indices = @transform_13, window_bounds = array<i64: 96, 1>}, {transform_indices = @transform_14, window_bounds = array<i64: 1, 1, 512>}]} {
    %c0 = arith.constant 0 : index
    %c0_0 = arith.constant 0 : index
    %0 = vector.load %arg4[%c0, %c0_0] : memref<48x512xf32, #tpu.memory_space<vmem>>, vector<9x256xf32>
    %c0_1 = arith.constant 0 : index
    %c0_2 = arith.constant 0 : index
    %c0_3 = arith.constant 0 : index
    %1 = vector.load %arg1[%c0_1, %c0_2, %c0_3] : memref<1x32x256xf32, #tpu.memory_space<vmem>>, vector<1x32x256xf32>
    %2 = vector.shape_cast %1 : vector<1x32x256xf32> to vector<32x256xf32>
    %c0_4 = arith.constant 0 : index
    %c0_5 = arith.constant 0 : index
    %3 = vector.load %arg14[%c0_4, %c0_5] : memref<96x1xf32, #tpu.memory_space<vmem>>, vector<32x1xf32>
    %4 = vector.extract_strided_slice %0 {offsets = [0, 0], sizes = [1, 256], strides = [1, 1]} : vector<9x256xf32> to vector<1x256xf32>
    %c5_i32 = arith.constant 5 : i32
    %5 = tpu.dynamic_rotate %2 by %c5_i32 dim 1 : vector<32x256xf32>, i32 -> vector<32x256xf32>
    %6 = vector.broadcast %4 : vector<1x256xf32> to vector<32x256xf32>
    %7 = arith.mulf %5, %6 : vector<32x256xf32>
    %c0_6 = arith.constant 0 : index
    %c0_7 = arith.constant 0 : index
    %c0_8 = arith.constant 0 : index
    %8 = vector.load %arg5[%c0_6, %c0_7, %c0_8] : memref<9x32x32xbf16, #tpu.memory_space<vmem>>, vector<1x32x32xbf16>
    %9 = vector.shape_cast %8 : vector<1x32x32xbf16> to vector<32x32xbf16>
    %10 = arith.truncf %7 : vector<32x256xf32> to vector<32x256xbf16>
    %cst = arith.constant dense<0.000000e+00> : vector<32x256xf32>
    %11 = tpu.matmul %9, %10, %cst {dimension_numbers = #tpu.dot_dimension_numbers<[1], [0], [0], [1], [0, 0, 1, 1], [], []>} : vector<32x32xbf16>, vector<32x256xbf16>, vector<32x256xf32> -> vector<32x256xf32>
    %12 = vector.extract_strided_slice %0 {offsets = [1, 0], sizes = [1, 256], strides = [1, 1]} : vector<9x256xf32> to vector<1x256xf32>
    %c4_i32 = arith.constant 4 : i32
    %13 = tpu.dynamic_rotate %2 by %c4_i32 dim 1 : vector<32x256xf32>, i32 -> vector<32x256xf32>
    %14 = vector.broadcast %12 : vector<1x256xf32> to vector<32x256xf32>
    %15 = arith.mulf %13, %14 : vector<32x256xf32>
    %c1 = arith.constant 1 : index
    %c0_9 = arith.constant 0 : index
    %c0_10 = arith.constant 0 : index
    %16 = vector.load %arg5[%c1, %c0_9, %c0_10] : memref<9x32x32xbf16, #tpu.memory_space<vmem>>, vector<1x32x32xbf16>
    %17 = vector.shape_cast %16 : vector<1x32x32xbf16> to vector<32x32xbf16>
    %18 = arith.truncf %15 : vector<32x256xf32> to vector<32x256xbf16>
    %cst_11 = arith.constant dense<0.000000e+00> : vector<32x256xf32>
    %19 = tpu.matmul %17, %18, %cst_11 {dimension_numbers = #tpu.dot_dimension_numbers<[1], [0], [0], [1], [0, 0, 1, 1], [], []>} : vector<32x32xbf16>, vector<32x256xbf16>, vector<32x256xf32> -> vector<32x256xf32>
    %20 = arith.addf %11, %19 : vector<32x256xf32>
    %21 = vector.extract_strided_slice %0 {offsets = [2, 0], sizes = [1, 256], strides = [1, 1]} : vector<9x256xf32> to vector<1x256xf32>
    %c3_i32 = arith.constant 3 : i32
    %22 = tpu.dynamic_rotate %2 by %c3_i32 dim 1 : vector<32x256xf32>, i32 -> vector<32x256xf32>
    %23 = vector.broadcast %21 : vector<1x256xf32> to vector<32x256xf32>
    %24 = arith.mulf %22, %23 : vector<32x256xf32>
    %c2 = arith.constant 2 : index
    %c0_12 = arith.constant 0 : index
    %c0_13 = arith.constant 0 : index
    %25 = vector.load %arg5[%c2, %c0_12, %c0_13] : memref<9x32x32xbf16, #tpu.memory_space<vmem>>, vector<1x32x32xbf16>
    %26 = vector.shape_cast %25 : vector<1x32x32xbf16> to vector<32x32xbf16>
    %27 = arith.truncf %24 : vector<32x256xf32> to vector<32x256xbf16>
    %cst_14 = arith.constant dense<0.000000e+00> : vector<32x256xf32>
    %28 = tpu.matmul %26, %27, %cst_14 {dimension_numbers = #tpu.dot_dimension_numbers<[1], [0], [0], [1], [0, 0, 1, 1], [], []>} : vector<32x32xbf16>, vector<32x256xbf16>, vector<32x256xf32> -> vector<32x256xf32>
    %29 = arith.addf %20, %28 : vector<32x256xf32>
    %30 = vector.extract_strided_slice %0 {offsets = [3, 0], sizes = [1, 256], strides = [1, 1]} : vector<9x256xf32> to vector<1x256xf32>
    %c1_i32 = arith.constant 1 : i32
    %31 = tpu.dynamic_rotate %2 by %c1_i32 dim 1 : vector<32x256xf32>, i32 -> vector<32x256xf32>
    %32 = vector.broadcast %30 : vector<1x256xf32> to vector<32x256xf32>
    %33 = arith.mulf %31, %32 : vector<32x256xf32>
    %c3 = arith.constant 3 : index
    %c0_15 = arith.constant 0 : index
    %c0_16 = arith.constant 0 : index
    %34 = vector.load %arg5[%c3, %c0_15, %c0_16] : memref<9x32x32xbf16, #tpu.memory_space<vmem>>, vector<1x32x32xbf16>
    %35 = vector.shape_cast %34 : vector<1x32x32xbf16> to vector<32x32xbf16>
    %36 = arith.truncf %33 : vector<32x256xf32> to vector<32x256xbf16>
    %cst_17 = arith.constant dense<0.000000e+00> : vector<32x256xf32>
    %37 = tpu.matmul %35, %36, %cst_17 {dimension_numbers = #tpu.dot_dimension_numbers<[1], [0], [0], [1], [0, 0, 1, 1], [], []>} : vector<32x32xbf16>, vector<32x256xbf16>, vector<32x256xf32> -> vector<32x256xf32>
    %38 = arith.addf %29, %37 : vector<32x256xf32>
    %c4 = arith.constant 4 : index
    %c0_18 = arith.constant 0 : index
    %c0_19 = arith.constant 0 : index
    %39 = vector.load %arg5[%c4, %c0_18, %c0_19] : memref<9x32x32xbf16, #tpu.memory_space<vmem>>, vector<1x32x32xbf16>
    %40 = vector.shape_cast %39 : vector<1x32x32xbf16> to vector<32x32xbf16>
    %41 = arith.truncf %2 : vector<32x256xf32> to vector<32x256xbf16>
    %cst_20 = arith.constant dense<0.000000e+00> : vector<32x256xf32>
    %42 = tpu.matmul %40, %41, %cst_20 {dimension_numbers = #tpu.dot_dimension_numbers<[1], [0], [0], [1], [0, 0, 1, 1], [], []>} : vector<32x32xbf16>, vector<32x256xbf16>, vector<32x256xf32> -> vector<32x256xf32>
    %43 = arith.addf %38, %42 : vector<32x256xf32>
    %44 = vector.extract_strided_slice %0 {offsets = [5, 0], sizes = [1, 256], strides = [1, 1]} : vector<9x256xf32> to vector<1x256xf32>
    %c255_i32 = arith.constant 255 : i32
    %45 = tpu.dynamic_rotate %2 by %c255_i32 dim 1 : vector<32x256xf32>, i32 -> vector<32x256xf32>
    %46 = vector.broadcast %44 : vector<1x256xf32> to vector<32x256xf32>
    %47 = arith.mulf %45, %46 : vector<32x256xf32>
    %c5 = arith.constant 5 : index
    %c0_21 = arith.constant 0 : index
    %c0_22 = arith.constant 0 : index
    %48 = vector.load %arg5[%c5, %c0_21, %c0_22] : memref<9x32x32xbf16, #tpu.memory_space<vmem>>, vector<1x32x32xbf16>
    %49 = vector.shape_cast %48 : vector<1x32x32xbf16> to vector<32x32xbf16>
    %50 = arith.truncf %47 : vector<32x256xf32> to vector<32x256xbf16>
    %cst_23 = arith.constant dense<0.000000e+00> : vector<32x256xf32>
    %51 = tpu.matmul %49, %50, %cst_23 {dimension_numbers = #tpu.dot_dimension_numbers<[1], [0], [0], [1], [0, 0, 1, 1], [], []>} : vector<32x32xbf16>, vector<32x256xbf16>, vector<32x256xf32> -> vector<32x256xf32>
    %52 = arith.addf %43, %51 : vector<32x256xf32>
    %53 = vector.extract_strided_slice %0 {offsets = [6, 0], sizes = [1, 256], strides = [1, 1]} : vector<9x256xf32> to vector<1x256xf32>
    %c253_i32 = arith.constant 253 : i32
    %54 = tpu.dynamic_rotate %2 by %c253_i32 dim 1 : vector<32x256xf32>, i32 -> vector<32x256xf32>
    %55 = vector.broadcast %53 : vector<1x256xf32> to vector<32x256xf32>
    %56 = arith.mulf %54, %55 : vector<32x256xf32>
    %c6 = arith.constant 6 : index
    %c0_24 = arith.constant 0 : index
    %c0_25 = arith.constant 0 : index
    %57 = vector.load %arg5[%c6, %c0_24, %c0_25] : memref<9x32x32xbf16, #tpu.memory_space<vmem>>, vector<1x32x32xbf16>
    %58 = vector.shape_cast %57 : vector<1x32x32xbf16> to vector<32x32xbf16>
    %59 = arith.truncf %56 : vector<32x256xf32> to vector<32x256xbf16>
    %cst_26 = arith.constant dense<0.000000e+00> : vector<32x256xf32>
    %60 = tpu.matmul %58, %59, %cst_26 {dimension_numbers = #tpu.dot_dimension_numbers<[1], [0], [0], [1], [0, 0, 1, 1], [], []>} : vector<32x32xbf16>, vector<32x256xbf16>, vector<32x256xf32> -> vector<32x256xf32>
    %61 = arith.addf %52, %60 : vector<32x256xf32>
    %62 = vector.extract_strided_slice %0 {offsets = [7, 0], sizes = [1, 256], strides = [1, 1]} : vector<9x256xf32> to vector<1x256xf32>
    %c252_i32 = arith.constant 252 : i32
    %63 = tpu.dynamic_rotate %2 by %c252_i32 dim 1 : vector<32x256xf32>, i32 -> vector<32x256xf32>
    %64 = vector.broadcast %62 : vector<1x256xf32> to vector<32x256xf32>
    %65 = arith.mulf %63, %64 : vector<32x256xf32>
    %c7 = arith.constant 7 : index
    %c0_27 = arith.constant 0 : index
    %c0_28 = arith.constant 0 : index
    %66 = vector.load %arg5[%c7, %c0_27, %c0_28] : memref<9x32x32xbf16, #tpu.memory_space<vmem>>, vector<1x32x32xbf16>
    %67 = vector.shape_cast %66 : vector<1x32x32xbf16> to vector<32x32xbf16>
    %68 = arith.truncf %65 : vector<32x256xf32> to vector<32x256xbf16>
    %cst_29 = arith.constant dense<0.000000e+00> : vector<32x256xf32>
    %69 = tpu.matmul %67, %68, %cst_29 {dimension_numbers = #tpu.dot_dimension_numbers<[1], [0], [0], [1], [0, 0, 1, 1], [], []>} : vector<32x32xbf16>, vector<32x256xbf16>, vector<32x256xf32> -> vector<32x256xf32>
    %70 = arith.addf %61, %69 : vector<32x256xf32>
    %71 = vector.extract_strided_slice %0 {offsets = [8, 0], sizes = [1, 256], strides = [1, 1]} : vector<9x256xf32> to vector<1x256xf32>
    %c251_i32 = arith.constant 251 : i32
    %72 = tpu.dynamic_rotate %2 by %c251_i32 dim 1 : vector<32x256xf32>, i32 -> vector<32x256xf32>
    %73 = vector.broadcast %71 : vector<1x256xf32> to vector<32x256xf32>
    %74 = arith.mulf %72, %73 : vector<32x256xf32>
    %c8 = arith.constant 8 : index
    %c0_30 = arith.constant 0 : index
    %c0_31 = arith.constant 0 : index
    %75 = vector.load %arg5[%c8, %c0_30, %c0_31] : memref<9x32x32xbf16, #tpu.memory_space<vmem>>, vector<1x32x32xbf16>
    %76 = vector.shape_cast %75 : vector<1x32x32xbf16> to vector<32x32xbf16>
    %77 = arith.truncf %74 : vector<32x256xf32> to vector<32x256xbf16>
    %cst_32 = arith.constant dense<0.000000e+00> : vector<32x256xf32>
    %78 = tpu.matmul %76, %77, %cst_32 {dimension_numbers = #tpu.dot_dimension_numbers<[1], [0], [0], [1], [0, 0, 1, 1], [], []>} : vector<32x32xbf16>, vector<32x256xbf16>, vector<32x256xf32> -> vector<32x256xf32>
    %79 = arith.addf %70, %78 : vector<32x256xf32>
    %80 = vector.broadcast %3 : vector<32x1xf32> to vector<32x256xf32>
    %81 = arith.addf %79, %80 : vector<32x256xf32>
    %cst_33 = arith.constant 0.000000e+00 : f32
    %82 = vector.broadcast %cst_33 : f32 to vector<32x256xf32>
    %83 = arith.maximumf %81, %82 : vector<32x256xf32>
    %c16 = arith.constant 16 : index
    %c0_34 = arith.constant 0 : index
    %84 = vector.load %arg4[%c16, %c0_34] : memref<48x512xf32, #tpu.memory_space<vmem>>, vector<9x256xf32>
    %85 = arith.truncf %83 : vector<32x256xf32> to vector<32x256xbf16>
    %c0_35 = arith.constant 0 : index
    %c0_36 = arith.constant 0 : index
    %86 = vector.load %arg6[%c0_35, %c0_36] : memref<256x256xbf16, #tpu.memory_space<vmem>>, vector<256x256xbf16>
    %cst_37 = arith.constant dense<0.000000e+00> : vector<32x256xf32>
    %87 = tpu.matmul %85, %86, %cst_37 {dimension_numbers = #tpu.dot_dimension_numbers<[1], [0], [0], [1], [0, 0, 1, 1], [], []>} : vector<32x256xbf16>, vector<256x256xbf16>, vector<32x256xf32> -> vector<32x256xf32>
    %c0_38 = arith.constant 0 : index
    %c0_39 = arith.constant 0 : index
    %c0_40 = arith.constant 0 : index
    %88 = vector.load %arg2[%c0_38, %c0_39, %c0_40] : memref<1x16x256xf32, #tpu.memory_space<vmem>>, vector<1x16x256xf32>
    %89 = vector.shape_cast %88 : vector<1x16x256xf32> to vector<16x256xf32>
    %c32 = arith.constant 32 : index
    %c0_41 = arith.constant 0 : index
    %90 = vector.load %arg14[%c32, %c0_41] : memref<96x1xf32, #tpu.memory_space<vmem>>, vector<16x1xf32>
    %91 = vector.extract_strided_slice %84 {offsets = [0, 0], sizes = [1, 256], strides = [1, 1]} : vector<9x256xf32> to vector<1x256xf32>
    %c9_i32 = arith.constant 9 : i32
    %92 = tpu.dynamic_rotate %89 by %c9_i32 dim 1 : vector<16x256xf32>, i32 -> vector<16x256xf32>
    %93 = vector.broadcast %91 : vector<1x256xf32> to vector<16x256xf32>
    %94 = arith.mulf %92, %93 : vector<16x256xf32>
    %c0_42 = arith.constant 0 : index
    %c0_43 = arith.constant 0 : index
    %c0_44 = arith.constant 0 : index
    %95 = vector.load %arg7[%c0_42, %c0_43, %c0_44] : memref<9x16x16xbf16, #tpu.memory_space<vmem>>, vector<1x16x16xbf16>
    %96 = vector.shape_cast %95 : vector<1x16x16xbf16> to vector<16x16xbf16>
    %97 = arith.truncf %94 : vector<16x256xf32> to vector<16x256xbf16>
    %cst_45 = arith.constant dense<0.000000e+00> : vector<16x256xf32>
    %98 = tpu.matmul %96, %97, %cst_45 {dimension_numbers = #tpu.dot_dimension_numbers<[1], [0], [0], [1], [0, 0, 1, 1], [], []>} : vector<16x16xbf16>, vector<16x256xbf16>, vector<16x256xf32> -> vector<16x256xf32>
    %c9_i32_46 = arith.constant 9 : i32
    %99 = tpu.dynamic_rotate %87 by %c9_i32_46 dim 1 : vector<32x256xf32>, i32 -> vector<32x256xf32>
    %100 = vector.broadcast %91 : vector<1x256xf32> to vector<32x256xf32>
    %101 = arith.mulf %99, %100 : vector<32x256xf32>
    %c0_47 = arith.constant 0 : index
    %c0_48 = arith.constant 0 : index
    %c0_49 = arith.constant 0 : index
    %102 = vector.load %arg8[%c0_47, %c0_48, %c0_49] : memref<9x16x32xbf16, #tpu.memory_space<vmem>>, vector<1x16x32xbf16>
    %103 = vector.shape_cast %102 : vector<1x16x32xbf16> to vector<16x32xbf16>
    %104 = arith.truncf %101 : vector<32x256xf32> to vector<32x256xbf16>
    %cst_50 = arith.constant dense<0.000000e+00> : vector<16x256xf32>
    %105 = tpu.matmul %103, %104, %cst_50 {dimension_numbers = #tpu.dot_dimension_numbers<[1], [0], [0], [1], [0, 0, 1, 1], [], []>} : vector<16x32xbf16>, vector<32x256xbf16>, vector<16x256xf32> -> vector<16x256xf32>
    %106 = arith.addf %98, %105 : vector<16x256xf32>
    %107 = vector.extract_strided_slice %84 {offsets = [1, 0], sizes = [1, 256], strides = [1, 1]} : vector<9x256xf32> to vector<1x256xf32>
    %c8_i32 = arith.constant 8 : i32
    %108 = tpu.dynamic_rotate %89 by %c8_i32 dim 1 : vector<16x256xf32>, i32 -> vector<16x256xf32>
    %109 = vector.broadcast %107 : vector<1x256xf32> to vector<16x256xf32>
    %110 = arith.mulf %108, %109 : vector<16x256xf32>
    %c1_51 = arith.constant 1 : index
    %c0_52 = arith.constant 0 : index
    %c0_53 = arith.constant 0 : index
    %111 = vector.load %arg7[%c1_51, %c0_52, %c0_53] : memref<9x16x16xbf16, #tpu.memory_space<vmem>>, vector<1x16x16xbf16>
    %112 = vector.shape_cast %111 : vector<1x16x16xbf16> to vector<16x16xbf16>
    %113 = arith.truncf %110 : vector<16x256xf32> to vector<16x256xbf16>
    %cst_54 = arith.constant dense<0.000000e+00> : vector<16x256xf32>
    %114 = tpu.matmul %112, %113, %cst_54 {dimension_numbers = #tpu.dot_dimension_numbers<[1], [0], [0], [1], [0, 0, 1, 1], [], []>} : vector<16x16xbf16>, vector<16x256xbf16>, vector<16x256xf32> -> vector<16x256xf32>
    %115 = arith.addf %106, %114 : vector<16x256xf32>
    %c8_i32_55 = arith.constant 8 : i32
    %116 = tpu.dynamic_rotate %87 by %c8_i32_55 dim 1 : vector<32x256xf32>, i32 -> vector<32x256xf32>
    %117 = vector.broadcast %107 : vector<1x256xf32> to vector<32x256xf32>
    %118 = arith.mulf %116, %117 : vector<32x256xf32>
    %c1_56 = arith.constant 1 : index
    %c0_57 = arith.constant 0 : index
    %c0_58 = arith.constant 0 : index
    %119 = vector.load %arg8[%c1_56, %c0_57, %c0_58] : memref<9x16x32xbf16, #tpu.memory_space<vmem>>, vector<1x16x32xbf16>
    %120 = vector.shape_cast %119 : vector<1x16x32xbf16> to vector<16x32xbf16>
    %121 = arith.truncf %118 : vector<32x256xf32> to vector<32x256xbf16>
    %cst_59 = arith.constant dense<0.000000e+00> : vector<16x256xf32>
    %122 = tpu.matmul %120, %121, %cst_59 {dimension_numbers = #tpu.dot_dimension_numbers<[1], [0], [0], [1], [0, 0, 1, 1], [], []>} : vector<16x32xbf16>, vector<32x256xbf16>, vector<16x256xf32> -> vector<16x256xf32>
    %123 = arith.addf %115, %122 : vector<16x256xf32>
    %124 = vector.extract_strided_slice %84 {offsets = [2, 0], sizes = [1, 256], strides = [1, 1]} : vector<9x256xf32> to vector<1x256xf32>
    %c7_i32 = arith.constant 7 : i32
    %125 = tpu.dynamic_rotate %89 by %c7_i32 dim 1 : vector<16x256xf32>, i32 -> vector<16x256xf32>
    %126 = vector.broadcast %124 : vector<1x256xf32> to vector<16x256xf32>
    %127 = arith.mulf %125, %126 : vector<16x256xf32>
    %c2_60 = arith.constant 2 : index
    %c0_61 = arith.constant 0 : index
    %c0_62 = arith.constant 0 : index
    %128 = vector.load %arg7[%c2_60, %c0_61, %c0_62] : memref<9x16x16xbf16, #tpu.memory_space<vmem>>, vector<1x16x16xbf16>
    %129 = vector.shape_cast %128 : vector<1x16x16xbf16> to vector<16x16xbf16>
    %130 = arith.truncf %127 : vector<16x256xf32> to vector<16x256xbf16>
    %cst_63 = arith.constant dense<0.000000e+00> : vector<16x256xf32>
    %131 = tpu.matmul %129, %130, %cst_63 {dimension_numbers = #tpu.dot_dimension_numbers<[1], [0], [0], [1], [0, 0, 1, 1], [], []>} : vector<16x16xbf16>, vector<16x256xbf16>, vector<16x256xf32> -> vector<16x256xf32>
    %132 = arith.addf %123, %131 : vector<16x256xf32>
    %c7_i32_64 = arith.constant 7 : i32
    %133 = tpu.dynamic_rotate %87 by %c7_i32_64 dim 1 : vector<32x256xf32>, i32 -> vector<32x256xf32>
    %134 = vector.broadcast %124 : vector<1x256xf32> to vector<32x256xf32>
    %135 = arith.mulf %133, %134 : vector<32x256xf32>
    %c2_65 = arith.constant 2 : index
    %c0_66 = arith.constant 0 : index
    %c0_67 = arith.constant 0 : index
    %136 = vector.load %arg8[%c2_65, %c0_66, %c0_67] : memref<9x16x32xbf16, #tpu.memory_space<vmem>>, vector<1x16x32xbf16>
    %137 = vector.shape_cast %136 : vector<1x16x32xbf16> to vector<16x32xbf16>
    %138 = arith.truncf %135 : vector<32x256xf32> to vector<32x256xbf16>
    %cst_68 = arith.constant dense<0.000000e+00> : vector<16x256xf32>
    %139 = tpu.matmul %137, %138, %cst_68 {dimension_numbers = #tpu.dot_dimension_numbers<[1], [0], [0], [1], [0, 0, 1, 1], [], []>} : vector<16x32xbf16>, vector<32x256xbf16>, vector<16x256xf32> -> vector<16x256xf32>
    %140 = arith.addf %132, %139 : vector<16x256xf32>
    %141 = vector.extract_strided_slice %84 {offsets = [3, 0], sizes = [1, 256], strides = [1, 1]} : vector<9x256xf32> to vector<1x256xf32>
    %c1_i32_69 = arith.constant 1 : i32
    %142 = tpu.dynamic_rotate %89 by %c1_i32_69 dim 1 : vector<16x256xf32>, i32 -> vector<16x256xf32>
    %143 = vector.broadcast %141 : vector<1x256xf32> to vector<16x256xf32>
    %144 = arith.mulf %142, %143 : vector<16x256xf32>
    %c3_70 = arith.constant 3 : index
    %c0_71 = arith.constant 0 : index
    %c0_72 = arith.constant 0 : index
    %145 = vector.load %arg7[%c3_70, %c0_71, %c0_72] : memref<9x16x16xbf16, #tpu.memory_space<vmem>>, vector<1x16x16xbf16>
    %146 = vector.shape_cast %145 : vector<1x16x16xbf16> to vector<16x16xbf16>
    %147 = arith.truncf %144 : vector<16x256xf32> to vector<16x256xbf16>
    %cst_73 = arith.constant dense<0.000000e+00> : vector<16x256xf32>
    %148 = tpu.matmul %146, %147, %cst_73 {dimension_numbers = #tpu.dot_dimension_numbers<[1], [0], [0], [1], [0, 0, 1, 1], [], []>} : vector<16x16xbf16>, vector<16x256xbf16>, vector<16x256xf32> -> vector<16x256xf32>
    %149 = arith.addf %140, %148 : vector<16x256xf32>
    %c1_i32_74 = arith.constant 1 : i32
    %150 = tpu.dynamic_rotate %87 by %c1_i32_74 dim 1 : vector<32x256xf32>, i32 -> vector<32x256xf32>
    %151 = vector.broadcast %141 : vector<1x256xf32> to vector<32x256xf32>
    %152 = arith.mulf %150, %151 : vector<32x256xf32>
    %c3_75 = arith.constant 3 : index
    %c0_76 = arith.constant 0 : index
    %c0_77 = arith.constant 0 : index
    %153 = vector.load %arg8[%c3_75, %c0_76, %c0_77] : memref<9x16x32xbf16, #tpu.memory_space<vmem>>, vector<1x16x32xbf16>
    %154 = vector.shape_cast %153 : vector<1x16x32xbf16> to vector<16x32xbf16>
    %155 = arith.truncf %152 : vector<32x256xf32> to vector<32x256xbf16>
    %cst_78 = arith.constant dense<0.000000e+00> : vector<16x256xf32>
    %156 = tpu.matmul %154, %155, %cst_78 {dimension_numbers = #tpu.dot_dimension_numbers<[1], [0], [0], [1], [0, 0, 1, 1], [], []>} : vector<16x32xbf16>, vector<32x256xbf16>, vector<16x256xf32> -> vector<16x256xf32>
    %157 = arith.addf %149, %156 : vector<16x256xf32>
    %c4_79 = arith.constant 4 : index
    %c0_80 = arith.constant 0 : index
    %c0_81 = arith.constant 0 : index
    %158 = vector.load %arg7[%c4_79, %c0_80, %c0_81] : memref<9x16x16xbf16, #tpu.memory_space<vmem>>, vector<1x16x16xbf16>
    %159 = vector.shape_cast %158 : vector<1x16x16xbf16> to vector<16x16xbf16>
    %160 = arith.truncf %89 : vector<16x256xf32> to vector<16x256xbf16>
    %cst_82 = arith.constant dense<0.000000e+00> : vector<16x256xf32>
    %161 = tpu.matmul %159, %160, %cst_82 {dimension_numbers = #tpu.dot_dimension_numbers<[1], [0], [0], [1], [0, 0, 1, 1], [], []>} : vector<16x16xbf16>, vector<16x256xbf16>, vector<16x256xf32> -> vector<16x256xf32>
    %162 = arith.addf %157, %161 : vector<16x256xf32>
    %c4_83 = arith.constant 4 : index
    %c0_84 = arith.constant 0 : index
    %c0_85 = arith.constant 0 : index
    %163 = vector.load %arg8[%c4_83, %c0_84, %c0_85] : memref<9x16x32xbf16, #tpu.memory_space<vmem>>, vector<1x16x32xbf16>
    %164 = vector.shape_cast %163 : vector<1x16x32xbf16> to vector<16x32xbf16>
    %165 = arith.truncf %87 : vector<32x256xf32> to vector<32x256xbf16>
    %cst_86 = arith.constant dense<0.000000e+00> : vector<16x256xf32>
    %166 = tpu.matmul %164, %165, %cst_86 {dimension_numbers = #tpu.dot_dimension_numbers<[1], [0], [0], [1], [0, 0, 1, 1], [], []>} : vector<16x32xbf16>, vector<32x256xbf16>, vector<16x256xf32> -> vector<16x256xf32>
    %167 = arith.addf %162, %166 : vector<16x256xf32>
    %168 = vector.extract_strided_slice %84 {offsets = [5, 0], sizes = [1, 256], strides = [1, 1]} : vector<9x256xf32> to vector<1x256xf32>
    %c255_i32_87 = arith.constant 255 : i32
    %169 = tpu.dynamic_rotate %89 by %c255_i32_87 dim 1 : vector<16x256xf32>, i32 -> vector<16x256xf32>
    %170 = vector.broadcast %168 : vector<1x256xf32> to vector<16x256xf32>
    %171 = arith.mulf %169, %170 : vector<16x256xf32>
    %c5_88 = arith.constant 5 : index
    %c0_89 = arith.constant 0 : index
    %c0_90 = arith.constant 0 : index
    %172 = vector.load %arg7[%c5_88, %c0_89, %c0_90] : memref<9x16x16xbf16, #tpu.memory_space<vmem>>, vector<1x16x16xbf16>
    %173 = vector.shape_cast %172 : vector<1x16x16xbf16> to vector<16x16xbf16>
    %174 = arith.truncf %171 : vector<16x256xf32> to vector<16x256xbf16>
    %cst_91 = arith.constant dense<0.000000e+00> : vector<16x256xf32>
    %175 = tpu.matmul %173, %174, %cst_91 {dimension_numbers = #tpu.dot_dimension_numbers<[1], [0], [0], [1], [0, 0, 1, 1], [], []>} : vector<16x16xbf16>, vector<16x256xbf16>, vector<16x256xf32> -> vector<16x256xf32>
    %176 = arith.addf %167, %175 : vector<16x256xf32>
    %c255_i32_92 = arith.constant 255 : i32
    %177 = tpu.dynamic_rotate %87 by %c255_i32_92 dim 1 : vector<32x256xf32>, i32 -> vector<32x256xf32>
    %178 = vector.broadcast %168 : vector<1x256xf32> to vector<32x256xf32>
    %179 = arith.mulf %177, %178 : vector<32x256xf32>
    %c5_93 = arith.constant 5 : index
    %c0_94 = arith.constant 0 : index
    %c0_95 = arith.constant 0 : index
    %180 = vector.load %arg8[%c5_93, %c0_94, %c0_95] : memref<9x16x32xbf16, #tpu.memory_space<vmem>>, vector<1x16x32xbf16>
    %181 = vector.shape_cast %180 : vector<1x16x32xbf16> to vector<16x32xbf16>
    %182 = arith.truncf %179 : vector<32x256xf32> to vector<32x256xbf16>
    %cst_96 = arith.constant dense<0.000000e+00> : vector<16x256xf32>
    %183 = tpu.matmul %181, %182, %cst_96 {dimension_numbers = #tpu.dot_dimension_numbers<[1], [0], [0], [1], [0, 0, 1, 1], [], []>} : vector<16x32xbf16>, vector<32x256xbf16>, vector<16x256xf32> -> vector<16x256xf32>
    %184 = arith.addf %176, %183 : vector<16x256xf32>
    %185 = vector.extract_strided_slice %84 {offsets = [6, 0], sizes = [1, 256], strides = [1, 1]} : vector<9x256xf32> to vector<1x256xf32>
    %c249_i32 = arith.constant 249 : i32
    %186 = tpu.dynamic_rotate %89 by %c249_i32 dim 1 : vector<16x256xf32>, i32 -> vector<16x256xf32>
    %187 = vector.broadcast %185 : vector<1x256xf32> to vector<16x256xf32>
    %188 = arith.mulf %186, %187 : vector<16x256xf32>
    %c6_97 = arith.constant 6 : index
    %c0_98 = arith.constant 0 : index
    %c0_99 = arith.constant 0 : index
    %189 = vector.load %arg7[%c6_97, %c0_98, %c0_99] : memref<9x16x16xbf16, #tpu.memory_space<vmem>>, vector<1x16x16xbf16>
    %190 = vector.shape_cast %189 : vector<1x16x16xbf16> to vector<16x16xbf16>
    %191 = arith.truncf %188 : vector<16x256xf32> to vector<16x256xbf16>
    %cst_100 = arith.constant dense<0.000000e+00> : vector<16x256xf32>
    %192 = tpu.matmul %190, %191, %cst_100 {dimension_numbers = #tpu.dot_dimension_numbers<[1], [0], [0], [1], [0, 0, 1, 1], [], []>} : vector<16x16xbf16>, vector<16x256xbf16>, vector<16x256xf32> -> vector<16x256xf32>
    %193 = arith.addf %184, %192 : vector<16x256xf32>
    %c249_i32_101 = arith.constant 249 : i32
    %194 = tpu.dynamic_rotate %87 by %c249_i32_101 dim 1 : vector<32x256xf32>, i32 -> vector<32x256xf32>
    %195 = vector.broadcast %185 : vector<1x256xf32> to vector<32x256xf32>
    %196 = arith.mulf %194, %195 : vector<32x256xf32>
    %c6_102 = arith.constant 6 : index
    %c0_103 = arith.constant 0 : index
    %c0_104 = arith.constant 0 : index
    %197 = vector.load %arg8[%c6_102, %c0_103, %c0_104] : memref<9x16x32xbf16, #tpu.memory_space<vmem>>, vector<1x16x32xbf16>
    %198 = vector.shape_cast %197 : vector<1x16x32xbf16> to vector<16x32xbf16>
    %199 = arith.truncf %196 : vector<32x256xf32> to vector<32x256xbf16>
    %cst_105 = arith.constant dense<0.000000e+00> : vector<16x256xf32>
    %200 = tpu.matmul %198, %199, %cst_105 {dimension_numbers = #tpu.dot_dimension_numbers<[1], [0], [0], [1], [0, 0, 1, 1], [], []>} : vector<16x32xbf16>, vector<32x256xbf16>, vector<16x256xf32> -> vector<16x256xf32>
    %201 = arith.addf %193, %200 : vector<16x256xf32>
    %202 = vector.extract_strided_slice %84 {offsets = [7, 0], sizes = [1, 256], strides = [1, 1]} : vector<9x256xf32> to vector<1x256xf32>
    %c248_i32 = arith.constant 248 : i32
    %203 = tpu.dynamic_rotate %89 by %c248_i32 dim 1 : vector<16x256xf32>, i32 -> vector<16x256xf32>
    %204 = vector.broadcast %202 : vector<1x256xf32> to vector<16x256xf32>
    %205 = arith.mulf %203, %204 : vector<16x256xf32>
    %c7_106 = arith.constant 7 : index
    %c0_107 = arith.constant 0 : index
    %c0_108 = arith.constant 0 : index
    %206 = vector.load %arg7[%c7_106, %c0_107, %c0_108] : memref<9x16x16xbf16, #tpu.memory_space<vmem>>, vector<1x16x16xbf16>
    %207 = vector.shape_cast %206 : vector<1x16x16xbf16> to vector<16x16xbf16>
    %208 = arith.truncf %205 : vector<16x256xf32> to vector<16x256xbf16>
    %cst_109 = arith.constant dense<0.000000e+00> : vector<16x256xf32>
    %209 = tpu.matmul %207, %208, %cst_109 {dimension_numbers = #tpu.dot_dimension_numbers<[1], [0], [0], [1], [0, 0, 1, 1], [], []>} : vector<16x16xbf16>, vector<16x256xbf16>, vector<16x256xf32> -> vector<16x256xf32>
    %210 = arith.addf %201, %209 : vector<16x256xf32>
    %c248_i32_110 = arith.constant 248 : i32
    %211 = tpu.dynamic_rotate %87 by %c248_i32_110 dim 1 : vector<32x256xf32>, i32 -> vector<32x256xf32>
    %212 = vector.broadcast %202 : vector<1x256xf32> to vector<32x256xf32>
    %213 = arith.mulf %211, %212 : vector<32x256xf32>
    %c7_111 = arith.constant 7 : index
    %c0_112 = arith.constant 0 : index
    %c0_113 = arith.constant 0 : index
    %214 = vector.load %arg8[%c7_111, %c0_112, %c0_113] : memref<9x16x32xbf16, #tpu.memory_space<vmem>>, vector<1x16x32xbf16>
    %215 = vector.shape_cast %214 : vector<1x16x32xbf16> to vector<16x32xbf16>
    %216 = arith.truncf %213 : vector<32x256xf32> to vector<32x256xbf16>
    %cst_114 = arith.constant dense<0.000000e+00> : vector<16x256xf32>
    %217 = tpu.matmul %215, %216, %cst_114 {dimension_numbers = #tpu.dot_dimension_numbers<[1], [0], [0], [1], [0, 0, 1, 1], [], []>} : vector<16x32xbf16>, vector<32x256xbf16>, vector<16x256xf32> -> vector<16x256xf32>
    %218 = arith.addf %210, %217 : vector<16x256xf32>
    %219 = vector.extract_strided_slice %84 {offsets = [8, 0], sizes = [1, 256], strides = [1, 1]} : vector<9x256xf32> to vector<1x256xf32>
    %c247_i32 = arith.constant 247 : i32
    %220 = tpu.dynamic_rotate %89 by %c247_i32 dim 1 : vector<16x256xf32>, i32 -> vector<16x256xf32>
    %221 = vector.broadcast %219 : vector<1x256xf32> to vector<16x256xf32>
    %222 = arith.mulf %220, %221 : vector<16x256xf32>
    %c8_115 = arith.constant 8 : index
    %c0_116 = arith.constant 0 : index
    %c0_117 = arith.constant 0 : index
    %223 = vector.load %arg7[%c8_115, %c0_116, %c0_117] : memref<9x16x16xbf16, #tpu.memory_space<vmem>>, vector<1x16x16xbf16>
    %224 = vector.shape_cast %223 : vector<1x16x16xbf16> to vector<16x16xbf16>
    %225 = arith.truncf %222 : vector<16x256xf32> to vector<16x256xbf16>
    %cst_118 = arith.constant dense<0.000000e+00> : vector<16x256xf32>
    %226 = tpu.matmul %224, %225, %cst_118 {dimension_numbers = #tpu.dot_dimension_numbers<[1], [0], [0], [1], [0, 0, 1, 1], [], []>} : vector<16x16xbf16>, vector<16x256xbf16>, vector<16x256xf32> -> vector<16x256xf32>
    %227 = arith.addf %218, %226 : vector<16x256xf32>
    %c247_i32_119 = arith.constant 247 : i32
    %228 = tpu.dynamic_rotate %87 by %c247_i32_119 dim 1 : vector<32x256xf32>, i32 -> vector<32x256xf32>
    %229 = vector.broadcast %219 : vector<1x256xf32> to vector<32x256xf32>
    %230 = arith.mulf %228, %229 : vector<32x256xf32>
    %c8_120 = arith.constant 8 : index
    %c0_121 = arith.constant 0 : index
    %c0_122 = arith.constant 0 : index
    %231 = vector.load %arg8[%c8_120, %c0_121, %c0_122] : memref<9x16x32xbf16, #tpu.memory_space<vmem>>, vector<1x16x32xbf16>
    %232 = vector.shape_cast %231 : vector<1x16x32xbf16> to vector<16x32xbf16>
    %233 = arith.truncf %230 : vector<32x256xf32> to vector<32x256xbf16>
    %cst_123 = arith.constant dense<0.000000e+00> : vector<16x256xf32>
    %234 = tpu.matmul %232, %233, %cst_123 {dimension_numbers = #tpu.dot_dimension_numbers<[1], [0], [0], [1], [0, 0, 1, 1], [], []>} : vector<16x32xbf16>, vector<32x256xbf16>, vector<16x256xf32> -> vector<16x256xf32>
    %235 = arith.addf %227, %234 : vector<16x256xf32>
    %236 = vector.broadcast %90 : vector<16x1xf32> to vector<16x256xf32>
    %237 = arith.addf %235, %236 : vector<16x256xf32>
    %cst_124 = arith.constant 0.000000e+00 : f32
    %238 = vector.broadcast %cst_124 : f32 to vector<16x256xf32>
    %239 = arith.maximumf %237, %238 : vector<16x256xf32>
    %c48 = arith.constant 48 : index
    %c0_125 = arith.constant 0 : index
    %240 = vector.load %arg14[%c48, %c0_125] : memref<96x1xf32, #tpu.memory_space<vmem>>, vector<16x1xf32>
    %241 = vector.extract_strided_slice %84 {offsets = [0, 0], sizes = [1, 256], strides = [1, 1]} : vector<9x256xf32> to vector<1x256xf32>
    %c9_i32_126 = arith.constant 9 : i32
    %242 = tpu.dynamic_rotate %239 by %c9_i32_126 dim 1 : vector<16x256xf32>, i32 -> vector<16x256xf32>
    %243 = vector.broadcast %241 : vector<1x256xf32> to vector<16x256xf32>
    %244 = arith.mulf %242, %243 : vector<16x256xf32>
    %c0_127 = arith.constant 0 : index
    %c0_128 = arith.constant 0 : index
    %c0_129 = arith.constant 0 : index
    %245 = vector.load %arg9[%c0_127, %c0_128, %c0_129] : memref<9x16x16xbf16, #tpu.memory_space<vmem>>, vector<1x16x16xbf16>
    %246 = vector.shape_cast %245 : vector<1x16x16xbf16> to vector<16x16xbf16>
    %247 = arith.truncf %244 : vector<16x256xf32> to vector<16x256xbf16>
    %cst_130 = arith.constant dense<0.000000e+00> : vector<16x256xf32>
    %248 = tpu.matmul %246, %247, %cst_130 {dimension_numbers = #tpu.dot_dimension_numbers<[1], [0], [0], [1], [0, 0, 1, 1], [], []>} : vector<16x16xbf16>, vector<16x256xbf16>, vector<16x256xf32> -> vector<16x256xf32>
    %249 = vector.extract_strided_slice %84 {offsets = [1, 0], sizes = [1, 256], strides = [1, 1]} : vector<9x256xf32> to vector<1x256xf32>
    %c8_i32_131 = arith.constant 8 : i32
    %250 = tpu.dynamic_rotate %239 by %c8_i32_131 dim 1 : vector<16x256xf32>, i32 -> vector<16x256xf32>
    %251 = vector.broadcast %249 : vector<1x256xf32> to vector<16x256xf32>
    %252 = arith.mulf %250, %251 : vector<16x256xf32>
    %c1_132 = arith.constant 1 : index
    %c0_133 = arith.constant 0 : index
    %c0_134 = arith.constant 0 : index
    %253 = vector.load %arg9[%c1_132, %c0_133, %c0_134] : memref<9x16x16xbf16, #tpu.memory_space<vmem>>, vector<1x16x16xbf16>
    %254 = vector.shape_cast %253 : vector<1x16x16xbf16> to vector<16x16xbf16>
    %255 = arith.truncf %252 : vector<16x256xf32> to vector<16x256xbf16>
    %cst_135 = arith.constant dense<0.000000e+00> : vector<16x256xf32>
    %256 = tpu.matmul %254, %255, %cst_135 {dimension_numbers = #tpu.dot_dimension_numbers<[1], [0], [0], [1], [0, 0, 1, 1], [], []>} : vector<16x16xbf16>, vector<16x256xbf16>, vector<16x256xf32> -> vector<16x256xf32>
    %257 = arith.addf %248, %256 : vector<16x256xf32>
    %258 = vector.extract_strided_slice %84 {offsets = [2, 0], sizes = [1, 256], strides = [1, 1]} : vector<9x256xf32> to vector<1x256xf32>
    %c7_i32_136 = arith.constant 7 : i32
    %259 = tpu.dynamic_rotate %239 by %c7_i32_136 dim 1 : vector<16x256xf32>, i32 -> vector<16x256xf32>
    %260 = vector.broadcast %258 : vector<1x256xf32> to vector<16x256xf32>
    %261 = arith.mulf %259, %260 : vector<16x256xf32>
    %c2_137 = arith.constant 2 : index
    %c0_138 = arith.constant 0 : index
    %c0_139 = arith.constant 0 : index
    %262 = vector.load %arg9[%c2_137, %c0_138, %c0_139] : memref<9x16x16xbf16, #tpu.memory_space<vmem>>, vector<1x16x16xbf16>
    %263 = vector.shape_cast %262 : vector<1x16x16xbf16> to vector<16x16xbf16>
    %264 = arith.truncf %261 : vector<16x256xf32> to vector<16x256xbf16>
    %cst_140 = arith.constant dense<0.000000e+00> : vector<16x256xf32>
    %265 = tpu.matmul %263, %264, %cst_140 {dimension_numbers = #tpu.dot_dimension_numbers<[1], [0], [0], [1], [0, 0, 1, 1], [], []>} : vector<16x16xbf16>, vector<16x256xbf16>, vector<16x256xf32> -> vector<16x256xf32>
    %266 = arith.addf %257, %265 : vector<16x256xf32>
    %267 = vector.extract_strided_slice %84 {offsets = [3, 0], sizes = [1, 256], strides = [1, 1]} : vector<9x256xf32> to vector<1x256xf32>
    %c1_i32_141 = arith.constant 1 : i32
    %268 = tpu.dynamic_rotate %239 by %c1_i32_141 dim 1 : vector<16x256xf32>, i32 -> vector<16x256xf32>
    %269 = vector.broadcast %267 : vector<1x256xf32> to vector<16x256xf32>
    %270 = arith.mulf %268, %269 : vector<16x256xf32>
    %c3_142 = arith.constant 3 : index
    %c0_143 = arith.constant 0 : index
    %c0_144 = arith.constant 0 : index
    %271 = vector.load %arg9[%c3_142, %c0_143, %c0_144] : memref<9x16x16xbf16, #tpu.memory_space<vmem>>, vector<1x16x16xbf16>
    %272 = vector.shape_cast %271 : vector<1x16x16xbf16> to vector<16x16xbf16>
    %273 = arith.truncf %270 : vector<16x256xf32> to vector<16x256xbf16>
    %cst_145 = arith.constant dense<0.000000e+00> : vector<16x256xf32>
    %274 = tpu.matmul %272, %273, %cst_145 {dimension_numbers = #tpu.dot_dimension_numbers<[1], [0], [0], [1], [0, 0, 1, 1], [], []>} : vector<16x16xbf16>, vector<16x256xbf16>, vector<16x256xf32> -> vector<16x256xf32>
    %275 = arith.addf %266, %274 : vector<16x256xf32>
    %c4_146 = arith.constant 4 : index
    %c0_147 = arith.constant 0 : index
    %c0_148 = arith.constant 0 : index
    %276 = vector.load %arg9[%c4_146, %c0_147, %c0_148] : memref<9x16x16xbf16, #tpu.memory_space<vmem>>, vector<1x16x16xbf16>
    %277 = vector.shape_cast %276 : vector<1x16x16xbf16> to vector<16x16xbf16>
    %278 = arith.truncf %239 : vector<16x256xf32> to vector<16x256xbf16>
    %cst_149 = arith.constant dense<0.000000e+00> : vector<16x256xf32>
    %279 = tpu.matmul %277, %278, %cst_149 {dimension_numbers = #tpu.dot_dimension_numbers<[1], [0], [0], [1], [0, 0, 1, 1], [], []>} : vector<16x16xbf16>, vector<16x256xbf16>, vector<16x256xf32> -> vector<16x256xf32>
    %280 = arith.addf %275, %279 : vector<16x256xf32>
    %281 = vector.extract_strided_slice %84 {offsets = [5, 0], sizes = [1, 256], strides = [1, 1]} : vector<9x256xf32> to vector<1x256xf32>
    %c255_i32_150 = arith.constant 255 : i32
    %282 = tpu.dynamic_rotate %239 by %c255_i32_150 dim 1 : vector<16x256xf32>, i32 -> vector<16x256xf32>
    %283 = vector.broadcast %281 : vector<1x256xf32> to vector<16x256xf32>
    %284 = arith.mulf %282, %283 : vector<16x256xf32>
    %c5_151 = arith.constant 5 : index
    %c0_152 = arith.constant 0 : index
    %c0_153 = arith.constant 0 : index
    %285 = vector.load %arg9[%c5_151, %c0_152, %c0_153] : memref<9x16x16xbf16, #tpu.memory_space<vmem>>, vector<1x16x16xbf16>
    %286 = vector.shape_cast %285 : vector<1x16x16xbf16> to vector<16x16xbf16>
    %287 = arith.truncf %284 : vector<16x256xf32> to vector<16x256xbf16>
    %cst_154 = arith.constant dense<0.000000e+00> : vector<16x256xf32>
    %288 = tpu.matmul %286, %287, %cst_154 {dimension_numbers = #tpu.dot_dimension_numbers<[1], [0], [0], [1], [0, 0, 1, 1], [], []>} : vector<16x16xbf16>, vector<16x256xbf16>, vector<16x256xf32> -> vector<16x256xf32>
    %289 = arith.addf %280, %288 : vector<16x256xf32>
    %290 = vector.extract_strided_slice %84 {offsets = [6, 0], sizes = [1, 256], strides = [1, 1]} : vector<9x256xf32> to vector<1x256xf32>
    %c249_i32_155 = arith.constant 249 : i32
    %291 = tpu.dynamic_rotate %239 by %c249_i32_155 dim 1 : vector<16x256xf32>, i32 -> vector<16x256xf32>
    %292 = vector.broadcast %290 : vector<1x256xf32> to vector<16x256xf32>
    %293 = arith.mulf %291, %292 : vector<16x256xf32>
    %c6_156 = arith.constant 6 : index
    %c0_157 = arith.constant 0 : index
    %c0_158 = arith.constant 0 : index
    %294 = vector.load %arg9[%c6_156, %c0_157, %c0_158] : memref<9x16x16xbf16, #tpu.memory_space<vmem>>, vector<1x16x16xbf16>
    %295 = vector.shape_cast %294 : vector<1x16x16xbf16> to vector<16x16xbf16>
    %296 = arith.truncf %293 : vector<16x256xf32> to vector<16x256xbf16>
    %cst_159 = arith.constant dense<0.000000e+00> : vector<16x256xf32>
    %297 = tpu.matmul %295, %296, %cst_159 {dimension_numbers = #tpu.dot_dimension_numbers<[1], [0], [0], [1], [0, 0, 1, 1], [], []>} : vector<16x16xbf16>, vector<16x256xbf16>, vector<16x256xf32> -> vector<16x256xf32>
    %298 = arith.addf %289, %297 : vector<16x256xf32>
    %299 = vector.extract_strided_slice %84 {offsets = [7, 0], sizes = [1, 256], strides = [1, 1]} : vector<9x256xf32> to vector<1x256xf32>
    %c248_i32_160 = arith.constant 248 : i32
    %300 = tpu.dynamic_rotate %239 by %c248_i32_160 dim 1 : vector<16x256xf32>, i32 -> vector<16x256xf32>
    %301 = vector.broadcast %299 : vector<1x256xf32> to vector<16x256xf32>
    %302 = arith.mulf %300, %301 : vector<16x256xf32>
    %c7_161 = arith.constant 7 : index
    %c0_162 = arith.constant 0 : index
    %c0_163 = arith.constant 0 : index
    %303 = vector.load %arg9[%c7_161, %c0_162, %c0_163] : memref<9x16x16xbf16, #tpu.memory_space<vmem>>, vector<1x16x16xbf16>
    %304 = vector.shape_cast %303 : vector<1x16x16xbf16> to vector<16x16xbf16>
    %305 = arith.truncf %302 : vector<16x256xf32> to vector<16x256xbf16>
    %cst_164 = arith.constant dense<0.000000e+00> : vector<16x256xf32>
    %306 = tpu.matmul %304, %305, %cst_164 {dimension_numbers = #tpu.dot_dimension_numbers<[1], [0], [0], [1], [0, 0, 1, 1], [], []>} : vector<16x16xbf16>, vector<16x256xbf16>, vector<16x256xf32> -> vector<16x256xf32>
    %307 = arith.addf %298, %306 : vector<16x256xf32>
    %308 = vector.extract_strided_slice %84 {offsets = [8, 0], sizes = [1, 256], strides = [1, 1]} : vector<9x256xf32> to vector<1x256xf32>
    %c247_i32_165 = arith.constant 247 : i32
    %309 = tpu.dynamic_rotate %239 by %c247_i32_165 dim 1 : vector<16x256xf32>, i32 -> vector<16x256xf32>
    %310 = vector.broadcast %308 : vector<1x256xf32> to vector<16x256xf32>
    %311 = arith.mulf %309, %310 : vector<16x256xf32>
    %c8_166 = arith.constant 8 : index
    %c0_167 = arith.constant 0 : index
    %c0_168 = arith.constant 0 : index
    %312 = vector.load %arg9[%c8_166, %c0_167, %c0_168] : memref<9x16x16xbf16, #tpu.memory_space<vmem>>, vector<1x16x16xbf16>
    %313 = vector.shape_cast %312 : vector<1x16x16xbf16> to vector<16x16xbf16>
    %314 = arith.truncf %311 : vector<16x256xf32> to vector<16x256xbf16>
    %cst_169 = arith.constant dense<0.000000e+00> : vector<16x256xf32>
    %315 = tpu.matmul %313, %314, %cst_169 {dimension_numbers = #tpu.dot_dimension_numbers<[1], [0], [0], [1], [0, 0, 1, 1], [], []>} : vector<16x16xbf16>, vector<16x256xbf16>, vector<16x256xf32> -> vector<16x256xf32>
    %316 = arith.addf %307, %315 : vector<16x256xf32>
    %317 = vector.broadcast %240 : vector<16x1xf32> to vector<16x256xf32>
    %318 = arith.addf %316, %317 : vector<16x256xf32>
    %319 = arith.addf %239, %318 : vector<16x256xf32>
    %cst_170 = arith.constant 0.000000e+00 : f32
    %320 = vector.broadcast %cst_170 : f32 to vector<16x256xf32>
    %321 = arith.maximumf %319, %320 : vector<16x256xf32>
    %c32_171 = arith.constant 32 : index
    %c0_172 = arith.constant 0 : index
    %322 = vector.load %arg4[%c32_171, %c0_172] : memref<48x512xf32, #tpu.memory_space<vmem>>, vector<9x512xf32>
    %323 = arith.truncf %321 : vector<16x256xf32> to vector<16x256xbf16>
    %c0_173 = arith.constant 0 : index
    %c0_174 = arith.constant 0 : index
    %324 = vector.load %arg10[%c0_173, %c0_174] : memref<256x512xbf16, #tpu.memory_space<vmem>>, vector<256x512xbf16>
    %cst_175 = arith.constant dense<0.000000e+00> : vector<16x512xf32>
    %325 = tpu.matmul %323, %324, %cst_175 {dimension_numbers = #tpu.dot_dimension_numbers<[1], [0], [0], [1], [0, 0, 1, 1], [], []>} : vector<16x256xbf16>, vector<256x512xbf16>, vector<16x512xf32> -> vector<16x512xf32>
    %c0_176 = arith.constant 0 : index
    %c0_177 = arith.constant 0 : index
    %c0_178 = arith.constant 0 : index
    %326 = vector.load %arg3[%c0_176, %c0_177, %c0_178] : memref<1x8x512xf32, #tpu.memory_space<vmem>>, vector<1x8x512xf32>
    %327 = vector.shape_cast %326 : vector<1x8x512xf32> to vector<8x512xf32>
    %c64 = arith.constant 64 : index
    %c0_179 = arith.constant 0 : index
    %328 = vector.load %arg14[%c64, %c0_179] : memref<96x1xf32, #tpu.memory_space<vmem>>, vector<8x1xf32>
    %329 = vector.extract_strided_slice %322 {offsets = [0, 0], sizes = [1, 512], strides = [1, 1]} : vector<9x512xf32> to vector<1x512xf32>
    %c17_i32 = arith.constant 17 : i32
    %330 = tpu.dynamic_rotate %327 by %c17_i32 dim 1 : vector<8x512xf32>, i32 -> vector<8x512xf32>
    %331 = vector.broadcast %329 : vector<1x512xf32> to vector<8x512xf32>
    %332 = arith.mulf %330, %331 : vector<8x512xf32>
    %c0_180 = arith.constant 0 : index
    %c0_181 = arith.constant 0 : index
    %c0_182 = arith.constant 0 : index
    %333 = vector.load %arg11[%c0_180, %c0_181, %c0_182] : memref<9x8x8xbf16, #tpu.memory_space<vmem>>, vector<1x8x8xbf16>
    %334 = vector.shape_cast %333 : vector<1x8x8xbf16> to vector<8x8xbf16>
    %335 = arith.truncf %332 : vector<8x512xf32> to vector<8x512xbf16>
    %cst_183 = arith.constant dense<0.000000e+00> : vector<8x512xf32>
    %336 = tpu.matmul %334, %335, %cst_183 {dimension_numbers = #tpu.dot_dimension_numbers<[1], [0], [0], [1], [0, 0, 1, 1], [], []>} : vector<8x8xbf16>, vector<8x512xbf16>, vector<8x512xf32> -> vector<8x512xf32>
    %c17_i32_184 = arith.constant 17 : i32
    %337 = tpu.dynamic_rotate %325 by %c17_i32_184 dim 1 : vector<16x512xf32>, i32 -> vector<16x512xf32>
    %338 = vector.broadcast %329 : vector<1x512xf32> to vector<16x512xf32>
    %339 = arith.mulf %337, %338 : vector<16x512xf32>
    %c0_185 = arith.constant 0 : index
    %c0_186 = arith.constant 0 : index
    %c0_187 = arith.constant 0 : index
    %340 = vector.load %arg12[%c0_185, %c0_186, %c0_187] : memref<9x8x16xbf16, #tpu.memory_space<vmem>>, vector<1x8x16xbf16>
    %341 = vector.shape_cast %340 : vector<1x8x16xbf16> to vector<8x16xbf16>
    %342 = arith.truncf %339 : vector<16x512xf32> to vector<16x512xbf16>
    %cst_188 = arith.constant dense<0.000000e+00> : vector<8x512xf32>
    %343 = tpu.matmul %341, %342, %cst_188 {dimension_numbers = #tpu.dot_dimension_numbers<[1], [0], [0], [1], [0, 0, 1, 1], [], []>} : vector<8x16xbf16>, vector<16x512xbf16>, vector<8x512xf32> -> vector<8x512xf32>
    %344 = arith.addf %336, %343 : vector<8x512xf32>
    %345 = vector.extract_strided_slice %322 {offsets = [1, 0], sizes = [1, 512], strides = [1, 1]} : vector<9x512xf32> to vector<1x512xf32>
    %c16_i32 = arith.constant 16 : i32
    %346 = tpu.dynamic_rotate %327 by %c16_i32 dim 1 : vector<8x512xf32>, i32 -> vector<8x512xf32>
    %347 = vector.broadcast %345 : vector<1x512xf32> to vector<8x512xf32>
    %348 = arith.mulf %346, %347 : vector<8x512xf32>
    %c1_189 = arith.constant 1 : index
    %c0_190 = arith.constant 0 : index
    %c0_191 = arith.constant 0 : index
    %349 = vector.load %arg11[%c1_189, %c0_190, %c0_191] : memref<9x8x8xbf16, #tpu.memory_space<vmem>>, vector<1x8x8xbf16>
    %350 = vector.shape_cast %349 : vector<1x8x8xbf16> to vector<8x8xbf16>
    %351 = arith.truncf %348 : vector<8x512xf32> to vector<8x512xbf16>
    %cst_192 = arith.constant dense<0.000000e+00> : vector<8x512xf32>
    %352 = tpu.matmul %350, %351, %cst_192 {dimension_numbers = #tpu.dot_dimension_numbers<[1], [0], [0], [1], [0, 0, 1, 1], [], []>} : vector<8x8xbf16>, vector<8x512xbf16>, vector<8x512xf32> -> vector<8x512xf32>
    %353 = arith.addf %344, %352 : vector<8x512xf32>
    %c16_i32_193 = arith.constant 16 : i32
    %354 = tpu.dynamic_rotate %325 by %c16_i32_193 dim 1 : vector<16x512xf32>, i32 -> vector<16x512xf32>
    %355 = vector.broadcast %345 : vector<1x512xf32> to vector<16x512xf32>
    %356 = arith.mulf %354, %355 : vector<16x512xf32>
    %c1_194 = arith.constant 1 : index
    %c0_195 = arith.constant 0 : index
    %c0_196 = arith.constant 0 : index
    %357 = vector.load %arg12[%c1_194, %c0_195, %c0_196] : memref<9x8x16xbf16, #tpu.memory_space<vmem>>, vector<1x8x16xbf16>
    %358 = vector.shape_cast %357 : vector<1x8x16xbf16> to vector<8x16xbf16>
    %359 = arith.truncf %356 : vector<16x512xf32> to vector<16x512xbf16>
    %cst_197 = arith.constant dense<0.000000e+00> : vector<8x512xf32>
    %360 = tpu.matmul %358, %359, %cst_197 {dimension_numbers = #tpu.dot_dimension_numbers<[1], [0], [0], [1], [0, 0, 1, 1], [], []>} : vector<8x16xbf16>, vector<16x512xbf16>, vector<8x512xf32> -> vector<8x512xf32>
    %361 = arith.addf %353, %360 : vector<8x512xf32>
    %362 = vector.extract_strided_slice %322 {offsets = [2, 0], sizes = [1, 512], strides = [1, 1]} : vector<9x512xf32> to vector<1x512xf32>
    %c15_i32 = arith.constant 15 : i32
    %363 = tpu.dynamic_rotate %327 by %c15_i32 dim 1 : vector<8x512xf32>, i32 -> vector<8x512xf32>
    %364 = vector.broadcast %362 : vector<1x512xf32> to vector<8x512xf32>
    %365 = arith.mulf %363, %364 : vector<8x512xf32>
    %c2_198 = arith.constant 2 : index
    %c0_199 = arith.constant 0 : index
    %c0_200 = arith.constant 0 : index
    %366 = vector.load %arg11[%c2_198, %c0_199, %c0_200] : memref<9x8x8xbf16, #tpu.memory_space<vmem>>, vector<1x8x8xbf16>
    %367 = vector.shape_cast %366 : vector<1x8x8xbf16> to vector<8x8xbf16>
    %368 = arith.truncf %365 : vector<8x512xf32> to vector<8x512xbf16>
    %cst_201 = arith.constant dense<0.000000e+00> : vector<8x512xf32>
    %369 = tpu.matmul %367, %368, %cst_201 {dimension_numbers = #tpu.dot_dimension_numbers<[1], [0], [0], [1], [0, 0, 1, 1], [], []>} : vector<8x8xbf16>, vector<8x512xbf16>, vector<8x512xf32> -> vector<8x512xf32>
    %370 = arith.addf %361, %369 : vector<8x512xf32>
    %c15_i32_202 = arith.constant 15 : i32
    %371 = tpu.dynamic_rotate %325 by %c15_i32_202 dim 1 : vector<16x512xf32>, i32 -> vector<16x512xf32>
    %372 = vector.broadcast %362 : vector<1x512xf32> to vector<16x512xf32>
    %373 = arith.mulf %371, %372 : vector<16x512xf32>
    %c2_203 = arith.constant 2 : index
    %c0_204 = arith.constant 0 : index
    %c0_205 = arith.constant 0 : index
    %374 = vector.load %arg12[%c2_203, %c0_204, %c0_205] : memref<9x8x16xbf16, #tpu.memory_space<vmem>>, vector<1x8x16xbf16>
    %375 = vector.shape_cast %374 : vector<1x8x16xbf16> to vector<8x16xbf16>
    %376 = arith.truncf %373 : vector<16x512xf32> to vector<16x512xbf16>
    %cst_206 = arith.constant dense<0.000000e+00> : vector<8x512xf32>
    %377 = tpu.matmul %375, %376, %cst_206 {dimension_numbers = #tpu.dot_dimension_numbers<[1], [0], [0], [1], [0, 0, 1, 1], [], []>} : vector<8x16xbf16>, vector<16x512xbf16>, vector<8x512xf32> -> vector<8x512xf32>
    %378 = arith.addf %370, %377 : vector<8x512xf32>
    %379 = vector.extract_strided_slice %322 {offsets = [3, 0], sizes = [1, 512], strides = [1, 1]} : vector<9x512xf32> to vector<1x512xf32>
    %c1_i32_207 = arith.constant 1 : i32
    %380 = tpu.dynamic_rotate %327 by %c1_i32_207 dim 1 : vector<8x512xf32>, i32 -> vector<8x512xf32>
    %381 = vector.broadcast %379 : vector<1x512xf32> to vector<8x512xf32>
    %382 = arith.mulf %380, %381 : vector<8x512xf32>
    %c3_208 = arith.constant 3 : index
    %c0_209 = arith.constant 0 : index
    %c0_210 = arith.constant 0 : index
    %383 = vector.load %arg11[%c3_208, %c0_209, %c0_210] : memref<9x8x8xbf16, #tpu.memory_space<vmem>>, vector<1x8x8xbf16>
    %384 = vector.shape_cast %383 : vector<1x8x8xbf16> to vector<8x8xbf16>
    %385 = arith.truncf %382 : vector<8x512xf32> to vector<8x512xbf16>
    %cst_211 = arith.constant dense<0.000000e+00> : vector<8x512xf32>
    %386 = tpu.matmul %384, %385, %cst_211 {dimension_numbers = #tpu.dot_dimension_numbers<[1], [0], [0], [1], [0, 0, 1, 1], [], []>} : vector<8x8xbf16>, vector<8x512xbf16>, vector<8x512xf32> -> vector<8x512xf32>
    %387 = arith.addf %378, %386 : vector<8x512xf32>
    %c1_i32_212 = arith.constant 1 : i32
    %388 = tpu.dynamic_rotate %325 by %c1_i32_212 dim 1 : vector<16x512xf32>, i32 -> vector<16x512xf32>
    %389 = vector.broadcast %379 : vector<1x512xf32> to vector<16x512xf32>
    %390 = arith.mulf %388, %389 : vector<16x512xf32>
    %c3_213 = arith.constant 3 : index
    %c0_214 = arith.constant 0 : index
    %c0_215 = arith.constant 0 : index
    %391 = vector.load %arg12[%c3_213, %c0_214, %c0_215] : memref<9x8x16xbf16, #tpu.memory_space<vmem>>, vector<1x8x16xbf16>
    %392 = vector.shape_cast %391 : vector<1x8x16xbf16> to vector<8x16xbf16>
    %393 = arith.truncf %390 : vector<16x512xf32> to vector<16x512xbf16>
    %cst_216 = arith.constant dense<0.000000e+00> : vector<8x512xf32>
    %394 = tpu.matmul %392, %393, %cst_216 {dimension_numbers = #tpu.dot_dimension_numbers<[1], [0], [0], [1], [0, 0, 1, 1], [], []>} : vector<8x16xbf16>, vector<16x512xbf16>, vector<8x512xf32> -> vector<8x512xf32>
    %395 = arith.addf %387, %394 : vector<8x512xf32>
    %c4_217 = arith.constant 4 : index
    %c0_218 = arith.constant 0 : index
    %c0_219 = arith.constant 0 : index
    %396 = vector.load %arg11[%c4_217, %c0_218, %c0_219] : memref<9x8x8xbf16, #tpu.memory_space<vmem>>, vector<1x8x8xbf16>
    %397 = vector.shape_cast %396 : vector<1x8x8xbf16> to vector<8x8xbf16>
    %398 = arith.truncf %327 : vector<8x512xf32> to vector<8x512xbf16>
    %cst_220 = arith.constant dense<0.000000e+00> : vector<8x512xf32>
    %399 = tpu.matmul %397, %398, %cst_220 {dimension_numbers = #tpu.dot_dimension_numbers<[1], [0], [0], [1], [0, 0, 1, 1], [], []>} : vector<8x8xbf16>, vector<8x512xbf16>, vector<8x512xf32> -> vector<8x512xf32>
    %400 = arith.addf %395, %399 : vector<8x512xf32>
    %c4_221 = arith.constant 4 : index
    %c0_222 = arith.constant 0 : index
    %c0_223 = arith.constant 0 : index
    %401 = vector.load %arg12[%c4_221, %c0_222, %c0_223] : memref<9x8x16xbf16, #tpu.memory_space<vmem>>, vector<1x8x16xbf16>
    %402 = vector.shape_cast %401 : vector<1x8x16xbf16> to vector<8x16xbf16>
    %403 = arith.truncf %325 : vector<16x512xf32> to vector<16x512xbf16>
    %cst_224 = arith.constant dense<0.000000e+00> : vector<8x512xf32>
    %404 = tpu.matmul %402, %403, %cst_224 {dimension_numbers = #tpu.dot_dimension_numbers<[1], [0], [0], [1], [0, 0, 1, 1], [], []>} : vector<8x16xbf16>, vector<16x512xbf16>, vector<8x512xf32> -> vector<8x512xf32>
    %405 = arith.addf %400, %404 : vector<8x512xf32>
    %406 = vector.extract_strided_slice %322 {offsets = [5, 0], sizes = [1, 512], strides = [1, 1]} : vector<9x512xf32> to vector<1x512xf32>
    %c511_i32 = arith.constant 511 : i32
    %407 = tpu.dynamic_rotate %327 by %c511_i32 dim 1 : vector<8x512xf32>, i32 -> vector<8x512xf32>
    %408 = vector.broadcast %406 : vector<1x512xf32> to vector<8x512xf32>
    %409 = arith.mulf %407, %408 : vector<8x512xf32>
    %c5_225 = arith.constant 5 : index
    %c0_226 = arith.constant 0 : index
    %c0_227 = arith.constant 0 : index
    %410 = vector.load %arg11[%c5_225, %c0_226, %c0_227] : memref<9x8x8xbf16, #tpu.memory_space<vmem>>, vector<1x8x8xbf16>
    %411 = vector.shape_cast %410 : vector<1x8x8xbf16> to vector<8x8xbf16>
    %412 = arith.truncf %409 : vector<8x512xf32> to vector<8x512xbf16>
    %cst_228 = arith.constant dense<0.000000e+00> : vector<8x512xf32>
    %413 = tpu.matmul %411, %412, %cst_228 {dimension_numbers = #tpu.dot_dimension_numbers<[1], [0], [0], [1], [0, 0, 1, 1], [], []>} : vector<8x8xbf16>, vector<8x512xbf16>, vector<8x512xf32> -> vector<8x512xf32>
    %414 = arith.addf %405, %413 : vector<8x512xf32>
    %c511_i32_229 = arith.constant 511 : i32
    %415 = tpu.dynamic_rotate %325 by %c511_i32_229 dim 1 : vector<16x512xf32>, i32 -> vector<16x512xf32>
    %416 = vector.broadcast %406 : vector<1x512xf32> to vector<16x512xf32>
    %417 = arith.mulf %415, %416 : vector<16x512xf32>
    %c5_230 = arith.constant 5 : index
    %c0_231 = arith.constant 0 : index
    %c0_232 = arith.constant 0 : index
    %418 = vector.load %arg12[%c5_230, %c0_231, %c0_232] : memref<9x8x16xbf16, #tpu.memory_space<vmem>>, vector<1x8x16xbf16>
    %419 = vector.shape_cast %418 : vector<1x8x16xbf16> to vector<8x16xbf16>
    %420 = arith.truncf %417 : vector<16x512xf32> to vector<16x512xbf16>
    %cst_233 = arith.constant dense<0.000000e+00> : vector<8x512xf32>
    %421 = tpu.matmul %419, %420, %cst_233 {dimension_numbers = #tpu.dot_dimension_numbers<[1], [0], [0], [1], [0, 0, 1, 1], [], []>} : vector<8x16xbf16>, vector<16x512xbf16>, vector<8x512xf32> -> vector<8x512xf32>
    %422 = arith.addf %414, %421 : vector<8x512xf32>
    %423 = vector.extract_strided_slice %322 {offsets = [6, 0], sizes = [1, 512], strides = [1, 1]} : vector<9x512xf32> to vector<1x512xf32>
    %c497_i32 = arith.constant 497 : i32
    %424 = tpu.dynamic_rotate %327 by %c497_i32 dim 1 : vector<8x512xf32>, i32 -> vector<8x512xf32>
    %425 = vector.broadcast %423 : vector<1x512xf32> to vector<8x512xf32>
    %426 = arith.mulf %424, %425 : vector<8x512xf32>
    %c6_234 = arith.constant 6 : index
    %c0_235 = arith.constant 0 : index
    %c0_236 = arith.constant 0 : index
    %427 = vector.load %arg11[%c6_234, %c0_235, %c0_236] : memref<9x8x8xbf16, #tpu.memory_space<vmem>>, vector<1x8x8xbf16>
    %428 = vector.shape_cast %427 : vector<1x8x8xbf16> to vector<8x8xbf16>
    %429 = arith.truncf %426 : vector<8x512xf32> to vector<8x512xbf16>
    %cst_237 = arith.constant dense<0.000000e+00> : vector<8x512xf32>
    %430 = tpu.matmul %428, %429, %cst_237 {dimension_numbers = #tpu.dot_dimension_numbers<[1], [0], [0], [1], [0, 0, 1, 1], [], []>} : vector<8x8xbf16>, vector<8x512xbf16>, vector<8x512xf32> -> vector<8x512xf32>
    %431 = arith.addf %422, %430 : vector<8x512xf32>
    %c497_i32_238 = arith.constant 497 : i32
    %432 = tpu.dynamic_rotate %325 by %c497_i32_238 dim 1 : vector<16x512xf32>, i32 -> vector<16x512xf32>
    %433 = vector.broadcast %423 : vector<1x512xf32> to vector<16x512xf32>
    %434 = arith.mulf %432, %433 : vector<16x512xf32>
    %c6_239 = arith.constant 6 : index
    %c0_240 = arith.constant 0 : index
    %c0_241 = arith.constant 0 : index
    %435 = vector.load %arg12[%c6_239, %c0_240, %c0_241] : memref<9x8x16xbf16, #tpu.memory_space<vmem>>, vector<1x8x16xbf16>
    %436 = vector.shape_cast %435 : vector<1x8x16xbf16> to vector<8x16xbf16>
    %437 = arith.truncf %434 : vector<16x512xf32> to vector<16x512xbf16>
    %cst_242 = arith.constant dense<0.000000e+00> : vector<8x512xf32>
    %438 = tpu.matmul %436, %437, %cst_242 {dimension_numbers = #tpu.dot_dimension_numbers<[1], [0], [0], [1], [0, 0, 1, 1], [], []>} : vector<8x16xbf16>, vector<16x512xbf16>, vector<8x512xf32> -> vector<8x512xf32>
    %439 = arith.addf %431, %438 : vector<8x512xf32>
    %440 = vector.extract_strided_slice %322 {offsets = [7, 0], sizes = [1, 512], strides = [1, 1]} : vector<9x512xf32> to vector<1x512xf32>
    %c496_i32 = arith.constant 496 : i32
    %441 = tpu.dynamic_rotate %327 by %c496_i32 dim 1 : vector<8x512xf32>, i32 -> vector<8x512xf32>
    %442 = vector.broadcast %440 : vector<1x512xf32> to vector<8x512xf32>
    %443 = arith.mulf %441, %442 : vector<8x512xf32>
    %c7_243 = arith.constant 7 : index
    %c0_244 = arith.constant 0 : index
    %c0_245 = arith.constant 0 : index
    %444 = vector.load %arg11[%c7_243, %c0_244, %c0_245] : memref<9x8x8xbf16, #tpu.memory_space<vmem>>, vector<1x8x8xbf16>
    %445 = vector.shape_cast %444 : vector<1x8x8xbf16> to vector<8x8xbf16>
    %446 = arith.truncf %443 : vector<8x512xf32> to vector<8x512xbf16>
    %cst_246 = arith.constant dense<0.000000e+00> : vector<8x512xf32>
    %447 = tpu.matmul %445, %446, %cst_246 {dimension_numbers = #tpu.dot_dimension_numbers<[1], [0], [0], [1], [0, 0, 1, 1], [], []>} : vector<8x8xbf16>, vector<8x512xbf16>, vector<8x512xf32> -> vector<8x512xf32>
    %448 = arith.addf %439, %447 : vector<8x512xf32>
    %c496_i32_247 = arith.constant 496 : i32
    %449 = tpu.dynamic_rotate %325 by %c496_i32_247 dim 1 : vector<16x512xf32>, i32 -> vector<16x512xf32>
    %450 = vector.broadcast %440 : vector<1x512xf32> to vector<16x512xf32>
    %451 = arith.mulf %449, %450 : vector<16x512xf32>
    %c7_248 = arith.constant 7 : index
    %c0_249 = arith.constant 0 : index
    %c0_250 = arith.constant 0 : index
    %452 = vector.load %arg12[%c7_248, %c0_249, %c0_250] : memref<9x8x16xbf16, #tpu.memory_space<vmem>>, vector<1x8x16xbf16>
    %453 = vector.shape_cast %452 : vector<1x8x16xbf16> to vector<8x16xbf16>
    %454 = arith.truncf %451 : vector<16x512xf32> to vector<16x512xbf16>
    %cst_251 = arith.constant dense<0.000000e+00> : vector<8x512xf32>
    %455 = tpu.matmul %453, %454, %cst_251 {dimension_numbers = #tpu.dot_dimension_numbers<[1], [0], [0], [1], [0, 0, 1, 1], [], []>} : vector<8x16xbf16>, vector<16x512xbf16>, vector<8x512xf32> -> vector<8x512xf32>
    %456 = arith.addf %448, %455 : vector<8x512xf32>
    %457 = vector.extract_strided_slice %322 {offsets = [8, 0], sizes = [1, 512], strides = [1, 1]} : vector<9x512xf32> to vector<1x512xf32>
    %c495_i32 = arith.constant 495 : i32
    %458 = tpu.dynamic_rotate %327 by %c495_i32 dim 1 : vector<8x512xf32>, i32 -> vector<8x512xf32>
    %459 = vector.broadcast %457 : vector<1x512xf32> to vector<8x512xf32>
    %460 = arith.mulf %458, %459 : vector<8x512xf32>
    %c8_252 = arith.constant 8 : index
    %c0_253 = arith.constant 0 : index
    %c0_254 = arith.constant 0 : index
    %461 = vector.load %arg11[%c8_252, %c0_253, %c0_254] : memref<9x8x8xbf16, #tpu.memory_space<vmem>>, vector<1x8x8xbf16>
    %462 = vector.shape_cast %461 : vector<1x8x8xbf16> to vector<8x8xbf16>
    %463 = arith.truncf %460 : vector<8x512xf32> to vector<8x512xbf16>
    %cst_255 = arith.constant dense<0.000000e+00> : vector<8x512xf32>
    %464 = tpu.matmul %462, %463, %cst_255 {dimension_numbers = #tpu.dot_dimension_numbers<[1], [0], [0], [1], [0, 0, 1, 1], [], []>} : vector<8x8xbf16>, vector<8x512xbf16>, vector<8x512xf32> -> vector<8x512xf32>
    %465 = arith.addf %456, %464 : vector<8x512xf32>
    %c495_i32_256 = arith.constant 495 : i32
    %466 = tpu.dynamic_rotate %325 by %c495_i32_256 dim 1 : vector<16x512xf32>, i32 -> vector<16x512xf32>
    %467 = vector.broadcast %457 : vector<1x512xf32> to vector<16x512xf32>
    %468 = arith.mulf %466, %467 : vector<16x512xf32>
    %c8_257 = arith.constant 8 : index
    %c0_258 = arith.constant 0 : index
    %c0_259 = arith.constant 0 : index
    %469 = vector.load %arg12[%c8_257, %c0_258, %c0_259] : memref<9x8x16xbf16, #tpu.memory_space<vmem>>, vector<1x8x16xbf16>
    %470 = vector.shape_cast %469 : vector<1x8x16xbf16> to vector<8x16xbf16>
    %471 = arith.truncf %468 : vector<16x512xf32> to vector<16x512xbf16>
    %cst_260 = arith.constant dense<0.000000e+00> : vector<8x512xf32>
    %472 = tpu.matmul %470, %471, %cst_260 {dimension_numbers = #tpu.dot_dimension_numbers<[1], [0], [0], [1], [0, 0, 1, 1], [], []>} : vector<8x16xbf16>, vector<16x512xbf16>, vector<8x512xf32> -> vector<8x512xf32>
    %473 = arith.addf %465, %472 : vector<8x512xf32>
    %474 = vector.broadcast %328 : vector<8x1xf32> to vector<8x512xf32>
    %475 = arith.addf %473, %474 : vector<8x512xf32>
    %cst_261 = arith.constant 0.000000e+00 : f32
    %476 = vector.broadcast %cst_261 : f32 to vector<8x512xf32>
    %477 = arith.maximumf %475, %476 : vector<8x512xf32>
    %c72 = arith.constant 72 : index
    %c0_262 = arith.constant 0 : index
    %478 = vector.load %arg14[%c72, %c0_262] : memref<96x1xf32, #tpu.memory_space<vmem>>, vector<8x1xf32>
    %479 = vector.extract_strided_slice %322 {offsets = [0, 0], sizes = [1, 512], strides = [1, 1]} : vector<9x512xf32> to vector<1x512xf32>
    %c17_i32_263 = arith.constant 17 : i32
    %480 = tpu.dynamic_rotate %477 by %c17_i32_263 dim 1 : vector<8x512xf32>, i32 -> vector<8x512xf32>
    %481 = vector.broadcast %479 : vector<1x512xf32> to vector<8x512xf32>
    %482 = arith.mulf %480, %481 : vector<8x512xf32>
    %c0_264 = arith.constant 0 : index
    %c0_265 = arith.constant 0 : index
    %c0_266 = arith.constant 0 : index
    %483 = vector.load %arg13[%c0_264, %c0_265, %c0_266] : memref<9x8x8xbf16, #tpu.memory_space<vmem>>, vector<1x8x8xbf16>
    %484 = vector.shape_cast %483 : vector<1x8x8xbf16> to vector<8x8xbf16>
    %485 = arith.truncf %482 : vector<8x512xf32> to vector<8x512xbf16>
    %cst_267 = arith.constant dense<0.000000e+00> : vector<8x512xf32>
    %486 = tpu.matmul %484, %485, %cst_267 {dimension_numbers = #tpu.dot_dimension_numbers<[1], [0], [0], [1], [0, 0, 1, 1], [], []>} : vector<8x8xbf16>, vector<8x512xbf16>, vector<8x512xf32> -> vector<8x512xf32>
    %487 = vector.extract_strided_slice %322 {offsets = [1, 0], sizes = [1, 512], strides = [1, 1]} : vector<9x512xf32> to vector<1x512xf32>
    %c16_i32_268 = arith.constant 16 : i32
    %488 = tpu.dynamic_rotate %477 by %c16_i32_268 dim 1 : vector<8x512xf32>, i32 -> vector<8x512xf32>
    %489 = vector.broadcast %487 : vector<1x512xf32> to vector<8x512xf32>
    %490 = arith.mulf %488, %489 : vector<8x512xf32>
    %c1_269 = arith.constant 1 : index
    %c0_270 = arith.constant 0 : index
    %c0_271 = arith.constant 0 : index
    %491 = vector.load %arg13[%c1_269, %c0_270, %c0_271] : memref<9x8x8xbf16, #tpu.memory_space<vmem>>, vector<1x8x8xbf16>
    %492 = vector.shape_cast %491 : vector<1x8x8xbf16> to vector<8x8xbf16>
    %493 = arith.truncf %490 : vector<8x512xf32> to vector<8x512xbf16>
    %cst_272 = arith.constant dense<0.000000e+00> : vector<8x512xf32>
    %494 = tpu.matmul %492, %493, %cst_272 {dimension_numbers = #tpu.dot_dimension_numbers<[1], [0], [0], [1], [0, 0, 1, 1], [], []>} : vector<8x8xbf16>, vector<8x512xbf16>, vector<8x512xf32> -> vector<8x512xf32>
    %495 = arith.addf %486, %494 : vector<8x512xf32>
    %496 = vector.extract_strided_slice %322 {offsets = [2, 0], sizes = [1, 512], strides = [1, 1]} : vector<9x512xf32> to vector<1x512xf32>
    %c15_i32_273 = arith.constant 15 : i32
    %497 = tpu.dynamic_rotate %477 by %c15_i32_273 dim 1 : vector<8x512xf32>, i32 -> vector<8x512xf32>
    %498 = vector.broadcast %496 : vector<1x512xf32> to vector<8x512xf32>
    %499 = arith.mulf %497, %498 : vector<8x512xf32>
    %c2_274 = arith.constant 2 : index
    %c0_275 = arith.constant 0 : index
    %c0_276 = arith.constant 0 : index
    %500 = vector.load %arg13[%c2_274, %c0_275, %c0_276] : memref<9x8x8xbf16, #tpu.memory_space<vmem>>, vector<1x8x8xbf16>
    %501 = vector.shape_cast %500 : vector<1x8x8xbf16> to vector<8x8xbf16>
    %502 = arith.truncf %499 : vector<8x512xf32> to vector<8x512xbf16>
    %cst_277 = arith.constant dense<0.000000e+00> : vector<8x512xf32>
    %503 = tpu.matmul %501, %502, %cst_277 {dimension_numbers = #tpu.dot_dimension_numbers<[1], [0], [0], [1], [0, 0, 1, 1], [], []>} : vector<8x8xbf16>, vector<8x512xbf16>, vector<8x512xf32> -> vector<8x512xf32>
    %504 = arith.addf %495, %503 : vector<8x512xf32>
    %505 = vector.extract_strided_slice %322 {offsets = [3, 0], sizes = [1, 512], strides = [1, 1]} : vector<9x512xf32> to vector<1x512xf32>
    %c1_i32_278 = arith.constant 1 : i32
    %506 = tpu.dynamic_rotate %477 by %c1_i32_278 dim 1 : vector<8x512xf32>, i32 -> vector<8x512xf32>
    %507 = vector.broadcast %505 : vector<1x512xf32> to vector<8x512xf32>
    %508 = arith.mulf %506, %507 : vector<8x512xf32>
    %c3_279 = arith.constant 3 : index
    %c0_280 = arith.constant 0 : index
    %c0_281 = arith.constant 0 : index
    %509 = vector.load %arg13[%c3_279, %c0_280, %c0_281] : memref<9x8x8xbf16, #tpu.memory_space<vmem>>, vector<1x8x8xbf16>
    %510 = vector.shape_cast %509 : vector<1x8x8xbf16> to vector<8x8xbf16>
    %511 = arith.truncf %508 : vector<8x512xf32> to vector<8x512xbf16>
    %cst_282 = arith.constant dense<0.000000e+00> : vector<8x512xf32>
    %512 = tpu.matmul %510, %511, %cst_282 {dimension_numbers = #tpu.dot_dimension_numbers<[1], [0], [0], [1], [0, 0, 1, 1], [], []>} : vector<8x8xbf16>, vector<8x512xbf16>, vector<8x512xf32> -> vector<8x512xf32>
    %513 = arith.addf %504, %512 : vector<8x512xf32>
    %c4_283 = arith.constant 4 : index
    %c0_284 = arith.constant 0 : index
    %c0_285 = arith.constant 0 : index
    %514 = vector.load %arg13[%c4_283, %c0_284, %c0_285] : memref<9x8x8xbf16, #tpu.memory_space<vmem>>, vector<1x8x8xbf16>
    %515 = vector.shape_cast %514 : vector<1x8x8xbf16> to vector<8x8xbf16>
    %516 = arith.truncf %477 : vector<8x512xf32> to vector<8x512xbf16>
    %cst_286 = arith.constant dense<0.000000e+00> : vector<8x512xf32>
    %517 = tpu.matmul %515, %516, %cst_286 {dimension_numbers = #tpu.dot_dimension_numbers<[1], [0], [0], [1], [0, 0, 1, 1], [], []>} : vector<8x8xbf16>, vector<8x512xbf16>, vector<8x512xf32> -> vector<8x512xf32>
    %518 = arith.addf %513, %517 : vector<8x512xf32>
    %519 = vector.extract_strided_slice %322 {offsets = [5, 0], sizes = [1, 512], strides = [1, 1]} : vector<9x512xf32> to vector<1x512xf32>
    %c511_i32_287 = arith.constant 511 : i32
    %520 = tpu.dynamic_rotate %477 by %c511_i32_287 dim 1 : vector<8x512xf32>, i32 -> vector<8x512xf32>
    %521 = vector.broadcast %519 : vector<1x512xf32> to vector<8x512xf32>
    %522 = arith.mulf %520, %521 : vector<8x512xf32>
    %c5_288 = arith.constant 5 : index
    %c0_289 = arith.constant 0 : index
    %c0_290 = arith.constant 0 : index
    %523 = vector.load %arg13[%c5_288, %c0_289, %c0_290] : memref<9x8x8xbf16, #tpu.memory_space<vmem>>, vector<1x8x8xbf16>
    %524 = vector.shape_cast %523 : vector<1x8x8xbf16> to vector<8x8xbf16>
    %525 = arith.truncf %522 : vector<8x512xf32> to vector<8x512xbf16>
    %cst_291 = arith.constant dense<0.000000e+00> : vector<8x512xf32>
    %526 = tpu.matmul %524, %525, %cst_291 {dimension_numbers = #tpu.dot_dimension_numbers<[1], [0], [0], [1], [0, 0, 1, 1], [], []>} : vector<8x8xbf16>, vector<8x512xbf16>, vector<8x512xf32> -> vector<8x512xf32>
    %527 = arith.addf %518, %526 : vector<8x512xf32>
    %528 = vector.extract_strided_slice %322 {offsets = [6, 0], sizes = [1, 512], strides = [1, 1]} : vector<9x512xf32> to vector<1x512xf32>
    %c497_i32_292 = arith.constant 497 : i32
    %529 = tpu.dynamic_rotate %477 by %c497_i32_292 dim 1 : vector<8x512xf32>, i32 -> vector<8x512xf32>
    %530 = vector.broadcast %528 : vector<1x512xf32> to vector<8x512xf32>
    %531 = arith.mulf %529, %530 : vector<8x512xf32>
    %c6_293 = arith.constant 6 : index
    %c0_294 = arith.constant 0 : index
    %c0_295 = arith.constant 0 : index
    %532 = vector.load %arg13[%c6_293, %c0_294, %c0_295] : memref<9x8x8xbf16, #tpu.memory_space<vmem>>, vector<1x8x8xbf16>
    %533 = vector.shape_cast %532 : vector<1x8x8xbf16> to vector<8x8xbf16>
    %534 = arith.truncf %531 : vector<8x512xf32> to vector<8x512xbf16>
    %cst_296 = arith.constant dense<0.000000e+00> : vector<8x512xf32>
    %535 = tpu.matmul %533, %534, %cst_296 {dimension_numbers = #tpu.dot_dimension_numbers<[1], [0], [0], [1], [0, 0, 1, 1], [], []>} : vector<8x8xbf16>, vector<8x512xbf16>, vector<8x512xf32> -> vector<8x512xf32>
    %536 = arith.addf %527, %535 : vector<8x512xf32>
    %537 = vector.extract_strided_slice %322 {offsets = [7, 0], sizes = [1, 512], strides = [1, 1]} : vector<9x512xf32> to vector<1x512xf32>
    %c496_i32_297 = arith.constant 496 : i32
    %538 = tpu.dynamic_rotate %477 by %c496_i32_297 dim 1 : vector<8x512xf32>, i32 -> vector<8x512xf32>
    %539 = vector.broadcast %537 : vector<1x512xf32> to vector<8x512xf32>
    %540 = arith.mulf %538, %539 : vector<8x512xf32>
    %c7_298 = arith.constant 7 : index
    %c0_299 = arith.constant 0 : index
    %c0_300 = arith.constant 0 : index
    %541 = vector.load %arg13[%c7_298, %c0_299, %c0_300] : memref<9x8x8xbf16, #tpu.memory_space<vmem>>, vector<1x8x8xbf16>
    %542 = vector.shape_cast %541 : vector<1x8x8xbf16> to vector<8x8xbf16>
    %543 = arith.truncf %540 : vector<8x512xf32> to vector<8x512xbf16>
    %cst_301 = arith.constant dense<0.000000e+00> : vector<8x512xf32>
    %544 = tpu.matmul %542, %543, %cst_301 {dimension_numbers = #tpu.dot_dimension_numbers<[1], [0], [0], [1], [0, 0, 1, 1], [], []>} : vector<8x8xbf16>, vector<8x512xbf16>, vector<8x512xf32> -> vector<8x512xf32>
    %545 = arith.addf %536, %544 : vector<8x512xf32>
    %546 = vector.extract_strided_slice %322 {offsets = [8, 0], sizes = [1, 512], strides = [1, 1]} : vector<9x512xf32> to vector<1x512xf32>
    %c495_i32_302 = arith.constant 495 : i32
    %547 = tpu.dynamic_rotate %477 by %c495_i32_302 dim 1 : vector<8x512xf32>, i32 -> vector<8x512xf32>
    %548 = vector.broadcast %546 : vector<1x512xf32> to vector<8x512xf32>
    %549 = arith.mulf %547, %548 : vector<8x512xf32>
    %c8_303 = arith.constant 8 : index
    %c0_304 = arith.constant 0 : index
    %c0_305 = arith.constant 0 : index
    %550 = vector.load %arg13[%c8_303, %c0_304, %c0_305] : memref<9x8x8xbf16, #tpu.memory_space<vmem>>, vector<1x8x8xbf16>
    %551 = vector.shape_cast %550 : vector<1x8x8xbf16> to vector<8x8xbf16>
    %552 = arith.truncf %549 : vector<8x512xf32> to vector<8x512xbf16>
    %cst_306 = arith.constant dense<0.000000e+00> : vector<8x512xf32>
    %553 = tpu.matmul %551, %552, %cst_306 {dimension_numbers = #tpu.dot_dimension_numbers<[1], [0], [0], [1], [0, 0, 1, 1], [], []>} : vector<8x8xbf16>, vector<8x512xbf16>, vector<8x512xf32> -> vector<8x512xf32>
    %554 = arith.addf %545, %553 : vector<8x512xf32>
    %555 = vector.broadcast %478 : vector<8x1xf32> to vector<8x512xf32>
    %556 = arith.addf %554, %555 : vector<8x512xf32>
    %557 = arith.addf %477, %556 : vector<8x512xf32>
    %cst_307 = arith.constant 0.000000e+00 : f32
    %558 = vector.broadcast %cst_307 : f32 to vector<8x512xf32>
    %559 = arith.maximumf %557, %558 : vector<8x512xf32>
    %c80 = arith.constant 80 : index
    %c0_308 = arith.constant 0 : index
    %560 = vector.load %arg14[%c80, %c0_308] : memref<96x1xf32, #tpu.memory_space<vmem>>, vector<8x1xf32>
    %c88 = arith.constant 88 : index
    %c0_309 = arith.constant 0 : index
    %561 = vector.load %arg14[%c88, %c0_309] : memref<96x1xf32, #tpu.memory_space<vmem>>, vector<1x1xf32>
    %562 = vector.broadcast %560 : vector<8x1xf32> to vector<8x512xf32>
    %563 = arith.mulf %559, %562 : vector<8x512xf32>
    %cst_310 = arith.constant dense<0.000000e+00> : vector<512xf32>
    %564 = vector.multi_reduction <add>, %563, %cst_310 [0] : vector<8x512xf32> to vector<512xf32>
    %565 = vector.shape_cast %564 : vector<512xf32> to vector<1x512xf32>
    %566 = vector.broadcast %561 : vector<1x1xf32> to vector<1x512xf32>
    %567 = arith.addf %565, %566 : vector<1x512xf32>
    %568 = vector.shape_cast %567 : vector<1x512xf32> to vector<1x1x512xf32>
    %c0_311 = arith.constant 0 : index
    %c0_312 = arith.constant 0 : index
    %c0_313 = arith.constant 0 : index
    %569 = vector.load %arg15[%c0_311, %c0_312, %c0_313] : memref<1x1x512xf32, #tpu.memory_space<vmem>>, vector<1x1x512xf32>
    tpu.vector_store %arg15[%c0_311, %c0_312, %c0_313], %568 {strides = array<i32>} : memref<1x1x512xf32, #tpu.memory_space<vmem>>, vector<1x1x512xf32>,
    return
  }
  func.func @transform_0(%arg0: i32) -> (i32, i32, i32) {
    %c0_i32 = arith.constant 0 : i32
    %c0_i32_0 = arith.constant 0 : i32
    %c0_i32_1 = arith.constant 0 : i32
    return %arg0, %c0_i32, %c0_i32_0 : i32, i32, i32
  }
  func.func @transform_1(%arg0: i32) -> (i32, i32, i32) {
    %c0_i32 = arith.constant 0 : i32
    %c0_i32_0 = arith.constant 0 : i32
    %c0_i32_1 = arith.constant 0 : i32
    return %arg0, %c0_i32, %c0_i32_0 : i32, i32, i32
  }
  func.func @transform_2(%arg0: i32) -> (i32, i32, i32) {
    %c0_i32 = arith.constant 0 : i32
    %c0_i32_0 = arith.constant 0 : i32
    %c0_i32_1 = arith.constant 0 : i32
    return %arg0, %c0_i32, %c0_i32_0 : i32, i32, i32
  }
  func.func @transform_3(%arg0: i32) -> (i32, i32) {
    %c0_i32 = arith.constant 0 : i32
    %c0_i32_0 = arith.constant 0 : i32
    %c0_i32_1 = arith.constant 0 : i32
    return %c0_i32, %c0_i32_0 : i32, i32
  }
  func.func @transform_4(%arg0: i32) -> (i32, i32, i32) {
    %c0_i32 = arith.constant 0 : i32
    %c0_i32_0 = arith.constant 0 : i32
    %c0_i32_1 = arith.constant 0 : i32
    %c0_i32_2 = arith.constant 0 : i32
    return %c0_i32, %c0_i32_0, %c0_i32_1 : i32, i32, i32
  }
  func.func @transform_5(%arg0: i32) -> (i32, i32) {
    %c0_i32 = arith.constant 0 : i32
    %c0_i32_0 = arith.constant 0 : i32
    %c0_i32_1 = arith.constant 0 : i32
    return %c0_i32, %c0_i32_0 : i32, i32
  }
  func.func @transform_6(%arg0: i32) -> (i32, i32, i32) {
    %c0_i32 = arith.constant 0 : i32
    %c0_i32_0 = arith.constant 0 : i32
    %c0_i32_1 = arith.constant 0 : i32
    %c0_i32_2 = arith.constant 0 : i32
    return %c0_i32, %c0_i32_0, %c0_i32_1 : i32, i32, i32
  }
  func.func @transform_7(%arg0: i32) -> (i32, i32, i32) {
    %c0_i32 = arith.constant 0 : i32
    %c0_i32_0 = arith.constant 0 : i32
    %c0_i32_1 = arith.constant 0 : i32
    %c0_i32_2 = arith.constant 0 : i32
    return %c0_i32, %c0_i32_0, %c0_i32_1 : i32, i32, i32
  }
  func.func @transform_8(%arg0: i32) -> (i32, i32, i32) {
    %c0_i32 = arith.constant 0 : i32
    %c0_i32_0 = arith.constant 0 : i32
    %c0_i32_1 = arith.constant 0 : i32
    %c0_i32_2 = arith.constant 0 : i32
    return %c0_i32, %c0_i32_0, %c0_i32_1 : i32, i32, i32
  }
  func.func @transform_9(%arg0: i32) -> (i32, i32) {
    %c0_i32 = arith.constant 0 : i32
    %c0_i32_0 = arith.constant 0 : i32
    %c0_i32_1 = arith.constant 0 : i32
    return %c0_i32, %c0_i32_0 : i32, i32
  }
  func.func @transform_10(%arg0: i32) -> (i32, i32, i32) {
    %c0_i32 = arith.constant 0 : i32
    %c0_i32_0 = arith.constant 0 : i32
    %c0_i32_1 = arith.constant 0 : i32
    %c0_i32_2 = arith.constant 0 : i32
    return %c0_i32, %c0_i32_0, %c0_i32_1 : i32, i32, i32
  }
  func.func @transform_11(%arg0: i32) -> (i32, i32, i32) {
    %c0_i32 = arith.constant 0 : i32
    %c0_i32_0 = arith.constant 0 : i32
    %c0_i32_1 = arith.constant 0 : i32
    %c0_i32_2 = arith.constant 0 : i32
    return %c0_i32, %c0_i32_0, %c0_i32_1 : i32, i32, i32
  }
  func.func @transform_12(%arg0: i32) -> (i32, i32, i32) {
    %c0_i32 = arith.constant 0 : i32
    %c0_i32_0 = arith.constant 0 : i32
    %c0_i32_1 = arith.constant 0 : i32
    %c0_i32_2 = arith.constant 0 : i32
    return %c0_i32, %c0_i32_0, %c0_i32_1 : i32, i32, i32
  }
  func.func @transform_13(%arg0: i32) -> (i32, i32) {
    %c0_i32 = arith.constant 0 : i32
    %c0_i32_0 = arith.constant 0 : i32
    %c0_i32_1 = arith.constant 0 : i32
    return %c0_i32, %c0_i32_0 : i32, i32
  }
  func.func @transform_14(%arg0: i32) -> (i32, i32, i32) {
    %c0_i32 = arith.constant 0 : i32
    %c0_i32_0 = arith.constant 0 : i32
    %c0_i32_1 = arith.constant 0 : i32
    return %arg0, %c0_i32, %c0_i32_0 : i32, i32, i32
  }
}

</mosaic_0001>

<bundles_post_ra>
// kernel: tpu_custom_call.1
= control target key start
LH: loop header
LB: loop body
LE: loop exit
PB: predicated region body
PF: predicated region fallthrough
CT: control target
= control target key end

     0   :  { %s12833_s0 = inlined_call_operand.hbm [shape: f32[2,32,256], index: 0, kind: input, shape index: {}]   ;;  %s12834_s1 = inlined_call_operand.hbm [shape: f32[2,16,256], index: 1, kind: input, shape index: {}]   ;;  %s12835_s2 = inlined_call_operand.hbm [shape: f32[2,8,512], index: 2, kind: input, shape index: {}]   ;;  %s12836_s3 = inlined_call_operand.vmem [shape: f32[48,512], index: 3, kind: input, shape index: {}]   ;;  %s12837_s4 = inlined_call_operand.hbm [shape: bf16[9,32,32], index: 4, kind: input, shape index: {}]   ;;  %s12838_s5 = inlined_call_operand.hbm [shape: bf16[256,256], index: 5, kind: input, shape index: {}]   ;;  %s12839_s6 = inlined_call_operand.hbm [shape: bf16[9,16,16], index: 6, kind: input, shape index: {}]   ;;  %s12840_s7 = inlined_call_operand.hbm [shape: bf16[9,16,32], index: 7, kind: input, shape index: {}]   ;;  %s12841_s8 = inlined_call_operand.hbm [shape: bf16[9,16,16], index: 8, kind: input, shape index: {}]   ;;  %s12842_s9 = inlined_call_operand.hbm [shape: bf16[256,512], index: 9, kind: input, shape index: {}]   ;;  %s12843_s10 = inlined_call_operand.vmem [shape: bf16[9,8,8], index: 10, kind: input, shape index: {}]   ;;  %s12844_s11 = inlined_call_operand.vmem [shape: bf16[9,8,16], index: 11, kind: input, shape index: {}]   ;;  %s12845_s12 = inlined_call_operand.vmem [shape: bf16[9,8,8], index: 12, kind: input, shape index: {}]   ;;  %s12846_s13 = inlined_call_operand.vmem [shape: f32[96,1], index: 13, kind: input, shape index: {}]   ;;  %s12847_s14 = inlined_call_operand.hbm [shape: f32[2,1,512], index: 14, kind: output, shape index: {}]  }
   0x1   :  { %12892 = sst [smem:[#allocation37_spill]] %s12834_s1 }
   0x2   :  { %12893 = sst [smem:[#allocation38_spill]] %s12836_s3 }
   0x3   :  { %12894 = sst [smem:[#allocation39_spill]] %s12837_s4 }
   0x4   :  { %12895 = sst [smem:[#allocation40_spill]] %s12839_s6 }
   0x5   :  { %12896 = sst [smem:[#allocation41_spill]] %s12841_s8 }
   0x6   :  { %12897 = sst [smem:[#allocation42_spill]] %s12843_s10 }
   0x7   :  { %12898 = sst [smem:[#allocation43_spill]] %s12844_s11 }
   0x8   :  { %12899 = sst [smem:[#allocation44_spill]] %s12845_s12 }
   0x9   :  { %12900 = sst [smem:[#allocation45_spill]] %s12846_s13 }
   0xa   :  { %12901 = sst [smem:[#allocation46_spill]] %s12847_s14 }
   0xb   :  { %19 = vsyncpa [#allocation3], 0 }
   0xc   :  { %21 = vsyncpa [#allocation3 + $0x1], 0 }
   0xd   :  { %22 = vsyncpa [#allocation6], 0 }
   0xe   :  { %24 = vsyncpa [#allocation6 + $0x1], 0 }
   0xf   :  { %25 = vsyncpa [#allocation9], 0 }
  0x10   :  { %26 = vsyncpa [#allocation12], 0 }
  0x11   :  { %27 = vsyncpa [#allocation15], 0 }
  0x12   :  { %28 = vsyncpa [#allocation4], 0 }
  0x13   :  { %30 = vsyncpa [#allocation4 + $0x1], 0  ;;  %s9786_s29 = smov 0   ;;  %s9788_s30 = smov 0  }
  0x14   :  { %s9790_s15 = smov 0   ;;  %s9792_s16 = smov 0  }
  0x15 LB: > { %12902 = sst [smem:[#allocation24_spill]] %s9659_s29  ;;  %s9673_s17 = smov [#allocation8]   ;;  %s9671_s16 = sphi %s9792_s16, %s12972_s16   ;;  %s9667_s15 = sphi %s9790_s15, %s12974_s15   ;;  %s9663_s30 = sphi %s9788_s30, %s12976_s30   ;;  %s9659_s29 = sphi %s9786_s29, %s12975_s29  }
  0x16   : > { %12903 = sst [smem:[#allocation25_spill]] %s9667_s15  ;;  %s391_s18 = sshll.u32 %s9673_s17, 4  ;;  %s9812_s18 = int_to_ptr.vmem [resolvable:$true] %s391_s18 }
  0x17   : > { %s9807_s19 = sadd.s32 4294967295, %s9671_s16   ;;  %p8482_p0 = scmp.ge.s32.totalorder %s9671_s16, 1 }
  0x18   : > { %p12859_p1 = scmp.eq.s32.totalorder %s9807_s19, 0  ;;  %p376_p2 = scmp.lt.s32.totalorder %s9671_s16, 3 }
  0x19   : > { %s9674_s21 = smov [#allocation11]   ;;  %s9675_s24 = smov [#allocation14]  }
  0x1a   : > { %p9814_p3 = pnand %p8482_p0, %p376_p2  ;;  %s417_s22 = sshll.u32 %s9674_s21, 4  ;;  %s9827_s22 = int_to_ptr.vmem [resolvable:$true] %s417_s22 }
  0x1b   : > { %s443_s25 = sshll.u32 %s9675_s24, 4  ;;  %s12906_s4 = sld [smem:[#allocation39_spill]]  ;;  %s9829_s25 = int_to_ptr.vmem [resolvable:$true] %s443_s25 }
  0x1c   : > { %s12904_s20 = scalar_select %p9814_p3, 1, 0 }
  0x1d   : > { %p9023_p5 = pneg %p9814_p3 }
  0x1f   : > { %p9823_p6 = pnand %p9023_p5, %p12859_p1 }
  0x21   : > { %s12905_s23 = scalar_select %p9823_p6, 1, 0 }
  0x22   : > { %s9331_s28 = scalar_lea.hbm %s12906_s4, 2304  ;;  %p9839_p8 = pneg %p9823_p6 }
  0x23   : > { %p9332_p7 = scmp.ne.s32.totalorder %s12906_s4, %s9331_s28  ;;  %p9338_p11 = scmp.lt.u32.totalorder %s9331_s28, %s12906_s4 }
  0x24   : > { %s12907_s21 = scalar_select %p9839_p8, 1, 0 }
  0x25   : > { %p9334_p9 = pnand %p9839_p8, %p9332_p7 }
  0x27   : > { %p9335_p10 = pneg %p9334_p9 }
  0x29   : > { %p9340_p12 = pnand %p9338_p11, %p9335_p10 }
  0x2b   : > { %9343 = shalt.err (!%p9340_p12)
}
  0x2c   : > { %s9344_s14 = scalar_lea.vmem %s9812_s18, 2304  ;;  %p9352_p5 = scmp.lt.s32.totalorder %s9812_s18, %s9812_s18 }
  0x2d   : > { %p9345_p13 = scmp.ne.s32.totalorder %s9812_s18, %s9344_s14  ;;  %p9353_p4 = scmp.lt.s32.totalorder %s9344_s14, %s9344_s14 }
  0x2f   : > { %p9347_p0 = pnand %p9345_p13, %p9839_p8  ;;  %p9354_p7 = por %p9353_p4, %p9352_p5 }
  0x31   : > { %p9348_p2 = pneg %p9347_p0 }
  0x33   : > { %p9355_p9 = pnand %p9354_p7, %p9348_p2 }
  0x35   : > { %9358 = shalt.err (!%p9355_p9)
}
  0x36   : > { %s12855_s26 = smov 64   ;;  %s12856_s12 = smov 4  }
  0x37   : > { %9026 = dma.hbm_to_vmem [thread:$0]  (!%p9823_p6), %s12906_s4, 2304, %s9812_s18, [#allocation9], %s12855_s26, %s12855_s26, %s12856_s12  }
  0x38   : > { %s12908_s6 = sld [smem:[#allocation40_spill]] }
  0x3e   : > { %s9359_s14 = scalar_lea.hbm %s12908_s6, 1152 }
  0x3f   : > { %p9360_p4 = scmp.ne.s32.totalorder %s12908_s6, %s9359_s14  ;;  %p9366_p12 = scmp.lt.u32.totalorder %s9359_s14, %s12908_s6 }
  0x41   : > { %p9362_p10 = pnand %p9360_p4, %p9839_p8 }
  0x43   : > { %p9363_p11 = pneg %p9362_p10 }
  0x45   : > { %p9368_p13 = pnand %p9366_p12, %p9363_p11 }
  0x47   : > { %9371 = shalt.err (!%p9368_p13)
}
  0x48   : > { %s9372_s18 = scalar_lea.vmem %s9827_s22, 1152  ;;  %p9380_p7 = scmp.lt.s32.totalorder %s9827_s22, %s9827_s22 }
  0x49   : > { %p9373_p0 = scmp.ne.s32.totalorder %s9827_s22, %s9372_s18  ;;  %p9381_p9 = scmp.lt.s32.totalorder %s9372_s18, %s9372_s18 }
  0x4b   : > { %p9375_p2 = pnand %p9373_p0, %p9839_p8  ;;  %p9382_p4 = por %p9381_p9, %p9380_p7 }
  0x4d   : > { %p9376_p5 = pneg %p9375_p2 }
  0x4f   : > { %p9383_p10 = pnand %p9382_p4, %p9376_p5 }
  0x51   : > { %9386 = shalt.err (!%p9383_p10)
}
  0x52   : > { %9032 = dma.hbm_to_vmem [thread:$0]  (!%p9823_p6), %s12908_s6, 1152, %s9827_s22, [#allocation12], %s12855_s26, %s12855_s26, %s12856_s12  }
  0x53   : > { %s12909_s8 = sld [smem:[#allocation41_spill]] }
  0x59   : > { %s9387_s27 = scalar_lea.hbm %s12909_s8, 1152 }
  0x5a   : > { %p9388_p11 = scmp.ne.s32.totalorder %s12909_s8, %s9387_s27  ;;  %p9394_p0 = scmp.lt.u32.totalorder %s9387_s27, %s12909_s8 }
  0x5c   : > { %p9390_p12 = pnand %p9388_p11, %p9839_p8 }
  0x5e   : > { %p9391_p13 = pneg %p9390_p12 }
  0x60   : > { %p9396_p2 = pnand %p9394_p0, %p9391_p13 }
  0x62   : > { %9399 = shalt.err (!%p9396_p2)
}
  0x63   : > { %s9400_s22 = scalar_lea.vmem %s9829_s25, 1152  ;;  %p9408_p4 = scmp.lt.s32.totalorder %s9829_s25, %s9829_s25 }
  0x64   : > { %p9401_p5 = scmp.ne.s32.totalorder %s9829_s25, %s9400_s22  ;;  %p9409_p10 = scmp.lt.s32.totalorder %s9400_s22, %s9400_s22 }
  0x66   : > { %p9403_p7 = pnand %p9401_p5, %p9839_p8  ;;  %p9410_p11 = por %p9409_p10, %p9408_p4 }
  0x68   : > { %p9404_p9 = pneg %p9403_p7 }
  0x6a   : > { %p9411_p12 = pnand %p9410_p11, %p9404_p9 }
  0x6c   : > { %9414 = shalt.err (!%p9411_p12)
}
  0x6d   : > { %9038 = dma.hbm_to_vmem [thread:$0]  (!%p9823_p6), %s12909_s8, 1152, %s9829_s25, [#allocation15], %s12855_s26, %s12855_s26, %s12856_s12  }
  0x6e   : > { %s8481_s10 = sadd.s32 4294967294, %s9671_s16   ;;  %s9917_s11 = sadd.s32 1, %s9671_s16  }
  0x6f   : > { %12910 = sst [smem:[#allocation26_spill]] %s9917_s11  ;;  %s43_s13 = sadd.s32 1, %s9667_s15 }
  0x70   : > { %s40_s27 = ssub.s32 %s9671_s16, %s9917_s11  ;;  %p50_p13 = scmp.ne.s32.totalorder %s9667_s15, %s9663_s30 }
  0x71   : > { %p41_p0 = scmp.eq.s32.totalorder %s40_s27, 0  ;;  %p51_p2 = scmp.eq.s32.totalorder %s9671_s16, 0 }
  0x72   : > { %p56_p5 = scmp.ne.s32.totalorder %s9663_s30, %s9659_s29  ;;  %p363_p7 = scmp.eq.s32.totalorder %s9807_s19, 1 }
  0x73   : > { %s9929_s28 = scalar_select %p41_p0, %s9667_s15, %s43_s13  }
  0x74   : > { %p52_p9 = por %p51_p2, %p50_p13  ;;  %p9933_p4 = por %p12859_p1, %p56_p5 }
  0x75   : > { %12911 = sst [smem:[#allocation27_spill]] %s9929_s28  ;;  %p9937_p10 = por %p363_p7, %p50_p13 }
  0x76   : > { %s12912_s25 = scalar_select %p9933_p4, 1, 0 }
  0x77   : > { %s12913_s17 = scalar_select %p9937_p10, 1, 0 }
  0x78   : > { %p369_p11 = scmp.eq.s32.totalorder %s8481_s10, 1  ;;  %p9062_p3 = scmp.lt.s32.totalorder %s9671_s16, 2 }
  0x79   : > { %s9947_s14 = sand.u32 1, %s9667_s15   ;;  %s503_s22 = sand.u32 1, %s9671_s16  }
  0x7a   : > { %p9941_p12 = por %p369_p11, %p56_p5  ;;  %p9950_p0 = pnand %p9062_p3, %p52_p9 }
  0x7b   : > { %s12857_s3 = sshll.u32 %s9947_s14, 5  ;;  %s12858_s13 = sshll.u32 %s9671_s16, 9 }
  0x7c   : > { %s12914_s24 = scalar_select %p9941_p12, 1, 0 }
  0x7d   : > { %s12916_s18 = scalar_select %p9950_p0, 1, 0 }
  0x7e   : > { %12915 = sst [smem:[#allocation28_spill]] %s12914_s24  ;;  %s12917_s1 = sld [smem:[#allocation37_spill]] }
  0x7f   : > { %s507_s12 = scalar_lea.vmem [#allocation5], %s12857_s3  ;;  %s9967_s6 = scalar_lea.sflag [#allocation6], %s503_s22 }
  0x80   : > { %s514_s4 = sshll.u32 %s507_s12, 4  ;;  %p9973_p13 = pneg %p9950_p0  ;;  %s9965_s4 = int_to_ptr.vmem [resolvable:$true] %s514_s4 }
  0x82   : > { %s12918_s28 = scalar_select %p9973_p13, 1, 0 }
  0x84   : > { %s9961_s26 = scalar_lea.hbm %s12917_s1, %s12858_s13  ;;  %s9420_s3 = scalar_lea.hbm %s12917_s1, 1024 }
  0x85   : > { %s9415_s8 = scalar_lea.hbm %s9961_s26, 512  ;;  %p9421_p7 = scmp.lt.u32.totalorder %s9961_s26, %s12917_s1 }
  0x86   : > { %p9416_p3 = scmp.ne.s32.totalorder %s9961_s26, %s9415_s8  ;;  %p9422_p9 = scmp.lt.u32.totalorder %s9420_s3, %s9415_s8 }
  0x87   : > { %p9424_p1 = scmp.lt.u32.totalorder %s9415_s8, %s9961_s26 }
  0x88   : > { %p9418_p2 = pnand %p9973_p13, %p9416_p3  ;;  %p9423_p11 = por %p9422_p9, %p9421_p7 }
  0x8a   : > { %p9419_p5 = pneg %p9418_p2  ;;  %p9425_p12 = por %p9424_p1, %p9423_p11 }
  0x8c   : > { %p9426_p10 = pnand %p9425_p12, %p9419_p5 }
  0x8e   : > { %9429 = shalt.err (!%p9426_p10)
}
  0x8f   : > { %s9430_s22 = scalar_lea.vmem %s9965_s4, 512  ;;  %s9678_s27 = smov [#allocation5]  }
  0x90   : > { %p9431_p3 = scmp.ne.s32.totalorder %s9965_s4, %s9430_s22  ;;  %s9435_s10 = sshll.u32 %s9678_s27, 4  ;;  %s9436_s10 = int_to_ptr.vmem [resolvable:$false] %s9435_s10 }
  0x91   : > { %s9437_s13 = scalar_lea.vmem %s9436_s10, 1024  ;;  %p9438_p6 = scmp.lt.s32.totalorder %s9965_s4, %s9436_s10 }
  0x92   : > { %p9433_p2 = pnand %p9431_p3, %p9973_p13  ;;  %p9439_p8 = scmp.lt.s32.totalorder %s9437_s13, %s9430_s22 }
  0x94   : > { %p9434_p4 = pneg %p9433_p2  ;;  %p9440_p7 = por %p9439_p8, %p9438_p6 }
  0x96   : > { %p9441_p9 = pnand %p9440_p7, %p9434_p4 }
  0x98   : > { %9444 = shalt.err (!%p9441_p9)
}
  0x99   : > { %s12872_s8 = smov 256   ;;  %s12874_s3 = smov 16  }
  0x9a   : > { %9048 = dma.hbm_to_vmem [thread:$0]  (!%p9950_p0), %s9961_s26, 512, %s9965_s4, %s9967_s6, %s12872_s8, %s12872_s8, %s12874_s3  }
  0x9b   : > { %s9681_s12 = smov [#allocation10]   ;;  %s9445_s13 = scalar_lea.hbm %s12838_s5, 4096 }
  0x9c   : > { %s404_s27 = sshll.u32 %s9681_s12, 4  ;;  %p9446_p1 = scmp.ne.s32.totalorder %s12838_s5, %s9445_s13  ;;  %s405_s27 = int_to_ptr.vmem [resolvable:$true] %s404_s27 }
  0x9d   : > { %p12919_p6 = scmp.ne.s32.totalorder %s12907_s21, 0  ;;  %p9452_p10 = scmp.lt.u32.totalorder %s9445_s13, %s12838_s5 }
  0x9f   : > { %p9448_p8 = pnand %p9446_p1, %p12919_p6 }
  0xa1   : > { %p9449_p4 = pneg %p9448_p8 }
  0xa3   : > { %p9454_p12 = pnand %p9452_p10, %p9449_p4 }
  0xa5   : > { %9457 = shalt.err (!%p9454_p12)
}
  0xa6   : > { %s9458_s4 = scalar_lea.vmem %s405_s27, 4096  ;;  %p9466_p2 = scmp.lt.s32.totalorder %s405_s27, %s405_s27 }
  0xa7   : > { %p9459_p5 = scmp.ne.s32.totalorder %s405_s27, %s9458_s4  ;;  %p9467_p7 = scmp.lt.s32.totalorder %s9458_s4, %s9458_s4 }
  0xa9   : > { %p9461_p11 = pnand %p9459_p5, %p12919_p6  ;;  %p9468_p9 = por %p9467_p7, %p9466_p2 }
  0xab   : > { %p9462_p3 = pneg %p9461_p11 }
  0xad   : > { %p9469_p0 = pnand %p9468_p9, %p9462_p3 }
  0xaf   : > { %9472 = shalt.err (!%p9469_p0)
}
  0xb0   : > { %s9682_s1 = smov 128   ;;  %s9683_s15 = smov 8  }
  0xb1   : > { %p12920_p1 = scmp.ne.s32.totalorder %s12905_s23, 0  ;;  %s9684_s24 = smov [#allocation13]  }
  0xb2   : > { %s430_s12 = sshll.u32 %s9684_s24, 4  ;;  %s9685_s10 = smov [#allocation16]   ;;  %s431_s12 = int_to_ptr.vmem [resolvable:$true] %s430_s12 }
  0xb3   : > { %9029 = dma.hbm_to_vmem [thread:$0]  (!%p12920_p1), %s12838_s5, 4096, %s405_s27, [#allocation9], %s9682_s1, %s9682_s1, %s9683_s15  }
  0xb4   : > { %s456_s22 = sshll.u32 %s9685_s10, 4  ;;  %s9473_s8 = scalar_lea.hbm %s12840_s7, 1152  ;;  %s10018_s22 = int_to_ptr.vmem [resolvable:$true] %s456_s22 }
  0xb5   : > { %p9474_p0 = scmp.ne.s32.totalorder %s12840_s7, %s9473_s8  ;;  %p9480_p10 = scmp.lt.u32.totalorder %s9473_s8, %s12840_s7 }
  0xb7   : > { %p9476_p8 = pnand %p9474_p0, %p12919_p6 }
  0xb9   : > { %p9477_p4 = pneg %p9476_p8 }
  0xbb   : > { %p9482_p12 = pnand %p9480_p10, %p9477_p4 }
  0xbd   : > { %9485 = shalt.err (!%p9482_p12)
}
  0xbe   : > { %s9486_s1 = scalar_lea.vmem %s431_s12, 1152  ;;  %p9494_p2 = scmp.lt.s32.totalorder %s431_s12, %s431_s12 }
  0xbf   : > { %p9487_p5 = scmp.ne.s32.totalorder %s431_s12, %s9486_s1  ;;  %p9495_p7 = scmp.lt.s32.totalorder %s9486_s1, %s9486_s1 }
  0xc1   : > { %p9489_p11 = pnand %p9487_p5, %p12919_p6  ;;  %p9496_p9 = por %p9495_p7, %p9494_p2 }
  0xc3   : > { %p9490_p3 = pneg %p9489_p11 }
  0xc5   : > { %p9497_p13 = pnand %p9496_p9, %p9490_p3 }
  0xc7   : > { %9500 = shalt.err (!%p9497_p13)
}
  0xc8   : > { %s12921_s29 = smov 4   ;;  %s12922_s3 = smov 64  }
  0xc9   : > { %9035 = dma.hbm_to_vmem [thread:$0]  (!%p12920_p1), %s12840_s7, 1152, %s431_s12, [#allocation12], %s12922_s3, %s12922_s3, %s12921_s29  }
  0xca   : > { %s9501_s10 = scalar_lea.hbm %s12842_s9, 8192 }
  0xcb   : > { %p9502_p0 = scmp.ne.s32.totalorder %s12842_s9, %s9501_s10  ;;  %p9508_p4 = scmp.lt.u32.totalorder %s9501_s10, %s12842_s9 }
  0xcd   : > { %p9504_p13 = pnand %p9502_p0, %p12919_p6 }
  0xcf   : > { %p9505_p8 = pneg %p9504_p13 }
  0xd1   : > { %p9510_p10 = pnand %p9508_p4, %p9505_p8 }
  0xd3   : > { %9513 = shalt.err (!%p9510_p10)
}
  0xd4   : > { %s9514_s12 = scalar_lea.vmem %s10018_s22, 8192  ;;  %p9522_p3 = scmp.lt.s32.totalorder %s10018_s22, %s10018_s22 }
  0xd5   : > { %p9515_p12 = scmp.ne.s32.totalorder %s10018_s22, %s9514_s12  ;;  %p9523_p2 = scmp.lt.s32.totalorder %s9514_s12, %s9514_s12 }
  0xd7   : > { %p9517_p5 = pnand %p9515_p12, %p12919_p6  ;;  %p9524_p7 = por %p9523_p2, %p9522_p3 }
  0xd9   : > { %p9518_p11 = pneg %p9517_p5 }
  0xdb   : > { %p9525_p9 = pnand %p9524_p7, %p9518_p11 }
  0xdd   : > { %9528 = shalt.err (!%p9525_p9)
}
  0xde   : > { %s12923_s1 = smov 16   ;;  %s12924_s29 = smov 256  }
  0xdf   : > { %9041 = dma.hbm_to_vmem [thread:$0]  (!%p12920_p1), %s12842_s9, 8192, %s10018_s22, [#allocation15], %s12924_s29, %s12924_s29, %s12923_s1  }
  0xe0   : > { %s8490_s21 = sshll.u32 %s9947_s14, 6  ;;  %s8823_s8 = sshll.u32 %s9671_s16, 10 }
  0xe1   : > { %s10072_s10 = scalar_lea.hbm %s12833_s0, %s8823_s8  ;;  %s486_s23 = scalar_lea.vmem [#allocation2], %s8490_s21 }
  0xe2   : > { %s493_s13 = sshll.u32 %s486_s23, 4  ;;  %s483_s4 = scalar_lea.sflag [#allocation3], %s9947_s14  ;;  %s10074_s13 = int_to_ptr.vmem [resolvable:$true] %s493_s13 }
  0xe3   : > { %s9529_s26 = scalar_lea.hbm %s10072_s10, 1024  ;;  %p12925_p0 = scmp.ne.s32.totalorder %s12918_s28, 0 }
  0xe4   : > { %p9530_p6 = scmp.ne.s32.totalorder %s10072_s10, %s9529_s26  ;;  %s9534_s12 = scalar_lea.hbm %s12833_s0, 2048 }
  0xe5   : > { %p9535_p8 = scmp.lt.u32.totalorder %s10072_s10, %s12833_s0  ;;  %p9536_p4 = scmp.lt.u32.totalorder %s9534_s12, %s9529_s26 }
  0xe6   : > { %p9532_p1 = pnand %p9530_p6, %p12925_p0  ;;  %p9538_p12 = scmp.lt.u32.totalorder %s9529_s26, %s10072_s10 }
  0xe7   : > { %p9537_p10 = por %p9536_p4, %p9535_p8 }
  0xe8   : > { %p9533_p13 = pneg %p9532_p1 }
  0xe9   : > { %p9539_p5 = por %p9538_p12, %p9537_p10 }
  0xeb   : > { %p9540_p11 = pnand %p9539_p5, %p9533_p13 }
  0xed   : > { %9543 = shalt.err (!%p9540_p11)
}
  0xee   : > { %s9544_s21 = scalar_lea.vmem %s10074_s13, 1024  ;;  %s9686_s8 = smov [#allocation2]  }
  0xef   : > { %p9545_p3 = scmp.ne.s32.totalorder %s10074_s13, %s9544_s21  ;;  %s9549_s11 = sshll.u32 %s9686_s8, 4  ;;  %s9550_s11 = int_to_ptr.vmem [resolvable:$false] %s9549_s11 }
  0xf0   : > { %s9551_s24 = scalar_lea.vmem %s9550_s11, 2048  ;;  %p9552_p9 = scmp.lt.s32.totalorder %s10074_s13, %s9550_s11 }
  0xf1   : > { %p9547_p2 = pnand %p9545_p3, %p12925_p0  ;;  %p9553_p6 = scmp.lt.s32.totalorder %s9551_s24, %s9544_s21 }
  0xf3   : > { %p9548_p7 = pneg %p9547_p2  ;;  %p9554_p1 = por %p9553_p6, %p9552_p9 }
  0xf5   : > { %p9555_p8 = pnand %p9554_p1, %p9548_p7 }
  0xf7   : > { %9558 = shalt.err (!%p9555_p8)
}
  0xf8   : > { %p12926_p13 = scmp.ne.s32.totalorder %s12916_s18, 0  ;;  %s12927_s23 = sshll.u32 %s9671_s16, 9 }
  0xf9   : > { %s10108_s27 = scalar_lea.hbm %s12835_s2, %s12927_s23  ;;  %s12928_s12 = sshll.u32 %s9947_s14, 5 }
  0xfa   : > { %9045 = dma.hbm_to_vmem [thread:$0]  (!%p12926_p13), %s10072_s10, 1024, %s10074_s13, %s483_s4, %s12924_s29, %s12924_s29, %s12923_s1  }
  0xfb   : > { %s528_s3 = scalar_lea.vmem [#allocation7], %s12928_s12  ;;  %s9559_s21 = scalar_lea.hbm %s10108_s27, 512 }
  0xfc   : > { %s536_s15 = sshll.u32 %s528_s3, 4  ;;  %p9560_p4 = scmp.ne.s32.totalorder %s10108_s27, %s9559_s21  ;;  %s537_s15 = int_to_ptr.vmem [resolvable:$true] %s536_s15 }
  0xfd   : > { %s9564_s10 = scalar_lea.hbm %s12835_s2, 1024  ;;  %p9565_p5 = scmp.lt.u32.totalorder %s10108_s27, %s12835_s2 }
  0xfe   : > { %p9562_p10 = pnand %p9560_p4, %p12925_p0  ;;  %p9566_p11 = scmp.lt.u32.totalorder %s9564_s10, %s9559_s21 }
  0xff   : > { %p9568_p2 = scmp.lt.u32.totalorder %s9559_s21, %s10108_s27 }
 0x100   : > { %p9563_p12 = pneg %p9562_p10  ;;  %p9567_p3 = por %p9566_p11, %p9565_p5 }
 0x102   : > { %p9569_p7 = por %p9568_p2, %p9567_p3 }
 0x104   : > { %p9570_p9 = pnand %p9569_p7, %p9563_p12 }
 0x106   : > { %9573 = shalt.err (!%p9570_p9)
}
 0x107   : > { %s9574_s14 = scalar_lea.vmem %s537_s15, 512  ;;  %s9687_s8 = smov [#allocation7]  }
 0x108   : > { %p9575_p6 = scmp.ne.s32.totalorder %s537_s15, %s9574_s14  ;;  %s9579_s11 = sshll.u32 %s9687_s8, 4  ;;  %s9580_s11 = int_to_ptr.vmem [resolvable:$false] %s9579_s11 }
 0x109   : > { %s9581_s24 = scalar_lea.vmem %s9580_s11, 1024  ;;  %p9582_p4 = scmp.lt.s32.totalorder %s537_s15, %s9580_s11 }
 0x10a   : > { %p9577_p1 = pnand %p9575_p6, %p12925_p0  ;;  %p9583_p10 = scmp.lt.s32.totalorder %s9581_s24, %s9574_s14 }
 0x10c   : > { %p9578_p8 = pneg %p9577_p1  ;;  %p9584_p13 = por %p9583_p10, %p9582_p4 }
 0x10e   : > { %p9585_p5 = pnand %p9584_p13, %p9578_p8 }
 0x110   : > { %9588 = shalt.err (!%p9585_p5)
}
 0x111   : > { %p12929_p11 = scmp.ne.s32.totalorder %s12916_s18, 0  ;;  %p12930_p12 = scmp.ne.s32.totalorder %s12904_s20, 0 }
 0x113   : > { %9051 = dma.hbm_to_vmem [thread:$0]  (!%p12929_p11), %s10108_s27, 512, %s537_s15, %s9967_s6  }
 0x114   : > { %545 = sbr.rel (%p12930_p12) target bundleno = 3178 (0xc6a), region = 76 }
 0x11b   : > { %s10133_s28 = sand.u32 1, %s9663_s30   ;;  %p12931_p0 = scmp.ne.s32.totalorder %s12912_s25, 0 }
 0x11c   : > { %s8500_s23 = sshll.u32 %s10133_s28, 6  ;;  %s548_s26 = scalar_lea.sflag [#allocation3], %s10133_s28 }
 0x11d   : > { %s551_s22 = scalar_lea.vmem [#allocation2], %s8500_s23 }
 0x11e   : > { %9634 = dma.done.wait (%p12931_p0), %s548_s26, 1024  }
 0x11f   : > { %9636 = vsyncadd (%p12931_p0), %s548_s26, 4294966272  ;;  %s556_s6 = sand.u32 1, %s9807_s19   ;;  %s8501_s20 = sshll.u32 %s10133_s28, 5 }
 0x120   : > { %s557_s18 = scalar_lea.sflag [#allocation6], %s556_s6  ;;  %s10143_s27 = scalar_lea.vmem [#allocation5], %s8501_s20 }
 0x121   : > { %9638 = dma.done.wait (%p12931_p0), %s557_s18, 1024  }
 0x122   : > { %9640 = vsyncadd (%p12931_p0), %s557_s18, 4294966272  ;;  %s10149_s12 = scalar_lea.vmem [#allocation7], %s8501_s20  ;;  %p12932_p13 = scmp.eq.s32.totalorder %s9807_s19, 0 }
 0x124   : > { %9642 = dma.done.wait (%p12932_p13), [#allocation9], 6400   ;;  %p12933_p3 = pmov %p12932_p13 }
 0x126   : > { %9644 = vsyncadd (%p12933_p3), [#allocation9], 4294960896  ;;  %p12934_p2 = pmov %p12933_p3 }
 0x128   : > { %9646 = dma.done.wait (%p12934_p2), [#allocation12], 2304   ;;  %p12935_p7 = pmov %p12934_p2 }
 0x129   : > { %p12936_p9 = pmov %p12934_p2 }
 0x12a   : > { %9648 = vsyncadd (%p12935_p7), [#allocation12], 4294964992 }
 0x12b   : > { %9650 = dma.done.wait (%p12936_p9), [#allocation15], 9344   ;;  %p12937_p6 = pmov %p12934_p2 }
 0x12c   : > { %v10163_v0 = vld [vmem:[%s551_s22 + $0x8] sm:$0xff]  ;;  %v10165_v1 = vld [vmem:[%s551_s22] sm:$0xff]  ;;  %s9688_s25 = smov 4   ;;  %v10169_v2 = vld [vmem:[%s551_s22 + $0x18] sm:$0xff]  ;;  %v12880_v8 = vmov 0   ;;  %s9690_s3 = smov 5   ;;  %v12879_v9 = vlaneseq }
 0x12d   : > { %9652 = vsyncadd (%p12937_p6), [#allocation15], 4294957952  ;;  %724 = vrot.lane.b32.xlu1 %v10163_v0, %s9688_s25  ;;  %716 = vrot.lane.b32.xlu0 %v10165_v1, %s9688_s25  ;;  %v10171_v3 = vld [vmem:[%s551_s22 + $0x10] sm:$0xff]  ;;  %v10175_v5 = vld [vmem:[%s551_s22 + $0x20] sm:$0xff]  ;;  %s9691_s15 = smov 3   ;;  %s9692_s21 = smov 1  }
 0x12e   : > { %v10173_v4 = vld [vmem:[%s551_s22 + $0x30] sm:$0xff]  ;;  %v10179_v6 = vld [vmem:[%s551_s22 + $0x38] sm:$0xff]  ;;  %v10181_v7 = vld [vmem:[%s551_s22 + $0x28] sm:$0xff]  ;;  %815 = vmatprep.mubr.bf16.mxu0 %v12880_v8  ;;  %9137 = vset.pattern.permute.xlu1 %v12880_v8  ;;  %s9693_s1 = smov 127   ;;  %s9694_s29 = smov 125   ;;  %v10253_v10 = vshrl.u32 %v12879_v9, 7 }
 0x12f   : > { %9136 = vset.pattern.permute.xlu0 %v12880_v8  ;;  %s9695_s10 = smov 124   ;;  %v10258_v11 = vand.u32 127, %v12879_v9  ;;  %s9696_s13 = smov 123   ;;  %v9138_v50 = vld [vmem:[#allocation8 + $0x10] sm:$0xff]   ;;  %vm776_vm2 = vcmask 261120   ;;  %vm2171_vm11 = vcmask 130048  }
 0x130   : > { %12938 = vst [vmem:[#allocation29_spill] sm:$0xff] %v10253_v10  ;;  %v10261_v12 = vsub.s32 1, %v10253_v10  ;;  %s12939_s8 = sld [smem:[#allocation38_spill]]  ;;  %v10303_v35 = vsub.s32 0, %v10253_v10  ;;  %s12940_s22 = sld [smem:[#allocation45_spill]] }
 0x131   : > { %726 = vrot.lane.b32.xlu1 %v10169_v2, %s9688_s25  ;;  %718 = vrot.lane.b32.xlu0 %v10171_v3, %s9688_s25  ;;  %vm732_vm0 = vcmp.lt.s32.totalorder %v10258_v11, 4  ;;  %vm683_vm1 = vcmp.lt.s32.totalorder %v10258_v11, 5  ;;  %vm921_vm3 = vcmp.lt.s32.totalorder %v10258_v11, 3  ;;  %vm1048_vm4 = vcmp.lt.s32.totalorder %v10258_v11, 1  ;;  %s9697_s14 = smov 9   ;;  %s9698_s11 = smov 8  }
 0x132   : > { %vm1261_vm5 = vcmp.lt.s32.totalorder %v10258_v11, 127  ;;  %vm1388_vm6 = vcmp.lt.s32.totalorder %v10258_v11, 125  ;;  %vm1515_vm7 = vcmp.lt.s32.totalorder %v10258_v11, 124  ;;  %vm1642_vm8 = vcmp.lt.s32.totalorder %v10258_v11, 123  ;;  %s9700_s20 = smov 121   ;;  %s9701_s18 = smov 120  }
 0x133   : > { %vm2056_vm9 = vcmp.lt.s32.totalorder %v10258_v11, 9  ;;  %vm2226_vm10 = vcmp.lt.s32.totalorder %v10258_v11, 8  ;;  %vm2405_vm12 = vcmp.lt.s32.totalorder %v10258_v11, 7  ;;  %vm3062_vm13 = vcmp.lt.s32.totalorder %v10258_v11, 121  ;;  %s9703_s6 = smov 17   ;;  %s9708_s24 = smov 111  }
 0x134   : > { %vm3241_vm14 = vcmp.lt.s32.totalorder %v10258_v11, 120  ;;  %vm3420_vm15 = vcmp.lt.s32.totalorder %v10258_v11, 119  ;;  %s12948_s26 = sld [smem:[#allocation43_spill]]  ;;  %p12967_p8 = scmp.ne.s32.totalorder %s12913_s17, 0 }
 0x135   : > { %722 = vrot.lane.b32.xlu1 %v10173_v4, %s9688_s25  ;;  %720 = vrot.lane.b32.xlu0 %v10175_v5, %s9688_s25 }
 0x136   : > { %v10270_v13 = vld [vmem:[%s12939_s8 + $0x8] sm:$0xff]  ;;  %v10276_v14 = vld [vmem:[%s12939_s8] sm:$0xff] }
 0x137   : > { %v748_v17 = vrot.slane %v10270_v13, %v10261_v12  ;;  %v744_v19 = vrot.slane %v10276_v14, %v10261_v12  ;;  %v695_v48 = vrot.slane %v10276_v14, %v10303_v35  ;;  %v699_v49 = vrot.slane %v10270_v13, %v10303_v35 }
 0x139   : > { %730 = vrot.lane.b32.xlu1 %v10179_v6, %s9688_s25  ;;  %728 = vrot.lane.b32.xlu0 %v10181_v7, %s9688_s25  ;;  %s9702_s25 = smov 119  }
 0x13d   : > { %667 = vrot.lane.b32.xlu1 %v10171_v3, %s9690_s3  ;;  %665 = vrot.lane.b32.xlu0 %v10165_v1, %s9690_s3 }
 0x141   : > { %675 = vrot.lane.b32.xlu1 %v10169_v2, %s9690_s3  ;;  %673 = vrot.lane.b32.xlu0 %v10163_v0, %s9690_s3 }
 0x145   : > { %671 = vrot.lane.b32.xlu1 %v10173_v4, %s9690_s3  ;;  %669 = vrot.lane.b32.xlu0 %v10175_v5, %s9690_s3 }
 0x149   : > { %679 = vrot.lane.b32.xlu1 %v10179_v6, %s9690_s3  ;;  %677 = vrot.lane.b32.xlu0 %v10181_v7, %s9690_s3  ;;  %s12960_s3 = sld [smem:[#allocation44_spill]] }
 0x14d   : > { %907 = vrot.lane.b32.xlu1 %v10171_v3, %s9691_s15  ;;  %905 = vrot.lane.b32.xlu0 %v10165_v1, %s9691_s15 }
 0x151   : > { %915 = vrot.lane.b32.xlu1 %v10169_v2, %s9691_s15  ;;  %913 = vrot.lane.b32.xlu0 %v10163_v0, %s9691_s15 }
 0x155   : > { %911 = vrot.lane.b32.xlu1 %v10173_v4, %s9691_s15  ;;  %909 = vrot.lane.b32.xlu0 %v10175_v5, %s9691_s15 }
 0x159   : > { %919 = vrot.lane.b32.xlu1 %v10179_v6, %s9691_s15  ;;  %917 = vrot.lane.b32.xlu0 %v10181_v7, %s9691_s15  ;;  %s8297_s15 = scalar_lea.sflag [#allocation4], %s10133_s28 }
 0x15d   : > { %1034 = vrot.lane.b32.xlu1 %v10171_v3, %s9692_s21  ;;  %1032 = vrot.lane.b32.xlu0 %v10165_v1, %s9692_s21 }
 0x161   : > { %1042 = vrot.lane.b32.xlu1 %v10169_v2, %s9692_s21  ;;  %1040 = vrot.lane.b32.xlu0 %v10163_v0, %s9692_s21 }
 0x165   : > { %1038 = vrot.lane.b32.xlu1 %v10173_v4, %s9692_s21  ;;  %1036 = vrot.lane.b32.xlu0 %v10175_v5, %s9692_s21 }
 0x169   : > { %1046 = vrot.lane.b32.xlu1 %v10179_v6, %s9692_s21  ;;  %1044 = vrot.lane.b32.xlu0 %v10181_v7, %s9692_s21 }
 0x16d   : > { %1247 = vrot.lane.b32.xlu1 %v10171_v3, %s9693_s1  ;;  %1245 = vrot.lane.b32.xlu0 %v10165_v1, %s9693_s1 }
 0x171   : > { %1255 = vrot.lane.b32.xlu1 %v10169_v2, %s9693_s1  ;;  %1253 = vrot.lane.b32.xlu0 %v10163_v0, %s9693_s1 }
 0x175   : > { %1251 = vrot.lane.b32.xlu1 %v10173_v4, %s9693_s1  ;;  %1249 = vrot.lane.b32.xlu0 %v10175_v5, %s9693_s1 }
 0x179   : > { %1259 = vrot.lane.b32.xlu1 %v10179_v6, %s9693_s1  ;;  %1257 = vrot.lane.b32.xlu0 %v10181_v7, %s9693_s1 }
 0x17d   : > { %1374 = vrot.lane.b32.xlu1 %v10171_v3, %s9694_s29  ;;  %1372 = vrot.lane.b32.xlu0 %v10165_v1, %s9694_s29 }
 0x181   : > { %1382 = vrot.lane.b32.xlu1 %v10169_v2, %s9694_s29  ;;  %1380 = vrot.lane.b32.xlu0 %v10163_v0, %s9694_s29 }
 0x185   : > { %1378 = vrot.lane.b32.xlu1 %v10173_v4, %s9694_s29  ;;  %1376 = vrot.lane.b32.xlu0 %v10175_v5, %s9694_s29 }
 0x189   : > { %1386 = vrot.lane.b32.xlu1 %v10179_v6, %s9694_s29  ;;  %1384 = vrot.lane.b32.xlu0 %v10181_v7, %s9694_s29  ;;  %s12950_s29 = sld [smem:[#allocation42_spill]] }
 0x18d   : > { %1501 = vrot.lane.b32.xlu1 %v10171_v3, %s9695_s10  ;;  %1499 = vrot.lane.b32.xlu0 %v10165_v1, %s9695_s10 }
 0x191   : > { %1509 = vrot.lane.b32.xlu1 %v10169_v2, %s9695_s10  ;;  %1507 = vrot.lane.b32.xlu0 %v10163_v0, %s9695_s10 }
 0x195   : > { %1505 = vrot.lane.b32.xlu1 %v10173_v4, %s9695_s10  ;;  %1503 = vrot.lane.b32.xlu0 %v10175_v5, %s9695_s10 }
 0x199   : > { %1513 = vrot.lane.b32.xlu1 %v10179_v6, %s9695_s10  ;;  %1511 = vrot.lane.b32.xlu0 %v10181_v7, %s9695_s10  ;;  %s12951_s10 = smov %s12950_s29 }
 0x19d   : > { %1628 = vrot.lane.b32.xlu1 %v10171_v3, %s9696_s13  ;;  %1626 = vrot.lane.b32.xlu0 %v10165_v1, %s9696_s13 }
 0x19f   : > { %v725_v15 = vpop.permute.xlu1 %724  ;;  %v717_v16 = vpop.permute.xlu0 %716 }
 0x1a0   : > { %v733_v18 = vsel %vm732_vm0, %v717_v16, %v725_v15  ;;  %v737_v20 = vsel %vm732_vm0, %v725_v15, %v717_v16  ;;  %v9139_v16 = vld [vmem:[#allocation8 + $0x18] sm:$0xff]  }
 0x1a1   : > { %1636 = vrot.lane.b32.xlu1 %v10169_v2, %s9696_s13  ;;  %1634 = vrot.lane.b32.xlu0 %v10163_v0, %s9696_s13  ;;  %v750_v25 = vmul.f32 %v748_v17, %v733_v18  ;;  %v749_v27 = vmul.f32 %v744_v19, %v737_v20 }
 0x1a3   : > { %v727_v21 = vpop.permute.xlu1 %726  ;;  %v719_v22 = vpop.permute.xlu0 %718 }
 0x1a4   : > { %v738_v23 = vsel %vm732_vm0, %v727_v21, %v719_v22  ;;  %v734_v24 = vsel %vm732_vm0, %v719_v22, %v727_v21 }
 0x1a5   : > { %v752_v26 = vmul.f32 %v748_v17, %v734_v24  ;;  %v751_v28 = vmul.f32 %v744_v19, %v738_v23  ;;  %1632 = vrot.lane.b32.xlu1 %v10173_v4, %s9696_s13  ;;  %1630 = vrot.lane.b32.xlu0 %v10175_v5, %s9696_s13 }
 0x1a7   : > { %v723_v29 = vpop.permute.xlu1 %722  ;;  %v721_v30 = vpop.permute.xlu0 %720  ;;  %v763_v31 = vpack.c.bf16 %v752_v26, %v750_v25  ;;  %v762_v32 = vpack.c.bf16 %v751_v28, %v749_v27  ;;  %v662_v28 = vld [vmem:[%s12940_s22 + $0x8] sm:$0xff] }
 0x1a9   : > { %783 = vmatprep.subr.bf16.mxu0 %v763_v31  ;;  %1640 = vrot.lane.b32.xlu1 %v10179_v6, %s9696_s13  ;;  %v9158_v31 = vld [vmem:[#allocation10] ss:$8 sps:$4 sm:$0xff]  }
 0x1aa   : > { %784 = vmatpush1.bf16.msra.mxu0 %v762_v32  ;;  %1638 = vrot.lane.b32.xlu0 %v10181_v7, %s9696_s13 }
 0x1ab   : > { %v731_v33 = vpop.permute.xlu1 %730  ;;  %v729_v34 = vpop.permute.xlu0 %728 }
 0x1ac   : > { %v736_v36 = vsel %vm732_vm0, %v723_v29, %v731_v33  ;;  %v740_v37 = vsel %vm732_vm0, %v731_v33, %v723_v29  ;;  %v735_v38 = vsel %vm732_vm0, %v721_v30, %v729_v34  ;;  %v739_v39 = vsel %vm732_vm0, %v729_v34, %v721_v30  ;;  %v661_v29 = vld [vmem:[%s12940_s22] sm:$0xff]  ;;  %v9156_v30 = vld [vmem:[#allocation10 + $0x4] ss:$8 sps:$4 sm:$0xff]  }
 0x1ad   : > { %v755_v40 = vmul.f32 %v744_v19, %v740_v37  ;;  %v756_v41 = vmul.f32 %v748_v17, %v736_v36  ;;  %v753_v42 = vmul.f32 %v744_v19, %v739_v39  ;;  %v754_v43 = vmul.f32 %v748_v17, %v735_v38  ;;  %1760 = vperm.xlu1 %9137, %v662_v28   ;;  %v663_v37 = vld [vmem:[%s12940_s22 + $0x10] sm:$0xff]  ;;  %v9159_v38 = vld [vmem:[#allocation10 + $0x14] ss:$8 sps:$4 sm:$0xff]   ;;  %v664_v39 = vld [vmem:[%s12940_s22 + $0x18] sm:$0xff] }
 0x1ae   : > { %v10329_v19 = vsub.s32 2, %v10253_v10  ;;  %1755 = vperm.xlu0 %9136, %v661_v29   ;;  %1989 = vmatprep.subr.bf16.mxu1 %v9156_v30  ;;  %vm4785_vm0 = vcmp.lt.s32.totalorder %v10258_v11, 17 }
 0x1af   : > { %v668_v44 = vpop.permute.xlu1 %667  ;;  %v666_v45 = vpop.permute.xlu0 %665  ;;  %v765_v46 = vpack.c.bf16 %v756_v41, %v754_v43  ;;  %v764_v47 = vpack.c.bf16 %v755_v40, %v753_v42  ;;  %v9140_v42 = vld [vmem:[#allocation8] sm:$0xff]   ;;  %1990 = vmatpush1.bf16.msra.mxu1 %v9158_v31 }
 0x1b0   : > { %v933_v40 = vrot.slane %v10276_v14, %v10329_v19  ;;  %v937_v41 = vrot.slane %v10270_v13, %v10329_v19  ;;  %v9161_v43 = vld [vmem:[#allocation10 + $0x10] ss:$8 sps:$4 sm:$0xff]   ;;  %1991 = vmatprep.subr.bf16.mxu1 %v9159_v38 }
 0x1b1   : > { %785 = vmatprep.subr.bf16.mxu0 %v765_v46  ;;  %1765 = vperm.xlu1 %9137, %v663_v37   ;;  %v9162_v46 = vld [vmem:[#allocation10 + $0x24] ss:$8 sps:$4 sm:$0xff]   ;;  %v9173_v37 = vld [vmem:[#allocation10 + $0x50] ss:$8 sps:$4 sm:$0xff]  }
 0x1b2   : > { %786 = vmatpush1.bf16.msra.mxu0 %v764_v47  ;;  %1770 = vperm.xlu0 %9136, %v664_v39  }
 0x1b3   : > { %v676_v51 = vpop.permute.xlu1 %675  ;;  %v674_v52 = vpop.permute.xlu0 %673  ;;  %1992 = vmatpush1.bf16.msra.mxu1 %v9161_v43 }
 0x1b4   : > { %v685_v53 = vsel %vm683_vm1, %v668_v44, %v676_v51  ;;  %v689_v54 = vsel %vm683_vm1, %v676_v51, %v668_v44  ;;  %v684_v55 = vsel %vm683_vm1, %v666_v45, %v674_v52  ;;  %v688_v56 = vsel %vm683_vm1, %v674_v52, %v666_v45  ;;  %1993 = vmatprep.subr.bf16.mxu1 %v9162_v46 }
 0x1b5   : > { %v702_v57 = vmul.f32 %v695_v48, %v689_v54  ;;  %v703_v58 = vmul.f32 %v699_v49, %v685_v53  ;;  %v700_v59 = vmul.f32 %v695_v48, %v688_v56  ;;  %v701_v60 = vmul.f32 %v699_v49, %v684_v55  ;;  %8512 = vmatmul.mubr.msk.bf16.vlgmr.msra.gmra.mrb[0].mxu0 %vm776_vm2, %v9138_v50  ;;  %v9164_v55 = vld [vmem:[#allocation10 + $0x20] ss:$8 sps:$4 sm:$0xff]  }
 0x1b6   : > { %825 = vmatprep.mubr.bf16.mxu0 %v12880_v8 }
 0x1b7   : > { %v712_v61 = vpack.c.bf16 %v702_v57, %v700_v59  ;;  %v672_v62 = vpop.permute.xlu1 %671  ;;  %v670_v63 = vpop.permute.xlu0 %669  ;;  %v713_v15 = vpack.c.bf16 %v703_v58, %v701_v60  ;;  %v9165_v60 = vld [vmem:[#allocation10 + $0x34] ss:$8 sps:$4 sm:$0xff]   ;;  %1994 = vmatpush1.bf16.msra.mxu1 %v9164_v55 }
 0x1b8   : > { %1995 = vmatprep.subr.bf16.mxu1 %v9165_v60  ;;  %v9143_v55 = vld [vmem:[#allocation8 + $0x28] sm:$0xff]   ;;  %v9180_v60 = vld [vmem:[#allocation10 + $0x84] ss:$8 sps:$4 sm:$0xff]  }
 0x1b9   : > { %852 = vmatprep.subr.bf16.mxu0 %v713_v15 }
 0x1ba   : > { %853 = vmatpush1.bf16.msra.mxu0 %v712_v61  ;;  %v9141_v61 = vld [vmem:[#allocation8 + $0x8] sm:$0xff]  }
 0x1bb   : > { %v680_v17 = vpop.permute.xlu1 %679  ;;  %v678_v18 = vpop.permute.xlu0 %677 }
 0x1bc   : > { %v687_v20 = vsel %vm683_vm1, %v672_v62, %v680_v17  ;;  %v691_v21 = vsel %vm683_vm1, %v680_v17, %v672_v62  ;;  %v686_v22 = vsel %vm683_vm1, %v670_v63, %v678_v18  ;;  %v690_v23 = vsel %vm683_vm1, %v678_v18, %v670_v63  ;;  %v9167_v62 = vld [vmem:[#allocation10 + $0x30] ss:$8 sps:$4 sm:$0xff]   ;;  %v9168_v17 = vld [vmem:[#allocation10 + $0x44] ss:$8 sps:$4 sm:$0xff]  }
 0x1bd   : > { %v706_v24 = vmul.f32 %v695_v48, %v691_v21  ;;  %v707_v25 = vmul.f32 %v699_v49, %v687_v20  ;;  %v704_v26 = vmul.f32 %v695_v48, %v690_v23  ;;  %v705_v27 = vmul.f32 %v699_v49, %v686_v22  ;;  %8513 = vmatmul.mubr.msk.bf16.gmra.mrb[4].mxu0 %vm776_vm2, %v9139_v16 }
 0x1be   : > { %884 = vmatprep.mubr.bf16.mxu0 %v12880_v8  ;;  %v10369_v16 = vsub.s32 3, %v10253_v10  ;;  %1996 = vmatpush1.bf16.msra.mxu1 %v9167_v62  ;;  %vm5044_vm1 = vcmp.lt.s32.totalorder %v10258_v11, 16 }
 0x1bf   : > { %v714_v32 = vpack.c.bf16 %v706_v24, %v704_v26  ;;  %v908_v33 = vpop.permute.xlu1 %907  ;;  %v906_v34 = vpop.permute.xlu0 %905  ;;  %v715_v36 = vpack.c.bf16 %v707_v25, %v705_v27  ;;  %v9170_v27 = vld [vmem:[#allocation10 + $0x40] ss:$8 sps:$4 sm:$0xff]   ;;  %1997 = vmatprep.subr.bf16.mxu1 %v9168_v17 }
 0x1c1   : > { %854 = vmatprep.subr.bf16.mxu0 %v715_v36  ;;  %v9142_v36 = vld [vmem:[#allocation8 + $0x20] sm:$0xff]  }
 0x1c2   : > { %855 = vmatpush1.bf16.msra.mxu0 %v714_v32  ;;  %v9171_v32 = vld [vmem:[#allocation10 + $0x54] ss:$8 sps:$4 sm:$0xff]   ;;  %1998 = vmatpush1.bf16.msra.mxu1 %v9170_v27  ;;  %v1165_v27 = vpack.c.bf16 %v10169_v2, %v10163_v0  ;;  %v1167_v0 = vpack.c.bf16 %v10179_v6, %v10181_v7  ;;  %v9185_v2 = vld [vmem:[#allocation10 + $0x90] ss:$8 sps:$4 sm:$0xff]  }
 0x1c3   : > { %v916_v44 = vpop.permute.xlu1 %915  ;;  %v914_v45 = vpop.permute.xlu0 %913  ;;  %1999 = vmatprep.subr.bf16.mxu1 %v9171_v32 }
 0x1c4   : > { %v923_v47 = vsel %vm921_vm3, %v908_v33, %v916_v44  ;;  %v927_v48 = vsel %vm921_vm3, %v916_v44, %v908_v33  ;;  %v922_v49 = vsel %vm921_vm3, %v906_v34, %v914_v45  ;;  %v926_v50 = vsel %vm921_vm3, %v914_v45, %v906_v34 }
 0x1c5   : > { %v940_v51 = vmul.f32 %v933_v40, %v927_v48  ;;  %v941_v52 = vmul.f32 %v937_v41, %v923_v47  ;;  %v938_v53 = vmul.f32 %v933_v40, %v926_v50  ;;  %v939_v54 = vmul.f32 %v937_v41, %v922_v49  ;;  %8516 = vmatmul.mubr.msk.bf16.vlgmr.msra.gmra.mrb[0].mxu0 %vm776_vm2, %v9140_v42  ;;  %v9176_v49 = vld [vmem:[#allocation10 + $0x60] ss:$8 sps:$4 sm:$0xff]  }
 0x1c6   : > { %894 = vmatprep.mubr.bf16.mxu0 %v12880_v8  ;;  %v1060_v33 = vrot.slane %v10276_v14, %v10369_v16  ;;  %v1064_v34 = vrot.slane %v10270_v13, %v10369_v16  ;;  %2000 = vmatpush1.bf16.msra.mxu1 %v9173_v37  ;;  %v9186_v37 = vld [vmem:[#allocation10 + $0xa4] ss:$8 sps:$4 sm:$0xff]  }
 0x1c7   : > { %v951_v56 = vpack.c.bf16 %v940_v51, %v938_v53  ;;  %v912_v57 = vpop.permute.xlu1 %911  ;;  %v910_v58 = vpop.permute.xlu0 %909  ;;  %v952_v59 = vpack.c.bf16 %v941_v52, %v939_v54  ;;  %v9177_v54 = vld [vmem:[#allocation10 + $0x74] ss:$8 sps:$4 sm:$0xff]  }
 0x1c9   : > { %971 = vmatprep.subr.bf16.mxu0 %v952_v59  ;;  %v10397_v59 = vsub.s32 5, %v10253_v10 }
 0x1ca   : > { %972 = vmatpush1.bf16.msra.mxu0 %v951_v56  ;;  %v9179_v56 = vld [vmem:[#allocation10 + $0x70] ss:$8 sps:$4 sm:$0xff]  }
 0x1cb   : > { %v920_v63 = vpop.permute.xlu1 %919  ;;  %v918_v15 = vpop.permute.xlu0 %917 }
 0x1cc   : > { %v925_v18 = vsel %vm921_vm3, %v912_v57, %v920_v63  ;;  %v929_v20 = vsel %vm921_vm3, %v920_v63, %v912_v57  ;;  %v924_v21 = vsel %vm921_vm3, %v910_v58, %v918_v15  ;;  %v928_v22 = vsel %vm921_vm3, %v918_v15, %v910_v58 }
 0x1cd   : > { %v944_v23 = vmul.f32 %v933_v40, %v929_v20  ;;  %v945_v24 = vmul.f32 %v937_v41, %v925_v18  ;;  %v942_v25 = vmul.f32 %v933_v40, %v928_v22  ;;  %v943_v26 = vmul.f32 %v937_v41, %v924_v21  ;;  %8517 = vmatmul.mubr.msk.bf16.gmra.mrb[4].mxu0 %vm776_vm2, %v9141_v61  ;;  %v9174_v40 = vld [vmem:[#allocation10 + $0x64] ss:$8 sps:$4 sm:$0xff]   ;;  %v9182_v22 = vld [vmem:[#allocation10 + $0x80] ss:$8 sps:$4 sm:$0xff]  }
 0x1ce   : > { %1003 = vmatprep.mubr.bf16.mxu0 %v12880_v8  ;;  %2001 = vmatprep.subr.bf16.mxu1 %v9174_v40  ;;  %v9188_v40 = vld [vmem:[#allocation10 + $0xa0] ss:$8 sps:$4 sm:$0xff]   ;;  %vm4937_vm3 = vcmask 64512  }
 0x1cf   : > { %v953_v28 = vpack.c.bf16 %v944_v23, %v942_v25  ;;  %v1035_v29 = vpop.permute.xlu1 %1034  ;;  %v1033_v30 = vpop.permute.xlu0 %1032  ;;  %v954_v31 = vpack.c.bf16 %v945_v24, %v943_v26  ;;  %2002 = vmatpush1.bf16.msra.mxu1 %v9176_v49  ;;  %v9192_v49 = vld [vmem:[#allocation10 + $0xc4] ss:$8 sps:$4 sm:$0xff]  }
 0x1d0   : > { %2003 = vmatprep.subr.bf16.mxu1 %v9177_v54 }
 0x1d1   : > { %973 = vmatprep.subr.bf16.mxu0 %v954_v31  ;;  %v1164_v31 = vpack.c.bf16 %v10171_v3, %v10165_v1  ;;  %v1166_v3 = vpack.c.bf16 %v10173_v4, %v10175_v5 }
 0x1d2   : > { %974 = vmatpush1.bf16.msra.mxu0 %v953_v28  ;;  %v9183_v28 = vld [vmem:[#allocation10 + $0x94] ss:$8 sps:$4 sm:$0xff]  }
 0x1d3   : > { %v1043_v38 = vpop.permute.xlu1 %1042  ;;  %v1041_v39 = vpop.permute.xlu0 %1040  ;;  %2004 = vmatpush1.bf16.msra.mxu1 %v9179_v56 }
 0x1d4   : > { %v1050_v41 = vsel %vm1048_vm4, %v1035_v29, %v1043_v38  ;;  %v1054_v42 = vsel %vm1048_vm4, %v1043_v38, %v1035_v29  ;;  %v1049_v43 = vsel %vm1048_vm4, %v1033_v30, %v1041_v39  ;;  %v1053_v44 = vsel %vm1048_vm4, %v1041_v39, %v1033_v30  ;;  %2005 = vmatprep.subr.bf16.mxu1 %v9180_v60  ;;  %v9144_v29 = vld [vmem:[#allocation8 + $0x30] sm:$0xff]  }
 0x1d5   : > { %v1067_v45 = vmul.f32 %v1060_v33, %v1054_v42  ;;  %v1068_v46 = vmul.f32 %v1064_v34, %v1050_v41  ;;  %v1065_v47 = vmul.f32 %v1060_v33, %v1053_v44  ;;  %v1066_v48 = vmul.f32 %v1064_v34, %v1049_v43  ;;  %8520 = vmatmul.mubr.msk.bf16.vlgmr.msra.gmra.mrb[0].mxu0 %vm776_vm2, %v9142_v36  ;;  %v9189_v41 = vld [vmem:[#allocation10 + $0xb4] ss:$8 sps:$4 sm:$0xff]   ;;  %v9145_v42 = vld [vmem:[#allocation8 + $0x38] sm:$0xff]  }
 0x1d6   : > { %1013 = vmatprep.mubr.bf16.mxu0 %v12880_v8  ;;  %v1277_v30 = vrot.slane %v10270_v13, %v10397_v59  ;;  %v1273_v43 = vrot.slane %v10276_v14, %v10397_v59  ;;  %v9194_v60 = vld [vmem:[#allocation10 + $0xc0] ss:$8 sps:$4 sm:$0xff]  }
 0x1d7   : > { %v1078_v50 = vpack.c.bf16 %v1067_v45, %v1065_v47  ;;  %v1039_v51 = vpop.permute.xlu1 %1038  ;;  %v1037_v52 = vpop.permute.xlu0 %1036  ;;  %v1079_v53 = vpack.c.bf16 %v1068_v46, %v1066_v48  ;;  %2006 = vmatpush1.bf16.msra.mxu1 %v9182_v22  ;;  %v9191_v46 = vld [vmem:[#allocation10 + $0xb0] ss:$8 sps:$4 sm:$0xff]  }
 0x1d8   : > { %2007 = vmatprep.subr.bf16.mxu1 %v9183_v28 }
 0x1d9   : > { %1098 = vmatprep.subr.bf16.mxu0 %v1079_v53 }
 0x1da   : > { %1099 = vmatpush1.bf16.msra.mxu0 %v1078_v50  ;;  %v10438_v50 = vsub.s32 6, %v10253_v10 }
 0x1db   : > { %v1047_v57 = vpop.permute.xlu1 %1046  ;;  %v1045_v58 = vpop.permute.xlu0 %1044  ;;  %2008 = vmatpush1.bf16.msra.mxu1 %v9185_v2 }
 0x1dc   : > { %v1052_v61 = vsel %vm1048_vm4, %v1039_v51, %v1047_v57  ;;  %v1056_v62 = vsel %vm1048_vm4, %v1047_v57, %v1039_v51  ;;  %v1051_v63 = vsel %vm1048_vm4, %v1037_v52, %v1045_v58  ;;  %v1055_v15 = vsel %vm1048_vm4, %v1045_v58, %v1037_v52  ;;  %2009 = vmatprep.subr.bf16.mxu1 %v9186_v37 }
 0x1dd   : > { %v1071_v17 = vmul.f32 %v1060_v33, %v1056_v62  ;;  %v1072_v18 = vmul.f32 %v1064_v34, %v1052_v61  ;;  %v1069_v20 = vmul.f32 %v1060_v33, %v1055_v15  ;;  %v1070_v21 = vmul.f32 %v1064_v34, %v1051_v63  ;;  %8521 = vmatmul.mubr.msk.bf16.gmra.mrb[4].mxu0 %vm776_vm2, %v9143_v55  ;;  %v9195_v61 = vld [vmem:[#allocation10 + $0xd4] ss:$8 sps:$4 sm:$0xff]  }
 0x1de   : > { %1130 = vmatprep.mubr.bf16.mxu0 %v12880_v8  ;;  %12941 = vst [vmem:[#allocation30_spill] sm:$0xff] %v10438_v50  ;;  %v9146_v62 = vld [vmem:[#allocation8 + $0x40] sm:$0xff]   ;;  %v1404_v63 = vrot.slane %v10270_v13, %v10438_v50 }
 0x1df   : > { %v1080_v23 = vpack.c.bf16 %v1071_v17, %v1069_v20  ;;  %v1081_v24 = vpack.c.bf16 %v1072_v18, %v1070_v21  ;;  %v1248_v25 = vpop.permute.xlu1 %1247  ;;  %v1246_v26 = vpop.permute.xlu0 %1245  ;;  %2010 = vmatpush1.bf16.msra.mxu1 %v9188_v40 }
 0x1e0   : > { %2011 = vmatprep.subr.bf16.mxu1 %v9189_v41 }
 0x1e1   : > { %1100 = vmatprep.subr.bf16.mxu0 %v1081_v24 }
 0x1e2   : > { %1101 = vmatpush1.bf16.msra.mxu0 %v1080_v23 }
 0x1e3   : > { %1184 = vmatprep.subr.bf16.mxu0 %v1165_v27  ;;  %v1256_v32 = vpop.permute.xlu1 %1255  ;;  %v1254_v33 = vpop.permute.xlu0 %1253  ;;  %2012 = vmatpush1.bf16.msra.mxu1 %v9191_v46 }
 0x1e4   : > { %v1267_v34 = vsel %vm1261_vm5, %v1256_v32, %v1248_v25  ;;  %v1266_v36 = vsel %vm1261_vm5, %v1254_v33, %v1246_v26  ;;  %v1263_v44 = vsel %vm1261_vm5, %v1248_v25, %v1256_v32  ;;  %v1262_v45 = vsel %vm1261_vm5, %v1246_v26, %v1254_v33  ;;  %2013 = vmatprep.subr.bf16.mxu1 %v9192_v49 }
 0x1e5   : > { %8524 = vmatmul.mubr.msk.bf16.vlgmr.msra.gmra.mrb[0].mxu0 %vm776_vm2, %v9144_v29  ;;  %v1281_v38 = vmul.f32 %v1277_v30, %v1267_v34  ;;  %v1279_v1 = vmul.f32 %v1277_v30, %v1266_v36  ;;  %v1280_v51 = vmul.f32 %v1273_v43, %v1263_v44  ;;  %v1278_v52 = vmul.f32 %v1273_v43, %v1262_v45 }
 0x1e6   : > { %1140 = vmatprep.mubr.bf16.mxu0 %v12880_v8  ;;  %1185 = vmatpush1.bf16.msra.mxu0 %v1164_v31  ;;  %v9147_v31 = vld [vmem:[#allocation8 + $0x48] sm:$0xff]   ;;  %v1400_v32 = vrot.slane %v10276_v14, %v10438_v50 }
 0x1e7   : > { %1186 = vmatprep.subr.bf16.mxu0 %v1167_v0  ;;  %v1252_v6 = vpop.permute.xlu1 %1251  ;;  %v1250_v7 = vpop.permute.xlu0 %1249  ;;  %v1292_v39 = vpack.c.bf16 %v1281_v38, %v1279_v1  ;;  %v1291_v15 = vpack.c.bf16 %v1280_v51, %v1278_v52  ;;  %2014 = vmatpush1.bf16.msra.mxu1 %v9194_v60  ;;  %v10466_v38 = vsub.s32 7, %v10253_v10 }
 0x1e8   : > { %2015 = vmatprep.subr.bf16.mxu1 %v9195_v61 }
 0x1e9   : > { %12942 = vst [vmem:[#allocation31_spill] sm:$0xff] %v10466_v38  ;;  %v1531_v44 = vrot.slane %v10270_v13, %v10466_v38 }
 0x1ea   : > { %1187 = vmatpush1.bf16.msra.mxu0 %v1166_v3 }
 0x1eb   : > { %1311 = vmatprep.subr.bf16.mxu0 %v1292_v39  ;;  %v1260_v4 = vpop.permute.xlu1 %1259  ;;  %v1258_v5 = vpop.permute.xlu0 %1257 }
 0x1ec   : > { %v1269_v47 = vsel %vm1261_vm5, %v1260_v4, %v1252_v6  ;;  %v1268_v48 = vsel %vm1261_vm5, %v1258_v5, %v1250_v7  ;;  %v1265_v53 = vsel %vm1261_vm5, %v1252_v6, %v1260_v4  ;;  %v1264_v55 = vsel %vm1261_vm5, %v1250_v7, %v1258_v5 }
 0x1ed   : > { %8525 = vmatmul.mubr.msk.bf16.gmra.mrb[4].mxu0 %vm776_vm2, %v9145_v42  ;;  %v1285_v54 = vmul.f32 %v1277_v30, %v1269_v47  ;;  %v1283_v56 = vmul.f32 %v1277_v30, %v1268_v48  ;;  %v1284_v17 = vmul.f32 %v1273_v43, %v1265_v53  ;;  %v1282_v18 = vmul.f32 %v1273_v43, %v1264_v55  ;;  %v9148_v43 = vld [vmem:[#allocation8 + $0x50] sm:$0xff]  }
 0x1ee   : > { %1216 = vmatprep.mubr.bf16.mxu0 %v12880_v8 }
 0x1ef   : > { %v1375_v57 = vpop.permute.xlu1 %1374  ;;  %v1373_v58 = vpop.permute.xlu0 %1372  ;;  %v1294_v20 = vpack.c.bf16 %v1285_v54, %v1283_v56  ;;  %v1293_v27 = vpack.c.bf16 %v1284_v17, %v1282_v18 }
 0x1f3   : > { %v1383_v21 = vpop.permute.xlu1 %1382  ;;  %v1381_v22 = vpop.permute.xlu0 %1380 }
 0x1f4   : > { %v1394_v23 = vsel %vm1388_vm6, %v1383_v21, %v1375_v57  ;;  %v1393_v24 = vsel %vm1388_vm6, %v1381_v22, %v1373_v58  ;;  %v1390_v33 = vsel %vm1388_vm6, %v1375_v57, %v1383_v21  ;;  %v1389_v0 = vsel %vm1388_vm6, %v1373_v58, %v1381_v22  ;;  %v9149_v57 = vld [vmem:[#allocation8 + $0x58] sm:$0xff]  }
 0x1f5   : > { %8528 = vmatmul.mubr.msk.bf16.vlgmr.msra.gmra.mrb[0].mxu0 %vm776_vm2, %v9146_v62  ;;  %v1408_v25 = vmul.f32 %v1404_v63, %v1394_v23  ;;  %v1406_v26 = vmul.f32 %v1404_v63, %v1393_v24  ;;  %v1407_v1 = vmul.f32 %v1400_v32, %v1390_v33  ;;  %v1405_v3 = vmul.f32 %v1400_v32, %v1389_v0 }
 0x1f6   : > { %1312 = vmatpush1.bf16.msra.mxu0 %v1291_v15  ;;  %1226 = vmatprep.mubr.bf16.mxu0 %v12880_v8  ;;  %v1527_v58 = vrot.slane %v10276_v14, %v10466_v38 }
 0x1f7   : > { %1313 = vmatprep.subr.bf16.mxu0 %v1294_v20  ;;  %v1379_v28 = vpop.permute.xlu1 %1378  ;;  %v1377_v29 = vpop.permute.xlu0 %1376  ;;  %v1419_v30 = vpack.c.bf16 %v1408_v25, %v1406_v26  ;;  %v1418_v45 = vpack.c.bf16 %v1407_v1, %v1405_v3  ;;  %v9150_v26 = vld [vmem:[#allocation8 + $0x60] sm:$0xff]  }
 0x1fa   : > { %1314 = vmatpush1.bf16.msra.mxu0 %v1293_v27 }
 0x1fb   : > { %1438 = vmatprep.subr.bf16.mxu0 %v1419_v30  ;;  %v1387_v2 = vpop.permute.xlu1 %1386  ;;  %v1385_v34 = vpop.permute.xlu0 %1384  ;;  %v8543_v30 = vld [vmem:[%s12939_s8 + $0x28] ss:$0 sm:$0xff] }
 0x1fc   : > { %v1396_v36 = vsel %vm1388_vm6, %v1387_v2, %v1379_v28  ;;  %v1395_v37 = vsel %vm1388_vm6, %v1385_v34, %v1377_v29  ;;  %v1392_v6 = vsel %vm1388_vm6, %v1379_v28, %v1387_v2  ;;  %v1391_v39 = vsel %vm1388_vm6, %v1377_v29, %v1385_v34 }
 0x1fd   : > { %8529 = vmatmul.mubr.msk.bf16.gmra.mrb[4].mxu0 %vm776_vm2, %v9147_v31  ;;  %v1412_v7 = vmul.f32 %v1404_v63, %v1396_v36  ;;  %v1410_v40 = vmul.f32 %v1404_v63, %v1395_v37  ;;  %v1411_v4 = vmul.f32 %v1400_v32, %v1392_v6  ;;  %v1409_v5 = vmul.f32 %v1400_v32, %v1391_v39  ;;  %v8542_v39 = vld [vmem:[%s12939_s8 + $0x20] ss:$0 sm:$0xff] }
 0x1fe   : > { %1343 = vmatprep.mubr.bf16.mxu0 %v12880_v8  ;;  %vm5311_vm6 = vcmp.lt.s32.totalorder %v10258_v11, 15 }
 0x1ff   : > { %v1502_v41 = vpop.permute.xlu1 %1501  ;;  %v1500_v42 = vpop.permute.xlu0 %1499  ;;  %v1421_v46 = vpack.c.bf16 %v1412_v7, %v1410_v40  ;;  %v1420_v54 = vpack.c.bf16 %v1411_v4, %v1409_v5  ;;  %v9151_v7 = vld [vmem:[#allocation8 + $0x68] sm:$0xff]  }
 0x203   : > { %v1510_v47 = vpop.permute.xlu1 %1509  ;;  %v1508_v48 = vpop.permute.xlu0 %1507 }
 0x204   : > { %v1521_v49 = vsel %vm1515_vm7, %v1510_v47, %v1502_v41  ;;  %v1520_v51 = vsel %vm1515_vm7, %v1508_v48, %v1500_v42  ;;  %v1517_v60 = vsel %vm1515_vm7, %v1502_v41, %v1510_v47  ;;  %v1516_v61 = vsel %vm1515_vm7, %v1500_v42, %v1508_v48 }
 0x205   : > { %8532 = vmatmul.mubr.msk.bf16.vlgmr.msra.gmra.mrb[0].mxu0 %vm776_vm2, %v9148_v43  ;;  %v1535_v52 = vmul.f32 %v1531_v44, %v1521_v49  ;;  %v1533_v53 = vmul.f32 %v1531_v44, %v1520_v51  ;;  %v1534_v18 = vmul.f32 %v1527_v58, %v1517_v60  ;;  %v1532_v20 = vmul.f32 %v1527_v58, %v1516_v61  ;;  %v9152_v51 = vld [vmem:[#allocation8 + $0x70] sm:$0xff]   ;;  %v9197_v60 = vld [vmem:[#allocation10 + $0xd0] ss:$8 sps:$4 sm:$0xff]  }
 0x206   : > { %1439 = vmatpush1.bf16.msra.mxu0 %v1418_v45  ;;  %1353 = vmatprep.mubr.bf16.mxu0 %v12880_v8  ;;  %v9198_v61 = vld [vmem:[#allocation10 + $0xe4] ss:$8 sps:$4 sm:$0xff]  }
 0x207   : > { %1440 = vmatprep.subr.bf16.mxu0 %v1421_v46  ;;  %v1506_v13 = vpop.permute.xlu1 %1505  ;;  %v1504_v55 = vpop.permute.xlu0 %1503  ;;  %v1546_v56 = vpack.c.bf16 %v1535_v52, %v1533_v53  ;;  %v1545_v27 = vpack.c.bf16 %v1534_v18, %v1532_v20  ;;  %2016 = vmatpush1.bf16.msra.mxu1 %v9197_v60 }
 0x208   : > { %2017 = vmatprep.subr.bf16.mxu1 %v9198_v61  ;;  %v10689_v61 = vld [vmem:[%s12939_s8 + $0x40] sm:$0xff] }
 0x20a   : > { %1441 = vmatpush1.bf16.msra.mxu0 %v1420_v54 }
 0x20b   : > { %1565 = vmatprep.subr.bf16.mxu0 %v1546_v56  ;;  %v1514_v62 = vpop.permute.xlu1 %1513  ;;  %v1512_v63 = vpop.permute.xlu0 %1511  ;;  %v9153_v56 = vld [vmem:[#allocation8 + $0x78] sm:$0xff]  }
 0x20c   : > { %v1523_v15 = vsel %vm1515_vm7, %v1514_v62, %v1506_v13  ;;  %v1522_v17 = vsel %vm1515_vm7, %v1512_v63, %v1504_v55  ;;  %v1519_v14 = vsel %vm1515_vm7, %v1506_v13, %v1514_v62  ;;  %v1518_v22 = vsel %vm1515_vm7, %v1504_v55, %v1512_v63  ;;  %v9200_v62 = vld [vmem:[#allocation10 + $0xe0] ss:$8 sps:$4 sm:$0xff]   ;;  %v9201_v63 = vld [vmem:[#allocation10 + $0xf4] ss:$8 sps:$4 sm:$0xff]  }
 0x20d   : > { %8533 = vmatmul.mubr.msk.bf16.gmra.mrb[4].mxu0 %vm776_vm2, %v9149_v57  ;;  %v1539_v21 = vmul.f32 %v1531_v44, %v1523_v15  ;;  %v1537_v23 = vmul.f32 %v1531_v44, %v1522_v17  ;;  %v1538_v28 = vmul.f32 %v1527_v58, %v1519_v14  ;;  %v1536_v29 = vmul.f32 %v1527_v58, %v1518_v22  ;;  %v9154_v57 = vld [vmem:[#allocation8 + $0x80] sm:$0xff]   ;;  %v9155_v58 = vld [vmem:[#allocation8 + $0x88] sm:$0xff]  }
 0x20e   : > { %1470 = vmatprep.mubr.bf16.mxu0 %v12880_v8  ;;  %2018 = vmatpush1.bf16.msra.mxu1 %v9200_v62  ;;  %v9203_v15 = vld [vmem:[#allocation10 + $0xf0] ss:$8 sps:$4 sm:$0xff]   ;;  %vm6312_vm7 = vcmp.lt.s32.totalorder %v10258_v11, 113 }
 0x20f   : > { %v1629_v24 = vpop.permute.xlu1 %1628  ;;  %v1627_v25 = vpop.permute.xlu0 %1626  ;;  %v1548_v31 = vpack.c.bf16 %v1539_v21, %v1537_v23  ;;  %v1547_v37 = vpack.c.bf16 %v1538_v28, %v1536_v29  ;;  %2019 = vmatprep.subr.bf16.mxu1 %v9201_v63  ;;  %v10694_v62 = vld [vmem:[%s12939_s8 + $0x48] sm:$0xff] }
 0x212   : > { %2020 = vmatpush1.bf16.msra.mxu1 %v9203_v15  ;;  %v10701_v15 = vrot.slane %v10689_v61, %v10303_v35 }
 0x213   : > { %v1637_v32 = vpop.permute.xlu1 %1636  ;;  %v1635_v33 = vpop.permute.xlu0 %1634 }
 0x214   : > { %v1648_v0 = vsel %vm1642_vm8, %v1637_v32, %v1629_v24  ;;  %v1647_v2 = vsel %vm1642_vm8, %v1635_v33, %v1627_v25  ;;  %v1644_v40 = vsel %vm1642_vm8, %v1629_v24, %v1637_v32  ;;  %v1643_v41 = vsel %vm1642_vm8, %v1627_v25, %v1635_v33 }
 0x215   : > { %8536 = vmatmul.mubr.msk.bf16.vlgmr.msra.gmra.mrb[0].mxu0 %vm776_vm2, %v9150_v26  ;;  %v1662_v34 = vmul.f32 %v8543_v30, %v1648_v0  ;;  %v1660_v36 = vmul.f32 %v8543_v30, %v1647_v2  ;;  %v1661_v4 = vmul.f32 %v8542_v39, %v1644_v40  ;;  %v1659_v5 = vmul.f32 %v8542_v39, %v1643_v41 }
 0x216   : > { %1566 = vmatpush1.bf16.msra.mxu0 %v1545_v27  ;;  %1480 = vmatprep.mubr.bf16.mxu0 %v12880_v8 }
 0x217   : > { %1567 = vmatprep.subr.bf16.mxu0 %v1548_v31  ;;  %v1633_v1 = vpop.permute.xlu1 %1632  ;;  %v1631_v3 = vpop.permute.xlu0 %1630  ;;  %v1673_v6 = vpack.c.bf16 %v1662_v34, %v1660_v36  ;;  %v1672_v52 = vpack.c.bf16 %v1661_v4, %v1659_v5 }
 0x21a   : > { %1568 = vmatpush1.bf16.msra.mxu0 %v1547_v37 }
 0x21b   : > { %1692 = vmatprep.subr.bf16.mxu0 %v1673_v6  ;;  %v1641_v42 = vpop.permute.xlu1 %1640 }
 0x21c   : > { %v1650_v43 = vsel %vm1642_vm8, %v1641_v42, %v1633_v1  ;;  %v1639_v44 = vpop.permute.xlu0 %1638  ;;  %v1646_v46 = vsel %vm1642_vm8, %v1633_v1, %v1641_v42 }
 0x21d   : > { %8537 = vmatmul.mubr.msk.bf16.gmra.mrb[4].mxu0 %vm776_vm2, %v9151_v7  ;;  %v1649_v45 = vsel %vm1642_vm8, %v1639_v44, %v1631_v3  ;;  %v1666_v47 = vmul.f32 %v8543_v30, %v1650_v43  ;;  %v1645_v48 = vsel %vm1642_vm8, %v1631_v3, %v1639_v44  ;;  %v1665_v53 = vmul.f32 %v8542_v39, %v1646_v46 }
 0x21e   : > { %1597 = vmatprep.mubr.bf16.mxu0 %v12880_v8  ;;  %v1664_v49 = vmul.f32 %v8543_v30, %v1649_v45  ;;  %v1663_v54 = vmul.f32 %v8542_v39, %v1645_v48  ;;  %vm6579_vm8 = vcmp.lt.s32.totalorder %v10258_v11, 112 }
 0x220   : > { %v1675_v13 = vpack.c.bf16 %v1666_v47, %v1664_v49  ;;  %v1674_v55 = vpack.c.bf16 %v1665_v53, %v1663_v54 }
 0x225   : > { %8540 = vmatmul.mubr.msk.bf16.vlgmr.msra.gmra.mrb[0].mxu0 %vm776_vm2, %v9152_v51 }
 0x226   : > { %1693 = vmatpush1.bf16.msra.mxu0 %v1672_v52  ;;  %1607 = vmatprep.mubr.bf16.mxu0 %v12880_v8 }
 0x227   : > { %1694 = vmatprep.subr.bf16.mxu0 %v1675_v13 }
 0x22a   : > { %1695 = vmatpush1.bf16.msra.mxu0 %v1674_v55  ;;  %v10573_v55 = vld [vmem:[%s10143_s27] sm:$0xff] }
 0x22c   : > { %v1761_v21 = vpop.permute.xlu1 %1760 }
 0x22d   : > { %8541 = vmatmul.mubr.msk.bf16.gmra.mrb[4].mxu0 %vm776_vm2, %v9153_v56  ;;  %v1756_v17 = vpop.permute.xlu0 %1755  ;;  %v10578_v56 = vld [vmem:[%s10143_s27 + $0x10] sm:$0xff] }
 0x22e   : > { %1724 = vmatprep.mubr.bf16.mxu0 %v12880_v8 }
 0x230   : > { %v1766_v32 = vpop.permute.xlu1 %1765 }
 0x231   : > { %v1771_v36 = vpop.permute.xlu0 %1770 }
 0x235   : > { %8546 = vmatmul.mubr.msk.bf16.vlgmr.msra.gmra.mrb[0].mxu0 %vm776_vm2, %v9154_v57  ;;  %v10583_v57 = vld [vmem:[%s10143_s27 + $0x8] sm:$0xff] }
 0x236   : > { %1734 = vmatprep.mubr.bf16.mxu0 %v12880_v8 }
 0x23d   : > { %8547 = vmatmul.mubr.msk.bf16.gmra.mrb[4].mxu0 %vm776_vm2, %v9155_v58  ;;  %v10588_v58 = vld [vmem:[%s10143_s27 + $0x18] sm:$0xff]  ;;  %s9699_s27 = smov 7  }
 0x23e   : > { %3692 = vmatprep.mubr.bf16.mxu0 %v12880_v8 }
 0x308   : > { %v1726_v18 = vpop.f32.mrb[0].mxu0 }
 0x309   : > { %v1773_v20 = vadd.f32 %v1756_v17, %v1726_v18  ;;  %v1728_v14 = vpop.f32.mrb[1].mxu0 }
 0x30a   : > { %v1774_v22 = vadd.f32 %v1756_v17, %v1728_v14  ;;  %v1730_v23 = vpop.f32.mrb[2].mxu0  ;;  %v10705_v17 = vrot.slane %v10694_v62, %v10303_v35 }
 0x30b   : > { %v1775_v24 = vadd.f32 %v1761_v21, %v1730_v23  ;;  %v1732_v25 = vpop.f32.mrb[3].mxu0  ;;  %v1781_v27 = vmax.f32 %v1773_v20, 0.0 }
 0x30c   : > { %v1776_v26 = vadd.f32 %v1761_v21, %v1732_v25  ;;  %v1782_v29 = vmax.f32 %v1774_v22, 0.0 }
 0x30d   : > { %v1783_v28 = vmax.f32 %v1775_v24, 0.0 }
 0x30e   : > { %v1784_v30 = vmax.f32 %v1776_v26, 0.0 }
 0x30f   : > { %v1793_v31 = vpack.c.bf16 %v1783_v28, %v1781_v27 }
 0x310   : > { %v1736_v33 = vpop.f32.mrb[4].mxu0  ;;  %v1794_v0 = vpack.c.bf16 %v1784_v30, %v1782_v29 }
 0x311   : > { %v1777_v2 = vadd.f32 %v1766_v32, %v1736_v33  ;;  %v1738_v34 = vpop.f32.mrb[5].mxu0 }
 0x312   : > { %v1778_v37 = vadd.f32 %v1766_v32, %v1738_v34  ;;  %v1740_v1 = vpop.f32.mrb[6].mxu0  ;;  %2021 = vmatprep.mubr.bf16.mxu1 %v1794_v0 }
 0x313   : > { %v1779_v3 = vadd.f32 %v1771_v36, %v1740_v1  ;;  %v1742_v6 = vpop.f32.mrb[7].mxu0  ;;  %2022 = vmatmul.mubr.bf16.vlgmr.msra.gmra.mrb[0].mxu1 %v1793_v31  ;;  %v1785_v39 = vmax.f32 %v1777_v2, 0.0 }
 0x314   : > { %v1780_v7 = vadd.f32 %v1771_v36, %v1742_v6  ;;  %v1786_v41 = vmax.f32 %v1778_v37, 0.0 }
 0x315   : > { %v1787_v40 = vmax.f32 %v1779_v3, 0.0 }
 0x316   : > { %v1788_v42 = vmax.f32 %v1780_v7, 0.0 }
 0x317   : > { %v1795_v43 = vpack.c.bf16 %v1787_v40, %v1785_v39 }
 0x318   : > { %v1796_v44 = vpack.c.bf16 %v1788_v42, %v1786_v41 }
 0x31a   : > { %2031 = vmatprep.mubr.bf16.mxu1 %v1796_v44 }
 0x31b   : > { %2032 = vmatmul.mubr.bf16.gmra.mrb[4].mxu1 %v1795_v43  ;;  %v9204_v43 = vld [vmem:[#allocation13] sm:$0xff]  }
 0x31c   : > { %2155 = vmatprep.mubr.bf16.mxu1 %v12880_v8 }
 0x3e6   : > { %v10534_v45 = vpop.f32.mrb[0].mxu1 }
 0x3e7   : > { %2077 = vrot.lane.b32.xlu1 %v10534_v45, %s9697_s14  ;;  %v10538_v4 = vpop.f32.mrb[1].mxu1 }
 0x3e8   : > { %v10540_v5 = vpop.f32.mrb[2].mxu1 }
 0x3e9   : > { %2079 = vrot.lane.b32.xlu0 %v10540_v5, %s9697_s14  ;;  %v10544_v46 = vpop.f32.mrb[3].mxu1  ;;  %v2817_v47 = vpack.c.bf16 %v10540_v5, %v10534_v45 }
 0x3ea   : > { %v2818_v48 = vpack.c.bf16 %v10544_v46, %v10538_v4 }
 0x3eb   : > { %2085 = vrot.lane.b32.xlu1 %v10538_v4, %s9697_s14 }
 0x3ed   : > { %2087 = vrot.lane.b32.xlu0 %v10544_v46, %s9697_s14 }
 0x3ee   : > { %v10554_v49 = vpop.f32.mrb[4].mxu1 }
 0x3ef   : > { %2081 = vrot.lane.b32.xlu1 %v10554_v49, %s9697_s14  ;;  %v10558_v51 = vpop.f32.mrb[5].mxu1 }
 0x3f0   : > { %v10560_v52 = vpop.f32.mrb[6].mxu1 }
 0x3f1   : > { %2083 = vrot.lane.b32.xlu0 %v10560_v52, %s9697_s14  ;;  %v10564_v53 = vpop.f32.mrb[7].mxu1  ;;  %v2819_v54 = vpack.c.bf16 %v10560_v52, %v10554_v49 }
 0x3f2   : > { %v2820_v13 = vpack.c.bf16 %v10564_v53, %v10558_v51 }
 0x3f3   : > { %2089 = vrot.lane.b32.xlu1 %v10558_v51, %s9697_s14 }
 0x3f5   : > { %2091 = vrot.lane.b32.xlu0 %v10564_v53, %s9697_s14 }
 0x3f7   : > { %2048 = vrot.lane.b32.xlu1 %v10573_v55, %s9697_s14 }
 0x3f9   : > { %2050 = vrot.lane.b32.xlu0 %v10578_v56, %s9697_s14 }
 0x3fb   : > { %2052 = vrot.lane.b32.xlu1 %v10583_v57, %s9697_s14 }
 0x3fd   : > { %2054 = vrot.lane.b32.xlu0 %v10588_v58, %s9697_s14 }
 0x3ff   : > { %2218 = vrot.lane.b32.xlu1 %v10573_v55, %s9698_s11 }
 0x401   : > { %2220 = vrot.lane.b32.xlu0 %v10578_v56, %s9698_s11 }
 0x403   : > { %2222 = vrot.lane.b32.xlu1 %v10583_v57, %s9698_s11 }
 0x405   : > { %2224 = vrot.lane.b32.xlu0 %v10588_v58, %s9698_s11 }
 0x407   : > { %2303 = vrot.lane.b32.xlu1 %v10534_v45, %s9698_s11 }
 0x409   : > { %2305 = vrot.lane.b32.xlu0 %v10540_v5, %s9698_s11 }
 0x40b   : > { %2311 = vrot.lane.b32.xlu1 %v10538_v4, %s9698_s11 }
 0x40d   : > { %2313 = vrot.lane.b32.xlu0 %v10544_v46, %s9698_s11 }
 0x40f   : > { %2307 = vrot.lane.b32.xlu1 %v10554_v49, %s9698_s11 }
 0x411   : > { %2309 = vrot.lane.b32.xlu0 %v10560_v52, %s9698_s11 }
 0x413   : > { %2315 = vrot.lane.b32.xlu1 %v10558_v51, %s9698_s11 }
 0x415   : > { %2317 = vrot.lane.b32.xlu0 %v10564_v53, %s9698_s11 }
 0x417   : > { %2397 = vrot.lane.b32.xlu1 %v10573_v55, %s9699_s27 }
 0x419   : > { %2399 = vrot.lane.b32.xlu0 %v10578_v56, %s9699_s27 }
 0x41b   : > { %2401 = vrot.lane.b32.xlu1 %v10583_v57, %s9699_s27 }
 0x41d   : > { %2403 = vrot.lane.b32.xlu0 %v10588_v58, %s9699_s27 }
 0x41f   : > { %2482 = vrot.lane.b32.xlu1 %v10534_v45, %s9699_s27 }
 0x421   : > { %2484 = vrot.lane.b32.xlu0 %v10540_v5, %s9699_s27 }
 0x423   : > { %2490 = vrot.lane.b32.xlu1 %v10538_v4, %s9699_s27 }
 0x425   : > { %2492 = vrot.lane.b32.xlu0 %v10544_v46, %s9699_s27 }
 0x427   : > { %2486 = vrot.lane.b32.xlu1 %v10554_v49, %s9699_s27 }
 0x429   : > { %2488 = vrot.lane.b32.xlu0 %v10560_v52, %s9699_s27 }
 0x42b   : > { %2494 = vrot.lane.b32.xlu1 %v10558_v51, %s9699_s27 }
 0x42d   : > { %2496 = vrot.lane.b32.xlu0 %v10564_v53, %s9699_s27 }
 0x42f   : > { %2576 = vrot.lane.b32.xlu1 %v10573_v55, %s9692_s21 }
 0x431   : > { %2578 = vrot.lane.b32.xlu0 %v10578_v56, %s9692_s21 }
 0x433   : > { %2580 = vrot.lane.b32.xlu1 %v10583_v57, %s9692_s21 }
 0x435   : > { %2582 = vrot.lane.b32.xlu0 %v10588_v58, %s9692_s21 }
 0x437   : > { %2660 = vrot.lane.b32.xlu1 %v10534_v45, %s9692_s21 }
 0x439   : > { %2662 = vrot.lane.b32.xlu0 %v10540_v5, %s9692_s21 }
 0x43b   : > { %2668 = vrot.lane.b32.xlu1 %v10538_v4, %s9692_s21 }
 0x43d   : > { %2670 = vrot.lane.b32.xlu0 %v10544_v46, %s9692_s21 }
 0x43f   : > { %2664 = vrot.lane.b32.xlu1 %v10554_v49, %s9692_s21 }
 0x441   : > { %2666 = vrot.lane.b32.xlu0 %v10560_v52, %s9692_s21 }
 0x443   : > { %2672 = vrot.lane.b32.xlu1 %v10558_v51, %s9692_s21 }
 0x445   : > { %2674 = vrot.lane.b32.xlu0 %v10564_v53, %s9692_s21 }
 0x447   : > { %2876 = vrot.lane.b32.xlu1 %v10573_v55, %s9693_s1 }
 0x449   : > { %2878 = vrot.lane.b32.xlu0 %v10578_v56, %s9693_s1 }
 0x44b   : > { %2880 = vrot.lane.b32.xlu1 %v10583_v57, %s9693_s1 }
 0x44d   : > { %2882 = vrot.lane.b32.xlu0 %v10588_v58, %s9693_s1 }
 0x44f   : > { %2960 = vrot.lane.b32.xlu1 %v10534_v45, %s9693_s1 }
 0x451   : > { %2962 = vrot.lane.b32.xlu0 %v10540_v5, %s9693_s1 }
 0x453   : > { %2968 = vrot.lane.b32.xlu1 %v10538_v4, %s9693_s1 }
 0x455   : > { %2970 = vrot.lane.b32.xlu0 %v10544_v46, %s9693_s1 }
 0x457   : > { %2964 = vrot.lane.b32.xlu1 %v10554_v49, %s9693_s1 }
 0x459   : > { %v2078_v60 = vpop.permute.xlu1 %2077  ;;  %2966 = vrot.lane.b32.xlu0 %v10560_v52, %s9693_s1 }
 0x45b   : > { %v2080_v63 = vpop.permute.xlu0 %2079  ;;  %2972 = vrot.lane.b32.xlu1 %v10558_v51, %s9693_s1 }
 0x45d   : > { %v2086_v18 = vpop.permute.xlu1 %2085  ;;  %2974 = vrot.lane.b32.xlu0 %v10564_v53, %s9693_s1 }
 0x45e   : > { %v2093_v20 = vsel %vm2056_vm9, %v2078_v60, %v2086_v18  ;;  %v2097_v14 = vsel %vm2056_vm9, %v2086_v18, %v2078_v60 }
 0x45f   : > { %v2088_v21 = vpop.permute.xlu0 %2087  ;;  %3054 = vrot.lane.b32.xlu1 %v10573_v55, %s9700_s20  ;;  %v2101_v24 = vmul.f32 %v2097_v14, %v10701_v15  ;;  %v2102_v25 = vmul.f32 %v2093_v20, %v10705_v17 }
 0x460   : > { %v2094_v22 = vsel %vm2056_vm9, %v2080_v63, %v2088_v21  ;;  %v2098_v23 = vsel %vm2056_vm9, %v2088_v21, %v2080_v63 }
 0x461   : > { %v2103_v26 = vmul.f32 %v2098_v23, %v10701_v15  ;;  %v2104_v27 = vmul.f32 %v2094_v22, %v10705_v17  ;;  %v2082_v28 = vpop.permute.xlu1 %2081  ;;  %3056 = vrot.lane.b32.xlu0 %v10578_v56, %s9700_s20 }
 0x463   : > { %v2111_v29 = vpack.c.bf16 %v2103_v26, %v2101_v24  ;;  %3058 = vrot.lane.b32.xlu1 %v10583_v57, %s9700_s20  ;;  %v2084_v30 = vpop.permute.xlu0 %2083  ;;  %v2112_v31 = vpack.c.bf16 %v2104_v27, %v2102_v25  ;;  %v10772_v27 = vrot.slane %v10689_v61, %v10261_v12 }
 0x465   : > { %2123 = vmatprep.subr.bf16.mxu1 %v2112_v31  ;;  %v2090_v32 = vpop.permute.xlu1 %2089  ;;  %3060 = vrot.lane.b32.xlu0 %v10588_v58, %s9700_s20 }
 0x466   : > { %v2095_v33 = vsel %vm2056_vm9, %v2082_v28, %v2090_v32  ;;  %v2099_v0 = vsel %vm2056_vm9, %v2090_v32, %v2082_v28  ;;  %2124 = vmatpush1.bf16.msra.mxu1 %v2111_v29  ;;  %v10776_v28 = vrot.slane %v10694_v62, %v10261_v12 }
 0x467   : > { %3139 = vrot.lane.b32.xlu1 %v10534_v45, %s9700_s20  ;;  %v2092_v2 = vpop.permute.xlu0 %2091  ;;  %v2105_v37 = vmul.f32 %v2099_v0, %v10701_v15  ;;  %v2106_v1 = vmul.f32 %v2095_v33, %v10705_v17 }
 0x468   : > { %v2096_v34 = vsel %vm2056_vm9, %v2084_v30, %v2092_v2  ;;  %v2100_v36 = vsel %vm2056_vm9, %v2092_v2, %v2084_v30 }
 0x469   : > { %v2107_v3 = vmul.f32 %v2100_v36, %v10701_v15  ;;  %v2108_v6 = vmul.f32 %v2096_v34, %v10705_v17  ;;  %v2049_v7 = vpop.permute.xlu1 %2048  ;;  %3141 = vrot.lane.b32.xlu0 %v10540_v5, %s9700_s20 }
 0x46b   : > { %v2113_v39 = vpack.c.bf16 %v2107_v3, %v2105_v37  ;;  %3147 = vrot.lane.b32.xlu1 %v10538_v4, %s9700_s20  ;;  %v2051_v40 = vpop.permute.xlu0 %2050  ;;  %v2114_v41 = vpack.c.bf16 %v2108_v6, %v2106_v1  ;;  %v9205_v6 = vld [vmem:[#allocation11] sm:$0xff]  }
 0x46d   : > { %v2053_v42 = vpop.permute.xlu1 %2052  ;;  %3149 = vrot.lane.b32.xlu0 %v10544_v46, %s9700_s20  ;;  %2125 = vmatprep.subr.bf16.mxu1 %v2114_v41 }
 0x46e   : > { %v2057_v44 = vsel %vm2056_vm9, %v2049_v7, %v2053_v42  ;;  %v2059_v60 = vsel %vm2056_vm9, %v2053_v42, %v2049_v7  ;;  %2126 = vmatpush1.bf16.msra.mxu1 %v2113_v39 }
 0x46f   : > { %v2069_v63 = vmul.f32 %v10701_v15, %v2059_v60  ;;  %v2070_v18 = vmul.f32 %v10705_v17, %v2057_v44  ;;  %3143 = vrot.lane.b32.xlu1 %v10554_v49, %s9700_s20  ;;  %v2055_v20 = vpop.permute.xlu0 %2054 }
 0x470   : > { %v2058_v14 = vsel %vm2056_vm9, %v2051_v40, %v2055_v20  ;;  %v2060_v21 = vsel %vm2056_vm9, %v2055_v20, %v2051_v40 }
 0x471   : > { %v2071_v22 = vmul.f32 %v10701_v15, %v2060_v21  ;;  %v2072_v23 = vmul.f32 %v10705_v17, %v2058_v14  ;;  %v2219_v24 = vpop.permute.xlu1 %2218  ;;  %3145 = vrot.lane.b32.xlu0 %v10560_v52, %s9700_s20  ;;  %8581 = vmatmul.mubr.msk.bf16.vlgmr.msra.gmra.mrb[8].mxu1 %vm776_vm2, %v9204_v43 }
 0x472   : > { %2207 = vmatprep.mubr.bf16.mxu1 %v12880_v8 }
 0x473   : > { %v2075_v25 = vpack.c.bf16 %v2071_v22, %v2069_v63  ;;  %3151 = vrot.lane.b32.xlu1 %v10558_v51, %s9700_s20  ;;  %v2221_v26 = vpop.permute.xlu0 %2220  ;;  %v2076_v29 = vpack.c.bf16 %v2072_v23, %v2070_v18 }
 0x475   : > { %v2223_v30 = vpop.permute.xlu1 %2222  ;;  %3153 = vrot.lane.b32.xlu0 %v10564_v53, %s9700_s20  ;;  %2175 = vmatprep.subr.bf16.mxu1 %v2076_v29 }
 0x476   : > { %v2227_v31 = vsel %vm2226_vm10, %v2219_v24, %v2223_v30  ;;  %v2229_v32 = vsel %vm2226_vm10, %v2223_v30, %v2219_v24  ;;  %2176 = vmatpush1.bf16.msra.mxu1 %v2075_v25  ;;  %v9206_v25 = vld [vmem:[#allocation11 + $0x8] sm:$0xff]  }
 0x477   : > { %v2239_v33 = vmul.f32 %v10772_v27, %v2229_v32  ;;  %v2240_v0 = vmul.f32 %v10776_v28, %v2227_v31  ;;  %3233 = vrot.lane.b32.xlu1 %v10573_v55, %s9701_s18  ;;  %v2225_v2 = vpop.permute.xlu0 %2224 }
 0x478   : > { %v2228_v34 = vsel %vm2226_vm10, %v2221_v26, %v2225_v2  ;;  %v2230_v36 = vsel %vm2226_vm10, %v2225_v2, %v2221_v26 }
 0x479   : > { %v2241_v37 = vmul.f32 %v10772_v27, %v2230_v36  ;;  %v2242_v1 = vmul.f32 %v10776_v28, %v2228_v34  ;;  %v2304_v3 = vpop.permute.xlu1 %2303  ;;  %3235 = vrot.lane.b32.xlu0 %v10578_v56, %s9701_s18 }
 0x47b   : > { %v2246_v7 = vpack.c.bf16 %v2241_v37, %v2239_v33  ;;  %3237 = vrot.lane.b32.xlu1 %v10583_v57, %s9701_s18  ;;  %v2306_v39 = vpop.permute.xlu0 %2305  ;;  %v2247_v40 = vpack.c.bf16 %v2242_v1, %v2240_v0 }
 0x47d   : > { %v2312_v41 = vpop.permute.xlu1 %2311  ;;  %3239 = vrot.lane.b32.xlu0 %v10588_v58, %s9701_s18  ;;  %8583 = vmatmul.mubr.msk.bf16.vlgmr.msra.gmra.mrb[8].mxu1 %vm2171_vm11, %v9205_v6 }
 0x47e   : > { %v2319_v42 = vsel %vm2226_vm10, %v2304_v3, %v2312_v41  ;;  %2256 = vmatprep.subr.bf16.mxu1 %v2247_v40  ;;  %2288 = vmatprep.mubr.bf16.mxu1 %v12880_v8  ;;  %v2323_v14 = vsel %vm2226_vm10, %v2312_v41, %v2304_v3 }
 0x47f   : > { %2257 = vmatpush1.bf16.msra.mxu1 %v2246_v7  ;;  %3318 = vrot.lane.b32.xlu1 %v10534_v45, %s9701_s18  ;;  %v2314_v43 = vpop.permute.xlu0 %2313  ;;  %v2328_v60 = vmul.f32 %v2319_v42, %v10776_v28  ;;  %v2327_v26 = vmul.f32 %v2323_v14, %v10772_v27  ;;  %v10845_v7 = vrot.slane %v10689_v61, %v10329_v19 }
 0x480   : > { %v2320_v44 = vsel %vm2226_vm10, %v2306_v39, %v2314_v43  ;;  %v2324_v63 = vsel %vm2226_vm10, %v2314_v43, %v2306_v39  ;;  %v10849_v39 = vrot.slane %v10694_v62, %v10329_v19 }
 0x481   : > { %v2330_v18 = vmul.f32 %v2320_v44, %v10776_v28  ;;  %v2308_v20 = vpop.permute.xlu1 %2307  ;;  %3320 = vrot.lane.b32.xlu0 %v10540_v5, %s9701_s18  ;;  %v2329_v23 = vmul.f32 %v2324_v63, %v10772_v27 }
 0x483   : > { %3326 = vrot.lane.b32.xlu1 %v10538_v4, %s9701_s18  ;;  %v2310_v21 = vpop.permute.xlu0 %2309  ;;  %v2339_v22 = vpack.c.bf16 %v2330_v18, %v2328_v60  ;;  %v2338_v32 = vpack.c.bf16 %v2329_v23, %v2327_v26  ;;  %v9207_v23 = vld [vmem:[#allocation13 + $0x8] sm:$0xff]  }
 0x485   : > { %v2316_v24 = vpop.permute.xlu1 %2315  ;;  %3328 = vrot.lane.b32.xlu0 %v10544_v46, %s9701_s18  ;;  %2350 = vmatprep.subr.bf16.mxu1 %v2339_v22 }
 0x486   : > { %v2321_v29 = vsel %vm2226_vm10, %v2308_v20, %v2316_v24  ;;  %v2325_v30 = vsel %vm2226_vm10, %v2316_v24, %v2308_v20 }
 0x487   : > { %3322 = vrot.lane.b32.xlu1 %v10554_v49, %s9701_s18  ;;  %v2318_v31 = vpop.permute.xlu0 %2317  ;;  %v2331_v33 = vmul.f32 %v2325_v30, %v10772_v27  ;;  %v2332_v34 = vmul.f32 %v2321_v29, %v10776_v28 }
 0x488   : > { %v2322_v0 = vsel %vm2226_vm10, %v2310_v21, %v2318_v31  ;;  %v2326_v2 = vsel %vm2226_vm10, %v2318_v31, %v2310_v21 }
 0x489   : > { %v2333_v36 = vmul.f32 %v2326_v2, %v10772_v27  ;;  %v2334_v37 = vmul.f32 %v2322_v0, %v10776_v28  ;;  %v2398_v1 = vpop.permute.xlu1 %2397  ;;  %3324 = vrot.lane.b32.xlu0 %v10560_v52, %s9701_s18  ;;  %8585 = vmatmul.mubr.msk.bf16.vlgmr.msra.gmra.mrb[8].mxu1 %vm2171_vm11, %v9206_v25 }
 0x48a   : > { %2351 = vmatpush1.bf16.msra.mxu1 %v2338_v32  ;;  %2382 = vmatprep.mubr.bf16.mxu1 %v12880_v8 }
 0x48b   : > { %v2340_v3 = vpack.c.bf16 %v2333_v36, %v2331_v33  ;;  %3330 = vrot.lane.b32.xlu1 %v10558_v51, %s9701_s18  ;;  %v2400_v6 = vpop.permute.xlu0 %2399  ;;  %v2341_v40 = vpack.c.bf16 %v2334_v37, %v2332_v34 }
 0x48d   : > { %v2402_v41 = vpop.permute.xlu1 %2401  ;;  %3332 = vrot.lane.b32.xlu0 %v10564_v53, %s9701_s18  ;;  %2352 = vmatprep.subr.bf16.mxu1 %v2341_v40  ;;  %v9208_v40 = vld [vmem:[#allocation11 + $0x10] sm:$0xff]  }
 0x48e   : > { %v2406_v42 = vsel %vm2405_vm12, %v2398_v1, %v2402_v41  ;;  %v2408_v43 = vsel %vm2405_vm12, %v2402_v41, %v2398_v1  ;;  %2353 = vmatpush1.bf16.msra.mxu1 %v2340_v3 }
 0x48f   : > { %v2418_v44 = vmul.f32 %v10845_v7, %v2408_v43  ;;  %v2419_v60 = vmul.f32 %v10849_v39, %v2406_v42  ;;  %3412 = vrot.lane.b32.xlu1 %v10573_v55, %s9702_s25  ;;  %v2404_v63 = vpop.permute.xlu0 %2403 }
 0x490   : > { %v2407_v18 = vsel %vm2405_vm12, %v2400_v6, %v2404_v63  ;;  %v2409_v20 = vsel %vm2405_vm12, %v2404_v63, %v2400_v6 }
 0x491   : > { %v2420_v14 = vmul.f32 %v10845_v7, %v2409_v20  ;;  %v2421_v21 = vmul.f32 %v10849_v39, %v2407_v18  ;;  %v2483_v22 = vpop.permute.xlu1 %2482  ;;  %3414 = vrot.lane.b32.xlu0 %v10578_v56, %s9702_s25 }
 0x493   : > { %v2425_v24 = vpack.c.bf16 %v2420_v14, %v2418_v44  ;;  %3416 = vrot.lane.b32.xlu1 %v10583_v57, %s9702_s25  ;;  %v2485_v25 = vpop.permute.xlu0 %2484  ;;  %v2426_v26 = vpack.c.bf16 %v2421_v21, %v2419_v60 }
 0x495   : > { %v2491_v29 = vpop.permute.xlu1 %2490  ;;  %3418 = vrot.lane.b32.xlu0 %v10588_v58, %s9702_s25  ;;  %8587 = vmatmul.mubr.msk.bf16.vlgmr.msra.gmra.mrb[8].mxu1 %vm776_vm2, %v9207_v23 }
 0x496   : > { %v2498_v30 = vsel %vm2405_vm12, %v2483_v22, %v2491_v29  ;;  %2435 = vmatprep.subr.bf16.mxu1 %v2426_v26  ;;  %2467 = vmatprep.mubr.bf16.mxu1 %v12880_v8  ;;  %v2502_v36 = vsel %vm2405_vm12, %v2491_v29, %v2483_v22  ;;  %v10917_v26 = vrot.slane %v10689_v61, %v10369_v16 }
 0x497   : > { %2436 = vmatpush1.bf16.msra.mxu1 %v2425_v24  ;;  %3497 = vrot.lane.b32.xlu1 %v10534_v45, %s9702_s25  ;;  %v2493_v31 = vpop.permute.xlu0 %2492  ;;  %v2507_v33 = vmul.f32 %v2498_v30, %v10849_v39  ;;  %v2506_v41 = vmul.f32 %v2502_v36, %v10845_v7  ;;  %v10921_v29 = vrot.slane %v10694_v62, %v10369_v16 }
 0x498   : > { %v2499_v32 = vsel %vm2405_vm12, %v2485_v25, %v2493_v31  ;;  %v2503_v0 = vsel %vm2405_vm12, %v2493_v31, %v2485_v25  ;;  %v2046_v31 = vld [vmem:[%s12940_s22 + $0x20] sm:$0xff] }
 0x499   : > { %v2509_v2 = vmul.f32 %v2499_v32, %v10849_v39  ;;  %v2487_v34 = vpop.permute.xlu1 %2486  ;;  %3499 = vrot.lane.b32.xlu0 %v10540_v5, %s9702_s25  ;;  %v2508_v3 = vmul.f32 %v2503_v0, %v10845_v7 }
 0x49b   : > { %3505 = vrot.lane.b32.xlu1 %v10538_v4, %s9702_s25  ;;  %v2489_v37 = vpop.permute.xlu0 %2488  ;;  %v2518_v1 = vpack.c.bf16 %v2509_v2, %v2507_v33  ;;  %v2517_v60 = vpack.c.bf16 %v2508_v3, %v2506_v41  ;;  %v2047_v2 = vld [vmem:[%s12940_s22 + $0x28] sm:$0xff] }
 0x49d   : > { %v2495_v6 = vpop.permute.xlu1 %2494  ;;  %3507 = vrot.lane.b32.xlu0 %v10544_v46, %s9702_s25  ;;  %2529 = vmatprep.subr.bf16.mxu1 %v2518_v1 }
 0x49e   : > { %v2500_v42 = vsel %vm2405_vm12, %v2487_v34, %v2495_v6  ;;  %v2504_v43 = vsel %vm2405_vm12, %v2495_v6, %v2487_v34 }
 0x49f   : > { %3501 = vrot.lane.b32.xlu1 %v10554_v49, %s9702_s25  ;;  %v2497_v44 = vpop.permute.xlu0 %2496  ;;  %v2510_v63 = vmul.f32 %v2504_v43, %v10845_v7  ;;  %v2511_v14 = vmul.f32 %v2500_v42, %v10849_v39  ;;  %v9209_v42 = vld [vmem:[#allocation13 + $0x10] sm:$0xff]  }
 0x4a0   : > { %v2501_v18 = vsel %vm2405_vm12, %v2489_v37, %v2497_v44  ;;  %v2505_v20 = vsel %vm2405_vm12, %v2497_v44, %v2489_v37 }
 0x4a1   : > { %v2512_v21 = vmul.f32 %v2505_v20, %v10845_v7  ;;  %v2513_v22 = vmul.f32 %v2501_v18, %v10849_v39  ;;  %v2577_v23 = vpop.permute.xlu1 %2576  ;;  %3503 = vrot.lane.b32.xlu0 %v10560_v52, %s9702_s25  ;;  %8589 = vmatmul.mubr.msk.bf16.vlgmr.msra.gmra.mrb[8].mxu1 %vm2171_vm11, %v9208_v40 }
 0x4a2   : > { %2530 = vmatpush1.bf16.msra.mxu1 %v2517_v60  ;;  %2561 = vmatprep.mubr.bf16.mxu1 %v12880_v8 }
 0x4a3   : > { %v2519_v24 = vpack.c.bf16 %v2512_v21, %v2510_v63  ;;  %3509 = vrot.lane.b32.xlu1 %v10558_v51, %s9702_s25  ;;  %v2579_v25 = vpop.permute.xlu0 %2578  ;;  %v2520_v30 = vpack.c.bf16 %v2513_v22, %v2511_v14 }
 0x4a5   : > { %v2581_v32 = vpop.permute.xlu1 %2580  ;;  %3511 = vrot.lane.b32.xlu0 %v10564_v53, %s9702_s25  ;;  %2531 = vmatprep.subr.bf16.mxu1 %v2520_v30 }
 0x4a6   : > { %v2584_v33 = vsel %vm1048_vm4, %v2577_v23, %v2581_v32  ;;  %v2586_v0 = vsel %vm1048_vm4, %v2581_v32, %v2577_v23  ;;  %2532 = vmatpush1.bf16.msra.mxu1 %v2519_v24 }
 0x4a7   : > { %v2596_v34 = vmul.f32 %v10917_v26, %v2586_v0  ;;  %v2597_v36 = vmul.f32 %v10921_v29, %v2584_v33  ;;  %3593 = vperm.xlu1 %9137, %v2046_v31   ;;  %v2583_v37 = vpop.permute.xlu0 %2582  ;;  %v9210_v0 = vld [vmem:[#allocation11 + $0x18] sm:$0xff]  }
 0x4a8   : > { %v2585_v1 = vsel %vm1048_vm4, %v2579_v25, %v2583_v37  ;;  %v2587_v3 = vsel %vm1048_vm4, %v2583_v37, %v2579_v25 }
 0x4a9   : > { %v2598_v6 = vmul.f32 %v10917_v26, %v2587_v3  ;;  %v2599_v40 = vmul.f32 %v10921_v29, %v2585_v1  ;;  %v2661_v41 = vpop.permute.xlu1 %2660  ;;  %3598 = vperm.xlu0 %9136, %v2047_v2  }
 0x4ab   : > { %v2603_v43 = vpack.c.bf16 %v2598_v6, %v2596_v34  ;;  %v2663_v44 = vpop.permute.xlu0 %2662  ;;  %v2604_v60 = vpack.c.bf16 %v2599_v40, %v2597_v36 }
 0x4ad   : > { %v2669_v63 = vpop.permute.xlu1 %2668  ;;  %8591 = vmatmul.mubr.msk.bf16.vlgmr.msra.gmra.mrb[8].mxu1 %vm776_vm2, %v9209_v42  ;;  %2613 = vmatprep.subr.bf16.mxu1 %v2604_v60 }
 0x4ae   : > { %v2676_v18 = vsel %vm1048_vm4, %v2661_v41, %v2669_v63  ;;  %2614 = vmatpush1.bf16.msra.mxu1 %v2603_v43  ;;  %2645 = vmatprep.mubr.bf16.mxu1 %v12880_v8  ;;  %v2680_v25 = vsel %vm1048_vm4, %v2669_v63, %v2661_v41 }
 0x4af   : > { %v2671_v20 = vpop.permute.xlu0 %2670  ;;  %v2685_v21 = vmul.f32 %v2676_v18, %v10921_v29  ;;  %v2684_v2 = vmul.f32 %v2680_v25, %v10917_v26 }
 0x4b0   : > { %v2677_v14 = vsel %vm1048_vm4, %v2663_v44, %v2671_v20  ;;  %v2681_v22 = vsel %vm1048_vm4, %v2671_v20, %v2663_v44  ;;  %v2758_v20 = vpack.c.bf16 %v10588_v58, %v10583_v57 }
 0x4b1   : > { %v2687_v23 = vmul.f32 %v2677_v14, %v10921_v29  ;;  %v2665_v24 = vpop.permute.xlu1 %2664  ;;  %v2686_v32 = vmul.f32 %v2681_v22, %v10917_v26 }
 0x4b3   : > { %v2667_v30 = vpop.permute.xlu0 %2666  ;;  %v2696_v31 = vpack.c.bf16 %v2687_v23, %v2685_v21  ;;  %v2695_v1 = vpack.c.bf16 %v2686_v32, %v2684_v2  ;;  %v9211_v23 = vld [vmem:[#allocation13 + $0x18] sm:$0xff]  }
 0x4b5   : > { %v2673_v33 = vpop.permute.xlu1 %2672  ;;  %2707 = vmatprep.subr.bf16.mxu1 %v2696_v31 }
 0x4b6   : > { %v2678_v34 = vsel %vm1048_vm4, %v2665_v24, %v2673_v33  ;;  %v2682_v36 = vsel %vm1048_vm4, %v2673_v33, %v2665_v24  ;;  %v2757_v24 = vpack.c.bf16 %v10578_v56, %v10573_v55  ;;  %v10986_v56 = vrot.slane %v10694_v62, %v10397_v59 }
 0x4b7   : > { %v2675_v37 = vpop.permute.xlu0 %2674  ;;  %v2688_v40 = vmul.f32 %v2682_v36, %v10917_v26  ;;  %v2689_v41 = vmul.f32 %v2678_v34, %v10921_v29 }
 0x4b8   : > { %v2679_v3 = vsel %vm1048_vm4, %v2667_v30, %v2675_v37  ;;  %v2683_v6 = vsel %vm1048_vm4, %v2675_v37, %v2667_v30 }
 0x4b9   : > { %v2690_v42 = vmul.f32 %v2683_v6, %v10917_v26  ;;  %v2691_v43 = vmul.f32 %v2679_v3, %v10921_v29  ;;  %v2877_v44 = vpop.permute.xlu1 %2876  ;;  %8593 = vmatmul.mubr.msk.bf16.vlgmr.msra.gmra.mrb[8].mxu1 %vm2171_vm11, %v9210_v0  ;;  %v9212_v0 = vld [vmem:[#allocation11 + $0x20] sm:$0xff]   ;;  %v11004_v3 = vrot.slane %v10689_v61, %v10397_v59 }
 0x4ba   : > { %2708 = vmatpush1.bf16.msra.mxu1 %v2695_v1  ;;  %2739 = vmatprep.mubr.bf16.mxu1 %v12880_v8 }
 0x4bb   : > { %v2697_v60 = vpack.c.bf16 %v2690_v42, %v2688_v40  ;;  %v2879_v63 = vpop.permute.xlu0 %2878  ;;  %v2698_v18 = vpack.c.bf16 %v2691_v43, %v2689_v41  ;;  %v9213_v41 = vld [vmem:[#allocation13 + $0x20] sm:$0xff]  }
 0x4bd   : > { %v2881_v14 = vpop.permute.xlu1 %2880  ;;  %2709 = vmatprep.subr.bf16.mxu1 %v2698_v18 }
 0x4be   : > { %2710 = vmatpush1.bf16.msra.mxu1 %v2697_v60  ;;  %v2886_v32 = vsel %vm1261_vm5, %v2881_v14, %v2877_v44  ;;  %v2884_v34 = vsel %vm1261_vm5, %v2877_v44, %v2881_v14 }
 0x4bf   : > { %v2883_v21 = vpop.permute.xlu0 %2882  ;;  %2767 = vmatprep.subr.bf16.mxu1 %v2758_v20  ;;  %v2897_v2 = vmul.f32 %v10986_v56, %v2886_v32  ;;  %v2896_v5 = vmul.f32 %v11004_v3, %v2884_v34 }
 0x4c0   : > { %v2887_v55 = vsel %vm1261_vm5, %v2883_v21, %v2879_v63  ;;  %v2885_v36 = vsel %vm1261_vm5, %v2879_v63, %v2883_v21 }
 0x4c1   : > { %v2961_v22 = vpop.permute.xlu1 %2960  ;;  %v2899_v4 = vmul.f32 %v10986_v56, %v2887_v55  ;;  %v9214_v55 = vld [vmem:[#allocation11 + $0x28] sm:$0xff]  }
 0x4c3   : > { %v2963_v25 = vpop.permute.xlu0 %2962  ;;  %v2904_v1 = vpack.c.bf16 %v2899_v4, %v2897_v2 }
 0x4c5   : > { %v2969_v30 = vpop.permute.xlu1 %2968  ;;  %8595 = vmatmul.mubr.msk.bf16.vlgmr.msra.gmra.mrb[8].mxu1 %vm776_vm2, %v9211_v23 }
 0x4c6   : > { %2768 = vmatpush1.bf16.msra.mxu1 %v2757_v24  ;;  %2799 = vmatprep.mubr.bf16.mxu1 %v12880_v8  ;;  %v2980_v53 = vsel %vm1261_vm5, %v2969_v30, %v2961_v22  ;;  %v2976_v20 = vsel %vm1261_vm5, %v2961_v22, %v2969_v30  ;;  %v11046_v22 = vrot.slane %v10694_v62, %v10438_v50 }
 0x4c7   : > { %2829 = vmatprep.subr.bf16.mxu1 %v2818_v48  ;;  %v2971_v57 = vpop.permute.xlu0 %2970  ;;  %v2985_v43 = vmul.f32 %v2980_v53, %v10986_v56 }
 0x4c8   : > { %v2981_v6 = vsel %vm1261_vm5, %v2971_v57, %v2963_v25 }
 0x4c9   : > { %v2965_v58 = vpop.permute.xlu1 %2964 }
 0x4cb   : > { %v2967_v31 = vpop.permute.xlu0 %2966 }
 0x4cd   : > { %v2973_v33 = vpop.permute.xlu1 %2972 }
 0x4ce   : > { %v2982_v23 = vsel %vm1261_vm5, %v2973_v33, %v2965_v58  ;;  %v2978_v2 = vsel %vm1261_vm5, %v2965_v58, %v2973_v33 }
 0x4cf   : > { %v2975_v46 = vpop.permute.xlu0 %2974  ;;  %v2989_v4 = vmul.f32 %v2982_v23, %v10986_v56 }
 0x4d0   : > { %v2983_v18 = vsel %vm1261_vm5, %v2975_v46, %v2967_v31 }
 0x4d1   : > { %v3055_v48 = vpop.permute.xlu1 %3054  ;;  %8597 = vmatmul.mubr.msk.bf16.vlgmr.msra.gmra.mrb[8].mxu1 %vm2171_vm11, %v9212_v0  ;;  %v2991_v32 = vmul.f32 %v2983_v18, %v10986_v56  ;;  %v2984_v0 = vmul.f32 %v2976_v20, %v11004_v3  ;;  %v9215_v18 = vld [vmem:[#allocation13 + $0x28] sm:$0xff]  }
 0x4d2   : > { %2830 = vmatpush1.bf16.msra.mxu1 %v2817_v47  ;;  %2861 = vmatprep.mubr.bf16.mxu1 %v12880_v8  ;;  %v2898_v47 = vmul.f32 %v11004_v3, %v2885_v36 }
 0x4d3   : > { %2831 = vmatprep.subr.bf16.mxu1 %v2820_v13  ;;  %v3057_v37 = vpop.permute.xlu0 %3056  ;;  %v2987_v13 = vmul.f32 %v2981_v6, %v10986_v56  ;;  %v2988_v6 = vmul.f32 %v2978_v2, %v11004_v3 }
 0x4d4   : > { %v2903_v42 = vpack.c.bf16 %v2898_v47, %v2896_v5  ;;  %v2998_v47 = vpack.c.bf16 %v2991_v32, %v2989_v4 }
 0x4d5   : > { %v3059_v45 = vpop.permute.xlu1 %3058  ;;  %v2996_v49 = vpack.c.bf16 %v2987_v13, %v2985_v43 }
 0x4d6   : > { %2832 = vmatpush1.bf16.msra.mxu1 %v2819_v54  ;;  %v2977_v54 = vsel %vm1261_vm5, %v2963_v25, %v2971_v57  ;;  %v3065_v24 = vsel %vm3062_vm13, %v3059_v45, %v3055_v48  ;;  %v2979_v57 = vsel %vm1261_vm5, %v2967_v31, %v2975_v46  ;;  %v3063_v58 = vsel %vm3062_vm13, %v3055_v48, %v3059_v45 }
 0x4d7   : > { %v3061_v51 = vpop.permute.xlu0 %3060  ;;  %2913 = vmatprep.subr.bf16.mxu1 %v2904_v1  ;;  %v2986_v21 = vmul.f32 %v2977_v54, %v11004_v3  ;;  %v3076_v34 = vmul.f32 %v11046_v22, %v3065_v24  ;;  %v2990_v1 = vmul.f32 %v2979_v57, %v11004_v3 }
 0x4d8   : > { %v3066_v25 = vsel %vm3062_vm13, %v3061_v51, %v3057_v37  ;;  %v3064_v33 = vsel %vm3062_vm13, %v3057_v37, %v3061_v51 }
 0x4d9   : > { %v11016_v40 = vpop.permute.xlu1 %3139  ;;  %v3078_v36 = vmul.f32 %v11046_v22, %v3066_v25  ;;  %v2995_v46 = vpack.c.bf16 %v2986_v21, %v2984_v0 }
 0x4db   : > { %v11019_v44 = vpop.permute.xlu0 %3141  ;;  %v3083_v13 = vpack.c.bf16 %v3078_v36, %v3076_v34 }
 0x4dd   : > { %v11021_v60 = vpop.permute.xlu1 %3147  ;;  %8599 = vmatmul.mubr.msk.bf16.vlgmr.msra.gmra.mrb[8].mxu1 %vm776_vm2, %v9213_v41  ;;  %v2997_v41 = vpack.c.bf16 %v2990_v1, %v2988_v6  ;;  %v9216_v1 = vld [vmem:[#allocation11 + $0x30] sm:$0xff]  }
 0x4de   : > { %2914 = vmatpush1.bf16.msra.mxu1 %v2903_v42  ;;  %2945 = vmatprep.mubr.bf16.mxu1 %v12880_v8  ;;  %v11064_v42 = vrot.slane %v10689_v61, %v10438_v50  ;;  %v3159_v37 = vsel %vm3062_vm13, %v11021_v60, %v11016_v40  ;;  %v3155_v2 = vsel %vm3062_vm13, %v11016_v40, %v11021_v60 }
 0x4df   : > { %3007 = vmatprep.subr.bf16.mxu1 %v2996_v49  ;;  %v3150_v52 = vpop.permute.xlu0 %3149  ;;  %v3164_v21 = vmul.f32 %v3159_v37, %v11046_v22  ;;  %v11104_v40 = vrot.slane %v10694_v62, %v10466_v38 }
 0x4e0   : > { %v3075_v49 = vmul.f32 %v11064_v42, %v3063_v58  ;;  %v3077_v54 = vmul.f32 %v11064_v42, %v3064_v33  ;;  %v3160_v48 = vsel %vm3062_vm13, %v3150_v52, %v11019_v44  ;;  %v3156_v32 = vsel %vm3062_vm13, %v11019_v44, %v3150_v52 }
 0x4e1   : > { %v11027_v63 = vpop.permute.xlu1 %3143  ;;  %v3166_v51 = vmul.f32 %v3160_v48, %v11046_v22  ;;  %v3165_v4 = vmul.f32 %v3156_v32, %v11064_v42 }
 0x4e2   : > { %v3082_v20 = vpack.c.bf16 %v3077_v54, %v3075_v49 }
 0x4e3   : > { %v3146_v14 = vpop.permute.xlu0 %3145  ;;  %v3175_v25 = vpack.c.bf16 %v3166_v51, %v3164_v21  ;;  %v11123_v51 = vrot.slane %v10689_v61, %v10466_v38 }
 0x4e5   : > { %v3152_v30 = vpop.permute.xlu1 %3151 }
 0x4e6   : > { %v3161_v34 = vsel %vm3062_vm13, %v3152_v30, %v11027_v63  ;;  %v3157_v6 = vsel %vm3062_vm13, %v11027_v63, %v3152_v30 }
 0x4e7   : > { %v3154_v31 = vpop.permute.xlu0 %3153  ;;  %v3168_v58 = vmul.f32 %v3161_v34, %v11046_v22  ;;  %v3167_v49 = vmul.f32 %v3157_v6, %v11064_v42 }
 0x4e8   : > { %v3162_v0 = vsel %vm3062_vm13, %v3154_v31, %v3146_v14  ;;  %v3158_v36 = vsel %vm3062_vm13, %v3146_v14, %v3154_v31 }
 0x4e9   : > { %v3234_v5 = vpop.permute.xlu1 %3233  ;;  %8601 = vmatmul.mubr.msk.bf16.vlgmr.msra.gmra.mrb[8].mxu1 %vm2171_vm11, %v9214_v55 }
 0x4ea   : > { %3008 = vmatpush1.bf16.msra.mxu1 %v2995_v46  ;;  %3039 = vmatprep.mubr.bf16.mxu1 %v12880_v8  ;;  %v3170_v46 = vmul.f32 %v3162_v0, %v11046_v22 }
 0x4eb   : > { %3009 = vmatprep.subr.bf16.mxu1 %v2998_v47  ;;  %v3236_v53 = vpop.permute.xlu0 %3235  ;;  %v3163_v47 = vmul.f32 %v3155_v2, %v11064_v42 }
 0x4ec   : > { %v3177_v62 = vpack.c.bf16 %v3170_v46, %v3168_v58 }
 0x4ed   : > { %v3238_v43 = vpop.permute.xlu1 %3237 }
 0x4ee   : > { %3010 = vmatpush1.bf16.msra.mxu1 %v2997_v41  ;;  %v3244_v44 = vsel %vm3241_vm14, %v3238_v43, %v3234_v5  ;;  %v3169_v41 = vmul.f32 %v3158_v36, %v11064_v42  ;;  %v3242_v63 = vsel %vm3241_vm14, %v3234_v5, %v3238_v43 }
 0x4ef   : > { %v3240_v45 = vpop.permute.xlu0 %3239  ;;  %3092 = vmatprep.subr.bf16.mxu1 %v3083_v13  ;;  %v3255_v33 = vmul.f32 %v11104_v40, %v3244_v44  ;;  %v3174_v13 = vpack.c.bf16 %v3165_v4, %v3163_v47 }
 0x4f0   : > { %v3245_v52 = vsel %vm3241_vm14, %v3240_v45, %v3236_v53  ;;  %v3243_v30 = vsel %vm3241_vm14, %v3236_v53, %v3240_v45  ;;  %v3176_v37 = vpack.c.bf16 %v3169_v41, %v3167_v49  ;;  %v9217_v45 = vld [vmem:[#allocation13 + $0x30] sm:$0xff]  }
 0x4f1   : > { %v11077_v23 = vpop.permute.xlu1 %3318  ;;  %v3257_v14 = vmul.f32 %v11104_v40, %v3245_v52  ;;  %v3256_v21 = vmul.f32 %v11123_v51, %v3243_v30 }
 0x4f3   : > { %v3321_v24 = vpop.permute.xlu0 %3320  ;;  %v3262_v48 = vpack.c.bf16 %v3257_v14, %v3255_v33  ;;  %v11158_v33 = vld [vmem:[%s12939_s8 + $0x68] ss:$0 sm:$0xff] }
 0x4f5   : > { %8603 = vmatmul.mubr.msk.bf16.vlgmr.msra.gmra.mrb[8].mxu1 %vm776_vm2, %v9215_v18  ;;  %v3327_v55 = vpop.permute.xlu1 %3326 }
 0x4f6   : > { %3093 = vmatpush1.bf16.msra.mxu1 %v3082_v20  ;;  %3124 = vmatprep.mubr.bf16.mxu1 %v12880_v8  ;;  %v3254_v20 = vmul.f32 %v11123_v51, %v3242_v63  ;;  %v3338_v5 = vsel %vm3241_vm14, %v3327_v55, %v11077_v23  ;;  %v3334_v36 = vsel %vm3241_vm14, %v11077_v23, %v3327_v55  ;;  %v9218_v23 = vld [vmem:[#allocation11 + $0x38] sm:$0xff]  }
 0x4f7   : > { %3186 = vmatprep.subr.bf16.mxu1 %v3175_v25  ;;  %v3329_v57 = vpop.permute.xlu0 %3328  ;;  %v3343_v32 = vmul.f32 %v3338_v5, %v11104_v40  ;;  %v3342_v55 = vmul.f32 %v3334_v36, %v11123_v51 }
 0x4f8   : > { %v3339_v25 = vsel %vm3241_vm14, %v3329_v57, %v3321_v24  ;;  %v3261_v61 = vpack.c.bf16 %v3256_v21, %v3254_v20  ;;  %v3335_v34 = vsel %vm3241_vm14, %v3321_v24, %v3329_v57  ;;  %v11176_v21 = vld [vmem:[%s12939_s8 + $0x60] ss:$0 sm:$0xff] }
 0x4f9   : > { %v3323_v31 = vpop.permute.xlu1 %3322  ;;  %v3345_v53 = vmul.f32 %v3339_v25, %v11104_v40  ;;  %v3344_v46 = vmul.f32 %v3335_v34, %v11123_v51 }
 0x4fb   : > { %v3325_v60 = vpop.permute.xlu0 %3324  ;;  %v3354_v2 = vpack.c.bf16 %v3345_v53, %v3343_v32  ;;  %v3353_v49 = vpack.c.bf16 %v3344_v46, %v3342_v55  ;;  %v9220_v55 = vld [vmem:[#allocation11 + $0x40] sm:$0xff]  }
 0x4fd   : > { %v3331_v18 = vpop.permute.xlu1 %3330 }
 0x4fe   : > { %v3336_v14 = vsel %vm3241_vm14, %v3323_v31, %v3331_v18 }
 0x4ff   : > { %v3333_v54 = vpop.permute.xlu0 %3332 }
 0x500   : > { %v3341_v52 = vsel %vm3241_vm14, %v3333_v54, %v3325_v60  ;;  %v3337_v57 = vsel %vm3241_vm14, %v3325_v60, %v3333_v54  ;;  %v3346_v54 = vmul.f32 %v3336_v14, %v11123_v51 }
 0x501   : > { %8605 = vmatmul.mubr.msk.bf16.vlgmr.msra.gmra.mrb[8].mxu1 %vm2171_vm11, %v9216_v1  ;;  %v3413_v0 = vpop.permute.xlu1 %3412  ;;  %v3340_v1 = vsel %vm3241_vm14, %v3331_v18, %v3323_v31  ;;  %v3349_v6 = vmul.f32 %v3341_v52, %v11104_v40  ;;  %v3348_v63 = vmul.f32 %v3337_v57, %v11123_v51 }
 0x502   : > { %3187 = vmatpush1.bf16.msra.mxu1 %v3174_v13  ;;  %3218 = vmatprep.mubr.bf16.mxu1 %v12880_v8  ;;  %v3347_v13 = vmul.f32 %v3340_v1, %v11104_v40 }
 0x503   : > { %3188 = vmatprep.subr.bf16.mxu1 %v3177_v62  ;;  %v3415_v43 = vpop.permute.xlu0 %3414  ;;  %v3355_v20 = vpack.c.bf16 %v3348_v63, %v3346_v54 }
 0x504   : > { %v3356_v30 = vpack.c.bf16 %v3349_v6, %v3347_v13 }
 0x505   : > { %v3417_v44 = vpop.permute.xlu1 %3416 }
 0x506   : > { %3189 = vmatpush1.bf16.msra.mxu1 %v3176_v37  ;;  %v3423_v47 = vsel %vm3420_vm15, %v3417_v44, %v3413_v0  ;;  %v3421_v31 = vsel %vm3420_vm15, %v3413_v0, %v3417_v44  ;;  %v9219_v0 = vld [vmem:[#allocation13 + $0x38] sm:$0xff]  }
 0x507   : > { %3271 = vmatprep.subr.bf16.mxu1 %v3262_v48  ;;  %v3419_v4 = vpop.permute.xlu0 %3418  ;;  %v3434_v41 = vmul.f32 %v11158_v33, %v3423_v47  ;;  %v3433_v5 = vmul.f32 %v11176_v21, %v3421_v31 }
 0x508   : > { %v3424_v24 = vsel %vm3420_vm15, %v3419_v4, %v3415_v43  ;;  %v3422_v48 = vsel %vm3420_vm15, %v3415_v43, %v3419_v4 }
 0x509   : > { %v3436_v60 = vmul.f32 %v11158_v33, %v3424_v24  ;;  %v3498_v62 = vpop.permute.xlu1 %3497  ;;  %v3435_v53 = vmul.f32 %v11176_v21, %v3422_v48 }
 0x50b   : > { %v3500_v58 = vpop.permute.xlu0 %3499  ;;  %v3441_v18 = vpack.c.bf16 %v3436_v60, %v3434_v41 }
 0x50d   : > { %8607 = vmatmul.mubr.msk.bf16.vlgmr.msra.gmra.mrb[8].mxu1 %vm776_vm2, %v9217_v45  ;;  %v3506_v25 = vpop.permute.xlu1 %3505 }
 0x50e   : > { %3272 = vmatpush1.bf16.msra.mxu1 %v3261_v61  ;;  %3303 = vmatprep.mubr.bf16.mxu1 %v12880_v8  ;;  %v3517_v43 = vsel %vm3420_vm15, %v3506_v25, %v3498_v62  ;;  %v3513_v47 = vsel %vm3420_vm15, %v3498_v62, %v3506_v25 }
 0x50f   : > { %3365 = vmatprep.subr.bf16.mxu1 %v3354_v2  ;;  %v3508_v37 = vpop.permute.xlu0 %3507  ;;  %v3440_v2 = vpack.c.bf16 %v3435_v53, %v3433_v5  ;;  %v3522_v4 = vmul.f32 %v11158_v33, %v3517_v43 }
 0x510   : > { %v3518_v45 = vsel %vm3420_vm15, %v3508_v37, %v3500_v58  ;;  %v3514_v36 = vsel %vm3420_vm15, %v3500_v58, %v3508_v37  ;;  %v3521_v58 = vmul.f32 %v11176_v21, %v3513_v47  ;;  %v9254_v47 = vld [vmem:[#allocation16 + $0x6c] ss:$16 sps:$4 sm:$0xff]  }
 0x511   : > { %v3524_v61 = vmul.f32 %v11158_v33, %v3518_v45  ;;  %v3502_v34 = vpop.permute.xlu1 %3501  ;;  %v3523_v24 = vmul.f32 %v11176_v21, %v3514_v36  ;;  %v9240_v36 = vld [vmem:[#allocation16 + $0x28] ss:$16 sps:$4 sm:$0xff]  }
 0x513   : > { %v3504_v32 = vpop.permute.xlu0 %3503  ;;  %v3533_v44 = vpack.c.bf16 %v3524_v61, %v3522_v4  ;;  %v3532_v41 = vpack.c.bf16 %v3523_v24, %v3521_v58  ;;  %v3610_v4 = vld [vmem:[%s12940_s22 + $0x38] sm:$0xff]  ;;  %v9252_v24 = vld [vmem:[#allocation16 + $0x68] ss:$16 sps:$4 sm:$0xff]   ;;  %v9266_v58 = vld [vmem:[#allocation16 + $0xac] ss:$16 sps:$4 sm:$0xff]  }
 0x515   : > { %v3510_v46 = vpop.permute.xlu1 %3509 }
 0x516   : > { %v3519_v57 = vsel %vm3420_vm15, %v3510_v46, %v3502_v34  ;;  %v3515_v14 = vsel %vm3420_vm15, %v3502_v34, %v3510_v46  ;;  %v9234_v34 = vld [vmem:[#allocation16 + $0x8] ss:$16 sps:$4 sm:$0xff]   ;;  %v9248_v46 = vld [vmem:[#allocation16 + $0x4c] ss:$16 sps:$4 sm:$0xff]  }
 0x517   : > { %v3512_v52 = vpop.permute.xlu0 %3511  ;;  %v3526_v13 = vmul.f32 %v11158_v33, %v3519_v57  ;;  %v9260_v57 = vld [vmem:[#allocation16 + $0x8c] ss:$16 sps:$4 sm:$0xff]  }
 0x518   : > { %v3520_v1 = vsel %vm3420_vm15, %v3512_v52, %v3504_v32  ;;  %v3516_v6 = vsel %vm3420_vm15, %v3504_v32, %v3512_v52  ;;  %v9242_v52 = vld [vmem:[#allocation16 + $0x2c] ss:$16 sps:$4 sm:$0xff]  }
 0x519   : > { %8609 = vmatmul.mubr.msk.bf16.vlgmr.msra.gmra.mrb[8].mxu1 %vm2171_vm11, %v9218_v23  ;;  %v3528_v23 = vmul.f32 %v11158_v33, %v3520_v1  ;;  %v3527_v60 = vmul.f32 %v11176_v21, %v3516_v6  ;;  %v9246_v1 = vld [vmem:[#allocation16 + $0x48] ss:$16 sps:$4 sm:$0xff]  }
 0x51a   : > { %3366 = vmatpush1.bf16.msra.mxu1 %v3353_v49  ;;  %3397 = vmatprep.mubr.bf16.mxu1 %v12880_v8  ;;  %v3525_v49 = vmul.f32 %v11176_v21, %v3515_v14 }
 0x51b   : > { %3367 = vmatprep.subr.bf16.mxu1 %v3356_v30  ;;  %v3535_v62 = vpack.c.bf16 %v3528_v23, %v3526_v13  ;;  %v9221_v30 = vld [vmem:[#allocation13 + $0x40] sm:$0xff]   ;;  %v9258_v23 = vld [vmem:[#allocation16 + $0x88] ss:$16 sps:$4 sm:$0xff]  }
 0x51c   : > { %v3534_v63 = vpack.c.bf16 %v3527_v60, %v3525_v49  ;;  %v9264_v13 = vld [vmem:[#allocation16 + $0xa8] ss:$16 sps:$4 sm:$0xff]   ;;  %v9272_v49 = vld [vmem:[#allocation16 + $0xcc] ss:$16 sps:$4 sm:$0xff]  }
 0x51e   : > { %3368 = vmatpush1.bf16.msra.mxu1 %v3355_v20 }
 0x51f   : > { %3450 = vmatprep.subr.bf16.mxu1 %v3441_v18 }
 0x525   : > { %8611 = vmatmul.mubr.msk.bf16.vlgmr.msra.gmra.mrb[8].mxu1 %vm776_vm2, %v9219_v0 }
 0x526   : > { %3451 = vmatpush1.bf16.msra.mxu1 %v3440_v2  ;;  %3482 = vmatprep.mubr.bf16.mxu1 %v12880_v8  ;;  %v3594_v54 = vpop.permute.xlu1 %3593  ;;  %v3609_v2 = vld [vmem:[%s12940_s22 + $0x30] sm:$0xff] }
 0x527   : > { %3544 = vmatprep.subr.bf16.mxu1 %v3533_v44  ;;  %v9236_v44 = vld [vmem:[#allocation16 + $0xc] ss:$16 sps:$4 sm:$0xff]  }
 0x528   : > { %v3599_v18 = vpop.permute.xlu0 %3598 }
 0x531   : > { %8615 = vmatmul.mubr.msk.bf16.vlgmr.msra.gmra.mrb[8].mxu1 %vm2171_vm11, %v9220_v55 }
 0x532   : > { %3545 = vmatpush1.bf16.msra.mxu1 %v3532_v41  ;;  %3576 = vmatprep.mubr.bf16.mxu1 %v12880_v8 }
 0x533   : > { %3546 = vmatprep.subr.bf16.mxu1 %v3535_v62 }
 0x536   : > { %3547 = vmatpush1.bf16.msra.mxu1 %v3534_v63 }
 0x537   : > { %4729 = vmatprep.subr.bf16.mxu1 %v9236_v44 }
 0x53d   : > { %8617 = vmatmul.mubr.msk.bf16.vlgmr.msra.gmra.mrb[8].mxu1 %vm776_vm2, %v9221_v30  ;;  %vm4941_vm2 = vcmask 1043456  }
 0x53e   : > { %4730 = vmatpush1.bf16.msra.mxu1 %v9234_v34  ;;  %v9276_v34 = vld [vmem:[#allocation16 + $0xe8] ss:$16 sps:$4 sm:$0xff]  }
 0x53f   : > { %4731 = vmatprep.subr.bf16.mxu1 %v9242_v52  ;;  %v9284_v52 = vld [vmem:[#allocation16 + $0x10c] ss:$16 sps:$4 sm:$0xff]  }
 0x542   : > { %4732 = vmatpush1.bf16.msra.mxu1 %v9240_v36 }
 0x543   : > { %4733 = vmatprep.subr.bf16.mxu1 %v9248_v46 }
 0x546   : > { %4734 = vmatpush1.bf16.msra.mxu1 %v9246_v1 }
 0x547   : > { %4735 = vmatprep.subr.bf16.mxu1 %v9254_v47 }
 0x54a   : > { %4736 = vmatpush1.bf16.msra.mxu1 %v9252_v24 }
 0x54b   : > { %4737 = vmatprep.subr.bf16.mxu1 %v9260_v57 }
 0x54e   : > { %4738 = vmatpush1.bf16.msra.mxu1 %v9258_v23  ;;  %v9282_v23 = vld [vmem:[#allocation16 + $0x108] ss:$16 sps:$4 sm:$0xff]  }
 0x54f   : > { %4739 = vmatprep.subr.bf16.mxu1 %v9266_v58 }
 0x552   : > { %4740 = vmatpush1.bf16.msra.mxu1 %v9264_v13  ;;  %v9290_v13 = vld [vmem:[#allocation16 + $0x12c] ss:$16 sps:$4 sm:$0xff]  }
 0x553   : > { %4741 = vmatprep.subr.bf16.mxu1 %v9272_v49  ;;  %v9296_v49 = vld [vmem:[#allocation16 + $0x14c] ss:$16 sps:$4 sm:$0xff]  }
 0x610   : > { %v3578_v31 = vpop.f32.mrb[8].mxu1 }
 0x611   : > { %v3601_v48 = vadd.f32 %v3594_v54, %v3578_v31  ;;  %v3580_v37 = vpop.f32.mrb[9].mxu1 }
 0x612   : > { %v3582_v20 = vpop.f32.mrb[10].mxu1  ;;  %v3602_v5 = vadd.f32 %v3594_v54, %v3580_v37 }
 0x613   : > { %v11209_v25 = vmax.f32 %v3601_v48, 0.0  ;;  %v3603_v53 = vadd.f32 %v3599_v18, %v3582_v20  ;;  %v3584_v45 = vpop.f32.mrb[11].mxu1  ;;  %v9270_v20 = vld [vmem:[#allocation16 + $0xc8] ss:$16 sps:$4 sm:$0xff]  }
 0x614   : > { %v3604_v61 = vadd.f32 %v3599_v18, %v3584_v45  ;;  %v11215_v32 = vmax.f32 %v3602_v5, 0.0  ;;  %4742 = vmatpush1.bf16.msra.mxu1 %v9270_v20  ;;  %v9223_v20 = vld [vmem:[#allocation14] sm:$0xff]  }
 0x615   : > { %v11211_v43 = vmax.f32 %v3603_v53, 0.0  ;;  %3631 = vrot.lane.b32.xlu1 %v11209_v25, %s9698_s11 }
 0x616   : > { %v11219_v0 = vmax.f32 %v3604_v61, 0.0  ;;  %v9278_v61 = vld [vmem:[#allocation16 + $0xec] ss:$16 sps:$4 sm:$0xff]  }
 0x617   : > { %3633 = vrot.lane.b32.xlu0 %v11211_v43, %s9698_s11  ;;  %4743 = vmatprep.subr.bf16.mxu1 %v9278_v61  ;;  %v9294_v61 = vld [vmem:[#allocation16 + $0x148] ss:$16 sps:$4 sm:$0xff]  }
 0x618   : > { %4744 = vmatpush1.bf16.msra.mxu1 %v9276_v34 }
 0x619   : > { %3635 = vrot.lane.b32.xlu1 %v11215_v32, %s9698_s11  ;;  %4745 = vmatprep.subr.bf16.mxu1 %v9284_v52 }
 0x61b   : > { %3637 = vrot.lane.b32.xlu0 %v11219_v0, %s9698_s11 }
 0x61c   : > { %4746 = vmatpush1.bf16.msra.mxu1 %v9282_v23 }
 0x61d   : > { %3611 = vrot.lane.b32.xlu1 %v11209_v25, %s9697_s14  ;;  %4747 = vmatprep.subr.bf16.mxu1 %v9290_v13 }
 0x61f   : > { %3613 = vrot.lane.b32.xlu0 %v11211_v43, %s9697_s14 }
 0x621   : > { %3615 = vrot.lane.b32.xlu1 %v11215_v32, %s9697_s14 }
 0x623   : > { %3617 = vrot.lane.b32.xlu0 %v11219_v0, %s9697_s14 }
 0x625   : > { %3754 = vrot.lane.b32.xlu1 %v11209_v25, %s9699_s27 }
 0x627   : > { %3756 = vrot.lane.b32.xlu0 %v11211_v43, %s9699_s27 }
 0x629   : > { %3758 = vrot.lane.b32.xlu1 %v11215_v32, %s9699_s27 }
 0x62b   : > { %3760 = vrot.lane.b32.xlu0 %v11219_v0, %s9699_s27 }
 0x62d   : > { %3830 = vrot.lane.b32.xlu1 %v11209_v25, %s9692_s21 }
 0x62f   : > { %3832 = vrot.lane.b32.xlu0 %v11211_v43, %s9692_s21 }
 0x631   : > { %3834 = vrot.lane.b32.xlu1 %v11215_v32, %s9692_s21 }
 0x633   : > { %3836 = vrot.lane.b32.xlu0 %v11219_v0, %s9692_s21 }
 0x635   : > { %3966 = vrot.lane.b32.xlu1 %v11209_v25, %s9693_s1 }
 0x637   : > { %3968 = vrot.lane.b32.xlu0 %v11211_v43, %s9693_s1 }
 0x639   : > { %3970 = vrot.lane.b32.xlu1 %v11215_v32, %s9693_s1 }
 0x63b   : > { %3972 = vrot.lane.b32.xlu0 %v11219_v0, %s9693_s1 }
 0x63d   : > { %4042 = vrot.lane.b32.xlu1 %v11209_v25, %s9700_s20 }
 0x63f   : > { %4044 = vrot.lane.b32.xlu0 %v11211_v43, %s9700_s20 }
 0x641   : > { %4046 = vrot.lane.b32.xlu1 %v11215_v32, %s9700_s20 }
 0x643   : > { %4048 = vrot.lane.b32.xlu0 %v11219_v0, %s9700_s20  ;;  %s9704_s20 = smov 16  }
 0x645   : > { %4118 = vrot.lane.b32.xlu1 %v11209_v25, %s9701_s18 }
 0x647   : > { %4120 = vrot.lane.b32.xlu0 %v11211_v43, %s9701_s18 }
 0x649   : > { %4122 = vrot.lane.b32.xlu1 %v11215_v32, %s9701_s18 }
 0x64b   : > { %4124 = vrot.lane.b32.xlu0 %v11219_v0, %s9701_s18  ;;  %s9706_s18 = smov 113  }
 0x64d   : > { %4194 = vrot.lane.b32.xlu1 %v11209_v25, %s9702_s25 }
 0x64f   : > { %4196 = vrot.lane.b32.xlu0 %v11211_v43, %s9702_s25 }
 0x651   : > { %4198 = vrot.lane.b32.xlu1 %v11215_v32, %s9702_s25 }
 0x653   : > { %4200 = vrot.lane.b32.xlu0 %v11219_v0, %s9702_s25  ;;  %s9707_s25 = smov 112  }
 0x655   : > { %4272 = vperm.xlu1 %9137, %v3609_v2  }
 0x657   : > { %4277 = vperm.xlu0 %9136, %v3610_v4   ;;  %v9222_v4 = vld [vmem:[#allocation14 + $0x8] sm:$0xff]  }
 0x687   : > { %v3632_v6 = vpop.permute.xlu1 %3631 }
 0x689   : > { %v3634_v55 = vpop.permute.xlu0 %3633 }
 0x68b   : > { %v3636_v14 = vpop.permute.xlu1 %3635 }
 0x68c   : > { %v3639_v41 = vsel %vm2226_vm10, %v3632_v6, %v3636_v14  ;;  %v3641_v60 = vsel %vm2226_vm10, %v3636_v14, %v3632_v6 }
 0x68d   : > { %v3638_v62 = vpop.permute.xlu0 %3637  ;;  %v3643_v54 = vmul.f32 %v3641_v60, %v10772_v27  ;;  %v3644_v31 = vmul.f32 %v3639_v41, %v10776_v28  ;;  %v9288_v60 = vld [vmem:[#allocation16 + $0x128] ss:$16 sps:$4 sm:$0xff]  }
 0x68e   : > { %v3640_v63 = vsel %vm2226_vm10, %v3634_v55, %v3638_v62  ;;  %v3642_v30 = vsel %vm2226_vm10, %v3638_v62, %v3634_v55  ;;  %4748 = vmatpush1.bf16.msra.mxu1 %v9288_v60 }
 0x68f   : > { %v3645_v48 = vmul.f32 %v3642_v30, %v10772_v27  ;;  %v3646_v37 = vmul.f32 %v3640_v63, %v10776_v28  ;;  %v3612_v18 = vpop.permute.xlu1 %3611  ;;  %4749 = vmatprep.subr.bf16.mxu1 %v9296_v49 }
 0x691   : > { %v3650_v5 = vpack.c.bf16 %v3645_v48, %v3643_v54  ;;  %v3614_v53 = vpop.permute.xlu0 %3613  ;;  %v3651_v45 = vpack.c.bf16 %v3646_v37, %v3644_v31 }
 0x692   : > { %4750 = vmatpush1.bf16.msra.mxu1 %v9294_v61 }
 0x693   : > { %v3616_v2 = vpop.permute.xlu1 %3615  ;;  %3660 = vmatprep.subr.bf16.mxu0 %v3651_v45 }
 0x694   : > { %v3619_v44 = vsel %vm2056_vm9, %v3612_v18, %v3616_v2  ;;  %v3621_v27 = vsel %vm2056_vm9, %v3616_v2, %v3612_v18  ;;  %3661 = vmatpush1.bf16.msra.mxu0 %v3650_v5  ;;  %v9302_v2 = vld [vmem:[#allocation16 + $0x16c] ss:$16 sps:$4 sm:$0xff]  }
 0x695   : > { %v3618_v28 = vpop.permute.xlu0 %3617  ;;  %v3623_v36 = vmul.f32 %v3621_v27, %v10701_v15  ;;  %v3624_v47 = vmul.f32 %v3619_v44, %v10705_v17  ;;  %4751 = vmatprep.subr.bf16.mxu1 %v9302_v2  ;;  %v9308_v27 = vld [vmem:[#allocation16 + $0x18c] ss:$16 sps:$4 sm:$0xff]  }
 0x696   : > { %v3620_v46 = vsel %vm2056_vm9, %v3614_v53, %v3618_v28  ;;  %v3622_v1 = vsel %vm2056_vm9, %v3618_v28, %v3614_v53  ;;  %vm6846_vm9 = vcmp.lt.s32.totalorder %v10258_v11, 111 }
 0x697   : > { %v3625_v24 = vmul.f32 %v3622_v1, %v10701_v15  ;;  %v3626_v57 = vmul.f32 %v3620_v46, %v10705_v17  ;;  %v3755_v6 = vpop.permute.xlu1 %3754  ;;  %8619 = vmatmul.mubr.msk.bf16.vlgmr.msra.gmra.mrb[8].mxu0 %vm2171_vm11, %v9222_v4 }
 0x698   : > { %3743 = vmatprep.mubr.bf16.mxu0 %v12880_v8 }
 0x699   : > { %v3629_v55 = vpack.c.bf16 %v3625_v24, %v3623_v36  ;;  %v3757_v58 = vpop.permute.xlu0 %3756  ;;  %v3630_v14 = vpack.c.bf16 %v3626_v57, %v3624_v47  ;;  %v9306_v47 = vld [vmem:[#allocation16 + $0x188] ss:$16 sps:$4 sm:$0xff]  }
 0x69b   : > { %v3759_v41 = vpop.permute.xlu1 %3758  ;;  %3711 = vmatprep.subr.bf16.mxu0 %v3630_v14 }
 0x69c   : > { %v3762_v15 = vsel %vm2405_vm12, %v3755_v6, %v3759_v41  ;;  %v3764_v17 = vsel %vm2405_vm12, %v3759_v41, %v3755_v6  ;;  %3712 = vmatpush1.bf16.msra.mxu0 %v3629_v55  ;;  %v9224_v6 = vld [vmem:[#allocation14 + $0x10] sm:$0xff]  }
 0x69d   : > { %v3761_v62 = vpop.permute.xlu0 %3760  ;;  %v3766_v54 = vmul.f32 %v3764_v17, %v10845_v7  ;;  %v3767_v31 = vmul.f32 %v3762_v15, %v10849_v39  ;;  %v9225_v17 = vld [vmem:[#allocation14 + $0x18] sm:$0xff]  }
 0x69e   : > { %v3763_v63 = vsel %vm2405_vm12, %v3757_v58, %v3761_v62  ;;  %v3765_v30 = vsel %vm2405_vm12, %v3761_v62, %v3757_v58 }
 0x69f   : > { %v3768_v48 = vmul.f32 %v3765_v30, %v10845_v7  ;;  %v3769_v37 = vmul.f32 %v3763_v63, %v10849_v39  ;;  %v3831_v18 = vpop.permute.xlu1 %3830  ;;  %v9300_v39 = vld [vmem:[#allocation16 + $0x168] ss:$16 sps:$4 sm:$0xff]   ;;  %v3909_v63 = vpack.c.bf16 %v11211_v43, %v11209_v25 }
 0x6a0   : > { %4752 = vmatpush1.bf16.msra.mxu1 %v9300_v39 }
 0x6a1   : > { %v3773_v5 = vpack.c.bf16 %v3768_v48, %v3766_v54  ;;  %v3833_v53 = vpop.permute.xlu0 %3832  ;;  %v3774_v45 = vpack.c.bf16 %v3769_v37, %v3767_v31  ;;  %4753 = vmatprep.subr.bf16.mxu1 %v9308_v27 }
 0x6a3   : > { %v3835_v4 = vpop.permute.xlu1 %3834  ;;  %8621 = vmatmul.mubr.msk.bf16.vlgmr.msra.gmra.mrb[8].mxu0 %vm2171_vm11, %v9223_v20  ;;  %3783 = vmatprep.subr.bf16.mxu0 %v3774_v45  ;;  %v9226_v45 = vld [vmem:[#allocation14 + $0x20] sm:$0xff]  }
 0x6a4   : > { %v3838_v34 = vsel %vm1048_vm4, %v3831_v18, %v3835_v4  ;;  %3784 = vmatpush1.bf16.msra.mxu0 %v3773_v5  ;;  %3815 = vmatprep.mubr.bf16.mxu0 %v12880_v8  ;;  %v3840_v46 = vsel %vm1048_vm4, %v3835_v4, %v3831_v18 }
 0x6a5   : > { %v3837_v7 = vpop.permute.xlu0 %3836  ;;  %v3843_v28 = vmul.f32 %v3838_v34, %v10921_v29  ;;  %v3842_v23 = vmul.f32 %v3840_v46, %v10917_v26  ;;  %4754 = vmatpush1.bf16.msra.mxu1 %v9306_v47 }
 0x6a6   : > { %v3839_v44 = vsel %vm1048_vm4, %v3833_v53, %v3837_v7  ;;  %v3841_v52 = vsel %vm1048_vm4, %v3837_v7, %v3833_v53 }
 0x6a7   : > { %v3845_v36 = vmul.f32 %v3839_v44, %v10921_v29  ;;  %v3844_v24 = vmul.f32 %v3841_v52, %v10917_v26  ;;  %v3967_v55 = vpop.permute.xlu1 %3966  ;;  %v3910_v29 = vpack.c.bf16 %v11219_v0, %v11215_v32 }
 0x6a9   : > { %v3850_v1 = vpack.c.bf16 %v3845_v36, %v3843_v28  ;;  %v3969_v57 = vpop.permute.xlu0 %3968  ;;  %v3849_v58 = vpack.c.bf16 %v3844_v24, %v3842_v23 }
 0x6ab   : > { %3859 = vmatprep.subr.bf16.mxu0 %v3850_v1  ;;  %v3971_v13 = vpop.permute.xlu1 %3970  ;;  %v9227_v1 = vld [vmem:[#allocation14 + $0x28] sm:$0xff]  }
 0x6ac   : > { %v3976_v26 = vsel %vm1261_vm5, %v3971_v13, %v3967_v55 }
 0x6ad   : > { %v3973_v14 = vpop.permute.xlu0 %3972  ;;  %v3979_v62 = vmul.f32 %v3976_v26, %v10986_v56  ;;  %v9228_v26 = vld [vmem:[#allocation14 + $0x30] sm:$0xff]  }
 0x6ae   : > { %v3977_v41 = vsel %vm1261_vm5, %v3973_v14, %v3969_v57  ;;  %v3975_v31 = vsel %vm1261_vm5, %v3969_v57, %v3973_v14 }
 0x6af   : > { %8623 = vmatmul.mubr.msk.bf16.vlgmr.msra.gmra.mrb[8].mxu0 %vm2171_vm11, %v9224_v6  ;;  %v3981_v60 = vmul.f32 %v3977_v41, %v10986_v56  ;;  %v4043_v49 = vpop.permute.xlu1 %4042  ;;  %v3974_v56 = vsel %vm1261_vm5, %v3967_v55, %v3971_v13  ;;  %v3980_v18 = vmul.f32 %v3975_v31, %v11004_v3 }
 0x6b0   : > { %3860 = vmatpush1.bf16.msra.mxu0 %v3849_v58  ;;  %3891 = vmatprep.mubr.bf16.mxu0 %v12880_v8  ;;  %v3978_v61 = vmul.f32 %v3974_v56, %v11004_v3  ;;  %v9239_v56 = vld [vmem:[#allocation16 + $0x24] ss:$16 sps:$4 sm:$0xff]  }
 0x6b1   : > { %3919 = vmatprep.subr.bf16.mxu0 %v3910_v29  ;;  %v4045_v15 = vpop.permute.xlu0 %4044  ;;  %v3986_v30 = vpack.c.bf16 %v3981_v60, %v3979_v62 }
 0x6b2   : > { %v3985_v34 = vpack.c.bf16 %v3980_v18, %v3978_v61  ;;  %v9237_v18 = vld [vmem:[#allocation16 + $0x20] ss:$16 sps:$4 sm:$0xff]  }
 0x6b3   : > { %v4047_v48 = vpop.permute.xlu1 %4046  ;;  %v9255_v61 = vld [vmem:[#allocation16 + $0x80] ss:$16 sps:$4 sm:$0xff]  }
 0x6b4   : > { %v4052_v20 = vsel %vm3062_vm13, %v4047_v48, %v4043_v49  ;;  %v4050_v3 = vsel %vm3062_vm13, %v4043_v49, %v4047_v48  ;;  %v9230_v48 = vld [vmem:[#allocation14 + $0x40] sm:$0xff]  }
 0x6b5   : > { %v4049_v54 = vpop.permute.xlu0 %4048  ;;  %v4055_v2 = vmul.f32 %v4052_v20, %v11046_v22  ;;  %v4054_v47 = vmul.f32 %v4050_v3, %v11064_v42  ;;  %v9245_v20 = vld [vmem:[#allocation16 + $0x44] ss:$16 sps:$4 sm:$0xff]  }
 0x6b6   : > { %v4053_v37 = vsel %vm3062_vm13, %v4049_v54, %v4045_v15  ;;  %v4051_v44 = vsel %vm3062_vm13, %v4045_v15, %v4049_v54  ;;  %v9229_v54 = vld [vmem:[#allocation14 + $0x38] sm:$0xff]  }
 0x6b7   : > { %v4057_v5 = vmul.f32 %v4053_v37, %v11046_v22  ;;  %v4119_v4 = vpop.permute.xlu1 %4118  ;;  %v4056_v22 = vmul.f32 %v4051_v44, %v11064_v42  ;;  %v9231_v37 = vld [vmem:[#allocation16] ss:$16 sps:$4 sm:$0xff]   ;;  %v9287_v3 = vld [vmem:[#allocation16 + $0x124] ss:$16 sps:$4 sm:$0xff]  }
 0x6b8   : > { %v9273_v44 = vld [vmem:[#allocation16 + $0xe0] ss:$16 sps:$4 sm:$0xff]  }
 0x6b9   : > { %v4121_v53 = vpop.permute.xlu0 %4120  ;;  %v4062_v7 = vpack.c.bf16 %v4057_v5, %v4055_v2  ;;  %v4061_v6 = vpack.c.bf16 %v4056_v22, %v4054_v47  ;;  %v9243_v5 = vld [vmem:[#allocation16 + $0x40] ss:$16 sps:$4 sm:$0xff]   ;;  %v9263_v2 = vld [vmem:[#allocation16 + $0xa4] ss:$16 sps:$4 sm:$0xff]  }
 0x6ba   : > { %v9285_v22 = vld [vmem:[#allocation16 + $0x120] ss:$16 sps:$4 sm:$0xff]   ;;  %v9305_v47 = vld [vmem:[#allocation16 + $0x184] ss:$16 sps:$4 sm:$0xff]  }
 0x6bb   : > { %8625 = vmatmul.mubr.msk.bf16.vlgmr.msra.gmra.mrb[8].mxu0 %vm2171_vm11, %v9225_v17  ;;  %v4123_v27 = vpop.permute.xlu1 %4122 }
 0x6bc   : > { %3920 = vmatpush1.bf16.msra.mxu0 %v3909_v63  ;;  %3951 = vmatprep.mubr.bf16.mxu0 %v12880_v8  ;;  %v4128_v52 = vsel %vm3241_vm14, %v4123_v27, %v4119_v4  ;;  %v4126_v42 = vsel %vm3241_vm14, %v4119_v4, %v4123_v27  ;;  %v9261_v4 = vld [vmem:[#allocation16 + $0xa0] ss:$16 sps:$4 sm:$0xff]   ;;  %v9281_v27 = vld [vmem:[#allocation16 + $0x104] ss:$16 sps:$4 sm:$0xff]  }
 0x6bd   : > { %3995 = vmatprep.subr.bf16.mxu0 %v3986_v30  ;;  %v4125_v39 = vpop.permute.xlu0 %4124  ;;  %v4131_v24 = vmul.f32 %v4128_v52, %v11104_v40  ;;  %v4130_v60 = vmul.f32 %v4126_v42, %v11123_v51  ;;  %v9293_v52 = vld [vmem:[#allocation16 + $0x144] ss:$16 sps:$4 sm:$0xff]   ;;  %v9318_v42 = vld [vmem:[#allocation16 + $0x1c8] ss:$16 sps:$4 sm:$0xff]  }
 0x6be   : > { %v4129_v28 = vsel %vm3241_vm14, %v4125_v39, %v4121_v53  ;;  %v4127_v58 = vsel %vm3241_vm14, %v4121_v53, %v4125_v39  ;;  %v9249_v53 = vld [vmem:[#allocation16 + $0x60] ss:$16 sps:$4 sm:$0xff]   ;;  %v9275_v39 = vld [vmem:[#allocation16 + $0xe4] ss:$16 sps:$4 sm:$0xff]  }
 0x6bf   : > { %v4133_v36 = vmul.f32 %v4129_v28, %v11104_v40  ;;  %v4195_v57 = vpop.permute.xlu1 %4194  ;;  %v4132_v40 = vmul.f32 %v4127_v58, %v11123_v51  ;;  %v9279_v28 = vld [vmem:[#allocation16 + $0x100] ss:$16 sps:$4 sm:$0xff]   ;;  %v9317_v58 = vld [vmem:[#allocation16 + $0x1c4] ss:$16 sps:$4 sm:$0xff]  }
 0x6c1   : > { %v4197_v46 = vpop.permute.xlu0 %4196  ;;  %v4138_v23 = vpack.c.bf16 %v4133_v36, %v4131_v24  ;;  %v4137_v17 = vpack.c.bf16 %v4132_v40, %v4130_v60  ;;  %v9291_v36 = vld [vmem:[#allocation16 + $0x140] ss:$16 sps:$4 sm:$0xff]   ;;  %v9323_v40 = vld [vmem:[#allocation16 + $0x1e4] ss:$16 sps:$4 sm:$0xff]   ;;  %v11405_v60 = vld [vmem:[%s10149_s12] sm:$0xff] }
 0x6c2   : > { %v9303_v24 = vld [vmem:[#allocation16 + $0x180] ss:$16 sps:$4 sm:$0xff]   ;;  %4777 = vrot.lane.b32.xlu1 %v11405_v60, %s9703_s6 }
 0x6c3   : > { %v4199_v29 = vpop.permute.xlu1 %4198 }
 0x6c4   : > { %v4204_v13 = vsel %vm3420_vm15, %v4199_v29, %v4195_v57  ;;  %v4202_v63 = vsel %vm3420_vm15, %v4195_v57, %v4199_v29  ;;  %v9311_v57 = vld [vmem:[#allocation16 + $0x1a4] ss:$16 sps:$4 sm:$0xff]   ;;  %v9320_v29 = vld [vmem:[#allocation16 + $0x1cc] ss:$16 sps:$4 sm:$0xff]  }
 0x6c5   : > { %v4201_v55 = vpop.permute.xlu0 %4200  ;;  %v4207_v15 = vmul.f32 %v11158_v33, %v4204_v13  ;;  %v4206_v51 = vmul.f32 %v11176_v21, %v4202_v63  ;;  %v9326_v13 = vld [vmem:[#allocation16 + $0x1ec] ss:$16 sps:$4 sm:$0xff]  }
 0x6c6   : > { %v4205_v14 = vsel %vm3420_vm15, %v4201_v55, %v4197_v46  ;;  %v4203_v49 = vsel %vm3420_vm15, %v4197_v46, %v4201_v55  ;;  %v9299_v46 = vld [vmem:[#allocation16 + $0x164] ss:$16 sps:$4 sm:$0xff]   ;;  %v9312_v55 = vld [vmem:[#allocation16 + $0x1a8] ss:$16 sps:$4 sm:$0xff]  }
 0x6c7   : > { %8627 = vmatmul.mubr.msk.bf16.vlgmr.msra.gmra.mrb[8].mxu0 %vm2171_vm11, %v9226_v45  ;;  %v4209_v41 = vmul.f32 %v11158_v33, %v4205_v14  ;;  %v4208_v30 = vmul.f32 %v11176_v21, %v4203_v49  ;;  %v9233_v33 = vld [vmem:[#allocation16 + $0x4] ss:$16 sps:$4 sm:$0xff]   ;;  %v9315_v14 = vld [vmem:[#allocation16 + $0x1c0] ss:$16 sps:$4 sm:$0xff]  }
 0x6c8   : > { %3996 = vmatpush1.bf16.msra.mxu0 %v3985_v34  ;;  %4027 = vmatprep.mubr.bf16.mxu0 %v12880_v8  ;;  %v9251_v21 = vld [vmem:[#allocation16 + $0x64] ss:$16 sps:$4 sm:$0xff]  }
 0x6c9   : > { %4071 = vmatprep.subr.bf16.mxu0 %v4062_v7  ;;  %v4214_v62 = vpack.c.bf16 %v4209_v41, %v4207_v15  ;;  %v4213_v31 = vpack.c.bf16 %v4208_v30, %v4206_v51  ;;  %v9257_v45 = vld [vmem:[#allocation16 + $0x84] ss:$16 sps:$4 sm:$0xff]   ;;  %v9267_v7 = vld [vmem:[#allocation16 + $0xc0] ss:$16 sps:$4 sm:$0xff]  }
 0x6ca   : > { %v9269_v34 = vld [vmem:[#allocation16 + $0xc4] ss:$16 sps:$4 sm:$0xff]   ;;  %v9321_v41 = vld [vmem:[#allocation16 + $0x1e0] ss:$16 sps:$4 sm:$0xff]  }
 0x6cb   : > { %v11408_v15 = vld [vmem:[%s10149_s12 + $0x8] sm:$0xff] }
 0x6cc   : > { %4779 = vrot.lane.b32.xlu0 %v11408_v15, %s9703_s6 }
 0x6d3   : > { %8629 = vmatmul.mubr.msk.bf16.vlgmr.msra.gmra.mrb[8].mxu0 %vm2171_vm11, %v9227_v1  ;;  %v9297_v1 = vld [vmem:[#allocation16 + $0x160] ss:$16 sps:$4 sm:$0xff]  }
 0x6d4   : > { %4072 = vmatpush1.bf16.msra.mxu0 %v4061_v6  ;;  %4103 = vmatprep.mubr.bf16.mxu0 %v12880_v8  ;;  %v9314_v6 = vld [vmem:[#allocation16 + $0x1ac] ss:$16 sps:$4 sm:$0xff]   ;;  %v4273_v49 = vpop.permute.xlu1 %4272 }
 0x6d5   : > { %4147 = vmatprep.subr.bf16.mxu0 %v4138_v23  ;;  %v9309_v23 = vld [vmem:[#allocation16 + $0x1a0] ss:$16 sps:$4 sm:$0xff]   ;;  %4755 = vmatprep.subr.bf16.mxu1 %v9314_v6 }
 0x6d6   : > { %4756 = vmatpush1.bf16.msra.mxu1 %v9312_v55  ;;  %v4278_v51 = vpop.permute.xlu0 %4277 }
 0x6d7   : > { %4757 = vmatprep.subr.bf16.mxu1 %v9320_v29 }
 0x6da   : > { %4758 = vmatpush1.bf16.msra.mxu1 %v9318_v42 }
 0x6db   : > { %4759 = vmatprep.subr.bf16.mxu1 %v9326_v13 }
 0x6df   : > { %8631 = vmatmul.mubr.msk.bf16.vlgmr.msra.gmra.mrb[8].mxu0 %vm2171_vm11, %v9228_v26  ;;  %v9324_v26 = vld [vmem:[#allocation16 + $0x1e8] ss:$16 sps:$4 sm:$0xff]  }
 0x6e0   : > { %4148 = vmatpush1.bf16.msra.mxu0 %v4137_v17  ;;  %4179 = vmatprep.mubr.bf16.mxu0 %v12880_v8  ;;  %v11415_v17 = vld [vmem:[%s10149_s12 + $0x10] sm:$0xff] }
 0x6e1   : > { %4223 = vmatprep.subr.bf16.mxu0 %v4214_v62  ;;  %4760 = vmatpush1.bf16.msra.mxu1 %v9324_v26  ;;  %v11418_v62 = vld [vmem:[%s10149_s12 + $0x18] sm:$0xff]  ;;  %s9705_s12 = smov 15  }
 0x6e2   : > { %4781 = vrot.lane.b32.xlu1 %v11415_v17, %s9703_s6  ;;  %4783 = vrot.lane.b32.xlu0 %v11418_v62, %s9703_s6 }
 0x6e6   : > { %5036 = vrot.lane.b32.xlu1 %v11405_v60, %s9704_s20  ;;  %5038 = vrot.lane.b32.xlu0 %v11408_v15, %s9704_s20 }
 0x6ea   : > { %5040 = vrot.lane.b32.xlu1 %v11415_v17, %s9704_s20  ;;  %5042 = vrot.lane.b32.xlu0 %v11418_v62, %s9704_s20 }
 0x6eb   : > { %8633 = vmatmul.mubr.msk.bf16.vlgmr.msra.gmra.mrb[8].mxu0 %vm2171_vm11, %v9229_v54 }
 0x6ec   : > { %4224 = vmatpush1.bf16.msra.mxu0 %v4213_v31  ;;  %4255 = vmatprep.mubr.bf16.mxu0 %v12880_v8 }
 0x6ed   : > { %4686 = vmatprep.subr.bf16.mxu0 %v9233_v33 }
 0x6ee   : > { %5303 = vrot.lane.b32.xlu1 %v11405_v60, %s9705_s12  ;;  %5305 = vrot.lane.b32.xlu0 %v11408_v15, %s9705_s12 }
 0x6f2   : > { %5307 = vrot.lane.b32.xlu1 %v11415_v17, %s9705_s12  ;;  %5309 = vrot.lane.b32.xlu0 %v11418_v62, %s9705_s12 }
 0x6f7   : > { %8635 = vmatmul.mubr.msk.bf16.vlgmr.msra.gmra.mrb[8].mxu0 %vm2171_vm11, %v9230_v48 }
 0x6f8   : > { %4687 = vmatpush1.bf16.msra.mxu0 %v9231_v37 }
 0x6f9   : > { %4688 = vmatprep.subr.bf16.mxu0 %v9239_v56 }
 0x6fc   : > { %4689 = vmatpush1.bf16.msra.mxu0 %v9237_v18 }
 0x6fd   : > { %4690 = vmatprep.subr.bf16.mxu0 %v9245_v20 }
 0x700   : > { %4691 = vmatpush1.bf16.msra.mxu0 %v9243_v5 }
 0x701   : > { %4692 = vmatprep.subr.bf16.mxu0 %v9251_v21 }
 0x704   : > { %4693 = vmatpush1.bf16.msra.mxu0 %v9249_v53 }
 0x705   : > { %4694 = vmatprep.subr.bf16.mxu0 %v9257_v45 }
 0x708   : > { %4695 = vmatpush1.bf16.msra.mxu0 %v9255_v61 }
 0x709   : > { %4696 = vmatprep.subr.bf16.mxu0 %v9263_v2 }
 0x70c   : > { %4697 = vmatpush1.bf16.msra.mxu0 %v9261_v4 }
 0x70d   : > { %4698 = vmatprep.subr.bf16.mxu0 %v9269_v34 }
 0x710   : > { %4699 = vmatpush1.bf16.msra.mxu0 %v9267_v7 }
 0x711   : > { %4700 = vmatprep.subr.bf16.mxu0 %v9275_v39 }
 0x714   : > { %4701 = vmatpush1.bf16.msra.mxu0 %v9273_v44 }
 0x715   : > { %4702 = vmatprep.subr.bf16.mxu0 %v9281_v27 }
 0x718   : > { %4703 = vmatpush1.bf16.msra.mxu0 %v9279_v28 }
 0x719   : > { %4704 = vmatprep.subr.bf16.mxu0 %v9287_v3 }
 0x71c   : > { %4705 = vmatpush1.bf16.msra.mxu0 %v9285_v22 }
 0x71d   : > { %4706 = vmatprep.subr.bf16.mxu0 %v9293_v52 }
 0x720   : > { %4707 = vmatpush1.bf16.msra.mxu0 %v9291_v36 }
 0x721   : > { %4708 = vmatprep.subr.bf16.mxu0 %v9299_v46 }
 0x724   : > { %4709 = vmatpush1.bf16.msra.mxu0 %v9297_v1 }
 0x725   : > { %4710 = vmatprep.subr.bf16.mxu0 %v9305_v47 }
 0x728   : > { %4711 = vmatpush1.bf16.msra.mxu0 %v9303_v24 }
 0x729   : > { %4712 = vmatprep.subr.bf16.mxu0 %v9311_v57 }
 0x72c   : > { %4713 = vmatpush1.bf16.msra.mxu0 %v9309_v23 }
 0x72d   : > { %4714 = vmatprep.subr.bf16.mxu0 %v9317_v58 }
 0x730   : > { %4715 = vmatpush1.bf16.msra.mxu0 %v9315_v14 }
 0x731   : > { %4716 = vmatprep.subr.bf16.mxu0 %v9323_v40 }
 0x734   : > { %4717 = vmatpush1.bf16.msra.mxu0 %v9321_v41  ;;  %v11552_v36 = vpop.permute.xlu1 %4777 }
 0x73e   : > { %v11556_v46 = vpop.permute.xlu0 %4779 }
 0x754   : > { %v11562_v1 = vpop.permute.xlu1 %4781  ;;  %v11566_v47 = vpop.permute.xlu0 %4783 }
 0x755   : > { %v4786_v9 = vsel %vm4785_vm0, %v11562_v1, %v11566_v47 }
 0x758   : > { %v11572_v24 = vpop.permute.xlu1 %5036  ;;  %v11576_v57 = vpop.permute.xlu0 %5038 }
 0x75c   : > { %v11582_v6 = vpop.permute.xlu1 %5040  ;;  %v11586_v23 = vpop.permute.xlu0 %5042 }
 0x760   : > { %v11592_v55 = vpop.permute.xlu1 %5303  ;;  %v11596_v58 = vpop.permute.xlu0 %5305 }
 0x764   : > { %v11600_v29 = vpop.permute.xlu1 %5307  ;;  %v11604_v14 = vpop.permute.xlu0 %5309 }
 0x7ca   : > { %v4257_v63 = vpop.f32.mrb[8].mxu0 }
 0x7cb   : > { %v4280_v30 = vadd.f32 %v4273_v49, %v4257_v63  ;;  %v4259_v54 = vpop.f32.mrb[9].mxu0 }
 0x7cc   : > { %v4281_v33 = vadd.f32 %v4273_v49, %v4259_v54  ;;  %v4261_v31 = vpop.f32.mrb[10].mxu0 }
 0x7cd   : > { %v4284_v48 = vadd.f32 %v4280_v30, %v11209_v25  ;;  %v4282_v37 = vadd.f32 %v4278_v51, %v4261_v31  ;;  %v4263_v56 = vpop.f32.mrb[11].mxu0 }
 0x7ce   : > { %v4285_v18 = vadd.f32 %v4281_v33, %v11215_v32  ;;  %v4283_v20 = vadd.f32 %v4278_v51, %v4263_v56  ;;  %v11643_v33 = vld [vmem:[%s12939_s8 + $0x88] sm:$0xff] }
 0x7cf   : > { %v4286_v5 = vadd.f32 %v4282_v37, %v11211_v43  ;;  %v4288_v53 = vmax.f32 %v4284_v48, 0.0  ;;  %v11653_v48 = vld [vmem:[%s12939_s8 + $0x90] sm:$0xff]  ;;  %v11658_v37 = vld [vmem:[%s12939_s8 + $0x80] sm:$0xff] }
 0x7d0   : > { %v4287_v21 = vadd.f32 %v4283_v20, %v11219_v0  ;;  %v4289_v61 = vmax.f32 %v4285_v18, 0.0  ;;  %v11666_v18 = vrot.slane %v11643_v33, %v10303_v35  ;;  %v4788_v20 = vsel %vm4785_vm0, %v11552_v36, %v11556_v46 }
 0x7d1   : > { %v4290_v45 = vmax.f32 %v4286_v5, 0.0  ;;  %v11674_v5 = vrot.slane %v11653_v48, %v10303_v35 }
 0x7d2   : > { %v4291_v2 = vmax.f32 %v4287_v21, 0.0  ;;  %12943 = vst [vmem:[#allocation32_spill] sm:$0xff] %v11666_v18 }
 0x7d3   : > { %v4300_v4 = vpack.c.bf16 %v4290_v45, %v4288_v53  ;;  %12944 = vst [vmem:[#allocation33_spill] sm:$0xff] %v11674_v5  ;;  %v4787_v53 = vsel %vm4785_vm0, %v11556_v46, %v11562_v1  ;;  %v11684_v45 = vrot.slane %v11658_v37, %v10303_v35  ;;  %v4807_v46 = vmul.f32 %v11666_v18, %v4788_v20 }
 0x7d4   : > { %v4301_v34 = vpack.c.bf16 %v4291_v2, %v4289_v61  ;;  %v11691_v2 = vld [vmem:[%s12939_s8 + $0x98] sm:$0xff]  ;;  %v11708_v28 = vmul.f32 %v11674_v5, %v4787_v53 }
 0x7d5   : > { %12945 = vst [vmem:[#allocation34_spill] sm:$0xff] %v11684_v45  ;;  %v11718_v1 = vrot.slane %v11691_v2, %v10303_v35 }
 0x7d6   : > { %4718 = vmatprep.mubr.bf16.mxu0 %v4301_v34  ;;  %4761 = vmatprep.mubr.bf16.mxu1 %v4301_v34 }
 0x7d7   : > { %4719 = vmatmul.mubr.bf16.vlgmr.msra.gmra.mrb[12].mxu0 %v4300_v4  ;;  %4762 = vmatmul.mubr.bf16.vlgmr.msra.gmra.mrb[12].mxu1 %v4300_v4  ;;  %v4789_v4 = vsel %vm4785_vm0, %v11566_v47, %v11552_v36  ;;  %12946 = vst [vmem:[#allocation35_spill] sm:$0xff] %v11718_v1 }
 0x7d8   : > { %4887 = vmatprep.mubr.bf16.mxu0 %v12880_v8  ;;  %4928 = vmatprep.mubr.bf16.mxu1 %v12880_v8  ;;  %v4806_v47 = vmul.f32 %v11684_v45, %v4789_v4 }
 0x8aa   : > { %v11446_v25 = vpop.f32.mrb[12].mxu0  ;;  %v11448_v32 = vpop.f32.mrb[12].mxu1 }
 0x8ab   : > { %v11450_v43 = vpop.f32.mrb[13].mxu1  ;;  %4815 = vrot.lane.b32.xlu1 %v11446_v25, %s9703_s6  ;;  %v11454_v0 = vpop.f32.mrb[13].mxu0 }
 0x8ac   : > { %v11456_v7 = vpop.f32.mrb[14].mxu0  ;;  %v11458_v39 = vpop.f32.mrb[14].mxu1 }
 0x8ad   : > { %v11460_v44 = vpop.f32.mrb[15].mxu1  ;;  %4817 = vrot.lane.b32.xlu0 %v11456_v7, %s9703_s6  ;;  %v11464_v27 = vpop.f32.mrb[15].mxu0 }
 0x8af   : > { %4823 = vrot.lane.b32.xlu1 %v11448_v32, %s9703_s6 }
 0x8b1   : > { %4825 = vrot.lane.b32.xlu0 %v11458_v39, %s9703_s6 }
 0x8b3   : > { %5176 = vrot.lane.b32.xlu1 %v11446_v25, %s9704_s20 }
 0x8b5   : > { %5178 = vrot.lane.b32.xlu0 %v11456_v7, %s9704_s20 }
 0x8b7   : > { %5184 = vrot.lane.b32.xlu1 %v11448_v32, %s9704_s20 }
 0x8b9   : > { %5186 = vrot.lane.b32.xlu0 %v11458_v39, %s9704_s20 }
 0x8bb   : > { %5443 = vrot.lane.b32.xlu1 %v11446_v25, %s9705_s12 }
 0x8bd   : > { %5445 = vrot.lane.b32.xlu0 %v11456_v7, %s9705_s12 }
 0x8bf   : > { %5451 = vrot.lane.b32.xlu1 %v11448_v32, %s9705_s12 }
 0x8c1   : > { %5453 = vrot.lane.b32.xlu0 %v11458_v39, %s9705_s12 }
 0x8c3   : > { %4819 = vrot.lane.b32.xlu1 %v11454_v0, %s9703_s6 }
 0x8c5   : > { %4821 = vrot.lane.b32.xlu0 %v11464_v27, %s9703_s6 }
 0x8c7   : > { %4827 = vrot.lane.b32.xlu1 %v11450_v43, %s9703_s6 }
 0x8c9   : > { %4829 = vrot.lane.b32.xlu0 %v11460_v44, %s9703_s6 }
 0x8cb   : > { %5570 = vrot.lane.b32.xlu1 %v11405_v60, %s9692_s21 }
 0x8cd   : > { %5572 = vrot.lane.b32.xlu0 %v11408_v15, %s9692_s21 }
 0x8cf   : > { %5180 = vrot.lane.b32.xlu1 %v11454_v0, %s9704_s20 }
 0x8d1   : > { %5576 = vrot.lane.b32.xlu0 %v11418_v62, %s9692_s21 }
 0x8d3   : > { %5188 = vrot.lane.b32.xlu1 %v11450_v43, %s9704_s20 }
 0x8d5   : > { %5711 = vrot.lane.b32.xlu0 %v11456_v7, %s9692_s21 }
 0x8d7   : > { %5447 = vrot.lane.b32.xlu1 %v11454_v0, %s9705_s12 }
 0x8d9   : > { %5719 = vrot.lane.b32.xlu0 %v11458_v39, %s9692_s21 }
 0x8db   : > { %5455 = vrot.lane.b32.xlu1 %v11450_v43, %s9705_s12 }
 0x8dd   : > { %5182 = vrot.lane.b32.xlu0 %v11464_v27, %s9704_s20 }
 0x8df   : > { %5574 = vrot.lane.b32.xlu1 %v11415_v17, %s9692_s21 }
 0x8e1   : > { %5190 = vrot.lane.b32.xlu0 %v11460_v44, %s9704_s20 }
 0x8e3   : > { %5709 = vrot.lane.b32.xlu1 %v11446_v25, %s9692_s21 }
 0x8e5   : > { %6040 = vrot.lane.b32.xlu0 %v11408_v15, %s9693_s1 }
 0x8e7   : > { %5713 = vrot.lane.b32.xlu1 %v11454_v0, %s9692_s21 }
 0x8e9   : > { %6044 = vrot.lane.b32.xlu0 %v11418_v62, %s9693_s1 }
 0x8eb   : > { %5717 = vrot.lane.b32.xlu1 %v11448_v32, %s9692_s21 }
 0x8ed   : > { %5449 = vrot.lane.b32.xlu0 %v11464_v27, %s9705_s12 }
 0x8ef   : > { %5721 = vrot.lane.b32.xlu1 %v11450_v43, %s9692_s21 }
 0x8f1   : > { %5457 = vrot.lane.b32.xlu0 %v11460_v44, %s9705_s12 }
 0x8f3   : > { %6038 = vrot.lane.b32.xlu1 %v11405_v60, %s9693_s1 }
 0x8f5   : > { %6179 = vrot.lane.b32.xlu0 %v11456_v7, %s9693_s1 }
 0x8f7   : > { %6042 = vrot.lane.b32.xlu1 %v11415_v17, %s9693_s1 }
 0x8f9   : > { %6187 = vrot.lane.b32.xlu0 %v11458_v39, %s9693_s1 }
 0x8fb   : > { %6177 = vrot.lane.b32.xlu1 %v11446_v25, %s9693_s1 }
 0x8fd   : > { %5715 = vrot.lane.b32.xlu0 %v11464_v27, %s9692_s21 }
 0x8ff   : > { %6181 = vrot.lane.b32.xlu1 %v11454_v0, %s9693_s1 }
 0x901   : > { %5723 = vrot.lane.b32.xlu0 %v11460_v44, %s9692_s21 }
 0x903   : > { %6185 = vrot.lane.b32.xlu1 %v11448_v32, %s9693_s1 }
 0x905   : > { %6306 = vrot.lane.b32.xlu0 %v11408_v15, %s9706_s18 }
 0x907   : > { %6189 = vrot.lane.b32.xlu1 %v11450_v43, %s9693_s1 }
 0x909   : > { %6310 = vrot.lane.b32.xlu0 %v11418_v62, %s9706_s18 }
 0x90b   : > { %6304 = vrot.lane.b32.xlu1 %v11405_v60, %s9706_s18 }
 0x90d   : > { %6446 = vrot.lane.b32.xlu0 %v11456_v7, %s9706_s18 }
 0x90f   : > { %6308 = vrot.lane.b32.xlu1 %v11415_v17, %s9706_s18 }
 0x911   : > { %6454 = vrot.lane.b32.xlu0 %v11458_v39, %s9706_s18 }
 0x913   : > { %6444 = vrot.lane.b32.xlu1 %v11446_v25, %s9706_s18 }
 0x915   : > { %6573 = vrot.lane.b32.xlu0 %v11408_v15, %s9707_s25 }
 0x917   : > { %6448 = vrot.lane.b32.xlu1 %v11454_v0, %s9706_s18 }
 0x919   : > { %6577 = vrot.lane.b32.xlu0 %v11418_v62, %s9707_s25 }
 0x91b   : > { %6452 = vrot.lane.b32.xlu1 %v11448_v32, %s9706_s18 }
 0x91d   : > { %v4816_v42 = vpop.permute.xlu1 %4815  ;;  %6183 = vrot.lane.b32.xlu0 %v11464_v27, %s9693_s1 }
 0x91f   : > { %6456 = vrot.lane.b32.xlu1 %v11450_v43, %s9706_s18  ;;  %v4818_v40 = vpop.permute.xlu0 %4817 }
 0x921   : > { %v4824_v13 = vpop.permute.xlu1 %4823  ;;  %6191 = vrot.lane.b32.xlu0 %v11460_v44, %s9693_s1 }
 0x923   : > { %6571 = vrot.lane.b32.xlu1 %v11405_v60, %s9707_s25  ;;  %v4826_v41 = vpop.permute.xlu0 %4825 }
 0x925   : > { %v11616_v26 = vpop.permute.xlu1 %5176  ;;  %6713 = vrot.lane.b32.xlu0 %v11456_v7, %s9707_s25 }
 0x927   : > { %6575 = vrot.lane.b32.xlu1 %v11415_v17, %s9707_s25  ;;  %v11622_v49 = vpop.permute.xlu0 %5178 }
 0x929   : > { %v11624_v63 = vpop.permute.xlu1 %5184  ;;  %6721 = vrot.lane.b32.xlu0 %v11458_v39, %s9707_s25 }
 0x92b   : > { %6711 = vrot.lane.b32.xlu1 %v11446_v25, %s9707_s25  ;;  %v11630_v30 = vpop.permute.xlu0 %5186 }
 0x92d   : > { %v11632_v54 = vpop.permute.xlu1 %5443  ;;  %6450 = vrot.lane.b32.xlu0 %v11464_v27, %s9706_s18 }
 0x92f   : > { %6715 = vrot.lane.b32.xlu1 %v11454_v0, %s9707_s25  ;;  %v11638_v51 = vpop.permute.xlu0 %5445 }
 0x931   : > { %v11645_v31 = vpop.permute.xlu1 %5451  ;;  %6458 = vrot.lane.b32.xlu0 %v11460_v44, %s9706_s18 }
 0x933   : > { %6719 = vrot.lane.b32.xlu1 %v11448_v32, %s9707_s25  ;;  %v11662_v56 = vpop.permute.xlu0 %5453 }
 0x935   : > { %v4820_v21 = vpop.permute.xlu1 %4819  ;;  %6840 = vrot.lane.b32.xlu0 %v11408_v15, %s9708_s24 }
 0x936   : > { %v4835_v61 = vsel %vm4785_vm0, %v4816_v42, %v4820_v21  ;;  %v4833_v35 = vsel %vm4785_vm0, %v4820_v21, %v4824_v13 }
 0x937   : > { %6723 = vrot.lane.b32.xlu1 %v11450_v43, %s9707_s25  ;;  %v4822_v34 = vpop.permute.xlu0 %4821  ;;  %v4840_v36 = vmul.f32 %v4835_v61, %v11666_v18 }
 0x938   : > { %v4836_v3 = vsel %vm4785_vm0, %v4818_v40, %v4822_v34  ;;  %v4834_v52 = vsel %vm4785_vm0, %v4822_v34, %v4826_v41  ;;  %v11727_v34 = vrot.slane %v11643_v33, %v10261_v12 }
 0x939   : > { %v4844_v20 = vmul.f32 %v4836_v3, %v11666_v18  ;;  %v4828_v22 = vpop.permute.xlu1 %4827  ;;  %6844 = vrot.lane.b32.xlu0 %v11418_v62, %s9708_s24  ;;  %v5047_v3 = vsel %vm5044_vm1, %v11572_v24, %v11576_v57  ;;  %v4845_v10 = vmul.f32 %v4834_v52, %v11674_v5  ;;  %v4809_v52 = vmul.f32 %v11718_v1, %v4786_v9 }
 0x93a   : > { %v4831_v53 = vsel %vm4785_vm0, %v4824_v13, %v4828_v22  ;;  %v4837_v61 = vsel %vm4785_vm0, %v4828_v22, %v4816_v42  ;;  %12947 = vst [vmem:[#allocation36_spill] sm:$0xff] %v11727_v34  ;;  %v4811_v9 = vpack.c.bf16 %v4806_v47, %v4806_v47 }
 0x93b   : > { %6838 = vrot.lane.b32.xlu1 %v11405_v60, %s9708_s24  ;;  %v4830_v4 = vpop.permute.xlu0 %4829  ;;  %v4849_v8 = vpack.c.bf16 %v4844_v20, %v4840_v36  ;;  %v4839_v22 = vmul.f32 %v4837_v61, %v11684_v45  ;;  %v4842_v38 = vmul.f32 %v4831_v53, %v11718_v1  ;;  %v4812_v53 = vpack.c.bf16 %v4807_v46, %v4807_v46 }
 0x93c   : > { %v4832_v42 = vsel %vm4785_vm0, %v4826_v41, %v4830_v4  ;;  %v4838_v18 = vsel %vm4785_vm0, %v4830_v4, %v4818_v40  ;;  %v11753_v41 = vrot.slane %v11691_v2, %v10261_v12  ;;  %v5045_v40 = vsel %vm5044_vm1, %v11582_v6, %v11586_v23 }
 0x93d   : > { %v4843_v50 = vmul.f32 %v4838_v18, %v11684_v45  ;;  %v4846_v13 = vmul.f32 %v4832_v42, %v11718_v1  ;;  %v11746_v21 = vpop.permute.xlu1 %5570  ;;  %6717 = vrot.lane.b32.xlu0 %v11464_v27, %s9707_s25  ;;  %4855 = vmatprep.subr.bf16.mxu0 %v4849_v8  ;;  %v4841_v18 = vmul.f32 %v4833_v35, %v11674_v5 }
 0x93e   : > { %v5066_v61 = vmul.f32 %v11727_v34, %v5047_v3  ;;  %v11767_v4 = vrot.slane %v11658_v37, %v10261_v12  ;;  %v4813_v42 = vpack.c.bf16 %v11708_v28, %v11708_v28  ;;  %v4814_v46 = vpack.c.bf16 %v4809_v52, %v4809_v52 }
 0x93f   : > { %v4848_v36 = vpack.c.bf16 %v4843_v50, %v4839_v22  ;;  %6842 = vrot.lane.b32.xlu1 %v11415_v17, %s9708_s24  ;;  %v11762_v20 = vpop.permute.xlu0 %5572  ;;  %v4851_v8 = vpack.c.bf16 %v4846_v13, %v4842_v38  ;;  %v5048_v50 = vsel %vm5044_vm1, %v11586_v23, %v11572_v24  ;;  %v4850_v35 = vpack.c.bf16 %v4845_v10, %v4841_v18  ;;  %v4847_v38 = vld [vmem:[%s12948_s26] sm:$0xf] }
 0x940   : > { %v11784_v28 = vrot.slane %v11653_v48, %v10261_v12  ;;  %v5068_v47 = vmul.f32 %v11753_v41, %v5045_v40  ;;  %v5046_v10 = vsel %vm5044_vm1, %v11576_v57, %v11582_v6  ;;  %v5072_v23 = vpack.c.bf16 %v5066_v61, %v5066_v61 }
 0x941   : > { %v11775_v22 = vpop.permute.xlu1 %5180  ;;  %6725 = vrot.lane.b32.xlu0 %v11460_v44, %s9707_s25  ;;  %4856 = vmatpush1.bf16.msra.mxu0 %v4848_v36  ;;  %v5065_v12 = vmul.f32 %v11767_v4, %v5048_v50  ;;  %v4943_v3 = vsel %vm4941_vm2, %v4811_v9, 0  ;;  %v4949_v52 = vsel %vm4941_vm2, %v4813_v42, 0  ;;  %v12949_v36 = vmov 0  }
 0x942   : > { %4896 = vmatprep.subr.bf16.mxu1 %v4851_v8  ;;  %8702 = vmatprep.subr.msk.bf16.mxu0 %vm4941_vm2, %v4812_v53  ;;  %v5067_v57 = vmul.f32 %v11784_v28, %v5046_v10  ;;  %v5074_v6 = vpack.c.bf16 %v5068_v47, %v5068_v47  ;;  %v4810_v53 = vld [vmem:[%s12950_s29] sm:$0xf]  ;;  %v5314_v47 = vsel %vm5311_vm6, %v11592_v55, %v11596_v58 }
 0x943   : > { %4897 = vmatpush1.bf16.msra.mxu1 %v4850_v35  ;;  %6978 = vrot.lane.b32.xlu1 %v11446_v25, %s9708_s24  ;;  %v11794_v24 = vpop.permute.xlu0 %5576  ;;  %v5071_v18 = vpack.c.bf16 %v5065_v12, %v5065_v12  ;;  %v11833_v35 = vrot.slane %v11643_v33, %v10329_v19  ;;  %v11848_v10 = vrot.slane %v11658_v37, %v10329_v19 }
 0x944   : > { %8704 = vmatprep.subr.msk.bf16.mxu1 %vm4941_vm2, %v4814_v46  ;;  %8700 = vmatmul.mubr.msk.bf16.vlgmr.msra.gmra.mrb[16].mxu0 %vm2171_vm11, %v4847_v38  ;;  %v5073_v9 = vpack.c.bf16 %v5067_v57, %v5067_v57  ;;  %v11854_v12 = vrot.slane %v11691_v2, %v10329_v19 }
 0x945   : > { %v5189_v13 = vpop.permute.xlu1 %5188  ;;  %6980 = vrot.lane.b32.xlu0 %v11456_v7, %s9708_s24  ;;  %4955 = vmatpush1.bf16.msra.mxu0 %v4943_v3  ;;  %v5079_v42 = vsel %vm4941_vm2, %v5071_v18, 0  ;;  %v5315_v3 = vsel %vm5311_vm6, %v11604_v14, %v11592_v55 }
 0x946   : > { %8701 = vmatmul.mubr.msk.bf16.vlgmr.msra.gmra.mrb[16].mxu1 %vm2171_vm11, %v4847_v38  ;;  %8707 = vmatprep.subr.msk.bf16.mxu0 %vm4941_vm2, %v5072_v23  ;;  %v5196_v38 = vsel %vm5044_vm1, %v11616_v26, %v11775_v22  ;;  %v5085_v46 = vsel %vm4941_vm2, %v5073_v9, 0  ;;  %v5332_v1 = vmul.f32 %v11848_v10, %v5315_v3 }
 0x947   : > { %4996 = vmatpush1.bf16.msra.mxu1 %v4949_v52  ;;  %6982 = vrot.lane.b32.xlu1 %v11454_v0, %s9708_s24  ;;  %v11808_v40 = vpop.permute.xlu0 %5711  ;;  %v5312_v52 = vsel %vm5311_vm6, %v11600_v29, %v11604_v14  ;;  %v5201_v18 = vmul.f32 %v5196_v38, %v11727_v34  ;;  %v11886_v14 = vrot.slane %v11653_v48, %v10329_v19 }
 0x948   : > { %8709 = vmatprep.subr.msk.bf16.mxu1 %vm4941_vm2, %v5074_v6  ;;  %4986 = vmatprep.mubr.bf16.mxu0 %v12949_v36  ;;  %v4776_v6 = vld [vmem:[%s12940_s22 + $0x40] sm:$0xff]  ;;  %v5192_v38 = vsel %vm5044_vm1, %v11624_v63, %v5189_v13  ;;  %v5194_v19 = vsel %vm5044_vm1, %v11775_v22, %v11624_v63  ;;  %v5335_v5 = vmul.f32 %v11854_v12, %v5312_v52 }
 0x949   : > { %v11812_v8 = vpop.permute.xlu1 %5447  ;;  %6988 = vrot.lane.b32.xlu0 %v11458_v39, %s9708_s24  ;;  %5027 = vmatprep.mubr.bf16.mxu1 %v12949_v36  ;;  %v5203_v63 = vmul.f32 %v5192_v38, %v11753_v41 }
 0x94b   : > { %6986 = vrot.lane.b32.xlu1 %v11448_v32, %s9708_s24  ;;  %v11822_v61 = vpop.permute.xlu0 %5719 }
 0x94c   : > { %8703 = vmatmul.mubr.msk.bf16.vlgmr.msra.gmra.mrb[20].mxu0 %vm4937_vm3, %v4810_v53 }
 0x94d   : > { %5091 = vmatpush1.bf16.msra.mxu0 %v5079_v42  ;;  %v11827_v50 = vpop.permute.xlu1 %5455  ;;  %6984 = vrot.lane.b32.xlu0 %v11464_v27, %s9708_s24  ;;  %v8706_v42 = vld [vmem:[%s12951_s10 + $0x4] sm:$0xf] }
 0x94e   : > { %8705 = vmatmul.mubr.msk.bf16.vlgmr.msra.gmra.mrb[20].mxu1 %vm4937_vm3, %v4810_v53  ;;  %5122 = vmatprep.mubr.bf16.mxu0 %v12949_v36 }
 0x94f   : > { %5132 = vmatpush1.bf16.msra.mxu1 %v5085_v46  ;;  %6990 = vrot.lane.b32.xlu1 %v11450_v43, %s9708_s24  ;;  %v5183_v23 = vpop.permute.xlu0 %5182  ;;  %v5333_v46 = vmul.f32 %v11833_v35, %v5314_v47 }
 0x950   : > { %v5197_v57 = vsel %vm5044_vm1, %v11622_v49, %v5183_v23  ;;  %5163 = vmatprep.mubr.bf16.mxu1 %v12949_v36  ;;  %v5195_v55 = vsel %vm5044_vm1, %v5183_v23, %v11630_v30  ;;  %v5198_v23 = vsel %vm5044_vm1, %v5189_v13, %v11616_v26 }
 0x951   : > { %v5205_v53 = vmul.f32 %v5197_v57, %v11727_v34  ;;  %v11876_v9 = vpop.permute.xlu1 %5574  ;;  %6992 = vrot.lane.b32.xlu0 %v11460_v44, %s9708_s24  ;;  %v5313_v57 = vsel %vm5311_vm6, %v11596_v58, %v11600_v29  ;;  %v5206_v34 = vmul.f32 %v5195_v55, %v11784_v28  ;;  %v5200_v29 = vmul.f32 %v5198_v23, %v11767_v4 }
 0x952   : > { %v5339_v55 = vpack.c.bf16 %v5333_v46, %v5333_v46  ;;  %v5341_v23 = vpack.c.bf16 %v5335_v5, %v5335_v5  ;;  %v11945_v46 = vrot.slane %v11658_v37, %v10369_v16 }
 0x953   : > { %7107 = vperm.xlu1 %9137, %v4776_v6   ;;  %v5191_v47 = vpop.permute.xlu0 %5190  ;;  %v5211_v45 = vpack.c.bf16 %v5205_v53, %v5201_v18  ;;  %v5334_v6 = vmul.f32 %v11886_v14, %v5313_v57  ;;  %v5338_v53 = vpack.c.bf16 %v5332_v1, %v5332_v1 }
 0x954   : > { %v5193_v26 = vsel %vm5044_vm1, %v11630_v30, %v5191_v47  ;;  %v5199_v58 = vsel %vm5044_vm1, %v5191_v47, %v11622_v49  ;;  %8708 = vmatmul.mubr.msk.bf16.vlgmr.msra.gmra.mrb[24].mxu0 %vm4937_vm3, %v8706_v42  ;;  %v5202_v30 = vmul.f32 %v5194_v19, %v11784_v28  ;;  %v5463_v19 = vsel %vm5311_vm6, %v11632_v54, %v11812_v8 }
 0x955   : > { %v5204_v22 = vmul.f32 %v5199_v58, %v11767_v4  ;;  %v5207_v13 = vmul.f32 %v5193_v26, %v11753_v41  ;;  %v11916_v3 = vpop.permute.xlu1 %5709  ;;  %5217 = vmatprep.subr.bf16.mxu0 %v5211_v45  ;;  %5249 = vmatprep.mubr.bf16.mxu0 %v12949_v36  ;;  %v8711_v45 = vld [vmem:[%s12948_s26 + $0x4] sm:$0xf]  ;;  %v5346_v5 = vsel %vm4941_vm2, %v5338_v53, 0  ;;  %v5580_v58 = vsel %vm1048_vm4, %v11746_v21, %v11762_v20 }
 0x956   : > { %8710 = vmatmul.mubr.msk.bf16.vlgmr.msra.gmra.mrb[24].mxu1 %vm4937_vm3, %v8706_v42  ;;  %v5212_v38 = vpack.c.bf16 %v5206_v34, %v5202_v30  ;;  %v5340_v42 = vpack.c.bf16 %v5334_v6, %v5334_v6  ;;  %v11941_v34 = vrot.slane %v11643_v33, %v10369_v16  ;;  %v5468_v30 = vmul.f32 %v5463_v19, %v11833_v35 }
 0x957   : > { %v5210_v49 = vpack.c.bf16 %v5204_v22, %v5200_v29  ;;  %v11922_v52 = vpop.permute.xlu0 %6040  ;;  %v5213_v18 = vpack.c.bf16 %v5207_v13, %v5203_v63  ;;  %5290 = vmatprep.mubr.bf16.mxu1 %v12949_v36  ;;  %v5581_v29 = vsel %vm1048_vm4, %v11794_v24, %v11746_v21  ;;  %v5465_v22 = vsel %vm5311_vm6, %v11827_v50, %v11632_v54 }
 0x958   : > { %v5352_v26 = vsel %vm4941_vm2, %v5340_v42, 0  ;;  %v11968_v13 = vrot.slane %v11691_v2, %v10369_v16  ;;  %v5459_v21 = vsel %vm5311_vm6, %v11645_v31, %v11827_v50  ;;  %v5599_v53 = vmul.f32 %v11941_v34, %v5580_v58 }
 0x959   : > { %v11925_v47 = vpop.permute.xlu1 %5713  ;;  %5218 = vmatpush1.bf16.msra.mxu0 %v5210_v49  ;;  %5258 = vmatprep.subr.bf16.mxu1 %v5213_v18  ;;  %v5578_v50 = vsel %vm1048_vm4, %v11876_v9, %v11794_v24  ;;  %v5467_v42 = vmul.f32 %v5465_v22, %v11848_v10 }
 0x95a   : > { %5259 = vmatpush1.bf16.msra.mxu1 %v5212_v38  ;;  %8715 = vmatprep.subr.msk.bf16.mxu0 %vm4941_vm2, %v5339_v55  ;;  %v8714_v55 = vld [vmem:[%s12951_s10 + $0x8] sm:$0xf]  ;;  %v5598_v38 = vmul.f32 %v11945_v46, %v5581_v29 }
 0x95b   : > { %8717 = vmatprep.subr.msk.bf16.mxu1 %vm4941_vm2, %v5341_v23  ;;  %v11932_v57 = vpop.permute.xlu0 %6044  ;;  %v11989_v23 = vrot.slane %v11653_v48, %v10369_v16 }
 0x95c   : > { %8712 = vmatmul.mubr.msk.bf16.vlgmr.msra.gmra.mrb[28].mxu0 %vm2171_vm11, %v8711_v45 }
 0x95d   : > { %v11936_v1 = vpop.permute.xlu1 %5717  ;;  %5358 = vmatpush1.bf16.msra.mxu0 %v5346_v5  ;;  %5389 = vmatprep.mubr.bf16.mxu0 %v12949_v36  ;;  %v5579_v5 = vsel %vm1048_vm4, %v11762_v20, %v11876_v9 }
 0x95e   : > { %8713 = vmatmul.mubr.msk.bf16.vlgmr.msra.gmra.mrb[28].mxu1 %vm2171_vm11, %v8711_v45  ;;  %v5461_v45 = vsel %vm5311_vm6, %v11812_v8, %v11645_v31  ;;  %v5601_v8 = vmul.f32 %v11968_v13, %v5578_v50 }
 0x95f   : > { %5399 = vmatpush1.bf16.msra.mxu1 %v5352_v26  ;;  %v5450_v63 = vpop.permute.xlu0 %5449  ;;  %5430 = vmatprep.mubr.bf16.mxu1 %v12949_v36  ;;  %v5470_v26 = vmul.f32 %v5459_v21, %v11854_v12  ;;  %v5604_v21 = vpack.c.bf16 %v5598_v38, %v5598_v38 }
 0x960   : > { %v5464_v6 = vsel %vm5311_vm6, %v11638_v51, %v5450_v63  ;;  %v5462_v49 = vsel %vm5311_vm6, %v5450_v63, %v11662_v56  ;;  %v5469_v63 = vmul.f32 %v5461_v45, %v11886_v14  ;;  %v8719_v45 = vld [vmem:[%s12948_s26 + $0x8] sm:$0xf] }
 0x961   : > { %v5472_v54 = vmul.f32 %v5464_v6, %v11833_v35  ;;  %v5722_v18 = vpop.permute.xlu1 %5721  ;;  %v5473_v58 = vmul.f32 %v5462_v49, %v11886_v14 }
 0x963   : > { %v5458_v19 = vpop.permute.xlu0 %5457  ;;  %v5478_v16 = vpack.c.bf16 %v5472_v54, %v5468_v30  ;;  %v5605_v30 = vpack.c.bf16 %v5599_v53, %v5599_v53  ;;  %v5479_v49 = vpack.c.bf16 %v5473_v58, %v5469_v63  ;;  %v5607_v54 = vpack.c.bf16 %v5601_v8, %v5601_v8 }
 0x964   : > { %v5460_v24 = vsel %vm5311_vm6, %v11662_v56, %v5458_v19  ;;  %v5466_v31 = vsel %vm5311_vm6, %v5458_v19, %v11638_v51  ;;  %8716 = vmatmul.mubr.msk.bf16.vlgmr.msra.gmra.mrb[32].mxu0 %vm4937_vm3, %v8714_v55  ;;  %v5600_v56 = vmul.f32 %v11989_v23, %v5579_v5  ;;  %v5612_v53 = vsel %vm4941_vm2, %v5604_v21, 0 }
 0x965   : > { %v5471_v20 = vmul.f32 %v5466_v31, %v11848_v10  ;;  %v5474_v9 = vmul.f32 %v5460_v24, %v11854_v12  ;;  %v12016_v29 = vpop.permute.xlu1 %6038  ;;  %5484 = vmatprep.subr.bf16.mxu0 %v5478_v16  ;;  %5516 = vmatprep.mubr.bf16.mxu0 %v12949_v36  ;;  %v5731_v24 = vsel %vm1048_vm4, %v5722_v18, %v11916_v3 }
 0x966   : > { %8718 = vmatmul.mubr.msk.bf16.vlgmr.msra.gmra.mrb[32].mxu1 %vm4937_vm3, %v8714_v55  ;;  %v5606_v5 = vpack.c.bf16 %v5600_v56, %v5600_v56  ;;  %v5725_v63 = vsel %vm1048_vm4, %v11936_v1, %v5722_v18 }
 0x967   : > { %v5477_v51 = vpack.c.bf16 %v5471_v20, %v5467_v42  ;;  %v12022_v22 = vpop.permute.xlu0 %6179  ;;  %v5480_v6 = vpack.c.bf16 %v5474_v9, %v5470_v26  ;;  %5557 = vmatprep.mubr.bf16.mxu1 %v12949_v36  ;;  %v5729_v42 = vsel %vm1048_vm4, %v11916_v3, %v11925_v47  ;;  %v8722_v9 = vld [vmem:[%s12951_s10 + $0xc] sm:$0xf]  ;;  %v5727_v3 = vsel %vm1048_vm4, %v11925_v47, %v11936_v1 }
 0x968   : > { %v5618_v19 = vsel %vm4941_vm2, %v5606_v5, 0  ;;  %v5734_v58 = vmul.f32 %v5729_v42, %v11941_v34  ;;  %v5736_v18 = vmul.f32 %v5725_v63, %v11968_v13  ;;  %v12952_v63 = vpack.c.bf16 %v11464_v27, %v11454_v0 }
 0x969   : > { %v12025_v50 = vpop.permute.xlu1 %6042  ;;  %5485 = vmatpush1.bf16.msra.mxu0 %v5477_v51  ;;  %5525 = vmatprep.subr.bf16.mxu1 %v5480_v6  ;;  %v5733_v6 = vmul.f32 %v5731_v24, %v11945_v46  ;;  %v12953_v0 = vpack.c.bf16 %v11460_v44, %v11450_v43  ;;  %v6048_v27 = vsel %vm1261_vm5, %v12016_v29, %v11922_v52 }
 0x96a   : > { %5526 = vmatpush1.bf16.msra.mxu1 %v5479_v49  ;;  %8723 = vmatprep.subr.msk.bf16.mxu0 %vm4941_vm2, %v5605_v30  ;;  %v6046_v43 = vsel %vm1261_vm5, %v12025_v50, %v11932_v57 }
 0x96b   : > { %8725 = vmatprep.subr.msk.bf16.mxu1 %vm4941_vm2, %v5607_v54  ;;  %v12032_v55 = vpop.permute.xlu0 %6187 }
 0x96c   : > { %8720 = vmatmul.mubr.msk.bf16.vlgmr.msra.gmra.mrb[36].mxu0 %vm2171_vm11, %v8719_v45 }
 0x96d   : > { %v12036_v38 = vpop.permute.xlu1 %6177  ;;  %5624 = vmatpush1.bf16.msra.mxu0 %v5612_v53  ;;  %5655 = vmatprep.mubr.bf16.mxu0 %v12949_v36 }
 0x96e   : > { %8721 = vmatmul.mubr.msk.bf16.vlgmr.msra.gmra.mrb[36].mxu1 %vm2171_vm11, %v8719_v45  ;;  %v5735_v45 = vmul.f32 %v5727_v3, %v11989_v23  ;;  %v6049_v3 = vsel %vm1261_vm5, %v11932_v57, %v12016_v29  ;;  %v12955_v57 = vpack.c.bf16 %v11458_v39, %v11448_v32 }
 0x96f   : > { %5665 = vmatpush1.bf16.msra.mxu1 %v5618_v19  ;;  %v5716_v16 = vpop.permute.xlu0 %5715  ;;  %5696 = vmatprep.mubr.bf16.mxu1 %v12949_v36  ;;  %v5841_v19 = vpack.c.bf16 %v11418_v62, %v11418_v62 }
 0x970   : > { %v5730_v26 = vsel %vm1048_vm4, %v11808_v40, %v5716_v16  ;;  %v5728_v31 = vsel %vm1048_vm4, %v5716_v16, %v11822_v61 }
 0x971   : > { %v5738_v8 = vmul.f32 %v5730_v26, %v11941_v34  ;;  %v12057_v20 = vpop.permute.xlu1 %6181  ;;  %v5739_v30 = vmul.f32 %v5728_v31, %v11989_v23  ;;  %v5840_v26 = vpack.c.bf16 %v11415_v17, %v11415_v17  ;;  %v12109_v17 = vrot.slane %v11643_v33, %v10397_v59 }
 0x972   : > { %v6047_v31 = vsel %vm1261_vm5, %v11922_v52, %v12025_v50  ;;  %v6197_v32 = vsel %vm1261_vm5, %v12036_v38, %v12057_v20 }
 0x973   : > { %v5724_v56 = vpop.permute.xlu0 %5723  ;;  %v5744_v51 = vpack.c.bf16 %v5738_v8, %v5734_v58  ;;  %v5745_v16 = vpack.c.bf16 %v5739_v30, %v5735_v45  ;;  %v5852_v62 = vsel %vm4941_vm2, %v5840_v26, 0 }
 0x974   : > { %v5726_v21 = vsel %vm1048_vm4, %v11822_v61, %v5724_v56  ;;  %v5732_v49 = vsel %vm1048_vm4, %v5724_v56, %v11808_v40  ;;  %8724 = vmatmul.mubr.msk.bf16.vlgmr.msra.gmra.mrb[40].mxu0 %vm4937_vm3, %v8722_v9  ;;  %v5839_v40 = vpack.c.bf16 %v11408_v15, %v11408_v15  ;;  %v5838_v61 = vpack.c.bf16 %v11405_v60, %v11405_v60  ;;  %v8727_v60 = vld [vmem:[%s12948_s26 + $0xc] sm:$0xf] }
 0x975   : > { %v5737_v47 = vmul.f32 %v5732_v49, %v11945_v46  ;;  %v5740_v1 = vmul.f32 %v5726_v21, %v11968_v13  ;;  %v12081_v54 = vpop.permute.xlu1 %6185  ;;  %5750 = vmatprep.subr.bf16.mxu0 %v5744_v51  ;;  %5782 = vmatprep.mubr.bf16.mxu0 %v12949_v36  ;;  %v12137_v51 = vrot.slane %v11658_v37, %v10397_v59  ;;  %v8730_v21 = vld [vmem:[%s12951_s10 + $0x10] sm:$0xf] }
 0x976   : > { %8726 = vmatmul.mubr.msk.bf16.vlgmr.msra.gmra.mrb[40].mxu1 %vm4937_vm3, %v8722_v9  ;;  %v5846_v15 = vsel %vm4941_vm2, %v5838_v61, 0  ;;  %v12122_v9 = vrot.slane %v11691_v2, %v10397_v59  ;;  %v6195_v39 = vsel %vm1261_vm5, %v12057_v20, %v12081_v54 }
 0x977   : > { %v5743_v5 = vpack.c.bf16 %v5737_v47, %v5733_v6  ;;  %v12090_v53 = vpop.permute.xlu0 %6306  ;;  %v5746_v42 = vpack.c.bf16 %v5740_v1, %v5736_v18  ;;  %5823 = vmatprep.mubr.bf16.mxu1 %v12949_v36  ;;  %v6067_v6 = vmul.f32 %v12109_v17, %v6047_v31  ;;  %v12153_v18 = vrot.slane %v11653_v48, %v10397_v59 }
 0x978   : > { %v6069_v49 = vmul.f32 %v12122_v9, %v6049_v3  ;;  %v6066_v52 = vmul.f32 %v12137_v51, %v6048_v27  ;;  %v12954_v47 = vpack.c.bf16 %v11456_v7, %v11446_v25  ;;  %v6201_v31 = vmul.f32 %v6197_v32, %v12137_v51 }
 0x979   : > { %v12097_v58 = vpop.permute.xlu1 %6189  ;;  %5751 = vmatpush1.bf16.msra.mxu0 %v5743_v5  ;;  %5791 = vmatprep.subr.bf16.mxu1 %v5746_v42  ;;  %v6073_v29 = vpack.c.bf16 %v6067_v6, %v6067_v6  ;;  %v6068_v45 = vmul.f32 %v12153_v18, %v6046_v43 }
 0x97a   : > { %5792 = vmatpush1.bf16.msra.mxu1 %v5745_v16  ;;  %8731 = vmatprep.subr.msk.bf16.mxu0 %vm4941_vm2, %v5839_v40  ;;  %v6075_v59 = vpack.c.bf16 %v6069_v49, %v6069_v49  ;;  %v6072_v25 = vpack.c.bf16 %v6066_v52, %v6066_v52  ;;  %v8735_v40 = vld [vmem:[%s12948_s26 + $0x10] sm:$0xf]  ;;  %v6193_v3 = vsel %vm1261_vm5, %v12081_v54, %v12097_v58  ;;  %v8738_v52 = vld [vmem:[%s12951_s10 + $0x14] sm:$0xf] }
 0x97b   : > { %v12104_v24 = vpop.permute.xlu0 %6310  ;;  %8733 = vmatprep.subr.msk.bf16.mxu1 %vm4941_vm2, %v5841_v19  ;;  %v6074_v61 = vpack.c.bf16 %v6068_v45, %v6068_v45  ;;  %v12956_v19 = vld [vmem:[#allocation30_spill] sm:$0xff] }
 0x97c   : > { %8728 = vmatmul.mubr.msk.bf16.vlgmr.msra.gmra.mrb[44].mxu0 %vm2171_vm11, %v8727_v60  ;;  %v6080_v42 = vsel %vm4941_vm2, %v6072_v25, 0  ;;  %v12199_v16 = vrot.slane %v11643_v33, %v12956_v19  ;;  %v12210_v20 = vrot.slane %v11691_v2, %v12956_v19 }
 0x97d   : > { %v12117_v8 = vpop.permute.xlu1 %6304  ;;  %5858 = vmatpush1.bf16.msra.mxu0 %v5846_v15  ;;  %5889 = vmatprep.mubr.bf16.mxu0 %v12949_v36 }
 0x97e   : > { %8729 = vmatmul.mubr.msk.bf16.vlgmr.msra.gmra.mrb[44].mxu1 %vm2171_vm11, %v8727_v60  ;;  %5952 = vmatprep.subr.bf16.mxu0 %v12952_v63  ;;  %v12206_v60 = vrot.slane %v11658_v37, %v12956_v19  ;;  %v6202_v63 = vmul.f32 %v6195_v39, %v12109_v17  ;;  %v6315_v27 = vsel %vm6312_vm7, %v12117_v8, %v12090_v53 }
 0x97f   : > { %5899 = vmatpush1.bf16.msra.mxu1 %v5852_v62  ;;  %v12132_v56 = vpop.permute.xlu0 %6446  ;;  %5930 = vmatprep.mubr.bf16.mxu1 %v12949_v36  ;;  %v6086_v62 = vsel %vm4941_vm2, %v6074_v61, 0  ;;  %v6316_v49 = vsel %vm6312_vm7, %v12104_v24, %v12117_v8 }
 0x980   : > { %5993 = vmatprep.subr.bf16.mxu1 %v12953_v0  ;;  %v6199_v0 = vsel %vm1261_vm5, %v12097_v58, %v12036_v38  ;;  %v6336_v61 = vmul.f32 %v12210_v20, %v6316_v49 }
 0x981   : > { %v6309_v30 = vpop.permute.xlu1 %6308 }
 0x982   : > { %v6314_v15 = vsel %vm6312_vm7, %v12090_v53, %v6309_v30  ;;  %v6313_v8 = vsel %vm6312_vm7, %v6309_v30, %v12104_v24 }
 0x983   : > { %v12159_v44 = vpop.permute.xlu0 %6454  ;;  %v6334_v38 = vmul.f32 %v12199_v16, %v6314_v15 }
 0x984   : > { %8732 = vmatmul.mubr.msk.bf16.vlgmr.msra.gmra.mrb[48].mxu0 %vm4937_vm3, %v8730_v21 }
 0x985   : > { %5953 = vmatpush1.bf16.msra.mxu0 %v12954_v47  ;;  %v12166_v1 = vpop.permute.xlu1 %6444  ;;  %5984 = vmatprep.mubr.bf16.mxu0 %v12949_v36  ;;  %v12251_v47 = vrot.slane %v11653_v48, %v12956_v19 }
 0x986   : > { %8734 = vmatmul.mubr.msk.bf16.vlgmr.msra.gmra.mrb[48].mxu1 %vm4937_vm3, %v8730_v21  ;;  %8739 = vmatprep.subr.msk.bf16.mxu0 %vm4941_vm2, %v6073_v29  ;;  %v6203_v29 = vmul.f32 %v6193_v3, %v12153_v18 }
 0x987   : > { %5994 = vmatpush1.bf16.msra.mxu1 %v12955_v57  ;;  %v12175_v50 = vpop.permute.xlu0 %6573  ;;  %6025 = vmatprep.mubr.bf16.mxu1 %v12949_v36  ;;  %v6335_v15 = vmul.f32 %v12251_v47, %v6313_v8 }
 0x988   : > { %8741 = vmatprep.subr.msk.bf16.mxu1 %vm4941_vm2, %v6075_v59  ;;  %v6204_v59 = vmul.f32 %v6199_v0, %v12122_v9 }
 0x989   : > { %v12179_v7 = vpop.permute.xlu1 %6448  ;;  %v6341_v0 = vpack.c.bf16 %v6335_v15, %v6335_v15 }
 0x98b   : > { %v12184_v5 = vpop.permute.xlu0 %6577 }
 0x98c   : > { %8736 = vmatmul.mubr.msk.bf16.vlgmr.msra.gmra.mrb[52].mxu0 %vm2171_vm11, %v8735_v40 }
 0x98d   : > { %6092 = vmatpush1.bf16.msra.mxu0 %v6080_v42  ;;  %v12201_v26 = vpop.permute.xlu1 %6452  ;;  %6123 = vmatprep.mubr.bf16.mxu0 %v12949_v36  ;;  %v6340_v42 = vpack.c.bf16 %v6334_v38, %v6334_v38  ;;  %v12957_v38 = vld [vmem:[#allocation31_spill] sm:$0xff] }
 0x98e   : > { %8737 = vmatmul.mubr.msk.bf16.vlgmr.msra.gmra.mrb[52].mxu1 %vm2171_vm11, %v8735_v40  ;;  %v6333_v40 = vmul.f32 %v12206_v60, %v6315_v27 }
 0x98f   : > { %6133 = vmatpush1.bf16.msra.mxu1 %v6086_v62  ;;  %v6184_v6 = vpop.permute.xlu0 %6183  ;;  %6164 = vmatprep.mubr.bf16.mxu1 %v12949_v36 }
 0x990   : > { %v6196_v21 = vsel %vm1261_vm5, %v6184_v6, %v12032_v55  ;;  %v6198_v54 = vsel %vm1261_vm5, %v12022_v22, %v6184_v6  ;;  %v8743_v6 = vld [vmem:[%s12948_s26 + $0x14] sm:$0xf] }
 0x991   : > { %v6205_v58 = vmul.f32 %v6198_v54, %v12137_v51  ;;  %v6206_v43 = vmul.f32 %v6196_v21, %v12109_v17  ;;  %v6457_v53 = vpop.permute.xlu1 %6456  ;;  %v6464_v21 = vsel %vm6312_vm7, %v12166_v1, %v12179_v7  ;;  %v6462_v54 = vsel %vm6312_vm7, %v12179_v7, %v12201_v26 }
 0x992   : > { %v12305_v7 = vrot.slane %v11691_v2, %v12957_v38  ;;  %v6469_v8 = vmul.f32 %v6462_v54, %v12199_v16  ;;  %v6466_v2 = vsel %vm6312_vm7, %v6457_v53, %v12166_v1 }
 0x993   : > { %v6211_v45 = vpack.c.bf16 %v6205_v58, %v6201_v31  ;;  %v6192_v57 = vpop.permute.xlu0 %6191  ;;  %v6212_v25 = vpack.c.bf16 %v6206_v43, %v6202_v63  ;;  %v6339_v31 = vpack.c.bf16 %v6333_v40, %v6333_v40  ;;  %v6342_v63 = vpack.c.bf16 %v6336_v61, %v6336_v61 }
 0x994   : > { %v6194_v32 = vsel %vm1261_vm5, %v12032_v55, %v6192_v57  ;;  %v6200_v39 = vsel %vm1261_vm5, %v6192_v57, %v12022_v22  ;;  %8740 = vmatmul.mubr.msk.bf16.vlgmr.msra.gmra.mrb[56].mxu0 %vm4937_vm3, %v8738_v52  ;;  %v12294_v58 = vrot.slane %v11643_v33, %v12957_v38  ;;  %v6353_v33 = vsel %vm4941_vm2, %v6341_v0, 0 }
 0x995   : > { %v6207_v24 = vmul.f32 %v6194_v32, %v12153_v18  ;;  %v6208_v30 = vmul.f32 %v6200_v39, %v12122_v9  ;;  %v6572_v19 = vpop.permute.xlu1 %6571  ;;  %6218 = vmatprep.subr.bf16.mxu0 %v6212_v25  ;;  %6250 = vmatprep.mubr.bf16.mxu0 %v12949_v36  ;;  %v6347_v49 = vsel %vm4941_vm2, %v6339_v31, 0 }
 0x996   : > { %8742 = vmatmul.mubr.msk.bf16.vlgmr.msra.gmra.mrb[56].mxu1 %vm4937_vm3, %v8738_v52  ;;  %6219 = vmatpush1.bf16.msra.mxu0 %v6211_v45  ;;  %v12301_v52 = vrot.slane %v11658_v37, %v12957_v38  ;;  %v6460_v37 = vsel %vm6312_vm7, %v12201_v26, %v6457_v53  ;;  %v6582_v57 = vsel %vm6579_vm8, %v6572_v19, %v12175_v50 }
 0x997   : > { %v6213_v55 = vpack.c.bf16 %v6207_v24, %v6203_v29  ;;  %v12271_v62 = vpop.permute.xlu0 %6713  ;;  %8747 = vmatprep.subr.msk.bf16.mxu0 %vm4941_vm2, %v6340_v42  ;;  %v6214_v22 = vpack.c.bf16 %v6208_v30, %v6204_v59  ;;  %6291 = vmatprep.mubr.bf16.mxu1 %v12949_v36  ;;  %v6468_v59 = vmul.f32 %v6464_v21, %v12206_v60 }
 0x998   : > { %v6583_v40 = vsel %vm6579_vm8, %v12184_v5, %v6572_v19  ;;  %v6470_v39 = vmul.f32 %v6460_v37, %v12251_v47  ;;  %v12342_v42 = vrot.slane %v11653_v48, %v12957_v38  ;;  %v6471_v24 = vmul.f32 %v6466_v2, %v12210_v20 }
 0x999   : > { %v6576_v3 = vpop.permute.xlu1 %6575  ;;  %6259 = vmatprep.subr.bf16.mxu1 %v6214_v22  ;;  %v6600_v22 = vmul.f32 %v12301_v52, %v6582_v57  ;;  %v6603_v31 = vmul.f32 %v12305_v7, %v6583_v40 }
 0x99a   : > { %6260 = vmatpush1.bf16.msra.mxu1 %v6213_v55  ;;  %v6581_v29 = vsel %vm6579_vm8, %v12175_v50, %v6576_v3  ;;  %v8746_v50 = vld [vmem:[%s12951_s10 + $0x18] sm:$0xf]  ;;  %v6580_v30 = vsel %vm6579_vm8, %v6576_v3, %v12184_v5 }
 0x99b   : > { %8749 = vmatprep.subr.msk.bf16.mxu1 %vm4941_vm2, %v6342_v63  ;;  %v12279_v27 = vpop.permute.xlu0 %6721  ;;  %v6601_v61 = vmul.f32 %v12294_v58, %v6581_v29  ;;  %v6602_v21 = vmul.f32 %v12342_v42, %v6580_v30  ;;  %v6609_v38 = vpack.c.bf16 %v6603_v31, %v6603_v31 }
 0x99c   : > { %8744 = vmatmul.mubr.msk.bf16.vlgmr.msra.gmra.mrb[60].mxu0 %vm2171_vm11, %v8743_v6 }
 0x99d   : > { %6359 = vmatpush1.bf16.msra.mxu0 %v6347_v49  ;;  %v12296_v43 = vpop.permute.xlu1 %6711  ;;  %6390 = vmatprep.mubr.bf16.mxu0 %v12949_v36  ;;  %v6606_v49 = vpack.c.bf16 %v6600_v22, %v6600_v22  ;;  %v8754_v22 = vld [vmem:[%s12951_s10 + $0x1c] sm:$0xf] }
 0x99e   : > { %8745 = vmatmul.mubr.msk.bf16.vlgmr.msra.gmra.mrb[60].mxu1 %vm2171_vm11, %v8743_v6  ;;  %v6607_v6 = vpack.c.bf16 %v6601_v61, %v6601_v61 }
 0x99f   : > { %6400 = vmatpush1.bf16.msra.mxu1 %v6353_v33  ;;  %v6451_v45 = vpop.permute.xlu0 %6450  ;;  %6431 = vmatprep.mubr.bf16.mxu1 %v12949_v36  ;;  %v8751_v33 = vld [vmem:[%s12948_s26 + $0x18] sm:$0xf]  ;;  %v6614_v37 = vsel %vm4941_vm2, %v6606_v49, 0 }
 0x9a0   : > { %v6463_v25 = vsel %vm6312_vm7, %v6451_v45, %v12159_v44  ;;  %v6465_v26 = vsel %vm6312_vm7, %v12132_v56, %v6451_v45 }
 0x9a1   : > { %v6472_v1 = vmul.f32 %v6465_v26, %v12206_v60  ;;  %v6473_v53 = vmul.f32 %v6463_v25, %v12199_v16  ;;  %v6716_v32 = vpop.permute.xlu1 %6715 }
 0x9a2   : > { %v6731_v45 = vsel %vm6579_vm8, %v12296_v43, %v6716_v32 }
 0x9a3   : > { %v6478_v19 = vpack.c.bf16 %v6472_v1, %v6468_v59  ;;  %v6459_v15 = vpop.permute.xlu0 %6458  ;;  %v6479_v55 = vpack.c.bf16 %v6473_v53, %v6469_v8  ;;  %v6608_v59 = vpack.c.bf16 %v6602_v21, %v6602_v21  ;;  %v6735_v61 = vmul.f32 %v6731_v45, %v12301_v52 }
 0x9a4   : > { %v6461_v63 = vsel %vm6312_vm7, %v12159_v44, %v6459_v15  ;;  %v6467_v48 = vsel %vm6312_vm7, %v6459_v15, %v12132_v56  ;;  %8748 = vmatmul.mubr.msk.bf16.vlgmr.msra.gmra.mrb[64].mxu0 %vm4937_vm3, %v8746_v50 }
 0x9a5   : > { %v6474_v5 = vmul.f32 %v6461_v63, %v12251_v47  ;;  %v6475_v3 = vmul.f32 %v6467_v48, %v12210_v20  ;;  %v6720_v0 = vpop.permute.xlu1 %6719  ;;  %6485 = vmatprep.subr.bf16.mxu0 %v6479_v55  ;;  %6517 = vmatprep.mubr.bf16.mxu0 %v12949_v36  ;;  %v6620_v25 = vsel %vm4941_vm2, %v6608_v59, 0 }
 0x9a6   : > { %8750 = vmatmul.mubr.msk.bf16.vlgmr.msra.gmra.mrb[64].mxu1 %vm4937_vm3, %v8746_v50  ;;  %6486 = vmatpush1.bf16.msra.mxu0 %v6478_v19  ;;  %v6729_v2 = vsel %vm6579_vm8, %v6716_v32, %v6720_v0  ;;  %v12393_v50 = vld [vmem:[%s12939_s8 + $0xa8] ss:$0 sm:$0xff] }
 0x9a7   : > { %v6480_v44 = vpack.c.bf16 %v6474_v5, %v6470_v39  ;;  %v6841_v54 = vpop.permute.xlu0 %6840  ;;  %8755 = vmatprep.subr.msk.bf16.mxu0 %vm4941_vm2, %v6607_v6  ;;  %v6481_v56 = vpack.c.bf16 %v6475_v3, %v6471_v24  ;;  %6558 = vmatprep.mubr.bf16.mxu1 %v12949_v36  ;;  %v6736_v1 = vmul.f32 %v6729_v2, %v12294_v58  ;;  %v8762_v24 = vld [vmem:[%s12939_s8 + $0xa0] ss:$0 sm:$0xff]  ;;  %v12421_v5 = vld [vmem:[%s12939_s8 + $0xb0] ss:$0 sm:$0xff] }
 0x9a9   : > { %v6724_v29 = vpop.permute.xlu1 %6723  ;;  %6526 = vmatprep.subr.bf16.mxu1 %v6481_v56 }
 0x9aa   : > { %6527 = vmatpush1.bf16.msra.mxu1 %v6480_v44  ;;  %v6727_v26 = vsel %vm6579_vm8, %v6720_v0, %v6724_v29  ;;  %v6733_v39 = vsel %vm6579_vm8, %v6724_v29, %v12296_v43  ;;  %v12412_v43 = vld [vmem:[%s12939_s8 + $0xb8] ss:$0 sm:$0xff] }
 0x9ab   : > { %8757 = vmatprep.subr.msk.bf16.mxu1 %vm4941_vm2, %v6609_v38  ;;  %v6845_v8 = vpop.permute.xlu0 %6844  ;;  %v6737_v31 = vmul.f32 %v6727_v26, %v12342_v42  ;;  %v6738_v56 = vmul.f32 %v6733_v39, %v12305_v7 }
 0x9ac   : > { %8752 = vmatmul.mubr.msk.bf16.vlgmr.msra.gmra.mrb[68].mxu0 %vm2171_vm11, %v8751_v33 }
 0x9ad   : > { %6626 = vmatpush1.bf16.msra.mxu0 %v6614_v37  ;;  %v6839_v57 = vpop.permute.xlu1 %6838  ;;  %6657 = vmatprep.mubr.bf16.mxu0 %v12949_v36 }
 0x9ae   : > { %8753 = vmatmul.mubr.msk.bf16.vlgmr.msra.gmra.mrb[68].mxu1 %vm2171_vm11, %v8751_v33  ;;  %v6849_v30 = vsel %vm6846_vm9, %v6839_v57, %v6841_v54  ;;  %v6850_v63 = vsel %vm6846_vm9, %v6845_v8, %v6839_v57 }
 0x9af   : > { %6667 = vmatpush1.bf16.msra.mxu1 %v6620_v25  ;;  %v6718_v40 = vpop.permute.xlu0 %6717  ;;  %6698 = vmatprep.mubr.bf16.mxu1 %v12949_v36  ;;  %v6867_v49 = vmul.f32 %v8762_v24, %v6849_v30  ;;  %v6870_v29 = vmul.f32 %v12412_v43, %v6850_v63 }
 0x9b0   : > { %v6730_v53 = vsel %vm6579_vm8, %v6718_v40, %v12279_v27  ;;  %v6732_v32 = vsel %vm6579_vm8, %v12271_v62, %v6718_v40  ;;  %v8759_v40 = vld [vmem:[%s12948_s26 + $0x1c] sm:$0xf] }
 0x9b1   : > { %v6739_v19 = vmul.f32 %v6732_v32, %v12301_v52  ;;  %v6740_v15 = vmul.f32 %v6730_v53, %v12294_v58  ;;  %v6843_v55 = vpop.permute.xlu1 %6842  ;;  %v6873_v57 = vpack.c.bf16 %v6867_v49, %v6867_v49  ;;  %v6876_v25 = vpack.c.bf16 %v6870_v29, %v6870_v29 }
 0x9b2   : > { %v6848_v48 = vsel %vm6846_vm9, %v6841_v54, %v6843_v55  ;;  %v6847_v3 = vsel %vm6846_vm9, %v6843_v55, %v6845_v8 }
 0x9b3   : > { %v6745_v6 = vpack.c.bf16 %v6739_v19, %v6735_v61  ;;  %v6868_v0 = vmul.f32 %v12393_v50, %v6848_v48  ;;  %v6726_v21 = vpop.permute.xlu0 %6725  ;;  %v6746_v44 = vpack.c.bf16 %v6740_v15, %v6736_v1  ;;  %v6869_v45 = vmul.f32 %v12421_v5, %v6847_v3 }
 0x9b4   : > { %v6728_v54 = vsel %vm6579_vm8, %v12279_v27, %v6726_v21  ;;  %v6734_v38 = vsel %vm6579_vm8, %v6726_v21, %v12271_v62  ;;  %8756 = vmatmul.mubr.msk.bf16.vlgmr.msra.gmra.mrb[72].mxu0 %vm4937_vm3, %v8754_v22  ;;  %v6881_v53 = vsel %vm4941_vm2, %v6873_v57, 0 }
 0x9b5   : > { %v6874_v33 = vpack.c.bf16 %v6868_v0, %v6868_v0  ;;  %v6741_v59 = vmul.f32 %v6728_v54, %v12342_v42  ;;  %v6742_v8 = vmul.f32 %v6734_v38, %v12305_v7  ;;  %v6979_v37 = vpop.permute.xlu1 %6978  ;;  %6752 = vmatprep.subr.bf16.mxu0 %v6746_v44  ;;  %6784 = vmatprep.mubr.bf16.mxu0 %v12949_v36  ;;  %v8766_v0 = vld [vmem:[%s12951_s10 + $0x20] sm:$0xf] }
 0x9b6   : > { %8758 = vmatmul.mubr.msk.bf16.vlgmr.msra.gmra.mrb[72].mxu1 %vm4937_vm3, %v8754_v22  ;;  %6753 = vmatpush1.bf16.msra.mxu0 %v6745_v6  ;;  %v6875_v61 = vpack.c.bf16 %v6869_v45, %v6869_v45  ;;  %v8771_v45 = vld [vmem:[%s12948_s26 + $0x20] sm:$0xf] }
 0x9b7   : > { %v6747_v27 = vpack.c.bf16 %v6741_v59, %v6737_v31  ;;  %v6981_v2 = vpop.permute.xlu0 %6980  ;;  %8767 = vmatprep.subr.msk.bf16.mxu0 %vm4941_vm2, %v6874_v33  ;;  %v6748_v62 = vpack.c.bf16 %v6742_v8, %v6738_v56  ;;  %6825 = vmatprep.mubr.bf16.mxu1 %v12949_v36 }
 0x9b8   : > { %v6887_v19 = vsel %vm4941_vm2, %v6875_v61, 0 }
 0x9b9   : > { %v6983_v26 = vpop.permute.xlu1 %6982  ;;  %6793 = vmatprep.subr.bf16.mxu1 %v6748_v62 }
 0x9ba   : > { %6794 = vmatpush1.bf16.msra.mxu1 %v6747_v27  ;;  %v6998_v39 = vsel %vm6846_vm9, %v6979_v37, %v6983_v26 }
 0x9bb   : > { %v6989_v1 = vpop.permute.xlu0 %6988  ;;  %8769 = vmatprep.subr.msk.bf16.mxu1 %vm4941_vm2, %v6876_v25  ;;  %v7002_v31 = vmul.f32 %v8762_v24, %v6998_v39 }
 0x9bc   : > { %8760 = vmatmul.mubr.msk.bf16.vlgmr.msra.gmra.mrb[76].mxu0 %vm2171_vm11, %v8759_v40 }
 0x9bd   : > { %6893 = vmatpush1.bf16.msra.mxu0 %v6881_v53  ;;  %v6987_v32 = vpop.permute.xlu1 %6986  ;;  %6924 = vmatprep.mubr.bf16.mxu0 %v12949_v36 }
 0x9be   : > { %v6996_v30 = vsel %vm6846_vm9, %v6983_v26, %v6987_v32  ;;  %8761 = vmatmul.mubr.msk.bf16.vlgmr.msra.gmra.mrb[76].mxu1 %vm2171_vm11, %v8759_v40 }
 0x9bf   : > { %6934 = vmatpush1.bf16.msra.mxu1 %v6887_v19  ;;  %v6985_v15 = vpop.permute.xlu0 %6984  ;;  %6965 = vmatprep.mubr.bf16.mxu1 %v12949_v36  ;;  %v7003_v63 = vmul.f32 %v12393_v50, %v6996_v30 }
 0x9c0   : > { %v6997_v55 = vsel %vm6846_vm9, %v6985_v15, %v6989_v1  ;;  %v6999_v22 = vsel %vm6846_vm9, %v6981_v2, %v6985_v15 }
 0x9c1   : > { %v7006_v48 = vmul.f32 %v8762_v24, %v6999_v22  ;;  %v7007_v6 = vmul.f32 %v12393_v50, %v6997_v55  ;;  %v6991_v3 = vpop.permute.xlu1 %6990 }
 0x9c2   : > { %v6994_v21 = vsel %vm6846_vm9, %v6987_v32, %v6991_v3  ;;  %v7000_v44 = vsel %vm6846_vm9, %v6991_v3, %v6979_v37 }
 0x9c3   : > { %v7012_v56 = vpack.c.bf16 %v7006_v48, %v7002_v31  ;;  %v6993_v49 = vpop.permute.xlu0 %6992  ;;  %v7013_v54 = vpack.c.bf16 %v7007_v6, %v7003_v63  ;;  %v7004_v38 = vmul.f32 %v12421_v5, %v6994_v21  ;;  %v7005_v29 = vmul.f32 %v12412_v43, %v7000_v44 }
 0x9c4   : > { %v6995_v24 = vsel %vm6846_vm9, %v6989_v1, %v6993_v49  ;;  %v7001_v50 = vsel %vm6846_vm9, %v6993_v49, %v6981_v2  ;;  %8768 = vmatmul.mubr.msk.bf16.vlgmr.msra.gmra.mrb[80].mxu0 %vm4937_vm3, %v8766_v0 }
 0x9c5   : > { %v7008_v33 = vmul.f32 %v12421_v5, %v6995_v24  ;;  %v7009_v59 = vmul.f32 %v12412_v43, %v7001_v50  ;;  %7019 = vmatprep.subr.bf16.mxu0 %v7013_v54  ;;  %7051 = vmatprep.mubr.bf16.mxu0 %v12949_v36 }
 0x9c6   : > { %8770 = vmatmul.mubr.msk.bf16.vlgmr.msra.gmra.mrb[80].mxu1 %vm4937_vm3, %v8766_v0  ;;  %7020 = vmatpush1.bf16.msra.mxu0 %v7012_v56 }
 0x9c7   : > { %v7014_v8 = vpack.c.bf16 %v7008_v33, %v7004_v38  ;;  %v7015_v37 = vpack.c.bf16 %v7009_v59, %v7005_v29  ;;  %7092 = vmatprep.mubr.bf16.mxu1 %v12949_v36 }
 0x9c9   : > { %7060 = vmatprep.subr.bf16.mxu1 %v7015_v37 }
 0x9ca   : > { %7061 = vmatpush1.bf16.msra.mxu1 %v7014_v8 }
 0x9cc   : > { %8772 = vmatmul.mubr.msk.bf16.vlgmr.msra.gmra.mrb[84].mxu0 %vm2171_vm11, %v8771_v45 }
 0x9cd   : > { %7209 = vmatprep.mubr.bf16.mxu0 %v12949_v36 }
 0x9ce   : > { %8773 = vmatmul.mubr.msk.bf16.vlgmr.msra.gmra.mrb[84].mxu1 %vm2171_vm11, %v8771_v45 }
 0x9cf   : > { %7250 = vmatprep.mubr.bf16.mxu1 %v12949_v36 }
 0xa17   : > { %v4889_v43 = vpop.f32.mrb[16].mxu0 }
 0xa18   : > { %v4891_v5 = vpop.f32.mrb[17].mxu0 }
 0xa19   : > { %v4893_v27 = vpop.f32.mrb[18].mxu0  ;;  %v4930_v2 = vpop.f32.mrb[16].mxu1 }
 0xa1a   : > { %v4894_v62 = vpop.f32.mrb[19].mxu0  ;;  %v4932_v57 = vpop.f32.mrb[17].mxu1 }
 0xa1b   : > { %v4934_v25 = vpop.f32.mrb[18].mxu1 }
 0xa1c   : > { %v4935_v26 = vpop.f32.mrb[19].mxu1 }
 0xa1f   : > { %v4988_v40 = vpop.f32.mrb[20].mxu0 }
 0xa20   : > { %v4989_v61 = vadd.f32 %v4988_v40, %v4889_v43  ;;  %v4990_v1 = vpop.f32.mrb[21].mxu0 }
 0xa21   : > { %v4991_v53 = vadd.f32 %v4990_v1, %v4891_v5  ;;  %v5029_v32 = vpop.f32.mrb[20].mxu1  ;;  %v4992_v39 = vpop.f32.mrb[22].mxu0 }
 0xa22   : > { %v5030_v30 = vadd.f32 %v5029_v32, %v4930_v2  ;;  %v5031_v19 = vpop.f32.mrb[21].mxu1  ;;  %v4993_v15 = vpop.f32.mrb[23].mxu0 }
 0xa23   : > { %v5032_v55 = vadd.f32 %v5031_v19, %v4932_v57  ;;  %v5033_v22 = vpop.f32.mrb[22].mxu1 }
 0xa24   : > { %v5034_v31 = vpop.f32.mrb[23].mxu1 }
 0xa27   : > { %v5124_v63 = vpop.f32.mrb[24].mxu0 }
 0xa28   : > { %v5172_v48 = vadd.f32 %v5124_v63, %v4989_v61  ;;  %v5126_v6 = vpop.f32.mrb[25].mxu0 }
 0xa29   : > { %v5173_v3 = vadd.f32 %v5126_v6, %v4991_v53  ;;  %v5165_v0 = vpop.f32.mrb[24].mxu1  ;;  %v5128_v21 = vpop.f32.mrb[26].mxu0 }
 0xa2a   : > { %v5174_v44 = vadd.f32 %v5165_v0, %v5030_v30  ;;  %v5167_v56 = vpop.f32.mrb[25].mxu1  ;;  %v5129_v49 = vpop.f32.mrb[27].mxu0 }
 0xa2b   : > { %v5175_v54 = vadd.f32 %v5167_v56, %v5032_v55  ;;  %v5169_v38 = vpop.f32.mrb[26].mxu1 }
 0xa2c   : > { %v5170_v24 = vpop.f32.mrb[27].mxu1 }
 0xa2f   : > { %v5251_v50 = vpop.f32.mrb[28].mxu0 }
 0xa30   : > { %v5299_v29 = vadd.f32 %v5251_v50, %v5172_v48  ;;  %v5253_v33 = vpop.f32.mrb[29].mxu0 }
 0xa31   : > { %v5300_v59 = vadd.f32 %v5253_v33, %v5173_v3  ;;  %v5292_v8 = vpop.f32.mrb[28].mxu1  ;;  %v5255_v37 = vpop.f32.mrb[30].mxu0 }
 0xa32   : > { %v5301_v45 = vadd.f32 %v5292_v8, %v5174_v44  ;;  %v5294_v43 = vpop.f32.mrb[29].mxu1  ;;  %v5256_v5 = vpop.f32.mrb[31].mxu0 }
 0xa33   : > { %v5302_v27 = vadd.f32 %v5294_v43, %v5175_v54  ;;  %v5296_v2 = vpop.f32.mrb[30].mxu1 }
 0xa34   : > { %v5297_v62 = vpop.f32.mrb[31].mxu1 }
 0xa37   : > { %v5391_v57 = vpop.f32.mrb[32].mxu0 }
 0xa38   : > { %v5439_v25 = vadd.f32 %v5391_v57, %v5299_v29  ;;  %v5393_v26 = vpop.f32.mrb[33].mxu0 }
 0xa39   : > { %v5440_v40 = vadd.f32 %v5393_v26, %v5300_v59  ;;  %v5432_v61 = vpop.f32.mrb[32].mxu1  ;;  %v5395_v1 = vpop.f32.mrb[34].mxu0 }
 0xa3a   : > { %v5441_v53 = vadd.f32 %v5432_v61, %v5301_v45  ;;  %v5434_v32 = vpop.f32.mrb[33].mxu1  ;;  %v5396_v39 = vpop.f32.mrb[35].mxu0 }
 0xa3b   : > { %v5442_v30 = vadd.f32 %v5434_v32, %v5302_v27  ;;  %v5436_v19 = vpop.f32.mrb[34].mxu1 }
 0xa3c   : > { %v5437_v15 = vpop.f32.mrb[35].mxu1 }
 0xa3f   : > { %v5518_v55 = vpop.f32.mrb[36].mxu0 }
 0xa40   : > { %v5566_v22 = vadd.f32 %v5518_v55, %v5439_v25  ;;  %v5520_v31 = vpop.f32.mrb[37].mxu0 }
 0xa41   : > { %v5567_v63 = vadd.f32 %v5520_v31, %v5440_v40  ;;  %v5559_v48 = vpop.f32.mrb[36].mxu1  ;;  %v5522_v6 = vpop.f32.mrb[38].mxu0 }
 0xa42   : > { %v5568_v3 = vadd.f32 %v5559_v48, %v5441_v53  ;;  %v5561_v0 = vpop.f32.mrb[37].mxu1  ;;  %v5523_v21 = vpop.f32.mrb[39].mxu0 }
 0xa43   : > { %v5569_v44 = vadd.f32 %v5561_v0, %v5442_v30  ;;  %v5563_v56 = vpop.f32.mrb[38].mxu1 }
 0xa44   : > { %v5564_v49 = vpop.f32.mrb[39].mxu1 }
 0xa47   : > { %v5657_v54 = vpop.f32.mrb[40].mxu0 }
 0xa48   : > { %v5705_v38 = vadd.f32 %v5657_v54, %v5566_v22  ;;  %v5659_v24 = vpop.f32.mrb[41].mxu0 }
 0xa49   : > { %v5706_v50 = vadd.f32 %v5659_v24, %v5567_v63  ;;  %v5698_v29 = vpop.f32.mrb[40].mxu1  ;;  %v5661_v33 = vpop.f32.mrb[42].mxu0 }
 0xa4a   : > { %v5707_v59 = vadd.f32 %v5698_v29, %v5568_v3  ;;  %v5700_v8 = vpop.f32.mrb[41].mxu1  ;;  %v5662_v37 = vpop.f32.mrb[43].mxu0 }
 0xa4b   : > { %v5708_v45 = vadd.f32 %v5700_v8, %v5569_v44  ;;  %v5702_v43 = vpop.f32.mrb[42].mxu1 }
 0xa4c   : > { %v5703_v5 = vpop.f32.mrb[43].mxu1 }
 0xa4f   : > { %v5784_v27 = vpop.f32.mrb[44].mxu0 }
 0xa50   : > { %v5832_v2 = vadd.f32 %v5784_v27, %v5705_v38  ;;  %v5786_v62 = vpop.f32.mrb[45].mxu0 }
 0xa51   : > { %v5833_v57 = vadd.f32 %v5786_v62, %v5706_v50  ;;  %v5825_v25 = vpop.f32.mrb[44].mxu1  ;;  %v5788_v26 = vpop.f32.mrb[46].mxu0 }
 0xa52   : > { %v5834_v40 = vadd.f32 %v5825_v25, %v5707_v59  ;;  %v5827_v61 = vpop.f32.mrb[45].mxu1  ;;  %v5789_v1 = vpop.f32.mrb[47].mxu0 }
 0xa53   : > { %v5835_v53 = vadd.f32 %v5827_v61, %v5708_v45  ;;  %v5829_v32 = vpop.f32.mrb[46].mxu1 }
 0xa54   : > { %v5830_v39 = vpop.f32.mrb[47].mxu1 }
 0xa57   : > { %v5891_v30 = vpop.f32.mrb[48].mxu0 }
 0xa58   : > { %v5939_v19 = vadd.f32 %v5891_v30, %v5832_v2  ;;  %v5893_v15 = vpop.f32.mrb[49].mxu0 }
 0xa59   : > { %v5940_v55 = vadd.f32 %v5893_v15, %v5833_v57  ;;  %v5932_v22 = vpop.f32.mrb[48].mxu1  ;;  %v5895_v31 = vpop.f32.mrb[50].mxu0 }
 0xa5a   : > { %v5941_v63 = vadd.f32 %v5932_v22, %v5834_v40  ;;  %v5934_v48 = vpop.f32.mrb[49].mxu1  ;;  %v5896_v6 = vpop.f32.mrb[51].mxu0 }
 0xa5b   : > { %v5942_v3 = vadd.f32 %v5934_v48, %v5835_v53  ;;  %v5936_v0 = vpop.f32.mrb[50].mxu1 }
 0xa5c   : > { %v5937_v21 = vpop.f32.mrb[51].mxu1 }
 0xa5f   : > { %v5986_v44 = vpop.f32.mrb[52].mxu0 }
 0xa60   : > { %v6034_v56 = vadd.f32 %v5986_v44, %v5939_v19  ;;  %v5988_v49 = vpop.f32.mrb[53].mxu0 }
 0xa61   : > { %v6035_v54 = vadd.f32 %v5988_v49, %v5940_v55  ;;  %v6027_v38 = vpop.f32.mrb[52].mxu1  ;;  %v5990_v24 = vpop.f32.mrb[54].mxu0 }
 0xa62   : > { %v6036_v50 = vadd.f32 %v6027_v38, %v5941_v63  ;;  %v6029_v29 = vpop.f32.mrb[53].mxu1  ;;  %v5991_v33 = vpop.f32.mrb[55].mxu0 }
 0xa63   : > { %v6037_v59 = vadd.f32 %v6029_v29, %v5942_v3  ;;  %v6031_v8 = vpop.f32.mrb[54].mxu1 }
 0xa64   : > { %v6032_v37 = vpop.f32.mrb[55].mxu1 }
 0xa67   : > { %v6125_v45 = vpop.f32.mrb[56].mxu0 }
 0xa68   : > { %v6173_v43 = vadd.f32 %v6125_v45, %v6034_v56  ;;  %v6127_v5 = vpop.f32.mrb[57].mxu0 }
 0xa69   : > { %v6174_v27 = vadd.f32 %v6127_v5, %v6035_v54  ;;  %v6166_v2 = vpop.f32.mrb[56].mxu1  ;;  %v6129_v62 = vpop.f32.mrb[58].mxu0 }
 0xa6a   : > { %v6175_v57 = vadd.f32 %v6166_v2, %v6036_v50  ;;  %v6168_v25 = vpop.f32.mrb[57].mxu1  ;;  %v6130_v26 = vpop.f32.mrb[59].mxu0 }
 0xa6b   : > { %v6176_v40 = vadd.f32 %v6168_v25, %v6037_v59  ;;  %v6170_v61 = vpop.f32.mrb[58].mxu1 }
 0xa6c   : > { %v6171_v1 = vpop.f32.mrb[59].mxu1 }
 0xa6f   : > { %v6252_v53 = vpop.f32.mrb[60].mxu0 }
 0xa70   : > { %v6300_v32 = vadd.f32 %v6252_v53, %v6173_v43  ;;  %v6254_v39 = vpop.f32.mrb[61].mxu0 }
 0xa71   : > { %v6301_v30 = vadd.f32 %v6254_v39, %v6174_v27  ;;  %v6293_v19 = vpop.f32.mrb[60].mxu1  ;;  %v6256_v15 = vpop.f32.mrb[62].mxu0 }
 0xa72   : > { %v6302_v55 = vadd.f32 %v6293_v19, %v6175_v57  ;;  %v6295_v22 = vpop.f32.mrb[61].mxu1  ;;  %v6257_v31 = vpop.f32.mrb[63].mxu0 }
 0xa73   : > { %v6303_v63 = vadd.f32 %v6295_v22, %v6176_v40  ;;  %v6297_v48 = vpop.f32.mrb[62].mxu1 }
 0xa74   : > { %v6298_v6 = vpop.f32.mrb[63].mxu1 }
 0xa77   : > { %v6392_v3 = vpop.f32.mrb[64].mxu0 }
 0xa78   : > { %v6440_v0 = vadd.f32 %v6392_v3, %v6300_v32  ;;  %v6394_v21 = vpop.f32.mrb[65].mxu0 }
 0xa79   : > { %v6441_v44 = vadd.f32 %v6394_v21, %v6301_v30  ;;  %v6433_v56 = vpop.f32.mrb[64].mxu1  ;;  %v6396_v49 = vpop.f32.mrb[66].mxu0 }
 0xa7a   : > { %v6442_v54 = vadd.f32 %v6433_v56, %v6302_v55  ;;  %v6435_v38 = vpop.f32.mrb[65].mxu1  ;;  %v6397_v24 = vpop.f32.mrb[67].mxu0 }
 0xa7b   : > { %v6443_v50 = vadd.f32 %v6435_v38, %v6303_v63  ;;  %v6437_v29 = vpop.f32.mrb[66].mxu1 }
 0xa7c   : > { %v6438_v33 = vpop.f32.mrb[67].mxu1 }
 0xa7f   : > { %v6519_v59 = vpop.f32.mrb[68].mxu0 }
 0xa80   : > { %v6567_v8 = vadd.f32 %v6519_v59, %v6440_v0  ;;  %v6521_v37 = vpop.f32.mrb[69].mxu0 }
 0xa81   : > { %v6568_v45 = vadd.f32 %v6521_v37, %v6441_v44  ;;  %v6560_v43 = vpop.f32.mrb[68].mxu1  ;;  %v6523_v5 = vpop.f32.mrb[70].mxu0 }
 0xa82   : > { %v6569_v27 = vadd.f32 %v6560_v43, %v6442_v54  ;;  %v6562_v2 = vpop.f32.mrb[69].mxu1  ;;  %v6524_v62 = vpop.f32.mrb[71].mxu0 }
 0xa83   : > { %v6570_v57 = vadd.f32 %v6562_v2, %v6443_v50  ;;  %v6564_v25 = vpop.f32.mrb[70].mxu1 }
 0xa84   : > { %v6565_v26 = vpop.f32.mrb[71].mxu1  ;;  %v7108_v25 = vpop.permute.xlu1 %7107 }
 0xa87   : > { %v6659_v40 = vpop.f32.mrb[72].mxu0 }
 0xa88   : > { %v6707_v61 = vadd.f32 %v6659_v40, %v6567_v8  ;;  %v6661_v1 = vpop.f32.mrb[73].mxu0 }
 0xa89   : > { %v6708_v53 = vadd.f32 %v6661_v1, %v6568_v45  ;;  %v6700_v32 = vpop.f32.mrb[72].mxu1  ;;  %v6663_v39 = vpop.f32.mrb[74].mxu0 }
 0xa8a   : > { %v6709_v30 = vadd.f32 %v6700_v32, %v6569_v27  ;;  %v6702_v19 = vpop.f32.mrb[73].mxu1  ;;  %v6664_v15 = vpop.f32.mrb[75].mxu0 }
 0xa8b   : > { %v6710_v55 = vadd.f32 %v6702_v19, %v6570_v57  ;;  %v6704_v22 = vpop.f32.mrb[74].mxu1 }
 0xa8c   : > { %v6705_v31 = vpop.f32.mrb[75].mxu1 }
 0xa8f   : > { %v6786_v63 = vpop.f32.mrb[76].mxu0 }
 0xa90   : > { %v6834_v48 = vadd.f32 %v6786_v63, %v6707_v61  ;;  %v6788_v6 = vpop.f32.mrb[77].mxu0 }
 0xa91   : > { %v6835_v3 = vadd.f32 %v6788_v6, %v6708_v53  ;;  %v6827_v0 = vpop.f32.mrb[76].mxu1  ;;  %v6790_v21 = vpop.f32.mrb[78].mxu0 }
 0xa92   : > { %v6836_v44 = vadd.f32 %v6827_v0, %v6709_v30  ;;  %v6829_v56 = vpop.f32.mrb[77].mxu1  ;;  %v6791_v49 = vpop.f32.mrb[79].mxu0 }
 0xa93   : > { %v6837_v54 = vadd.f32 %v6829_v56, %v6710_v55  ;;  %v6831_v38 = vpop.f32.mrb[78].mxu1  ;;  %v8218_v56 = vld [vmem:[%s12940_s22 + $0x50] sm:$0xff]  ;;  %v8219_v49 = vld [vmem:[%s12940_s22 + $0x58] sm:$0x1] }
 0xa94   : > { %v6832_v24 = vpop.f32.mrb[79].mxu1 }
 0xa97   : > { %v6926_v50 = vpop.f32.mrb[80].mxu0 }
 0xa98   : > { %v6974_v29 = vadd.f32 %v6926_v50, %v6834_v48  ;;  %v6928_v33 = vpop.f32.mrb[81].mxu0  ;;  %v12958_v50 = vld [vmem:[#allocation36_spill] sm:$0xff] }
 0xa99   : > { %v6975_v59 = vadd.f32 %v6928_v33, %v6835_v3  ;;  %v6967_v8 = vpop.f32.mrb[80].mxu1  ;;  %v6930_v37 = vpop.f32.mrb[82].mxu0 }
 0xa9a   : > { %v6976_v45 = vadd.f32 %v6967_v8, %v6836_v44  ;;  %v6969_v43 = vpop.f32.mrb[81].mxu1  ;;  %v6931_v5 = vpop.f32.mrb[83].mxu0  ;;  %v7118_v44 = vld [vmem:[%s12940_s22 + $0x48] sm:$0xff] }
 0xa9b   : > { %v6977_v27 = vadd.f32 %v6969_v43, %v6837_v54  ;;  %v6971_v2 = vpop.f32.mrb[82].mxu1 }
 0xa9c   : > { %v6972_v62 = vpop.f32.mrb[83].mxu1 }
 0xa9f   : > { %v7053_v57 = vpop.f32.mrb[84].mxu0 }
 0xaa0   : > { %v7101_v26 = vadd.f32 %v7053_v57, %v6974_v29  ;;  %v7055_v40 = vpop.f32.mrb[85].mxu0 }
 0xaa1   : > { %v7102_v61 = vadd.f32 %v7055_v40, %v6975_v59  ;;  %v7094_v1 = vpop.f32.mrb[84].mxu1  ;;  %v7057_v53 = vpop.f32.mrb[86].mxu0 }
 0xaa2   : > { %v7110_v32 = vadd.f32 %v7108_v25, %v7101_v26  ;;  %v7103_v39 = vadd.f32 %v7094_v1, %v6976_v45  ;;  %v7096_v30 = vpop.f32.mrb[85].mxu1  ;;  %v7058_v19 = vpop.f32.mrb[87].mxu0  ;;  %v12959_v1 = vld [vmem:[#allocation32_spill] sm:$0xff] }
 0xaa3   : > { %v7111_v15 = vadd.f32 %v7108_v25, %v7102_v61  ;;  %v7104_v55 = vadd.f32 %v7096_v30, %v6977_v27  ;;  %v7098_v22 = vpop.f32.mrb[86].mxu1 }
 0xaa4   : > { %v12488_v31 = vmax.f32 %v7110_v32, 0.0  ;;  %v7112_v63 = vadd.f32 %v7108_v25, %v7103_v39  ;;  %v7099_v48 = vpop.f32.mrb[87].mxu1 }
 0xaa5   : > { %v12490_v6 = vmax.f32 %v7111_v15, 0.0  ;;  %v7113_v3 = vadd.f32 %v7108_v25, %v7104_v55  ;;  %v12961_v15 = vld [vmem:[#allocation33_spill] sm:$0xff]  ;;  %v12962_v48 = vld [vmem:[#allocation34_spill] sm:$0xff] }
 0xaa6   : > { %7140 = vrot.lane.b32.xlu0 %v12488_v31, %s9704_s20  ;;  %v12496_v0 = vmax.f32 %v7112_v63, 0.0 }
 0xaa7   : > { %7142 = vrot.lane.b32.xlu1 %v12490_v6, %s9704_s20  ;;  %v12498_v21 = vmax.f32 %v7113_v3, 0.0 }
 0xaaa   : > { %7144 = vrot.lane.b32.xlu0 %v12496_v0, %s9704_s20 }
 0xaab   : > { %7146 = vrot.lane.b32.xlu1 %v12498_v21, %s9704_s20 }
 0xaae   : > { %7119 = vrot.lane.b32.xlu0 %v12488_v31, %s9703_s6 }
 0xaaf   : > { %7121 = vrot.lane.b32.xlu1 %v12490_v6, %s9703_s6 }
 0xab2   : > { %7123 = vrot.lane.b32.xlu0 %v12496_v0, %s9703_s6 }
 0xab3   : > { %7125 = vrot.lane.b32.xlu1 %v12498_v21, %s9703_s6 }
 0xab6   : > { %7356 = vrot.lane.b32.xlu0 %v12488_v31, %s9705_s12 }
 0xab7   : > { %7358 = vrot.lane.b32.xlu1 %v12490_v6, %s9705_s12 }
 0xaba   : > { %7360 = vrot.lane.b32.xlu0 %v12496_v0, %s9705_s12 }
 0xabb   : > { %7362 = vrot.lane.b32.xlu1 %v12498_v21, %s9705_s12 }
 0xabe   : > { %7479 = vrot.lane.b32.xlu0 %v12488_v31, %s9692_s21 }
 0xabf   : > { %7481 = vrot.lane.b32.xlu1 %v12490_v6, %s9692_s21 }
 0xac2   : > { %7483 = vrot.lane.b32.xlu0 %v12496_v0, %s9692_s21 }
 0xac3   : > { %7485 = vrot.lane.b32.xlu1 %v12498_v21, %s9692_s21  ;;  %s8509_s21 = sshll.u32 %s10133_s28, 2 }
 0xac4   : > { %s647_s6 = scalar_lea.vmem [#allocation17], %s8509_s21 }
 0xac5   : > { %s8311_s20 = sshll.u32 %s647_s6, 4  ;;  %s12791_s20 = int_to_ptr.vmem [resolvable:$true] %s8311_s20 }
 0xac6   : > { %7709 = vrot.lane.b32.xlu0 %v12488_v31, %s9693_s1  ;;  %s9589_s29 = scalar_lea.vmem %s12791_s20, 64 }
 0xac7   : > { %7711 = vrot.lane.b32.xlu1 %v12490_v6, %s9693_s1  ;;  %p9590_p1 = scmp.ne.s32.totalorder %s12791_s20, %s9589_s29 }
 0xac9   : > { %p9591_p4 = pnand %p9590_p1, %p12967_p8 }
 0xaca   : > { %7713 = vrot.lane.b32.xlu0 %v12496_v0, %s9693_s1 }
 0xacb   : > { %7715 = vrot.lane.b32.xlu1 %v12498_v21, %s9693_s1  ;;  %s8826_s1 = sshll.u32 %s9807_s19, 6  ;;  %p9592_p10 = pneg %p9591_p4 }
 0xacc   : > { %s9710_s19 = smov [#allocation17]  }
 0xacd   : > { %s9593_s13 = sshll.u32 %s9710_s19, 4  ;;  %s9594_s13 = int_to_ptr.vmem [resolvable:$false] %s9593_s13 }
 0xace   : > { %7832 = vrot.lane.b32.xlu0 %v12488_v31, %s9706_s18  ;;  %s9595_s4 = scalar_lea.vmem %s9594_s13, 128  ;;  %p9596_p5 = scmp.lt.s32.totalorder %s12791_s20, %s9594_s13 }
 0xacf   : > { %7834 = vrot.lane.b32.xlu1 %v12490_v6, %s9706_s18  ;;  %p9597_p11 = scmp.lt.s32.totalorder %s9595_s4, %s9589_s29 }
 0xad1   : > { %p9598_p12 = por %p9597_p11, %p9596_p5 }
 0xad2   : > { %7836 = vrot.lane.b32.xlu0 %v12496_v0, %s9706_s18 }
 0xad3   : > { %7838 = vrot.lane.b32.xlu1 %v12498_v21, %s9706_s18  ;;  %p9599_p0 = pnand %p9598_p12, %p9592_p10 }
 0xad6   : > { %7955 = vrot.lane.b32.xlu0 %v12488_v31, %s9707_s25 }
 0xad7   : > { %7957 = vrot.lane.b32.xlu1 %v12490_v6, %s9707_s25 }
 0xada   : > { %7959 = vrot.lane.b32.xlu0 %v12496_v0, %s9707_s25 }
 0xadb   : > { %7961 = vrot.lane.b32.xlu1 %v12498_v21, %s9707_s25  ;;  %s12966_s25 = sld [smem:[#allocation46_spill]] }
 0xade   : > { %8078 = vrot.lane.b32.xlu0 %v12488_v31, %s9708_s24 }
 0xadf   : > { %8080 = vrot.lane.b32.xlu1 %v12490_v6, %s9708_s24 }
 0xae2   : > { %8082 = vrot.lane.b32.xlu0 %v12496_v0, %s9708_s24 }
 0xae3   : > { %8084 = vrot.lane.b32.xlu1 %v12498_v21, %s9708_s24  ;;  %s12789_s24 = scalar_lea.hbm %s12966_s25, %s8826_s1 }
 0xae6   : > { %8203 = vperm.xlu0 %9136, %v7118_v44   ;;  %v12963_v44 = vld [vmem:[#allocation35_spill] sm:$0xff] }
 0xae7   : > { %8222 = vperm.xlu1 %9137, %v8218_v56  }
 0xaea   : > { %8255 = vperm.xlu0 %9136, %v8219_v49  }
 0xb18   : > { %v7141_v54 = vpop.permute.xlu0 %7140 }
 0xb19   : > { %v7143_v38 = vpop.permute.xlu1 %7142 }
 0xb1a   : > { %v7150_v24 = vsel %vm5044_vm1, %v7141_v54, %v7143_v38 }
 0xb1b   : > { %v7153_v29 = vmul.f32 %v7150_v24, %v12958_v50 }
 0xb1c   : > { %v7145_v33 = vpop.permute.xlu0 %7144 }
 0xb1d   : > { %v7159_v59 = vpack.c.bf16 %v7153_v29, %v7153_v29  ;;  %v7149_v8 = vsel %vm5044_vm1, %v7143_v38, %v7145_v33  ;;  %v7147_v37 = vpop.permute.xlu1 %7146 }
 0xb1e   : > { %v7154_v45 = vmul.f32 %v7149_v8, %v11784_v28  ;;  %v7148_v43 = vsel %vm5044_vm1, %v7145_v33, %v7147_v37  ;;  %v7151_v5 = vsel %vm5044_vm1, %v7147_v37, %v7141_v54 }
 0xb1f   : > { %v7152_v27 = vmul.f32 %v7151_v5, %v11767_v4  ;;  %v7155_v2 = vmul.f32 %v7148_v43, %v11753_v41  ;;  %8775 = vmatprep.subr.msk.bf16.mxu0 %vm4941_vm2, %v7159_v59  ;;  %v8774_v41 = vld [vmem:[%s12960_s3 + $0x4] sm:$0xf] }
 0xb20   : > { %v7160_v62 = vpack.c.bf16 %v7154_v45, %v7154_v45  ;;  %v7120_v57 = vpop.permute.xlu0 %7119  ;;  %v7135_v45 = vld [vmem:[%s12960_s3] sm:$0xf] }
 0xb21   : > { %v7158_v25 = vpack.c.bf16 %v7152_v27, %v7152_v27  ;;  %v7161_v26 = vpack.c.bf16 %v7155_v2, %v7155_v2  ;;  %v7122_v40 = vpop.permute.xlu1 %7121 }
 0xb22   : > { %v7129_v28 = vsel %vm4785_vm0, %v7120_v57, %v7122_v40  ;;  %v7172_v61 = vsel %vm4941_vm2, %v7160_v62, 0 }
 0xb23   : > { %v7132_v53 = vmul.f32 %v7129_v28, %v12959_v1  ;;  %8777 = vmatprep.subr.msk.bf16.mxu1 %vm4941_vm2, %v7161_v26  ;;  %v7166_v4 = vsel %vm4941_vm2, %v7158_v25, 0 }
 0xb24   : > { %v7124_v32 = vpop.permute.xlu0 %7123  ;;  %7178 = vmatpush1.bf16.msra.mxu0 %v7166_v4  ;;  %7219 = vmatpush1.bf16.msra.mxu1 %v7172_v61 }
 0xb25   : > { %v7137_v39 = vpack.c.bf16 %v7132_v53, %v7132_v53  ;;  %v7128_v30 = vsel %vm4785_vm0, %v7122_v40, %v7124_v32  ;;  %v7126_v19 = vpop.permute.xlu1 %7125 }
 0xb26   : > { %v7133_v55 = vmul.f32 %v7128_v30, %v12961_v15  ;;  %v7127_v22 = vsel %vm4785_vm0, %v7124_v32, %v7126_v19  ;;  %v7130_v63 = vsel %vm4785_vm0, %v7126_v19, %v7120_v57  ;;  %v8783_v32 = vld [vmem:[%s12960_s3 + $0x8] sm:$0xf] }
 0xb27   : > { %v7131_v3 = vmul.f32 %v7130_v63, %v12962_v48  ;;  %v7134_v56 = vmul.f32 %v7127_v22, %v12963_v44  ;;  %8776 = vmatmul.mubr.msk.bf16.vlgmr.msra.gmra.mrb[88].mxu0 %vm4937_vm3, %v8774_v41  ;;  %8778 = vmatmul.mubr.msk.bf16.vlgmr.msra.gmra.mrb[88].mxu1 %vm4937_vm3, %v8774_v41 }
 0xb28   : > { %v7138_v49 = vpack.c.bf16 %v7133_v55, %v7133_v55  ;;  %8779 = vmatprep.subr.msk.bf16.mxu0 %vm4941_vm2, %v7137_v39  ;;  %v7357_v54 = vpop.permute.xlu0 %7356  ;;  %7306 = vmatprep.mubr.bf16.mxu0 %v12949_v36 }
 0xb29   : > { %v7136_v38 = vpack.c.bf16 %v7131_v3, %v7131_v3  ;;  %v7139_v24 = vpack.c.bf16 %v7134_v56, %v7134_v56  ;;  %v7359_v50 = vpop.permute.xlu1 %7358  ;;  %7347 = vmatprep.mubr.bf16.mxu1 %v12949_v36 }
 0xb2a   : > { %v7366_v29 = vsel %vm5311_vm6, %v7357_v54, %v7359_v50  ;;  %v7269_v33 = vsel %vm4941_vm2, %v7138_v49, 0 }
 0xb2b   : > { %v7369_v59 = vmul.f32 %v7366_v29, %v11833_v35  ;;  %8781 = vmatprep.subr.msk.bf16.mxu1 %vm4941_vm2, %v7139_v24  ;;  %v7263_v8 = vsel %vm4941_vm2, %v7136_v38, 0  ;;  %v7607_v38 = vpack.c.bf16 %v12498_v21, %v12498_v21  ;;  %v7606_v24 = vpack.c.bf16 %v12496_v0, %v12496_v0  ;;  %v8788_v29 = vld [vmem:[%s12960_s3 + $0xc] sm:$0xf] }
 0xb2c   : > { %v7361_v37 = vpop.permute.xlu0 %7360  ;;  %7275 = vmatpush1.bf16.msra.mxu0 %v7263_v8  ;;  %7316 = vmatpush1.bf16.msra.mxu1 %v7269_v33 }
 0xb2d   : > { %v7375_v43 = vpack.c.bf16 %v7369_v59, %v7369_v59  ;;  %v7365_v5 = vsel %vm5311_vm6, %v7359_v50, %v7361_v37  ;;  %v7363_v27 = vpop.permute.xlu1 %7362 }
 0xb2e   : > { %v7370_v2 = vmul.f32 %v7365_v5, %v11886_v14  ;;  %v7364_v35 = vsel %vm5311_vm6, %v7361_v37, %v7363_v27  ;;  %v7367_v62 = vsel %vm5311_vm6, %v7363_v27, %v7357_v54 }
 0xb2f   : > { %v7368_v57 = vmul.f32 %v7367_v62, %v11848_v10  ;;  %v7371_v25 = vmul.f32 %v7364_v35, %v11854_v12  ;;  %8780 = vmatmul.mubr.msk.bf16.vlgmr.msra.gmra.mrb[92].mxu0 %vm4937_vm3, %v7135_v45  ;;  %8782 = vmatmul.mubr.msk.bf16.vlgmr.msra.gmra.mrb[92].mxu1 %vm4937_vm3, %v7135_v45 }
 0xb30   : > { %v7376_v26 = vpack.c.bf16 %v7370_v2, %v7370_v2  ;;  %8784 = vmatprep.subr.msk.bf16.mxu0 %vm4941_vm2, %v7375_v43  ;;  %v7480_v40 = vpop.permute.xlu0 %7479  ;;  %7425 = vmatprep.mubr.bf16.mxu0 %v12949_v36 }
 0xb31   : > { %v7374_v14 = vpack.c.bf16 %v7368_v57, %v7368_v57  ;;  %v7377_v28 = vpack.c.bf16 %v7371_v25, %v7371_v25  ;;  %v7482_v61 = vpop.permute.xlu1 %7481  ;;  %7466 = vmatprep.mubr.bf16.mxu1 %v12949_v36 }
 0xb32   : > { %v7489_v10 = vsel %vm1048_vm4, %v7480_v40, %v7482_v61  ;;  %v7388_v12 = vsel %vm4941_vm2, %v7376_v26, 0 }
 0xb33   : > { %v7492_v1 = vmul.f32 %v7489_v10, %v11941_v34  ;;  %8786 = vmatprep.subr.msk.bf16.mxu1 %vm4941_vm2, %v7377_v28  ;;  %v7382_v53 = vsel %vm4941_vm2, %v7374_v14, 0 }
 0xb34   : > { %v7484_v4 = vpop.permute.xlu0 %7483  ;;  %7394 = vmatpush1.bf16.msra.mxu0 %v7382_v53  ;;  %7435 = vmatpush1.bf16.msra.mxu1 %v7388_v12 }
 0xb35   : > { %v7498_v41 = vpack.c.bf16 %v7492_v1, %v7492_v1  ;;  %v7488_v39 = vsel %vm1048_vm4, %v7482_v61, %v7484_v4  ;;  %v7486_v30 = vpop.permute.xlu1 %7485 }
 0xb36   : > { %v7493_v19 = vmul.f32 %v7488_v39, %v11989_v23  ;;  %v7487_v34 = vsel %vm1048_vm4, %v7484_v4, %v7486_v30  ;;  %v7490_v15 = vsel %vm1048_vm4, %v7486_v30, %v7480_v40  ;;  %v8793_v40 = vld [vmem:[%s12960_s3 + $0x10] sm:$0xf] }
 0xb37   : > { %v7491_v55 = vmul.f32 %v7490_v15, %v11945_v46  ;;  %v7494_v22 = vmul.f32 %v7487_v34, %v11968_v13  ;;  %8785 = vmatmul.mubr.msk.bf16.vlgmr.msra.gmra.mrb[96].mxu0 %vm4937_vm3, %v8783_v32  ;;  %8787 = vmatmul.mubr.msk.bf16.vlgmr.msra.gmra.mrb[96].mxu1 %vm4937_vm3, %v8783_v32  ;;  %v7605_v46 = vpack.c.bf16 %v12490_v6, %v12490_v6  ;;  %v8798_v15 = vld [vmem:[%s12960_s3 + $0x14] sm:$0xf] }
 0xb38   : > { %v7499_v63 = vpack.c.bf16 %v7493_v19, %v7493_v19  ;;  %8789 = vmatprep.subr.msk.bf16.mxu0 %vm4941_vm2, %v7498_v41  ;;  %v7710_v48 = vpop.permute.xlu0 %7709  ;;  %7548 = vmatprep.mubr.bf16.mxu0 %v12949_v36  ;;  %v7604_v13 = vpack.c.bf16 %v12488_v31, %v12488_v31 }
 0xb39   : > { %v7497_v23 = vpack.c.bf16 %v7491_v55, %v7491_v55  ;;  %v7500_v3 = vpack.c.bf16 %v7494_v22, %v7494_v22  ;;  %v7712_v44 = vpop.permute.xlu1 %7711  ;;  %7589 = vmatprep.mubr.bf16.mxu1 %v12949_v36 }
 0xb3a   : > { %v7511_v56 = vsel %vm4941_vm2, %v7499_v63, 0  ;;  %v7719_v49 = vsel %vm1261_vm5, %v7710_v48, %v7712_v44  ;;  %v7612_v2 = vsel %vm4941_vm2, %v7604_v13, 0 }
 0xb3b   : > { %8791 = vmatprep.subr.msk.bf16.mxu1 %vm4941_vm2, %v7500_v3  ;;  %v7505_v54 = vsel %vm4941_vm2, %v7497_v23, 0  ;;  %v7721_v8 = vmul.f32 %v7719_v49, %v12137_v51  ;;  %v7618_v51 = vsel %vm4941_vm2, %v7606_v24, 0 }
 0xb3c   : > { %v7714_v50 = vpop.permute.xlu0 %7713  ;;  %7517 = vmatpush1.bf16.msra.mxu0 %v7505_v54  ;;  %7558 = vmatpush1.bf16.msra.mxu1 %v7511_v56 }
 0xb3d   : > { %v7718_v33 = vsel %vm1261_vm5, %v7712_v44, %v7714_v50  ;;  %8796 = vmatprep.subr.msk.bf16.mxu1 %vm4941_vm2, %v7607_v38  ;;  %v7716_v59 = vpop.permute.xlu1 %7715  ;;  %8794 = vmatprep.subr.msk.bf16.mxu0 %vm4941_vm2, %v7605_v46 }
 0xb3e   : > { %v7722_v37 = vmul.f32 %v7718_v33, %v12109_v17  ;;  %v7717_v45 = vsel %vm1261_vm5, %v7714_v50, %v7716_v59  ;;  %v7720_v43 = vsel %vm1261_vm5, %v7716_v59, %v7710_v48  ;;  %v8803_v50 = vld [vmem:[%s12960_s3 + $0x18] sm:$0xf]  ;;  %v9327_v59 = vld [vmem:[%s12939_s8 + $0xa8] ss:$0 sm:$0xff] }
 0xb3f   : > { %v7723_v5 = vmul.f32 %v7717_v45, %v12153_v18  ;;  %v7724_v27 = vmul.f32 %v7720_v43, %v12122_v9  ;;  %8790 = vmatmul.mubr.msk.bf16.vlgmr.msra.gmra.mrb[100].mxu0 %vm4937_vm3, %v8788_v29  ;;  %8792 = vmatmul.mubr.msk.bf16.vlgmr.msra.gmra.mrb[100].mxu1 %vm4937_vm3, %v8788_v29  ;;  %v7727_v18 = vpack.c.bf16 %v7721_v8, %v7721_v8 }
 0xb40   : > { %v7728_v35 = vpack.c.bf16 %v7722_v37, %v7722_v37  ;;  %v7833_v17 = vpop.permute.xlu0 %7832  ;;  %7624 = vmatpush1.bf16.msra.mxu0 %v7612_v2  ;;  %7665 = vmatpush1.bf16.msra.mxu1 %v7618_v51  ;;  %v9329_v2 = vld [vmem:[%s12939_s8 + $0xb0] ss:$0 sm:$0xff] }
 0xb41   : > { %v7730_v62 = vpack.c.bf16 %v7724_v27, %v7724_v27  ;;  %v7835_v57 = vpop.permute.xlu1 %7834  ;;  %7655 = vmatprep.mubr.bf16.mxu0 %v12949_v36  ;;  %7696 = vmatprep.mubr.bf16.mxu1 %v12949_v36  ;;  %v7729_v9 = vpack.c.bf16 %v7723_v5, %v7723_v5  ;;  %v7735_v1 = vsel %vm4941_vm2, %v7727_v18, 0  ;;  %v9328_v5 = vld [vmem:[%s12939_s8 + $0xa0] ss:$0 sm:$0xff] }
 0xb42   : > { %8799 = vmatprep.subr.msk.bf16.mxu0 %vm4941_vm2, %v7728_v35  ;;  %v7842_v25 = vsel %vm6312_vm7, %v7833_v17, %v7835_v57  ;;  %v9330_v35 = vld [vmem:[%s12939_s8 + $0xb8] ss:$0 sm:$0xff] }
 0xb43   : > { %8801 = vmatprep.subr.msk.bf16.mxu1 %vm4941_vm2, %v7730_v62  ;;  %v7844_v53 = vmul.f32 %v7842_v25, %v12206_v60  ;;  %v8808_v25 = vld [vmem:[%s12960_s3 + $0x1c] sm:$0xf] }
 0xb44   : > { %v7837_v26 = vpop.permute.xlu0 %7836 }
 0xb45   : > { %v7841_v14 = vsel %vm6312_vm7, %v7835_v57, %v7837_v26  ;;  %v7839_v28 = vpop.permute.xlu1 %7838  ;;  %v7850_v60 = vpack.c.bf16 %v7844_v53, %v7844_v53 }
 0xb46   : > { %v7845_v61 = vmul.f32 %v7841_v14, %v12199_v16  ;;  %v7840_v10 = vsel %vm6312_vm7, %v7837_v26, %v7839_v28  ;;  %v7843_v12 = vsel %vm6312_vm7, %v7839_v28, %v7833_v17  ;;  %v7741_v16 = vsel %vm4941_vm2, %v7729_v9, 0  ;;  %v8813_v14 = vld [vmem:[%s12960_s3 + $0x20] sm:$0xf] }
 0xb47   : > { %v7846_v4 = vmul.f32 %v7840_v10, %v12251_v47  ;;  %v7847_v32 = vmul.f32 %v7843_v12, %v12210_v20  ;;  %8795 = vmatmul.mubr.msk.bf16.vlgmr.msra.gmra.mrb[104].mxu0 %vm4937_vm3, %v8793_v40  ;;  %8797 = vmatmul.mubr.msk.bf16.vlgmr.msra.gmra.mrb[104].mxu1 %vm4937_vm3, %v8793_v40  ;;  %v7858_v46 = vsel %vm4941_vm2, %v7850_v60, 0 }
 0xb48   : > { %v7851_v41 = vpack.c.bf16 %v7845_v61, %v7845_v61  ;;  %7747 = vmatpush1.bf16.msra.mxu0 %v7735_v1  ;;  %7788 = vmatpush1.bf16.msra.mxu1 %v7741_v16  ;;  %v7956_v39 = vpop.permute.xlu0 %7955 }
 0xb49   : > { %v7853_v30 = vpack.c.bf16 %v7847_v32, %v7847_v32  ;;  %v7958_v19 = vpop.permute.xlu1 %7957  ;;  %7778 = vmatprep.mubr.bf16.mxu0 %v12949_v36  ;;  %7819 = vmatprep.mubr.bf16.mxu1 %v12949_v36  ;;  %v7852_v20 = vpack.c.bf16 %v7846_v4, %v7846_v4 }
 0xb4a   : > { %8804 = vmatprep.subr.msk.bf16.mxu0 %vm4941_vm2, %v7851_v41  ;;  %v7965_v47 = vsel %vm6579_vm8, %v7956_v39, %v7958_v19 }
 0xb4b   : > { %8806 = vmatprep.subr.msk.bf16.mxu1 %vm4941_vm2, %v7853_v30  ;;  %v7967_v63 = vmul.f32 %v7965_v47, %v12301_v52  ;;  %v7864_v52 = vsel %vm4941_vm2, %v7852_v20, 0 }
 0xb4c   : > { %v7960_v34 = vpop.permute.xlu0 %7959 }
 0xb4d   : > { %v7964_v55 = vsel %vm6579_vm8, %v7958_v19, %v7960_v34  ;;  %v7962_v22 = vpop.permute.xlu1 %7961 }
 0xb4e   : > { %v7968_v48 = vmul.f32 %v7964_v55, %v12294_v58  ;;  %v7963_v23 = vsel %vm6579_vm8, %v7960_v34, %v7962_v22  ;;  %v7966_v3 = vsel %vm6579_vm8, %v7962_v22, %v7956_v39 }
 0xb4f   : > { %v7969_v44 = vmul.f32 %v7963_v23, %v12342_v42  ;;  %v7970_v56 = vmul.f32 %v7966_v3, %v12305_v7  ;;  %8800 = vmatmul.mubr.msk.bf16.vlgmr.msra.gmra.mrb[108].mxu0 %vm4937_vm3, %v8798_v15  ;;  %8802 = vmatmul.mubr.msk.bf16.vlgmr.msra.gmra.mrb[108].mxu1 %vm4937_vm3, %v8798_v15  ;;  %v7973_v42 = vpack.c.bf16 %v7967_v63, %v7967_v63 }
 0xb50   : > { %v7974_v13 = vpack.c.bf16 %v7968_v48, %v7968_v48  ;;  %7870 = vmatpush1.bf16.msra.mxu0 %v7858_v46  ;;  %7911 = vmatpush1.bf16.msra.mxu1 %v7864_v52  ;;  %v8079_v58 = vpop.permute.xlu0 %8078 }
 0xb51   : > { %v7976_v49 = vpack.c.bf16 %v7970_v56, %v7970_v56  ;;  %v8081_v54 = vpop.permute.xlu1 %8080  ;;  %7901 = vmatprep.mubr.bf16.mxu0 %v12949_v36  ;;  %7942 = vmatprep.mubr.bf16.mxu1 %v12949_v36  ;;  %v7975_v7 = vpack.c.bf16 %v7969_v44, %v7969_v44  ;;  %v7981_v43 = vsel %vm4941_vm2, %v7973_v42, 0 }
 0xb52   : > { %8809 = vmatprep.subr.msk.bf16.mxu0 %vm4941_vm2, %v7974_v13  ;;  %v8088_v38 = vsel %vm6846_vm9, %v8079_v58, %v8081_v54 }
 0xb53   : > { %8811 = vmatprep.subr.msk.bf16.mxu1 %vm4941_vm2, %v7976_v49  ;;  %v8090_v27 = vmul.f32 %v9328_v5, %v8088_v38  ;;  %v7987_v11 = vsel %vm4941_vm2, %v7975_v7, 0 }
 0xb54   : > { %v8083_v24 = vpop.permute.xlu0 %8082 }
 0xb55   : > { %v8087_v29 = vsel %vm6846_vm9, %v8081_v54, %v8083_v24  ;;  %v8085_v33 = vpop.permute.xlu1 %8084  ;;  %v8096_v18 = vpack.c.bf16 %v8090_v27, %v8090_v27 }
 0xb56   : > { %v8091_v8 = vmul.f32 %v9327_v59, %v8087_v29  ;;  %v8086_v37 = vsel %vm6846_vm9, %v8083_v24, %v8085_v33  ;;  %v8089_v45 = vsel %vm6846_vm9, %v8085_v33, %v8079_v58 }
 0xb57   : > { %v8092_v51 = vmul.f32 %v9329_v2, %v8086_v37  ;;  %v8093_v17 = vmul.f32 %v9330_v35, %v8089_v45  ;;  %8805 = vmatmul.mubr.msk.bf16.vlgmr.msra.gmra.mrb[112].mxu0 %vm4937_vm3, %v8803_v50  ;;  %8807 = vmatmul.mubr.msk.bf16.vlgmr.msra.gmra.mrb[112].mxu1 %vm4937_vm3, %v8803_v50  ;;  %v8104_v26 = vsel %vm4941_vm2, %v8096_v18, 0 }
 0xb58   : > { %v8097_v62 = vpack.c.bf16 %v8091_v8, %v8091_v8  ;;  %7993 = vmatpush1.bf16.msra.mxu0 %v7981_v43  ;;  %8034 = vmatpush1.bf16.msra.mxu1 %v7987_v11 }
 0xb59   : > { %v8099_v57 = vpack.c.bf16 %v8093_v17, %v8093_v17  ;;  %8024 = vmatprep.mubr.bf16.mxu0 %v12949_v36  ;;  %8065 = vmatprep.mubr.bf16.mxu1 %v12949_v36  ;;  %v8098_v9 = vpack.c.bf16 %v8092_v51, %v8092_v51 }
 0xb5a   : > { %8814 = vmatprep.subr.msk.bf16.mxu0 %vm4941_vm2, %v8097_v62 }
 0xb5b   : > { %8816 = vmatprep.subr.msk.bf16.mxu1 %vm4941_vm2, %v8099_v57  ;;  %v8110_v40 = vsel %vm4941_vm2, %v8098_v9, 0 }
 0xb5f   : > { %8810 = vmatmul.mubr.msk.bf16.vlgmr.msra.gmra.mrb[116].mxu0 %vm4937_vm3, %v8808_v25  ;;  %8812 = vmatmul.mubr.msk.bf16.vlgmr.msra.gmra.mrb[116].mxu1 %vm4937_vm3, %v8808_v25 }
 0xb60   : > { %8116 = vmatpush1.bf16.msra.mxu0 %v8104_v26  ;;  %8157 = vmatpush1.bf16.msra.mxu1 %v8110_v40 }
 0xb61   : > { %8188 = vmatprep.mubr.bf16.mxu1 %v12949_v36  ;;  %8147 = vmatprep.mubr.bf16.mxu0 %v12949_v36 }
 0xb67   : > { %8815 = vmatmul.mubr.msk.bf16.vlgmr.msra.gmra.mrb[120].mxu0 %vm4937_vm3, %v8813_v14  ;;  %8817 = vmatmul.mubr.msk.bf16.vlgmr.msra.gmra.mrb[120].mxu1 %vm4937_vm3, %v8813_v14 }
 0xbfa   : > { %v7211_v28 = vpop.f32.mrb[88].mxu0  ;;  %v7252_v61 = vpop.f32.mrb[88].mxu1 }
 0xbfb   : > { %v7213_v10 = vpop.f32.mrb[89].mxu0  ;;  %v7254_v12 = vpop.f32.mrb[89].mxu1 }
 0xbfc   : > { %v7215_v1 = vpop.f32.mrb[90].mxu0  ;;  %v7256_v53 = vpop.f32.mrb[90].mxu1 }
 0xbfd   : > { %v7216_v4 = vpop.f32.mrb[91].mxu0  ;;  %v7257_v32 = vpop.f32.mrb[91].mxu1 }
 0xc02   : > { %v7308_v16 = vpop.f32.mrb[92].mxu0  ;;  %v7349_v41 = vpop.f32.mrb[92].mxu1 }
 0xc03   : > { %v7309_v39 = vadd.f32 %v7308_v16, %v7211_v28  ;;  %v7350_v36 = vadd.f32 %v7349_v41, %v7252_v61  ;;  %v7310_v30 = vpop.f32.mrb[93].mxu0  ;;  %v7351_v19 = vpop.f32.mrb[93].mxu1 }
 0xc04   : > { %v7311_v60 = vadd.f32 %v7310_v30, %v7213_v10  ;;  %v7352_v20 = vadd.f32 %v7351_v19, %v7254_v12  ;;  %v7312_v47 = vpop.f32.mrb[94].mxu0  ;;  %v7353_v34 = vpop.f32.mrb[94].mxu1 }
 0xc05   : > { %v7313_v15 = vpop.f32.mrb[95].mxu0  ;;  %v7354_v55 = vpop.f32.mrb[95].mxu1 }
 0xc0a   : > { %v7427_v22 = vpop.f32.mrb[96].mxu0  ;;  %v7468_v63 = vpop.f32.mrb[96].mxu1 }
 0xc0b   : > { %v7475_v48 = vadd.f32 %v7427_v22, %v7309_v39  ;;  %v7477_v23 = vadd.f32 %v7468_v63, %v7350_v36  ;;  %v7429_v3 = vpop.f32.mrb[97].mxu0  ;;  %v7470_v44 = vpop.f32.mrb[97].mxu1 }
 0xc0c   : > { %v7476_v56 = vadd.f32 %v7429_v3, %v7311_v60  ;;  %v7478_v46 = vadd.f32 %v7470_v44, %v7352_v20  ;;  %v7431_v52 = vpop.f32.mrb[98].mxu0  ;;  %v7472_v13 = vpop.f32.mrb[98].mxu1 }
 0xc0d   : > { %v7432_v58 = vpop.f32.mrb[99].mxu0  ;;  %v7473_v49 = vpop.f32.mrb[99].mxu1 }
 0xc12   : > { %v7550_v54 = vpop.f32.mrb[100].mxu0  ;;  %v7591_v42 = vpop.f32.mrb[100].mxu1 }
 0xc13   : > { %v7598_v7 = vadd.f32 %v7550_v54, %v7475_v48  ;;  %v7600_v38 = vadd.f32 %v7591_v42, %v7477_v23  ;;  %v7552_v24 = vpop.f32.mrb[101].mxu0  ;;  %v7593_v50 = vpop.f32.mrb[101].mxu1 }
 0xc14   : > { %v7599_v29 = vadd.f32 %v7552_v24, %v7476_v56  ;;  %v7601_v33 = vadd.f32 %v7593_v50, %v7478_v46  ;;  %v7554_v59 = vpop.f32.mrb[102].mxu0  ;;  %v7595_v8 = vpop.f32.mrb[102].mxu1 }
 0xc15   : > { %v7555_v37 = vpop.f32.mrb[103].mxu0  ;;  %v7596_v45 = vpop.f32.mrb[103].mxu1 }
 0xc16   : > { %v8204_v54 = vpop.permute.xlu0 %8203 }
 0xc1a   : > { %v7657_v43 = vpop.f32.mrb[104].mxu0  ;;  %v7698_v5 = vpop.f32.mrb[104].mxu1 }
 0xc1b   : > { %v7705_v27 = vadd.f32 %v7657_v43, %v7598_v7  ;;  %v7707_v2 = vadd.f32 %v7698_v5, %v7600_v38  ;;  %v7659_v51 = vpop.f32.mrb[105].mxu0  ;;  %v7700_v35 = vpop.f32.mrb[105].mxu1 }
 0xc1c   : > { %v7706_v17 = vadd.f32 %v7659_v51, %v7599_v29  ;;  %v7708_v11 = vadd.f32 %v7700_v35, %v7601_v33  ;;  %v7661_v62 = vpop.f32.mrb[106].mxu0  ;;  %v7702_v57 = vpop.f32.mrb[106].mxu1 }
 0xc1d   : > { %v7662_v18 = vpop.f32.mrb[107].mxu0  ;;  %v7703_v9 = vpop.f32.mrb[107].mxu1 }
 0xc1e   : > { %v8223_v9 = vpop.permute.xlu1 %8222 }
 0xc22   : > { %v7780_v25 = vpop.f32.mrb[108].mxu0  ;;  %v7821_v26 = vpop.f32.mrb[108].mxu1 }
 0xc23   : > { %v7828_v40 = vadd.f32 %v7780_v25, %v7705_v27  ;;  %v7830_v14 = vadd.f32 %v7821_v26, %v7707_v2  ;;  %v7782_v28 = vpop.f32.mrb[109].mxu0  ;;  %v7823_v61 = vpop.f32.mrb[109].mxu1 }
 0xc24   : > { %v7829_v10 = vadd.f32 %v7782_v28, %v7706_v17  ;;  %v7831_v12 = vadd.f32 %v7823_v61, %v7708_v11  ;;  %v7784_v1 = vpop.f32.mrb[110].mxu0  ;;  %v7825_v53 = vpop.f32.mrb[110].mxu1 }
 0xc25   : > { %v7785_v4 = vpop.f32.mrb[111].mxu0  ;;  %v7826_v32 = vpop.f32.mrb[111].mxu1 }
 0xc2a   : > { %v7903_v16 = vpop.f32.mrb[112].mxu0  ;;  %v7944_v41 = vpop.f32.mrb[112].mxu1 }
 0xc2b   : > { %v7951_v39 = vadd.f32 %v7903_v16, %v7828_v40  ;;  %v7953_v36 = vadd.f32 %v7944_v41, %v7830_v14  ;;  %v7905_v30 = vpop.f32.mrb[113].mxu0  ;;  %v7946_v19 = vpop.f32.mrb[113].mxu1 }
 0xc2c   : > { %v7952_v60 = vadd.f32 %v7905_v30, %v7829_v10  ;;  %v7954_v20 = vadd.f32 %v7946_v19, %v7831_v12  ;;  %v7907_v47 = vpop.f32.mrb[114].mxu0  ;;  %v7948_v34 = vpop.f32.mrb[114].mxu1 }
 0xc2d   : > { %v7908_v15 = vpop.f32.mrb[115].mxu0  ;;  %v7949_v55 = vpop.f32.mrb[115].mxu1 }
 0xc32   : > { %v8026_v22 = vpop.f32.mrb[116].mxu0  ;;  %v8067_v63 = vpop.f32.mrb[116].mxu1 }
 0xc33   : > { %v8074_v48 = vadd.f32 %v8026_v22, %v7951_v39  ;;  %v8076_v23 = vadd.f32 %v8067_v63, %v7953_v36  ;;  %v8028_v3 = vpop.f32.mrb[117].mxu0  ;;  %v8069_v44 = vpop.f32.mrb[117].mxu1  ;;  %v9709_v39 = vmov 1966171168  }
 0xc34   : > { %v8075_v56 = vadd.f32 %v8028_v3, %v7952_v60  ;;  %v8077_v46 = vadd.f32 %v8069_v44, %v7954_v20  ;;  %v8030_v52 = vpop.f32.mrb[118].mxu0  ;;  %v8071_v13 = vpop.f32.mrb[118].mxu1  ;;  %v8269_v36 = vunpack.c.l.s4 %v9709_v39 }
 0xc35   : > { %v8031_v58 = vpop.f32.mrb[119].mxu0  ;;  %v8072_v49 = vpop.f32.mrb[119].mxu1 }
 0xc36   : > { %v8270_v22 = vunpack.c.0.s8 %v8269_v36  ;;  %v12964_v58 = vld [vmem:[#allocation29_spill] sm:$0xff] }
 0xc38   : > { %v8273_v49 = vsub.s32 %v8270_v22, %v12964_v58 }
 0xc3a   : > { %v8149_v42 = vpop.f32.mrb[120].mxu0  ;;  %v8190_v7 = vpop.f32.mrb[120].mxu1 }
 0xc3b   : > { %v8197_v38 = vadd.f32 %v8149_v42, %v8074_v48  ;;  %v8199_v24 = vadd.f32 %v8190_v7, %v8076_v23  ;;  %v8151_v50 = vpop.f32.mrb[121].mxu0  ;;  %v8192_v29 = vpop.f32.mrb[121].mxu1 }
 0xc3c   : > { %v8198_v33 = vadd.f32 %v8151_v50, %v8075_v56  ;;  %v8200_v59 = vadd.f32 %v8192_v29, %v8077_v46  ;;  %v8153_v8 = vpop.f32.mrb[122].mxu0  ;;  %v8194_v37 = vpop.f32.mrb[122].mxu1  ;;  %v12965_v50 = vlaneseq }
 0xc3d   : > { %v8206_v45 = vadd.f32 %v8204_v54, %v8197_v38  ;;  %v8208_v43 = vadd.f32 %v8204_v54, %v8199_v24  ;;  %v8154_v5 = vpop.f32.mrb[123].mxu0  ;;  %v8195_v27 = vpop.f32.mrb[123].mxu1 }
 0xc3e   : > { %v8207_v2 = vadd.f32 %v8204_v54, %v8198_v33  ;;  %v8209_v51 = vadd.f32 %v8204_v54, %v8200_v59  ;;  %v8256_v23 = vpop.permute.xlu0 %8255  ;;  %vm8293_vm4 = vcmp.lt.s32.totalorder %v12965_v50, 512 }
 0xc3f   : > { %v8210_v35 = vadd.f32 %v8206_v45, %v12488_v31  ;;  %v8212_v17 = vadd.f32 %v8208_v43, %v12496_v0 }
 0xc40   : > { %v8211_v11 = vadd.f32 %v8207_v2, %v12490_v6  ;;  %v8213_v62 = vadd.f32 %v8209_v51, %v12498_v21 }
 0xc41   : > { %v8214_v57 = vmax.f32 %v8210_v35, 0.0  ;;  %v8216_v18 = vmax.f32 %v8212_v17, 0.0 }
 0xc42   : > { %v8215_v25 = vmax.f32 %v8211_v11, 0.0  ;;  %v8217_v26 = vmax.f32 %v8213_v62, 0.0 }
 0xc43   : > { %v8225_v40 = vmul.f32 %v8223_v9, %v8214_v57  ;;  %v8227_v14 = vmul.f32 %v8223_v9, %v8216_v18 }
 0xc44   : > { %v8226_v28 = vmul.f32 %v8223_v9, %v8215_v25  ;;  %v8228_v61 = vmul.f32 %v8223_v9, %v8217_v26 }
 0xc45   : > { %v8229_v10 = vrot.slane %v8225_v40, 4  ;;  %v8241_v12 = vrot.slane %v8227_v14, 4 }
 0xc46   : > { %v8235_v1 = vrot.slane %v8226_v28, 4  ;;  %v8247_v53 = vrot.slane %v8228_v61, 4 }
 0xc47   : > { %v8230_v31 = vadd.f32 %v8229_v10, %v8225_v40  ;;  %v8242_v4 = vadd.f32 %v8241_v12, %v8227_v14 }
 0xc48   : > { %v8236_v0 = vadd.f32 %v8235_v1, %v8226_v28  ;;  %v8248_v32 = vadd.f32 %v8247_v53, %v8228_v61 }
 0xc49   : > { %v8231_v6 = vrot.slane %v8230_v31, 2  ;;  %v8243_v16 = vrot.slane %v8242_v4, 2 }
 0xc4a   : > { %v8237_v21 = vrot.slane %v8236_v0, 2  ;;  %v8249_v41 = vrot.slane %v8248_v32, 2 }
 0xc4b   : > { %v8232_v30 = vadd.f32 %v8231_v6, %v8230_v31  ;;  %v8244_v19 = vadd.f32 %v8243_v16, %v8242_v4 }
 0xc4c   : > { %v8238_v60 = vadd.f32 %v8237_v21, %v8236_v0  ;;  %v8250_v20 = vadd.f32 %v8249_v41, %v8248_v32 }
 0xc4d   : > { %v8233_v47 = vrot.slane %v8232_v30, 1  ;;  %v8245_v34 = vrot.slane %v8244_v19, 1 }
 0xc4e   : > { %v8239_v15 = vrot.slane %v8238_v60, 1  ;;  %v8251_v55 = vrot.slane %v8250_v20, 1 }
 0xc4f   : > { %v8234_v63 = vadd.f32 %v8233_v47, %v8232_v30  ;;  %v8246_v48 = vadd.f32 %v8245_v34, %v8244_v19 }
 0xc50   : > { %v8240_v3 = vadd.f32 %v8239_v15, %v8238_v60  ;;  %v8252_v44 = vadd.f32 %v8251_v55, %v8250_v20 }
 0xc51   : > { %v8258_v56 = vadd.f32 %v8256_v23, %v8234_v63  ;;  %v8260_v46 = vadd.f32 %v8256_v23, %v8246_v48 }
 0xc52   : > { %v8259_v52 = vadd.f32 %v8256_v23, %v8240_v3  ;;  %v8261_v13 = vadd.f32 %v8256_v23, %v8252_v44 }
 0xc54   : > { %v8266_v54 = vcombine.low %v8258_v56, %v8259_v52  ;;  %v8267_v42 = vcombine.low %v8260_v46, %v8261_v13 }
 0xc56   : > { %v8274_v7 = vrot.slane %v8266_v54, %v8273_v49  ;;  %v8281_v38 = vrot.slane %v8267_v42, %v8273_v49 }
 0xc58   : > { %v8282_v24 = vcombine.low %v8274_v7, %v8281_v38 }
 0xc5a   : > { %v8289_v29 = vrot.slane %v8282_v24, %v8273_v49 }
 0xc5c   : > { %8295 = vst.msk [vmem:[%s647_s6] sm:$0xf] %vm8293_vm4, %v8289_v29 }
 0xc5d   : > { %9602 = shalt.err (!%p9599_p0)
}
 0xc5e   : > { %s9603_s28 = scalar_lea.hbm %s12789_s24, 64  ;;  %s9607_s11 = scalar_lea.hbm %s12966_s25, 128 }
 0xc5f   : > { %p9604_p13 = scmp.ne.s32.totalorder %s12789_s24, %s9603_s28  ;;  %p9608_p7 = scmp.lt.u32.totalorder %s12789_s24, %s12966_s25 }
 0xc60   : > { %p9609_p9 = scmp.lt.u32.totalorder %s9607_s11, %s9603_s28  ;;  %p9611_p1 = scmp.lt.u32.totalorder %s9603_s28, %s12789_s24 }
 0xc61   : > { %p9605_p3 = pnand %p9604_p13, %p12967_p8 }
 0xc62   : > { %p9610_p6 = por %p9609_p9, %p9608_p7 }
 0xc63   : > { %p9606_p2 = pneg %p9605_p3 }
 0xc64   : > { %p9612_p4 = por %p9611_p1, %p9610_p6 }
 0xc66   : > { %p9613_p10 = pnand %p9612_p4, %p9606_p2 }
 0xc68   : > { %9616 = shalt.err (!%p9613_p10)
}
 0xc69   : > { %9021 = dma.vmem_to_hbm [thread:$0]  (%p12967_p8), %s12791_s20, 64, %s12789_s24, %s8297_s15  }
 0xc6a PF: > { %s12968_s1 = sld [smem:[#allocation24_spill]]  ;;  %s12969_s6 = sld [smem:[#allocation28_spill]] }
 0xc6b   : > { %p12971_p11 = scmp.ge.s32.totalorder %s9671_s16, 2 }
 0xc70   : > { %s8323_s12 = sand.u32 1, %s12968_s1   ;;  %p12970_p5 = scmp.ne.s32.totalorder %s12969_s6, 0 }
 0xc71   : > { %s8324_s18 = scalar_lea.sflag [#allocation4], %s8323_s12 }
 0xc72   : > { %p9053_p12 = pnand %p12971_p11, %p12970_p5 }
 0xc74   : > { %9654 = dma.done.wait (!%p9053_p12), %s8324_s18, 64  }
 0xc75   : > { %9656 = vsyncadd (!%p9053_p12), %s8324_s18, 4294967232  ;;  %s12972_s16 = sld [smem:[#allocation26_spill]]  ;;  %s12973_s19 = sld [smem:[#allocation25_spill]] }
 0xc76   : > { %s12974_s15 = sld [smem:[#allocation27_spill]]  ;;  %s12975_s29 = smov %s9663_s30 }
 0xc7b   : > { %p33_p0 = scmp.ge.s32.totalorder %s12972_s16, 4   ;;  %s12976_s30 = smov %s12973_s19 }
 0xc7d   :  { %35 = sbr.rel (!%p33_p0) target bundleno = 21 (0x15), region = 225 }
 0xc84   :  { %8329 = vsyncpa [#allocation3], 1 }
 0xc85   :  { %8331 = vsyncpa [#allocation3 + $0x1], 1 }
 0xc86   :  { %8332 = vsyncpa [#allocation6], 1 }
 0xc87   :  { %8334 = vsyncpa [#allocation6 + $0x1], 1 }
 0xc88   :  { %8335 = vsyncpa [#allocation9], 1 }
 0xc89   :  { %8336 = vsyncpa [#allocation12], 1 }
 0xc8a   :  { %8337 = vsyncpa [#allocation15], 1 }
 0xc8b   :  { %8338 = vsyncpa [#allocation4], 1 }
 0xc8c   :  { %8340 = vsyncpa [#allocation4 + $0x1], 1 }

</bundles_post_ra>
